<compile_context>
chip_gen: v7x
topology: tpu7x:2x2x1
jax: 0.10.0
libtpu: 0.0.40
codegen_flags: <defaults>
</compile_context>

<pallas_src>
import functools
import math

import jax
import jax.numpy as jnp
from jax import lax
from jax.experimental import pallas as pl
from jax.experimental.pallas import tpu as pltpu

# ----------------------------- model config ---------------------------------
BATCH = 2
FMRI_DIM = 48
SMRI_DIM = 40
D_MODEL = 32
N_HEADS = 4
N_LAYERS = 4            # -> n_layers // 2 = 2 layers per encoder / final stack
N_CROSS_LAYERS = 2
NUM_CLASSES = 2
LN_EPS = 1e-5
BN_EPS = 1e-5

_INV_SQRT2 = 0.7071067811865476


# ------------------------------ in-kernel math ------------------------------
def _erf(x):
    # Abramowitz & Stegun 7.1.26 polynomial approximation of erf (|err|<1.5e-7).
    a1, a2, a3, a4, a5 = (0.254829592, -0.284496736, 1.421413741,
                          -1.453152027, 1.061405429)
    p = 0.3275911
    sign = jnp.where(x >= 0.0, 1.0, -1.0)
    ax = jnp.abs(x)
    t = 1.0 / (1.0 + p * ax)
    poly = ((((a5 * t + a4) * t + a3) * t + a2) * t + a1) * t
    return sign * (1.0 - poly * jnp.exp(-ax * ax))


def _gelu(x):
    # Exact-erf GELU (PyTorch default for nn.GELU / F.gelu).
    return 0.5 * x * (1.0 + _erf(x * _INV_SQRT2))


def _mm(a, b):
    return jnp.dot(a, b, preferred_element_type=jnp.float32)


def _linear(x, wb):
    """x: (M, K); wb: (K+1, N) with rows 0..K-1 = W and row K = bias."""
    kin = wb.shape[0] - 1
    return _mm(x, wb[:kin, :]) + wb[kin:kin + 1, :]


def _layernorm(x, lnp, eps=LN_EPS):
    """lnp: (2, D); row 0 = gamma, row 1 = beta."""
    g = lnp[0:1, :]
    b = lnp[1:2, :]
    mu = jnp.mean(x, axis=-1, keepdims=True)
    xc = x - mu
    var = jnp.mean(xc * xc, axis=-1, keepdims=True)
    return xc * lax.rsqrt(var + eps) * g + b


def _mha(q_rows, kv_rows, lp, B, Sq, Skv):
    """nn.MultiheadAttention(batch_first=True) at eval time.

    q_rows : (B*Sq, d) row-major (batch, seq);  kv_rows : (B*Skv, d).
    lp["qkv"]: (d+1, 3d) fused q/k/v projection (scale folded into q block);
    lp["o"]  : (d+1, d) output projection.
    """
    d = D_MODEL
    nh = N_HEADS
    dh = d // nh
    qkv = lp["qkv"][...]

    if Skv == 1:
        # softmax over a single key is exactly 1 -> output = o_proj(v_proj(kv))
        # for every query; q/k projections and softmax are skipped.
        v = _linear(kv_rows, qkv[:, 2 * d:3 * d])            # (B, d)
        attn = _linear(v, lp["o"][...])                      # (B, d)
        if Sq == 1:
            return attn
        return jnp.concatenate(
            [attn[b:b + 1, :] for b in range(B) for _ in range(Sq)], axis=0)

    q = _linear(q_rows, qkv[:, 0:d])        # 1/sqrt(dh) already folded in
    k = _linear(kv_rows, qkv[:, d:2 * d])
    v = _linear(kv_rows, qkv[:, 2 * d:3 * d])

    per_batch = []
    for b in range(B):
        qb = q[b * Sq:(b + 1) * Sq, :]
        kb = k[b * Skv:(b + 1) * Skv, :]
        vb = v[b * Skv:(b + 1) * Skv, :]
        heads = []
        for h in range(nh):
            sl = slice(h * dh, (h + 1) * dh)
            qh = qb[:, sl]                                   # (Sq, dh)
            # scores on the VPU: broadcast-multiply + lane reduction per key
            scols = [jnp.sum(qh * kb[j:j + 1, sl], axis=-1, keepdims=True)
                     for j in range(Skv)]
            s = jnp.concatenate(scols, axis=-1)              # (Sq, Skv)
            s = s - jnp.max(s, axis=-1, keepdims=True)
            e = jnp.exp(s)
            p = e / jnp.sum(e, axis=-1, keepdims=True)
            heads.append(_mm(p, vb[:, sl]))                  # (Sq, dh)
        per_batch.append(jnp.concatenate(heads, axis=-1))    # (Sq, d)
    ctx = jnp.concatenate(per_batch, axis=0)                 # (B*Sq, d)
    return _linear(ctx, lp["o"][...])


def _encoder_layer(x, lp, B, S):
    """nn.TransformerEncoderLayer(norm_first=True, activation='gelu'), eval."""
    xn = _layernorm(x, lp["ln1"][...])
    x = x + _mha(xn, xn, lp, B, S, S)
    xn = _layernorm(x, lp["ln2"][...])
    h = _gelu(_linear(xn, lp["ff1"][...]))
    return x + _linear(h, lp["ff2"][...])


def _cross_layer(q_rows, kv_rows, lp, B, Sq, Skv):
    """CrossModalAttention (post-norm), eval."""
    attn = _mha(q_rows, kv_rows, lp, B, Sq, Skv)
    q1 = _layernorm(q_rows + attn, lp["ln1"][...])
    h = _linear(_gelu(_linear(q1, lp["ff1"][...])), lp["ff2"][...])
    return _layernorm(q1 + h, lp["ln2"][...])


# ------------------------------- fused kernel --------------------------------
def _forward_kernel(treedef, fmri_ref, smri_ref, *refs):
    out_ref = refs[-1]
    P = jax.tree_util.tree_unflatten(treedef, refs[:-1])   # nested dict of Refs

    fmri = fmri_ref[...]                                   # (B, FMRI_DIM)
    smri = smri_ref[...]                                   # (B, SMRI_DIM)
    B = fmri.shape[0]

    # ---- fMRI encoder (CLS-token branch): seq = [cls, proj(x)], S = 2 ----
    fp = P["fmri"]
    x = _layernorm(_linear(fmri, fp["proj"][...]), fp["proj_ln"][...])
    cls = fp["cls"][...]                                   # (1, d)
    h_f = jnp.concatenate(
        [blk for b in range(B) for blk in (cls, x[b:b + 1, :])], axis=0)
    for lp in fp["layers"]:
        h_f = _encoder_layer(h_f, lp, B, 2)                # (B*2, d)

    # ---- sMRI encoder (BatchNorm branch), S = 1 ----
    sp = P["smri"]
    y = jnp.maximum(_linear(smri, sp["proj"][...]), 0.0) + sp["pos"][...]
    for lp in sp["layers"]:
        y = _encoder_layer(y, lp, B, 1)                    # (B, d)

    # ---- cross-attention stack (alternating directions) ----
    for i, cp in enumerate(P["cross"]):
        if i % 2 == 0:
            h_f = _cross_layer(h_f, y, cp, B, 2, 1)
        else:
            y = _cross_layer(y, h_f, cp, B, 1, 2)

    # ---- fusion ----
    fmri_cls = jnp.concatenate([h_f[2 * b:2 * b + 1, :] for b in range(B)],
                               axis=0)                     # (B, d)
    fused = jnp.concatenate([fmri_cls, y], axis=-1)        # (B, 2d)
    fu = P["fusion"]
    fused = _gelu(_layernorm(_linear(fused, fu["lin"][...]), fu["ln"][...]))

    # ---- final transformer (S = 1) ----
    o = fused
    for lp in P["final"]:
        o = _encoder_layer(o, lp, B, 1)

    # ---- classifier ----
    cl = P["classifier"]
    h = _gelu(_layernorm(_linear(o, cl["lin1"][...]), cl["ln"][...]))
    out_ref[...] = _linear(h, cl["lin2"][...])             # (B, num_classes)


# --------------------------- parameter preparation ---------------------------
def prepare_params(params):
    """Fold/pack raw parameters into the kernel's VMEM layout (done once)."""
    d = D_MODEL
    scale = 1.0 / math.sqrt(d // N_HEADS)
    # BatchNorm1d eval fold with default running stats (mean=0, var=1, affine
    # = identity).  TODO(synk): fold real running stats / affine for trained
    # checkpoints.
    bn_scale = 1.0 / math.sqrt(1.0 + BN_EPS)

    def lin(lp, s=None):
        w = lp["w"] if s is None else lp["w"] * s
        b = lp["b"] if s is None else lp["b"] * s
        return jnp.concatenate([w, b[None, :]], axis=0).astype(jnp.float32)

    def ln(lp):
        return jnp.stack([lp["g"], lp["b"]], axis=0).astype(jnp.float32)

    def attn(ap):
        wq = ap["q"]["w"] * scale
        bq = ap["q"]["b"] * scale
        w = jnp.concatenate([wq, ap["k"]["w"], ap["v"]["w"]], axis=1)   # (d,3d)
        b = jnp.concatenate([bq, ap["k"]["b"], ap["v"]["b"]], axis=0)   # (3d,)
        return {"qkv": jnp.concatenate([w, b[None, :]], axis=0).astype(jnp.float32),
                "o": lin(ap["o"])}

    def layer(lp):
        out = {"ln1": ln(lp["ln1"]), "ln2": ln(lp["ln2"]),
               "ff1": lin(lp["ff1"]), "ff2": lin(lp["ff2"])}
        out.update(attn(lp["attn"]))
        return out

    return {
        "fmri": {"proj": lin(params["fmri_enc"]["proj"]),
                 "proj_ln": ln(params["fmri_enc"]["proj_ln"]),
                 "cls": params["fmri_enc"]["cls_token"].reshape(1, d)
                        .astype(jnp.float32),
                 "layers": [layer(l) for l in params["fmri_enc"]["layers"]]},
        "smri": {"proj": lin(params["smri_enc"]["proj"], bn_scale),
                 "pos": params["smri_enc"]["pos_embedding"].reshape(1, d)
                        .astype(jnp.float32),
                 "layers": [layer(l) for l in params["smri_enc"]["layers"]]},
        "cross": [layer(l) for l in params["cross"]],
        "fusion": {"lin": lin(params["fusion"]["lin"]),
                   "ln": ln(params["fusion"]["ln"])},
        "final": [layer(l) for l in params["final"]],
        "classifier": {"lin1": lin(params["classifier"]["lin1"]),
                       "ln": ln(params["classifier"]["ln"]),
                       "lin2": lin(params["classifier"]["lin2"])},
    }


def make_forward(params):
    """Build the fused forward callable (single pallas_call, weights in VMEM)."""
    prepped = prepare_params(params)
    leaves, treedef = jax.tree_util.tree_flatten(prepped)
    vmem = pl.BlockSpec(memory_space=pltpu.MemorySpace.VMEM)

    @jax.jit
    def fwd(leaves_, fmri, smri):
        call = pl.pallas_call(
            functools.partial(_forward_kernel, treedef),
            out_shape=jax.ShapeDtypeStruct((fmri.shape[0], NUM_CLASSES),
                                           jnp.float32),
            in_specs=[vmem] * (2 + len(leaves_)),
            out_specs=vmem,
        )
        return call(fmri, smri, *leaves_)

    return functools.partial(fwd, leaves)


# ------------------------------ param init -----------------------------------
class _KeyGen:
    def __init__(self, key):
        self._key = key

    def __call__(self):
        self._key, sub = jax.random.split(self._key)
        return sub


def _dense_p(kg, fan_in, fan_out):
    lim = math.sqrt(6.0 / (fan_in + fan_out))  # xavier_uniform, zero bias
    return {"w": jax.random.uniform(kg(), (fan_in, fan_out), jnp.float32, -lim, lim),
            "b": jnp.zeros((fan_out,), jnp.float32)}


def _ln_p(dim):
    return {"g": jnp.ones((dim,), jnp.float32), "b": jnp.zeros((dim,), jnp.float32)}


def _attn_p(kg, d):
    return {name: _dense_p(kg, d, d) for name in ("q", "k", "v", "o")}


def _tel_p(kg, d):
    return {"ln1": _ln_p(d), "attn": _attn_p(kg, d), "ln2": _ln_p(d),
            "ff1": _dense_p(kg, d, 4 * d), "ff2": _dense_p(kg, 4 * d, d)}


def _cross_p(kg, d):
    return {"attn": _attn_p(kg, d), "ln1": _ln_p(d), "ln2": _ln_p(d),
            "ff1": _dense_p(kg, d, 4 * d), "ff2": _dense_p(kg, 4 * d, d)}


def init_params(key):
    kg = _KeyGen(key)
    d = D_MODEL
    n_enc = N_LAYERS // 2
    return {
        "fmri_enc": {
            "proj": _dense_p(kg, FMRI_DIM, d),
            "proj_ln": _ln_p(d),
            "cls_token": jax.random.normal(kg(), (1, 1, d), jnp.float32),
            "layers": [_tel_p(kg, d) for _ in range(n_enc)],
        },
        "smri_enc": {
            "proj": _dense_p(kg, SMRI_DIM, d),
            "pos_embedding": 0.1 * jax.random.normal(kg(), (1, 1, d), jnp.float32),
            "layers": [_tel_p(kg, d) for _ in range(n_enc)],
        },
        "cross": [_cross_p(kg, d) for _ in range(N_CROSS_LAYERS)],
        "fusion": {"lin": _dense_p(kg, 2 * d, d), "ln": _ln_p(d)},
        "final": [_tel_p(kg, d) for _ in range(n_enc)],
        "classifier": {"lin1": _dense_p(kg, d, d // 2), "ln": _ln_p(d // 2),
                       "lin2": _dense_p(kg, d // 2, NUM_CLASSES)},
    }


# ---------------------------------- main --------------------------------------
if __name__ == "__main__":
    root = jax.random.PRNGKey(0)
    kp, kf, ks = jax.random.split(root, 3)
    params = init_params(kp)
    fmri = jax.random.normal(kf, (BATCH, FMRI_DIM), jnp.float32)
    smri = jax.random.normal(ks, (BATCH, SMRI_DIM), jnp.float32)

    forward = make_forward(params)
    logits = jax.block_until_ready(forward(fmri, smri))
    assert logits.shape == (BATCH, NUM_CLASSES)
    assert bool(jnp.all(jnp.isfinite(logits)))
    print("KERNEL_OK")
</pallas_src>

<mosaic_0001>
module attributes {stable_mosaic.version = 11 : i64} {
  func.func @_forward_kernel(%arg0: memref<2x48xf32, #tpu.memory_space<vmem>>, %arg1: memref<2x40xf32, #tpu.memory_space<vmem>>, %arg2: memref<33x16xf32, #tpu.memory_space<vmem>>, %arg3: memref<17x2xf32, #tpu.memory_space<vmem>>, %arg4: memref<2x16xf32, #tpu.memory_space<vmem>>, %arg5: memref<33x128xf32, #tpu.memory_space<vmem>>, %arg6: memref<129x32xf32, #tpu.memory_space<vmem>>, %arg7: memref<2x32xf32, #tpu.memory_space<vmem>>, %arg8: memref<2x32xf32, #tpu.memory_space<vmem>>, %arg9: memref<33x32xf32, #tpu.memory_space<vmem>>, %arg10: memref<33x96xf32, #tpu.memory_space<vmem>>, %arg11: memref<33x128xf32, #tpu.memory_space<vmem>>, %arg12: memref<129x32xf32, #tpu.memory_space<vmem>>, %arg13: memref<2x32xf32, #tpu.memory_space<vmem>>, %arg14: memref<2x32xf32, #tpu.memory_space<vmem>>, %arg15: memref<33x32xf32, #tpu.memory_space<vmem>>, %arg16: memref<33x96xf32, #tpu.memory_space<vmem>>, %arg17: memref<33x128xf32, #tpu.memory_space<vmem>>, %arg18: memref<129x32xf32, #tpu.memory_space<vmem>>, %arg19: memref<2x32xf32, #tpu.memory_space<vmem>>, %arg20: memref<2x32xf32, #tpu.memory_space<vmem>>, %arg21: memref<33x32xf32, #tpu.memory_space<vmem>>, %arg22: memref<33x96xf32, #tpu.memory_space<vmem>>, %arg23: memref<33x128xf32, #tpu.memory_space<vmem>>, %arg24: memref<129x32xf32, #tpu.memory_space<vmem>>, %arg25: memref<2x32xf32, #tpu.memory_space<vmem>>, %arg26: memref<2x32xf32, #tpu.memory_space<vmem>>, %arg27: memref<33x32xf32, #tpu.memory_space<vmem>>, %arg28: memref<33x96xf32, #tpu.memory_space<vmem>>, %arg29: memref<1x32xf32, #tpu.memory_space<vmem>>, %arg30: memref<33x128xf32, #tpu.memory_space<vmem>>, %arg31: memref<129x32xf32, #tpu.memory_space<vmem>>, %arg32: memref<2x32xf32, #tpu.memory_space<vmem>>, %arg33: memref<2x32xf32, #tpu.memory_space<vmem>>, %arg34: memref<33x32xf32, #tpu.memory_space<vmem>>, %arg35: memref<33x96xf32, #tpu.memory_space<vmem>>, %arg36: memref<33x128xf32, #tpu.memory_space<vmem>>, %arg37: memref<129x32xf32, #tpu.memory_space<vmem>>, %arg38: memref<2x32xf32, #tpu.memory_space<vmem>>, %arg39: memref<2x32xf32, #tpu.memory_space<vmem>>, %arg40: memref<33x32xf32, #tpu.memory_space<vmem>>, %arg41: memref<33x96xf32, #tpu.memory_space<vmem>>, %arg42: memref<49x32xf32, #tpu.memory_space<vmem>>, %arg43: memref<2x32xf32, #tpu.memory_space<vmem>>, %arg44: memref<65x32xf32, #tpu.memory_space<vmem>>, %arg45: memref<2x32xf32, #tpu.memory_space<vmem>>, %arg46: memref<33x128xf32, #tpu.memory_space<vmem>>, %arg47: memref<129x32xf32, #tpu.memory_space<vmem>>, %arg48: memref<2x32xf32, #tpu.memory_space<vmem>>, %arg49: memref<2x32xf32, #tpu.memory_space<vmem>>, %arg50: memref<33x32xf32, #tpu.memory_space<vmem>>, %arg51: memref<33x96xf32, #tpu.memory_space<vmem>>, %arg52: memref<33x128xf32, #tpu.memory_space<vmem>>, %arg53: memref<129x32xf32, #tpu.memory_space<vmem>>, %arg54: memref<2x32xf32, #tpu.memory_space<vmem>>, %arg55: memref<2x32xf32, #tpu.memory_space<vmem>>, %arg56: memref<33x32xf32, #tpu.memory_space<vmem>>, %arg57: memref<33x96xf32, #tpu.memory_space<vmem>>, %arg58: memref<1x32xf32, #tpu.memory_space<vmem>>, %arg59: memref<41x32xf32, #tpu.memory_space<vmem>>, %arg60: memref<2x2xf32, #tpu.memory_space<vmem>>) attributes {dimension_semantics = [], scalar_prefetch = 0 : i64, scratch_operands = 0 : i64, tpu.core_type = #tpu.core_type<tc>} {
    %c0 = arith.constant 0 : index
    %c0_0 = arith.constant 0 : index
    %0 = vector.load %arg0[%c0, %c0_0] : memref<2x48xf32, #tpu.memory_space<vmem>>, vector<2x48xf32>
    %c0_1 = arith.constant 0 : index
    %c0_2 = arith.constant 0 : index
    %1 = vector.load %arg1[%c0_1, %c0_2] : memref<2x40xf32, #tpu.memory_space<vmem>>, vector<2x40xf32>
    %c0_3 = arith.constant 0 : index
    %c0_4 = arith.constant 0 : index
    %2 = vector.load %arg42[%c0_3, %c0_4] : memref<49x32xf32, #tpu.memory_space<vmem>>, vector<49x32xf32>
    %3 = vector.extract_strided_slice %2 {offsets = [0, 0], sizes = [48, 32], strides = [1, 1]} : vector<49x32xf32> to vector<48x32xf32>
    %cst = arith.constant dense<0.000000e+00> : vector<2x32xf32>
    %4 = tpu.matmul %0, %3, %cst {dimension_numbers = #tpu.dot_dimension_numbers<[1], [0], [0], [1], [0, 0, 1, 1], [], []>} : vector<2x48xf32>, vector<48x32xf32>, vector<2x32xf32> -> vector<2x32xf32>
    %5 = vector.extract_strided_slice %2 {offsets = [48, 0], sizes = [1, 32], strides = [1, 1]} : vector<49x32xf32> to vector<1x32xf32>
    %6 = vector.broadcast %5 : vector<1x32xf32> to vector<2x32xf32>
    %7 = arith.addf %4, %6 : vector<2x32xf32>
    %c0_5 = arith.constant 0 : index
    %c0_6 = arith.constant 0 : index
    %8 = vector.load %arg43[%c0_5, %c0_6] : memref<2x32xf32, #tpu.memory_space<vmem>>, vector<2x32xf32>
    %9 = vector.extract_strided_slice %8 {offsets = [0, 0], sizes = [1, 32], strides = [1, 1]} : vector<2x32xf32> to vector<1x32xf32>
    %10 = vector.extract_strided_slice %8 {offsets = [1, 0], sizes = [1, 32], strides = [1, 1]} : vector<2x32xf32> to vector<1x32xf32>
    %cst_7 = arith.constant dense<0.000000e+00> : vector<2xf32>
    %11 = vector.multi_reduction <add>, %7, %cst_7 [1] : vector<2x32xf32> to vector<2xf32>
    %12 = vector.shape_cast %11 : vector<2xf32> to vector<2x1xf32>
    %cst_8 = arith.constant 3.200000e+01 : f32
    %13 = vector.broadcast %cst_8 : f32 to vector<2x1xf32>
    %14 = arith.divf %12, %13 : vector<2x1xf32>
    %15 = vector.broadcast %14 : vector<2x1xf32> to vector<2x32xf32>
    %16 = arith.subf %7, %15 : vector<2x32xf32>
    %17 = arith.mulf %16, %16 : vector<2x32xf32>
    %cst_9 = arith.constant dense<0.000000e+00> : vector<2xf32>
    %18 = vector.multi_reduction <add>, %17, %cst_9 [1] : vector<2x32xf32> to vector<2xf32>
    %19 = vector.shape_cast %18 : vector<2xf32> to vector<2x1xf32>
    %cst_10 = arith.constant 3.200000e+01 : f32
    %20 = vector.broadcast %cst_10 : f32 to vector<2x1xf32>
    %21 = arith.divf %19, %20 : vector<2x1xf32>
    %cst_11 = arith.constant 9.99999974E-6 : f32
    %22 = vector.broadcast %cst_11 : f32 to vector<2x1xf32>
    %23 = arith.addf %21, %22 : vector<2x1xf32>
    %24 = math.rsqrt %23 : vector<2x1xf32>
    %25 = vector.broadcast %24 : vector<2x1xf32> to vector<2x32xf32>
    %26 = arith.mulf %16, %25 : vector<2x32xf32>
    %27 = vector.broadcast %9 : vector<1x32xf32> to vector<2x32xf32>
    %28 = arith.mulf %26, %27 : vector<2x32xf32>
    %29 = vector.broadcast %10 : vector<1x32xf32> to vector<2x32xf32>
    %30 = arith.addf %28, %29 : vector<2x32xf32>
    %c0_12 = arith.constant 0 : index
    %c0_13 = arith.constant 0 : index
    %31 = vector.load %arg29[%c0_12, %c0_13] : memref<1x32xf32, #tpu.memory_space<vmem>>, vector<1x32xf32>
    %32 = vector.extract_strided_slice %30 {offsets = [0, 0], sizes = [1, 32], strides = [1, 1]} : vector<2x32xf32> to vector<1x32xf32>
    %33 = vector.extract_strided_slice %30 {offsets = [1, 0], sizes = [1, 32], strides = [1, 1]} : vector<2x32xf32> to vector<1x32xf32>
    %34 = tpu.concatenate %31, %32, %31, %33 in 0 : vector<1x32xf32>, vector<1x32xf32>, vector<1x32xf32>, vector<1x32xf32> -> vector<4x32xf32>
    %c0_14 = arith.constant 0 : index
    %c0_15 = arith.constant 0 : index
    %35 = vector.load %arg32[%c0_14, %c0_15] : memref<2x32xf32, #tpu.memory_space<vmem>>, vector<2x32xf32>
    %36 = vector.extract_strided_slice %35 {offsets = [0, 0], sizes = [1, 32], strides = [1, 1]} : vector<2x32xf32> to vector<1x32xf32>
    %37 = vector.extract_strided_slice %35 {offsets = [1, 0], sizes = [1, 32], strides = [1, 1]} : vector<2x32xf32> to vector<1x32xf32>
    %cst_16 = arith.constant dense<0.000000e+00> : vector<4xf32>
    %38 = vector.multi_reduction <add>, %34, %cst_16 [1] : vector<4x32xf32> to vector<4xf32>
    %39 = vector.shape_cast %38 : vector<4xf32> to vector<4x1xf32>
    %cst_17 = arith.constant 3.200000e+01 : f32
    %40 = vector.broadcast %cst_17 : f32 to vector<4x1xf32>
    %41 = arith.divf %39, %40 : vector<4x1xf32>
    %42 = vector.broadcast %41 : vector<4x1xf32> to vector<4x32xf32>
    %43 = arith.subf %34, %42 : vector<4x32xf32>
    %44 = arith.mulf %43, %43 : vector<4x32xf32>
    %cst_18 = arith.constant dense<0.000000e+00> : vector<4xf32>
    %45 = vector.multi_reduction <add>, %44, %cst_18 [1] : vector<4x32xf32> to vector<4xf32>
    %46 = vector.shape_cast %45 : vector<4xf32> to vector<4x1xf32>
    %cst_19 = arith.constant 3.200000e+01 : f32
    %47 = vector.broadcast %cst_19 : f32 to vector<4x1xf32>
    %48 = arith.divf %46, %47 : vector<4x1xf32>
    %cst_20 = arith.constant 9.99999974E-6 : f32
    %49 = vector.broadcast %cst_20 : f32 to vector<4x1xf32>
    %50 = arith.addf %48, %49 : vector<4x1xf32>
    %51 = math.rsqrt %50 : vector<4x1xf32>
    %52 = vector.broadcast %51 : vector<4x1xf32> to vector<4x32xf32>
    %53 = arith.mulf %43, %52 : vector<4x32xf32>
    %54 = vector.broadcast %36 : vector<1x32xf32> to vector<4x32xf32>
    %55 = arith.mulf %53, %54 : vector<4x32xf32>
    %56 = vector.broadcast %37 : vector<1x32xf32> to vector<4x32xf32>
    %57 = arith.addf %55, %56 : vector<4x32xf32>
    %c0_21 = arith.constant 0 : index
    %c0_22 = arith.constant 0 : index
    %58 = vector.load %arg35[%c0_21, %c0_22] : memref<33x96xf32, #tpu.memory_space<vmem>>, vector<33x96xf32>
    %59 = vector.extract_strided_slice %58 {offsets = [0, 0], sizes = [33, 32], strides = [1, 1]} : vector<33x96xf32> to vector<33x32xf32>
    %60 = vector.extract_strided_slice %59 {offsets = [0, 0], sizes = [32, 32], strides = [1, 1]} : vector<33x32xf32> to vector<32x32xf32>
    %cst_23 = arith.constant dense<0.000000e+00> : vector<4x32xf32>
    %61 = tpu.matmul %57, %60, %cst_23 {dimension_numbers = #tpu.dot_dimension_numbers<[1], [0], [0], [1], [0, 0, 1, 1], [], []>} : vector<4x32xf32>, vector<32x32xf32>, vector<4x32xf32> -> vector<4x32xf32>
    %62 = vector.extract_strided_slice %59 {offsets = [32, 0], sizes = [1, 32], strides = [1, 1]} : vector<33x32xf32> to vector<1x32xf32>
    %63 = vector.broadcast %62 : vector<1x32xf32> to vector<4x32xf32>
    %64 = arith.addf %61, %63 : vector<4x32xf32>
    %65 = vector.extract_strided_slice %58 {offsets = [0, 32], sizes = [33, 32], strides = [1, 1]} : vector<33x96xf32> to vector<33x32xf32>
    %66 = vector.extract_strided_slice %65 {offsets = [0, 0], sizes = [32, 32], strides = [1, 1]} : vector<33x32xf32> to vector<32x32xf32>
    %cst_24 = arith.constant dense<0.000000e+00> : vector<4x32xf32>
    %67 = tpu.matmul %57, %66, %cst_24 {dimension_numbers = #tpu.dot_dimension_numbers<[1], [0], [0], [1], [0, 0, 1, 1], [], []>} : vector<4x32xf32>, vector<32x32xf32>, vector<4x32xf32> -> vector<4x32xf32>
    %68 = vector.extract_strided_slice %65 {offsets = [32, 0], sizes = [1, 32], strides = [1, 1]} : vector<33x32xf32> to vector<1x32xf32>
    %69 = vector.broadcast %68 : vector<1x32xf32> to vector<4x32xf32>
    %70 = arith.addf %67, %69 : vector<4x32xf32>
    %71 = vector.extract_strided_slice %58 {offsets = [0, 64], sizes = [33, 32], strides = [1, 1]} : vector<33x96xf32> to vector<33x32xf32>
    %72 = vector.extract_strided_slice %71 {offsets = [0, 0], sizes = [32, 32], strides = [1, 1]} : vector<33x32xf32> to vector<32x32xf32>
    %cst_25 = arith.constant dense<0.000000e+00> : vector<4x32xf32>
    %73 = tpu.matmul %57, %72, %cst_25 {dimension_numbers = #tpu.dot_dimension_numbers<[1], [0], [0], [1], [0, 0, 1, 1], [], []>} : vector<4x32xf32>, vector<32x32xf32>, vector<4x32xf32> -> vector<4x32xf32>
    %74 = vector.extract_strided_slice %71 {offsets = [32, 0], sizes = [1, 32], strides = [1, 1]} : vector<33x32xf32> to vector<1x32xf32>
    %75 = vector.broadcast %74 : vector<1x32xf32> to vector<4x32xf32>
    %76 = arith.addf %73, %75 : vector<4x32xf32>
    %77 = vector.extract_strided_slice %64 {offsets = [0, 0], sizes = [2, 32], strides = [1, 1]} : vector<4x32xf32> to vector<2x32xf32>
    %78 = vector.extract_strided_slice %70 {offsets = [0, 0], sizes = [2, 32], strides = [1, 1]} : vector<4x32xf32> to vector<2x32xf32>
    %79 = vector.extract_strided_slice %76 {offsets = [0, 0], sizes = [2, 32], strides = [1, 1]} : vector<4x32xf32> to vector<2x32xf32>
    %80 = vector.extract_strided_slice %77 {offsets = [0, 0], sizes = [2, 8], strides = [1, 1]} : vector<2x32xf32> to vector<2x8xf32>
    %81 = vector.extract_strided_slice %78 {offsets = [0, 0], sizes = [1, 8], strides = [1, 1]} : vector<2x32xf32> to vector<1x8xf32>
    %82 = vector.broadcast %81 : vector<1x8xf32> to vector<2x8xf32>
    %83 = arith.mulf %80, %82 : vector<2x8xf32>
    %cst_26 = arith.constant dense<0.000000e+00> : vector<2xf32>
    %84 = vector.multi_reduction <add>, %83, %cst_26 [1] : vector<2x8xf32> to vector<2xf32>
    %85 = vector.shape_cast %84 : vector<2xf32> to vector<2x1xf32>
    %86 = vector.extract_strided_slice %78 {offsets = [1, 0], sizes = [1, 8], strides = [1, 1]} : vector<2x32xf32> to vector<1x8xf32>
    %87 = vector.broadcast %86 : vector<1x8xf32> to vector<2x8xf32>
    %88 = arith.mulf %80, %87 : vector<2x8xf32>
    %cst_27 = arith.constant dense<0.000000e+00> : vector<2xf32>
    %89 = vector.multi_reduction <add>, %88, %cst_27 [1] : vector<2x8xf32> to vector<2xf32>
    %90 = vector.shape_cast %89 : vector<2xf32> to vector<2x1xf32>
    %91 = tpu.concatenate %85, %90 in 1 : vector<2x1xf32>, vector<2x1xf32> -> vector<2x2xf32>
    %cst_28 = arith.constant dense<0xFF800000> : vector<2xf32>
    %92 = vector.multi_reduction <maximumf>, %91, %cst_28 [1] : vector<2x2xf32> to vector<2xf32>
    %93 = vector.shape_cast %92 : vector<2xf32> to vector<2x1xf32>
    %94 = vector.broadcast %93 : vector<2x1xf32> to vector<2x2xf32>
    %95 = arith.subf %91, %94 : vector<2x2xf32>
    %96 = math.exp %95 : vector<2x2xf32>
    %cst_29 = arith.constant dense<0.000000e+00> : vector<2xf32>
    %97 = vector.multi_reduction <add>, %96, %cst_29 [1] : vector<2x2xf32> to vector<2xf32>
    %98 = vector.shape_cast %97 : vector<2xf32> to vector<2x1xf32>
    %99 = vector.broadcast %98 : vector<2x1xf32> to vector<2x2xf32>
    %100 = arith.divf %96, %99 : vector<2x2xf32>
    %101 = vector.extract_strided_slice %79 {offsets = [0, 0], sizes = [2, 8], strides = [1, 1]} : vector<2x32xf32> to vector<2x8xf32>
    %cst_30 = arith.constant dense<0.000000e+00> : vector<2x8xf32>
    %102 = tpu.matmul %100, %101, %cst_30 {dimension_numbers = #tpu.dot_dimension_numbers<[1], [0], [0], [1], [0, 0, 1, 1], [], []>} : vector<2x2xf32>, vector<2x8xf32>, vector<2x8xf32> -> vector<2x8xf32>
    %103 = vector.extract_strided_slice %77 {offsets = [0, 8], sizes = [2, 8], strides = [1, 1]} : vector<2x32xf32> to vector<2x8xf32>
    %104 = vector.extract_strided_slice %78 {offsets = [0, 8], sizes = [1, 8], strides = [1, 1]} : vector<2x32xf32> to vector<1x8xf32>
    %105 = vector.broadcast %104 : vector<1x8xf32> to vector<2x8xf32>
    %106 = arith.mulf %103, %105 : vector<2x8xf32>
    %cst_31 = arith.constant dense<0.000000e+00> : vector<2xf32>
    %107 = vector.multi_reduction <add>, %106, %cst_31 [1] : vector<2x8xf32> to vector<2xf32>
    %108 = vector.shape_cast %107 : vector<2xf32> to vector<2x1xf32>
    %109 = vector.extract_strided_slice %78 {offsets = [1, 8], sizes = [1, 8], strides = [1, 1]} : vector<2x32xf32> to vector<1x8xf32>
    %110 = vector.broadcast %109 : vector<1x8xf32> to vector<2x8xf32>
    %111 = arith.mulf %103, %110 : vector<2x8xf32>
    %cst_32 = arith.constant dense<0.000000e+00> : vector<2xf32>
    %112 = vector.multi_reduction <add>, %111, %cst_32 [1] : vector<2x8xf32> to vector<2xf32>
    %113 = vector.shape_cast %112 : vector<2xf32> to vector<2x1xf32>
    %114 = tpu.concatenate %108, %113 in 1 : vector<2x1xf32>, vector<2x1xf32> -> vector<2x2xf32>
    %cst_33 = arith.constant dense<0xFF800000> : vector<2xf32>
    %115 = vector.multi_reduction <maximumf>, %114, %cst_33 [1] : vector<2x2xf32> to vector<2xf32>
    %116 = vector.shape_cast %115 : vector<2xf32> to vector<2x1xf32>
    %117 = vector.broadcast %116 : vector<2x1xf32> to vector<2x2xf32>
    %118 = arith.subf %114, %117 : vector<2x2xf32>
    %119 = math.exp %118 : vector<2x2xf32>
    %cst_34 = arith.constant dense<0.000000e+00> : vector<2xf32>
    %120 = vector.multi_reduction <add>, %119, %cst_34 [1] : vector<2x2xf32> to vector<2xf32>
    %121 = vector.shape_cast %120 : vector<2xf32> to vector<2x1xf32>
    %122 = vector.broadcast %121 : vector<2x1xf32> to vector<2x2xf32>
    %123 = arith.divf %119, %122 : vector<2x2xf32>
    %124 = vector.extract_strided_slice %79 {offsets = [0, 8], sizes = [2, 8], strides = [1, 1]} : vector<2x32xf32> to vector<2x8xf32>
    %cst_35 = arith.constant dense<0.000000e+00> : vector<2x8xf32>
    %125 = tpu.matmul %123, %124, %cst_35 {dimension_numbers = #tpu.dot_dimension_numbers<[1], [0], [0], [1], [0, 0, 1, 1], [], []>} : vector<2x2xf32>, vector<2x8xf32>, vector<2x8xf32> -> vector<2x8xf32>
    %126 = vector.extract_strided_slice %77 {offsets = [0, 16], sizes = [2, 8], strides = [1, 1]} : vector<2x32xf32> to vector<2x8xf32>
    %127 = vector.extract_strided_slice %78 {offsets = [0, 16], sizes = [1, 8], strides = [1, 1]} : vector<2x32xf32> to vector<1x8xf32>
    %128 = vector.broadcast %127 : vector<1x8xf32> to vector<2x8xf32>
    %129 = arith.mulf %126, %128 : vector<2x8xf32>
    %cst_36 = arith.constant dense<0.000000e+00> : vector<2xf32>
    %130 = vector.multi_reduction <add>, %129, %cst_36 [1] : vector<2x8xf32> to vector<2xf32>
    %131 = vector.shape_cast %130 : vector<2xf32> to vector<2x1xf32>
    %132 = vector.extract_strided_slice %78 {offsets = [1, 16], sizes = [1, 8], strides = [1, 1]} : vector<2x32xf32> to vector<1x8xf32>
    %133 = vector.broadcast %132 : vector<1x8xf32> to vector<2x8xf32>
    %134 = arith.mulf %126, %133 : vector<2x8xf32>
    %cst_37 = arith.constant dense<0.000000e+00> : vector<2xf32>
    %135 = vector.multi_reduction <add>, %134, %cst_37 [1] : vector<2x8xf32> to vector<2xf32>
    %136 = vector.shape_cast %135 : vector<2xf32> to vector<2x1xf32>
    %137 = tpu.concatenate %131, %136 in 1 : vector<2x1xf32>, vector<2x1xf32> -> vector<2x2xf32>
    %cst_38 = arith.constant dense<0xFF800000> : vector<2xf32>
    %138 = vector.multi_reduction <maximumf>, %137, %cst_38 [1] : vector<2x2xf32> to vector<2xf32>
    %139 = vector.shape_cast %138 : vector<2xf32> to vector<2x1xf32>
    %140 = vector.broadcast %139 : vector<2x1xf32> to vector<2x2xf32>
    %141 = arith.subf %137, %140 : vector<2x2xf32>
    %142 = math.exp %141 : vector<2x2xf32>
    %cst_39 = arith.constant dense<0.000000e+00> : vector<2xf32>
    %143 = vector.multi_reduction <add>, %142, %cst_39 [1] : vector<2x2xf32> to vector<2xf32>
    %144 = vector.shape_cast %143 : vector<2xf32> to vector<2x1xf32>
    %145 = vector.broadcast %144 : vector<2x1xf32> to vector<2x2xf32>
    %146 = arith.divf %142, %145 : vector<2x2xf32>
    %147 = vector.extract_strided_slice %79 {offsets = [0, 16], sizes = [2, 8], strides = [1, 1]} : vector<2x32xf32> to vector<2x8xf32>
    %cst_40 = arith.constant dense<0.000000e+00> : vector<2x8xf32>
    %148 = tpu.matmul %146, %147, %cst_40 {dimension_numbers = #tpu.dot_dimension_numbers<[1], [0], [0], [1], [0, 0, 1, 1], [], []>} : vector<2x2xf32>, vector<2x8xf32>, vector<2x8xf32> -> vector<2x8xf32>
    %149 = vector.extract_strided_slice %77 {offsets = [0, 24], sizes = [2, 8], strides = [1, 1]} : vector<2x32xf32> to vector<2x8xf32>
    %150 = vector.extract_strided_slice %78 {offsets = [0, 24], sizes = [1, 8], strides = [1, 1]} : vector<2x32xf32> to vector<1x8xf32>
    %151 = vector.broadcast %150 : vector<1x8xf32> to vector<2x8xf32>
    %152 = arith.mulf %149, %151 : vector<2x8xf32>
    %cst_41 = arith.constant dense<0.000000e+00> : vector<2xf32>
    %153 = vector.multi_reduction <add>, %152, %cst_41 [1] : vector<2x8xf32> to vector<2xf32>
    %154 = vector.shape_cast %153 : vector<2xf32> to vector<2x1xf32>
    %155 = vector.extract_strided_slice %78 {offsets = [1, 24], sizes = [1, 8], strides = [1, 1]} : vector<2x32xf32> to vector<1x8xf32>
    %156 = vector.broadcast %155 : vector<1x8xf32> to vector<2x8xf32>
    %157 = arith.mulf %149, %156 : vector<2x8xf32>
    %cst_42 = arith.constant dense<0.000000e+00> : vector<2xf32>
    %158 = vector.multi_reduction <add>, %157, %cst_42 [1] : vector<2x8xf32> to vector<2xf32>
    %159 = vector.shape_cast %158 : vector<2xf32> to vector<2x1xf32>
    %160 = tpu.concatenate %154, %159 in 1 : vector<2x1xf32>, vector<2x1xf32> -> vector<2x2xf32>
    %cst_43 = arith.constant dense<0xFF800000> : vector<2xf32>
    %161 = vector.multi_reduction <maximumf>, %160, %cst_43 [1] : vector<2x2xf32> to vector<2xf32>
    %162 = vector.shape_cast %161 : vector<2xf32> to vector<2x1xf32>
    %163 = vector.broadcast %162 : vector<2x1xf32> to vector<2x2xf32>
    %164 = arith.subf %160, %163 : vector<2x2xf32>
    %165 = math.exp %164 : vector<2x2xf32>
    %cst_44 = arith.constant dense<0.000000e+00> : vector<2xf32>
    %166 = vector.multi_reduction <add>, %165, %cst_44 [1] : vector<2x2xf32> to vector<2xf32>
    %167 = vector.shape_cast %166 : vector<2xf32> to vector<2x1xf32>
    %168 = vector.broadcast %167 : vector<2x1xf32> to vector<2x2xf32>
    %169 = arith.divf %165, %168 : vector<2x2xf32>
    %170 = vector.extract_strided_slice %79 {offsets = [0, 24], sizes = [2, 8], strides = [1, 1]} : vector<2x32xf32> to vector<2x8xf32>
    %cst_45 = arith.constant dense<0.000000e+00> : vector<2x8xf32>
    %171 = tpu.matmul %169, %170, %cst_45 {dimension_numbers = #tpu.dot_dimension_numbers<[1], [0], [0], [1], [0, 0, 1, 1], [], []>} : vector<2x2xf32>, vector<2x8xf32>, vector<2x8xf32> -> vector<2x8xf32>
    %172 = tpu.concatenate %102, %125, %148, %171 in 1 : vector<2x8xf32>, vector<2x8xf32>, vector<2x8xf32>, vector<2x8xf32> -> vector<2x32xf32>
    %173 = vector.extract_strided_slice %64 {offsets = [2, 0], sizes = [2, 32], strides = [1, 1]} : vector<4x32xf32> to vector<2x32xf32>
    %174 = vector.extract_strided_slice %70 {offsets = [2, 0], sizes = [2, 32], strides = [1, 1]} : vector<4x32xf32> to vector<2x32xf32>
    %175 = vector.extract_strided_slice %76 {offsets = [2, 0], sizes = [2, 32], strides = [1, 1]} : vector<4x32xf32> to vector<2x32xf32>
    %176 = vector.extract_strided_slice %173 {offsets = [0, 0], sizes = [2, 8], strides = [1, 1]} : vector<2x32xf32> to vector<2x8xf32>
    %177 = vector.extract_strided_slice %174 {offsets = [0, 0], sizes = [1, 8], strides = [1, 1]} : vector<2x32xf32> to vector<1x8xf32>
    %178 = vector.broadcast %177 : vector<1x8xf32> to vector<2x8xf32>
    %179 = arith.mulf %176, %178 : vector<2x8xf32>
    %cst_46 = arith.constant dense<0.000000e+00> : vector<2xf32>
    %180 = vector.multi_reduction <add>, %179, %cst_46 [1] : vector<2x8xf32> to vector<2xf32>
    %181 = vector.shape_cast %180 : vector<2xf32> to vector<2x1xf32>
    %182 = vector.extract_strided_slice %174 {offsets = [1, 0], sizes = [1, 8], strides = [1, 1]} : vector<2x32xf32> to vector<1x8xf32>
    %183 = vector.broadcast %182 : vector<1x8xf32> to vector<2x8xf32>
    %184 = arith.mulf %176, %183 : vector<2x8xf32>
    %cst_47 = arith.constant dense<0.000000e+00> : vector<2xf32>
    %185 = vector.multi_reduction <add>, %184, %cst_47 [1] : vector<2x8xf32> to vector<2xf32>
    %186 = vector.shape_cast %185 : vector<2xf32> to vector<2x1xf32>
    %187 = tpu.concatenate %181, %186 in 1 : vector<2x1xf32>, vector<2x1xf32> -> vector<2x2xf32>
    %cst_48 = arith.constant dense<0xFF800000> : vector<2xf32>
    %188 = vector.multi_reduction <maximumf>, %187, %cst_48 [1] : vector<2x2xf32> to vector<2xf32>
    %189 = vector.shape_cast %188 : vector<2xf32> to vector<2x1xf32>
    %190 = vector.broadcast %189 : vector<2x1xf32> to vector<2x2xf32>
    %191 = arith.subf %187, %190 : vector<2x2xf32>
    %192 = math.exp %191 : vector<2x2xf32>
    %cst_49 = arith.constant dense<0.000000e+00> : vector<2xf32>
    %193 = vector.multi_reduction <add>, %192, %cst_49 [1] : vector<2x2xf32> to vector<2xf32>
    %194 = vector.shape_cast %193 : vector<2xf32> to vector<2x1xf32>
    %195 = vector.broadcast %194 : vector<2x1xf32> to vector<2x2xf32>
    %196 = arith.divf %192, %195 : vector<2x2xf32>
    %197 = vector.extract_strided_slice %175 {offsets = [0, 0], sizes = [2, 8], strides = [1, 1]} : vector<2x32xf32> to vector<2x8xf32>
    %cst_50 = arith.constant dense<0.000000e+00> : vector<2x8xf32>
    %198 = tpu.matmul %196, %197, %cst_50 {dimension_numbers = #tpu.dot_dimension_numbers<[1], [0], [0], [1], [0, 0, 1, 1], [], []>} : vector<2x2xf32>, vector<2x8xf32>, vector<2x8xf32> -> vector<2x8xf32>
    %199 = vector.extract_strided_slice %173 {offsets = [0, 8], sizes = [2, 8], strides = [1, 1]} : vector<2x32xf32> to vector<2x8xf32>
    %200 = vector.extract_strided_slice %174 {offsets = [0, 8], sizes = [1, 8], strides = [1, 1]} : vector<2x32xf32> to vector<1x8xf32>
    %201 = vector.broadcast %200 : vector<1x8xf32> to vector<2x8xf32>
    %202 = arith.mulf %199, %201 : vector<2x8xf32>
    %cst_51 = arith.constant dense<0.000000e+00> : vector<2xf32>
    %203 = vector.multi_reduction <add>, %202, %cst_51 [1] : vector<2x8xf32> to vector<2xf32>
    %204 = vector.shape_cast %203 : vector<2xf32> to vector<2x1xf32>
    %205 = vector.extract_strided_slice %174 {offsets = [1, 8], sizes = [1, 8], strides = [1, 1]} : vector<2x32xf32> to vector<1x8xf32>
    %206 = vector.broadcast %205 : vector<1x8xf32> to vector<2x8xf32>
    %207 = arith.mulf %199, %206 : vector<2x8xf32>
    %cst_52 = arith.constant dense<0.000000e+00> : vector<2xf32>
    %208 = vector.multi_reduction <add>, %207, %cst_52 [1] : vector<2x8xf32> to vector<2xf32>
    %209 = vector.shape_cast %208 : vector<2xf32> to vector<2x1xf32>
    %210 = tpu.concatenate %204, %209 in 1 : vector<2x1xf32>, vector<2x1xf32> -> vector<2x2xf32>
    %cst_53 = arith.constant dense<0xFF800000> : vector<2xf32>
    %211 = vector.multi_reduction <maximumf>, %210, %cst_53 [1] : vector<2x2xf32> to vector<2xf32>
    %212 = vector.shape_cast %211 : vector<2xf32> to vector<2x1xf32>
    %213 = vector.broadcast %212 : vector<2x1xf32> to vector<2x2xf32>
    %214 = arith.subf %210, %213 : vector<2x2xf32>
    %215 = math.exp %214 : vector<2x2xf32>
    %cst_54 = arith.constant dense<0.000000e+00> : vector<2xf32>
    %216 = vector.multi_reduction <add>, %215, %cst_54 [1] : vector<2x2xf32> to vector<2xf32>
    %217 = vector.shape_cast %216 : vector<2xf32> to vector<2x1xf32>
    %218 = vector.broadcast %217 : vector<2x1xf32> to vector<2x2xf32>
    %219 = arith.divf %215, %218 : vector<2x2xf32>
    %220 = vector.extract_strided_slice %175 {offsets = [0, 8], sizes = [2, 8], strides = [1, 1]} : vector<2x32xf32> to vector<2x8xf32>
    %cst_55 = arith.constant dense<0.000000e+00> : vector<2x8xf32>
    %221 = tpu.matmul %219, %220, %cst_55 {dimension_numbers = #tpu.dot_dimension_numbers<[1], [0], [0], [1], [0, 0, 1, 1], [], []>} : vector<2x2xf32>, vector<2x8xf32>, vector<2x8xf32> -> vector<2x8xf32>
    %222 = vector.extract_strided_slice %173 {offsets = [0, 16], sizes = [2, 8], strides = [1, 1]} : vector<2x32xf32> to vector<2x8xf32>
    %223 = vector.extract_strided_slice %174 {offsets = [0, 16], sizes = [1, 8], strides = [1, 1]} : vector<2x32xf32> to vector<1x8xf32>
    %224 = vector.broadcast %223 : vector<1x8xf32> to vector<2x8xf32>
    %225 = arith.mulf %222, %224 : vector<2x8xf32>
    %cst_56 = arith.constant dense<0.000000e+00> : vector<2xf32>
    %226 = vector.multi_reduction <add>, %225, %cst_56 [1] : vector<2x8xf32> to vector<2xf32>
    %227 = vector.shape_cast %226 : vector<2xf32> to vector<2x1xf32>
    %228 = vector.extract_strided_slice %174 {offsets = [1, 16], sizes = [1, 8], strides = [1, 1]} : vector<2x32xf32> to vector<1x8xf32>
    %229 = vector.broadcast %228 : vector<1x8xf32> to vector<2x8xf32>
    %230 = arith.mulf %222, %229 : vector<2x8xf32>
    %cst_57 = arith.constant dense<0.000000e+00> : vector<2xf32>
    %231 = vector.multi_reduction <add>, %230, %cst_57 [1] : vector<2x8xf32> to vector<2xf32>
    %232 = vector.shape_cast %231 : vector<2xf32> to vector<2x1xf32>
    %233 = tpu.concatenate %227, %232 in 1 : vector<2x1xf32>, vector<2x1xf32> -> vector<2x2xf32>
    %cst_58 = arith.constant dense<0xFF800000> : vector<2xf32>
    %234 = vector.multi_reduction <maximumf>, %233, %cst_58 [1] : vector<2x2xf32> to vector<2xf32>
    %235 = vector.shape_cast %234 : vector<2xf32> to vector<2x1xf32>
    %236 = vector.broadcast %235 : vector<2x1xf32> to vector<2x2xf32>
    %237 = arith.subf %233, %236 : vector<2x2xf32>
    %238 = math.exp %237 : vector<2x2xf32>
    %cst_59 = arith.constant dense<0.000000e+00> : vector<2xf32>
    %239 = vector.multi_reduction <add>, %238, %cst_59 [1] : vector<2x2xf32> to vector<2xf32>
    %240 = vector.shape_cast %239 : vector<2xf32> to vector<2x1xf32>
    %241 = vector.broadcast %240 : vector<2x1xf32> to vector<2x2xf32>
    %242 = arith.divf %238, %241 : vector<2x2xf32>
    %243 = vector.extract_strided_slice %175 {offsets = [0, 16], sizes = [2, 8], strides = [1, 1]} : vector<2x32xf32> to vector<2x8xf32>
    %cst_60 = arith.constant dense<0.000000e+00> : vector<2x8xf32>
    %244 = tpu.matmul %242, %243, %cst_60 {dimension_numbers = #tpu.dot_dimension_numbers<[1], [0], [0], [1], [0, 0, 1, 1], [], []>} : vector<2x2xf32>, vector<2x8xf32>, vector<2x8xf32> -> vector<2x8xf32>
    %245 = vector.extract_strided_slice %173 {offsets = [0, 24], sizes = [2, 8], strides = [1, 1]} : vector<2x32xf32> to vector<2x8xf32>
    %246 = vector.extract_strided_slice %174 {offsets = [0, 24], sizes = [1, 8], strides = [1, 1]} : vector<2x32xf32> to vector<1x8xf32>
    %247 = vector.broadcast %246 : vector<1x8xf32> to vector<2x8xf32>
    %248 = arith.mulf %245, %247 : vector<2x8xf32>
    %cst_61 = arith.constant dense<0.000000e+00> : vector<2xf32>
    %249 = vector.multi_reduction <add>, %248, %cst_61 [1] : vector<2x8xf32> to vector<2xf32>
    %250 = vector.shape_cast %249 : vector<2xf32> to vector<2x1xf32>
    %251 = vector.extract_strided_slice %174 {offsets = [1, 24], sizes = [1, 8], strides = [1, 1]} : vector<2x32xf32> to vector<1x8xf32>
    %252 = vector.broadcast %251 : vector<1x8xf32> to vector<2x8xf32>
    %253 = arith.mulf %245, %252 : vector<2x8xf32>
    %cst_62 = arith.constant dense<0.000000e+00> : vector<2xf32>
    %254 = vector.multi_reduction <add>, %253, %cst_62 [1] : vector<2x8xf32> to vector<2xf32>
    %255 = vector.shape_cast %254 : vector<2xf32> to vector<2x1xf32>
    %256 = tpu.concatenate %250, %255 in 1 : vector<2x1xf32>, vector<2x1xf32> -> vector<2x2xf32>
    %cst_63 = arith.constant dense<0xFF800000> : vector<2xf32>
    %257 = vector.multi_reduction <maximumf>, %256, %cst_63 [1] : vector<2x2xf32> to vector<2xf32>
    %258 = vector.shape_cast %257 : vector<2xf32> to vector<2x1xf32>
    %259 = vector.broadcast %258 : vector<2x1xf32> to vector<2x2xf32>
    %260 = arith.subf %256, %259 : vector<2x2xf32>
    %261 = math.exp %260 : vector<2x2xf32>
    %cst_64 = arith.constant dense<0.000000e+00> : vector<2xf32>
    %262 = vector.multi_reduction <add>, %261, %cst_64 [1] : vector<2x2xf32> to vector<2xf32>
    %263 = vector.shape_cast %262 : vector<2xf32> to vector<2x1xf32>
    %264 = vector.broadcast %263 : vector<2x1xf32> to vector<2x2xf32>
    %265 = arith.divf %261, %264 : vector<2x2xf32>
    %266 = vector.extract_strided_slice %175 {offsets = [0, 24], sizes = [2, 8], strides = [1, 1]} : vector<2x32xf32> to vector<2x8xf32>
    %cst_65 = arith.constant dense<0.000000e+00> : vector<2x8xf32>
    %267 = tpu.matmul %265, %266, %cst_65 {dimension_numbers = #tpu.dot_dimension_numbers<[1], [0], [0], [1], [0, 0, 1, 1], [], []>} : vector<2x2xf32>, vector<2x8xf32>, vector<2x8xf32> -> vector<2x8xf32>
    %268 = tpu.concatenate %198, %221, %244, %267 in 1 : vector<2x8xf32>, vector<2x8xf32>, vector<2x8xf32>, vector<2x8xf32> -> vector<2x32xf32>
    %269 = tpu.concatenate %172, %268 in 0 : vector<2x32xf32>, vector<2x32xf32> -> vector<4x32xf32>
    %c0_66 = arith.constant 0 : index
    %c0_67 = arith.constant 0 : index
    %270 = vector.load %arg34[%c0_66, %c0_67] : memref<33x32xf32, #tpu.memory_space<vmem>>, vector<33x32xf32>
    %271 = vector.extract_strided_slice %270 {offsets = [0, 0], sizes = [32, 32], strides = [1, 1]} : vector<33x32xf32> to vector<32x32xf32>
    %cst_68 = arith.constant dense<0.000000e+00> : vector<4x32xf32>
    %272 = tpu.matmul %269, %271, %cst_68 {dimension_numbers = #tpu.dot_dimension_numbers<[1], [0], [0], [1], [0, 0, 1, 1], [], []>} : vector<4x32xf32>, vector<32x32xf32>, vector<4x32xf32> -> vector<4x32xf32>
    %273 = vector.extract_strided_slice %270 {offsets = [32, 0], sizes = [1, 32], strides = [1, 1]} : vector<33x32xf32> to vector<1x32xf32>
    %274 = vector.broadcast %273 : vector<1x32xf32> to vector<4x32xf32>
    %275 = arith.addf %272, %274 : vector<4x32xf32>
    %276 = arith.addf %34, %275 : vector<4x32xf32>
    %c0_69 = arith.constant 0 : index
    %c0_70 = arith.constant 0 : index
    %277 = vector.load %arg33[%c0_69, %c0_70] : memref<2x32xf32, #tpu.memory_space<vmem>>, vector<2x32xf32>
    %278 = vector.extract_strided_slice %277 {offsets = [0, 0], sizes = [1, 32], strides = [1, 1]} : vector<2x32xf32> to vector<1x32xf32>
    %279 = vector.extract_strided_slice %277 {offsets = [1, 0], sizes = [1, 32], strides = [1, 1]} : vector<2x32xf32> to vector<1x32xf32>
    %cst_71 = arith.constant dense<0.000000e+00> : vector<4xf32>
    %280 = vector.multi_reduction <add>, %276, %cst_71 [1] : vector<4x32xf32> to vector<4xf32>
    %281 = vector.shape_cast %280 : vector<4xf32> to vector<4x1xf32>
    %cst_72 = arith.constant 3.200000e+01 : f32
    %282 = vector.broadcast %cst_72 : f32 to vector<4x1xf32>
    %283 = arith.divf %281, %282 : vector<4x1xf32>
    %284 = vector.broadcast %283 : vector<4x1xf32> to vector<4x32xf32>
    %285 = arith.subf %276, %284 : vector<4x32xf32>
    %286 = arith.mulf %285, %285 : vector<4x32xf32>
    %cst_73 = arith.constant dense<0.000000e+00> : vector<4xf32>
    %287 = vector.multi_reduction <add>, %286, %cst_73 [1] : vector<4x32xf32> to vector<4xf32>
    %288 = vector.shape_cast %287 : vector<4xf32> to vector<4x1xf32>
    %cst_74 = arith.constant 3.200000e+01 : f32
    %289 = vector.broadcast %cst_74 : f32 to vector<4x1xf32>
    %290 = arith.divf %288, %289 : vector<4x1xf32>
    %cst_75 = arith.constant 9.99999974E-6 : f32
    %291 = vector.broadcast %cst_75 : f32 to vector<4x1xf32>
    %292 = arith.addf %290, %291 : vector<4x1xf32>
    %293 = math.rsqrt %292 : vector<4x1xf32>
    %294 = vector.broadcast %293 : vector<4x1xf32> to vector<4x32xf32>
    %295 = arith.mulf %285, %294 : vector<4x32xf32>
    %296 = vector.broadcast %278 : vector<1x32xf32> to vector<4x32xf32>
    %297 = arith.mulf %295, %296 : vector<4x32xf32>
    %298 = vector.broadcast %279 : vector<1x32xf32> to vector<4x32xf32>
    %299 = arith.addf %297, %298 : vector<4x32xf32>
    %c0_76 = arith.constant 0 : index
    %c0_77 = arith.constant 0 : index
    %300 = vector.load %arg30[%c0_76, %c0_77] : memref<33x128xf32, #tpu.memory_space<vmem>>, vector<33x128xf32>
    %301 = vector.extract_strided_slice %300 {offsets = [0, 0], sizes = [32, 128], strides = [1, 1]} : vector<33x128xf32> to vector<32x128xf32>
    %cst_78 = arith.constant dense<0.000000e+00> : vector<4x128xf32>
    %302 = tpu.matmul %299, %301, %cst_78 {dimension_numbers = #tpu.dot_dimension_numbers<[1], [0], [0], [1], [0, 0, 1, 1], [], []>} : vector<4x32xf32>, vector<32x128xf32>, vector<4x128xf32> -> vector<4x128xf32>
    %303 = vector.extract_strided_slice %300 {offsets = [32, 0], sizes = [1, 128], strides = [1, 1]} : vector<33x128xf32> to vector<1x128xf32>
    %304 = vector.broadcast %303 : vector<1x128xf32> to vector<4x128xf32>
    %305 = arith.addf %302, %304 : vector<4x128xf32>
    %cst_79 = arith.constant 5.000000e-01 : f32
    %306 = vector.broadcast %cst_79 : f32 to vector<4x128xf32>
    %307 = arith.mulf %306, %305 : vector<4x128xf32>
    %cst_80 = arith.constant 0.707106769 : f32
    %308 = vector.broadcast %cst_80 : f32 to vector<4x128xf32>
    %309 = arith.mulf %305, %308 : vector<4x128xf32>
    %cst_81 = arith.constant 0.000000e+00 : f32
    %310 = vector.broadcast %cst_81 : f32 to vector<4x128xf32>
    %311 = arith.cmpf oge, %309, %310 : vector<4x128xf32>
    %cst_82 = arith.constant 1.000000e+00 : f32
    %cst_83 = arith.constant -1.000000e+00 : f32
    %312 = vector.broadcast %cst_82 : f32 to vector<4x128xf32>
    %313 = vector.broadcast %cst_83 : f32 to vector<4x128xf32>
    %314 = arith.select %311, %312, %313 : vector<4x128xi1>, vector<4x128xf32>
    %315 = math.absf %309 : vector<4x128xf32>
    %cst_84 = arith.constant 0.327591091 : f32
    %316 = vector.broadcast %cst_84 : f32 to vector<4x128xf32>
    %317 = arith.mulf %316, %315 : vector<4x128xf32>
    %cst_85 = arith.constant 1.000000e+00 : f32
    %318 = vector.broadcast %cst_85 : f32 to vector<4x128xf32>
    %319 = arith.addf %318, %317 : vector<4x128xf32>
    %cst_86 = arith.constant 1.000000e+00 : f32
    %320 = vector.broadcast %cst_86 : f32 to vector<4x128xf32>
    %321 = arith.divf %320, %319 : vector<4x128xf32>
    %cst_87 = arith.constant 1.06140542 : f32
    %322 = vector.broadcast %cst_87 : f32 to vector<4x128xf32>
    %323 = arith.mulf %322, %321 : vector<4x128xf32>
    %cst_88 = arith.constant -1.45315206 : f32
    %324 = vector.broadcast %cst_88 : f32 to vector<4x128xf32>
    %325 = arith.addf %323, %324 : vector<4x128xf32>
    %326 = arith.mulf %325, %321 : vector<4x128xf32>
    %cst_89 = arith.constant 1.42141378 : f32
    %327 = vector.broadcast %cst_89 : f32 to vector<4x128xf32>
    %328 = arith.addf %326, %327 : vector<4x128xf32>
    %329 = arith.mulf %328, %321 : vector<4x128xf32>
    %cst_90 = arith.constant -0.284496725 : f32
    %330 = vector.broadcast %cst_90 : f32 to vector<4x128xf32>
    %331 = arith.addf %329, %330 : vector<4x128xf32>
    %332 = arith.mulf %331, %321 : vector<4x128xf32>
    %cst_91 = arith.constant 0.254829586 : f32
    %333 = vector.broadcast %cst_91 : f32 to vector<4x128xf32>
    %334 = arith.addf %332, %333 : vector<4x128xf32>
    %335 = arith.mulf %334, %321 : vector<4x128xf32>
    %cst_92 = arith.constant 0.000000e+00 : f32
    %336 = vector.broadcast %cst_92 : f32 to vector<4x128xf32>
    %337 = arith.subf %336, %315 : vector<4x128xf32>
    %338 = arith.mulf %337, %315 : vector<4x128xf32>
    %339 = math.exp %338 : vector<4x128xf32>
    %340 = arith.mulf %335, %339 : vector<4x128xf32>
    %cst_93 = arith.constant 1.000000e+00 : f32
    %341 = vector.broadcast %cst_93 : f32 to vector<4x128xf32>
    %342 = arith.subf %341, %340 : vector<4x128xf32>
    %343 = arith.mulf %314, %342 : vector<4x128xf32>
    %cst_94 = arith.constant 1.000000e+00 : f32
    %344 = vector.broadcast %cst_94 : f32 to vector<4x128xf32>
    %345 = arith.addf %344, %343 : vector<4x128xf32>
    %346 = arith.mulf %307, %345 : vector<4x128xf32>
    %c0_95 = arith.constant 0 : index
    %c0_96 = arith.constant 0 : index
    %347 = vector.load %arg31[%c0_95, %c0_96] : memref<129x32xf32, #tpu.memory_space<vmem>>, vector<129x32xf32>
    %348 = vector.extract_strided_slice %347 {offsets = [0, 0], sizes = [128, 32], strides = [1, 1]} : vector<129x32xf32> to vector<128x32xf32>
    %cst_97 = arith.constant dense<0.000000e+00> : vector<4x32xf32>
    %349 = tpu.matmul %346, %348, %cst_97 {dimension_numbers = #tpu.dot_dimension_numbers<[1], [0], [0], [1], [0, 0, 1, 1], [], []>} : vector<4x128xf32>, vector<128x32xf32>, vector<4x32xf32> -> vector<4x32xf32>
    %350 = vector.extract_strided_slice %347 {offsets = [128, 0], sizes = [1, 32], strides = [1, 1]} : vector<129x32xf32> to vector<1x32xf32>
    %351 = vector.broadcast %350 : vector<1x32xf32> to vector<4x32xf32>
    %352 = arith.addf %349, %351 : vector<4x32xf32>
    %353 = arith.addf %276, %352 : vector<4x32xf32>
    %c0_98 = arith.constant 0 : index
    %c0_99 = arith.constant 0 : index
    %354 = vector.load %arg38[%c0_98, %c0_99] : memref<2x32xf32, #tpu.memory_space<vmem>>, vector<2x32xf32>
    %355 = vector.extract_strided_slice %354 {offsets = [0, 0], sizes = [1, 32], strides = [1, 1]} : vector<2x32xf32> to vector<1x32xf32>
    %356 = vector.extract_strided_slice %354 {offsets = [1, 0], sizes = [1, 32], strides = [1, 1]} : vector<2x32xf32> to vector<1x32xf32>
    %cst_100 = arith.constant dense<0.000000e+00> : vector<4xf32>
    %357 = vector.multi_reduction <add>, %353, %cst_100 [1] : vector<4x32xf32> to vector<4xf32>
    %358 = vector.shape_cast %357 : vector<4xf32> to vector<4x1xf32>
    %cst_101 = arith.constant 3.200000e+01 : f32
    %359 = vector.broadcast %cst_101 : f32 to vector<4x1xf32>
    %360 = arith.divf %358, %359 : vector<4x1xf32>
    %361 = vector.broadcast %360 : vector<4x1xf32> to vector<4x32xf32>
    %362 = arith.subf %353, %361 : vector<4x32xf32>
    %363 = arith.mulf %362, %362 : vector<4x32xf32>
    %cst_102 = arith.constant dense<0.000000e+00> : vector<4xf32>
    %364 = vector.multi_reduction <add>, %363, %cst_102 [1] : vector<4x32xf32> to vector<4xf32>
    %365 = vector.shape_cast %364 : vector<4xf32> to vector<4x1xf32>
    %cst_103 = arith.constant 3.200000e+01 : f32
    %366 = vector.broadcast %cst_103 : f32 to vector<4x1xf32>
    %367 = arith.divf %365, %366 : vector<4x1xf32>
    %cst_104 = arith.constant 9.99999974E-6 : f32
    %368 = vector.broadcast %cst_104 : f32 to vector<4x1xf32>
    %369 = arith.addf %367, %368 : vector<4x1xf32>
    %370 = math.rsqrt %369 : vector<4x1xf32>
    %371 = vector.broadcast %370 : vector<4x1xf32> to vector<4x32xf32>
    %372 = arith.mulf %362, %371 : vector<4x32xf32>
    %373 = vector.broadcast %355 : vector<1x32xf32> to vector<4x32xf32>
    %374 = arith.mulf %372, %373 : vector<4x32xf32>
    %375 = vector.broadcast %356 : vector<1x32xf32> to vector<4x32xf32>
    %376 = arith.addf %374, %375 : vector<4x32xf32>
    %c0_105 = arith.constant 0 : index
    %c0_106 = arith.constant 0 : index
    %377 = vector.load %arg41[%c0_105, %c0_106] : memref<33x96xf32, #tpu.memory_space<vmem>>, vector<33x96xf32>
    %378 = vector.extract_strided_slice %377 {offsets = [0, 0], sizes = [33, 32], strides = [1, 1]} : vector<33x96xf32> to vector<33x32xf32>
    %379 = vector.extract_strided_slice %378 {offsets = [0, 0], sizes = [32, 32], strides = [1, 1]} : vector<33x32xf32> to vector<32x32xf32>
    %cst_107 = arith.constant dense<0.000000e+00> : vector<4x32xf32>
    %380 = tpu.matmul %376, %379, %cst_107 {dimension_numbers = #tpu.dot_dimension_numbers<[1], [0], [0], [1], [0, 0, 1, 1], [], []>} : vector<4x32xf32>, vector<32x32xf32>, vector<4x32xf32> -> vector<4x32xf32>
    %381 = vector.extract_strided_slice %378 {offsets = [32, 0], sizes = [1, 32], strides = [1, 1]} : vector<33x32xf32> to vector<1x32xf32>
    %382 = vector.broadcast %381 : vector<1x32xf32> to vector<4x32xf32>
    %383 = arith.addf %380, %382 : vector<4x32xf32>
    %384 = vector.extract_strided_slice %377 {offsets = [0, 32], sizes = [33, 32], strides = [1, 1]} : vector<33x96xf32> to vector<33x32xf32>
    %385 = vector.extract_strided_slice %384 {offsets = [0, 0], sizes = [32, 32], strides = [1, 1]} : vector<33x32xf32> to vector<32x32xf32>
    %cst_108 = arith.constant dense<0.000000e+00> : vector<4x32xf32>
    %386 = tpu.matmul %376, %385, %cst_108 {dimension_numbers = #tpu.dot_dimension_numbers<[1], [0], [0], [1], [0, 0, 1, 1], [], []>} : vector<4x32xf32>, vector<32x32xf32>, vector<4x32xf32> -> vector<4x32xf32>
    %387 = vector.extract_strided_slice %384 {offsets = [32, 0], sizes = [1, 32], strides = [1, 1]} : vector<33x32xf32> to vector<1x32xf32>
    %388 = vector.broadcast %387 : vector<1x32xf32> to vector<4x32xf32>
    %389 = arith.addf %386, %388 : vector<4x32xf32>
    %390 = vector.extract_strided_slice %377 {offsets = [0, 64], sizes = [33, 32], strides = [1, 1]} : vector<33x96xf32> to vector<33x32xf32>
    %391 = vector.extract_strided_slice %390 {offsets = [0, 0], sizes = [32, 32], strides = [1, 1]} : vector<33x32xf32> to vector<32x32xf32>
    %cst_109 = arith.constant dense<0.000000e+00> : vector<4x32xf32>
    %392 = tpu.matmul %376, %391, %cst_109 {dimension_numbers = #tpu.dot_dimension_numbers<[1], [0], [0], [1], [0, 0, 1, 1], [], []>} : vector<4x32xf32>, vector<32x32xf32>, vector<4x32xf32> -> vector<4x32xf32>
    %393 = vector.extract_strided_slice %390 {offsets = [32, 0], sizes = [1, 32], strides = [1, 1]} : vector<33x32xf32> to vector<1x32xf32>
    %394 = vector.broadcast %393 : vector<1x32xf32> to vector<4x32xf32>
    %395 = arith.addf %392, %394 : vector<4x32xf32>
    %396 = vector.extract_strided_slice %383 {offsets = [0, 0], sizes = [2, 32], strides = [1, 1]} : vector<4x32xf32> to vector<2x32xf32>
    %397 = vector.extract_strided_slice %389 {offsets = [0, 0], sizes = [2, 32], strides = [1, 1]} : vector<4x32xf32> to vector<2x32xf32>
    %398 = vector.extract_strided_slice %395 {offsets = [0, 0], sizes = [2, 32], strides = [1, 1]} : vector<4x32xf32> to vector<2x32xf32>
    %399 = vector.extract_strided_slice %396 {offsets = [0, 0], sizes = [2, 8], strides = [1, 1]} : vector<2x32xf32> to vector<2x8xf32>
    %400 = vector.extract_strided_slice %397 {offsets = [0, 0], sizes = [1, 8], strides = [1, 1]} : vector<2x32xf32> to vector<1x8xf32>
    %401 = vector.broadcast %400 : vector<1x8xf32> to vector<2x8xf32>
    %402 = arith.mulf %399, %401 : vector<2x8xf32>
    %cst_110 = arith.constant dense<0.000000e+00> : vector<2xf32>
    %403 = vector.multi_reduction <add>, %402, %cst_110 [1] : vector<2x8xf32> to vector<2xf32>
    %404 = vector.shape_cast %403 : vector<2xf32> to vector<2x1xf32>
    %405 = vector.extract_strided_slice %397 {offsets = [1, 0], sizes = [1, 8], strides = [1, 1]} : vector<2x32xf32> to vector<1x8xf32>
    %406 = vector.broadcast %405 : vector<1x8xf32> to vector<2x8xf32>
    %407 = arith.mulf %399, %406 : vector<2x8xf32>
    %cst_111 = arith.constant dense<0.000000e+00> : vector<2xf32>
    %408 = vector.multi_reduction <add>, %407, %cst_111 [1] : vector<2x8xf32> to vector<2xf32>
    %409 = vector.shape_cast %408 : vector<2xf32> to vector<2x1xf32>
    %410 = tpu.concatenate %404, %409 in 1 : vector<2x1xf32>, vector<2x1xf32> -> vector<2x2xf32>
    %cst_112 = arith.constant dense<0xFF800000> : vector<2xf32>
    %411 = vector.multi_reduction <maximumf>, %410, %cst_112 [1] : vector<2x2xf32> to vector<2xf32>
    %412 = vector.shape_cast %411 : vector<2xf32> to vector<2x1xf32>
    %413 = vector.broadcast %412 : vector<2x1xf32> to vector<2x2xf32>
    %414 = arith.subf %410, %413 : vector<2x2xf32>
    %415 = math.exp %414 : vector<2x2xf32>
    %cst_113 = arith.constant dense<0.000000e+00> : vector<2xf32>
    %416 = vector.multi_reduction <add>, %415, %cst_113 [1] : vector<2x2xf32> to vector<2xf32>
    %417 = vector.shape_cast %416 : vector<2xf32> to vector<2x1xf32>
    %418 = vector.broadcast %417 : vector<2x1xf32> to vector<2x2xf32>
    %419 = arith.divf %415, %418 : vector<2x2xf32>
    %420 = vector.extract_strided_slice %398 {offsets = [0, 0], sizes = [2, 8], strides = [1, 1]} : vector<2x32xf32> to vector<2x8xf32>
    %cst_114 = arith.constant dense<0.000000e+00> : vector<2x8xf32>
    %421 = tpu.matmul %419, %420, %cst_114 {dimension_numbers = #tpu.dot_dimension_numbers<[1], [0], [0], [1], [0, 0, 1, 1], [], []>} : vector<2x2xf32>, vector<2x8xf32>, vector<2x8xf32> -> vector<2x8xf32>
    %422 = vector.extract_strided_slice %396 {offsets = [0, 8], sizes = [2, 8], strides = [1, 1]} : vector<2x32xf32> to vector<2x8xf32>
    %423 = vector.extract_strided_slice %397 {offsets = [0, 8], sizes = [1, 8], strides = [1, 1]} : vector<2x32xf32> to vector<1x8xf32>
    %424 = vector.broadcast %423 : vector<1x8xf32> to vector<2x8xf32>
    %425 = arith.mulf %422, %424 : vector<2x8xf32>
    %cst_115 = arith.constant dense<0.000000e+00> : vector<2xf32>
    %426 = vector.multi_reduction <add>, %425, %cst_115 [1] : vector<2x8xf32> to vector<2xf32>
    %427 = vector.shape_cast %426 : vector<2xf32> to vector<2x1xf32>
    %428 = vector.extract_strided_slice %397 {offsets = [1, 8], sizes = [1, 8], strides = [1, 1]} : vector<2x32xf32> to vector<1x8xf32>
    %429 = vector.broadcast %428 : vector<1x8xf32> to vector<2x8xf32>
    %430 = arith.mulf %422, %429 : vector<2x8xf32>
    %cst_116 = arith.constant dense<0.000000e+00> : vector<2xf32>
    %431 = vector.multi_reduction <add>, %430, %cst_116 [1] : vector<2x8xf32> to vector<2xf32>
    %432 = vector.shape_cast %431 : vector<2xf32> to vector<2x1xf32>
    %433 = tpu.concatenate %427, %432 in 1 : vector<2x1xf32>, vector<2x1xf32> -> vector<2x2xf32>
    %cst_117 = arith.constant dense<0xFF800000> : vector<2xf32>
    %434 = vector.multi_reduction <maximumf>, %433, %cst_117 [1] : vector<2x2xf32> to vector<2xf32>
    %435 = vector.shape_cast %434 : vector<2xf32> to vector<2x1xf32>
    %436 = vector.broadcast %435 : vector<2x1xf32> to vector<2x2xf32>
    %437 = arith.subf %433, %436 : vector<2x2xf32>
    %438 = math.exp %437 : vector<2x2xf32>
    %cst_118 = arith.constant dense<0.000000e+00> : vector<2xf32>
    %439 = vector.multi_reduction <add>, %438, %cst_118 [1] : vector<2x2xf32> to vector<2xf32>
    %440 = vector.shape_cast %439 : vector<2xf32> to vector<2x1xf32>
    %441 = vector.broadcast %440 : vector<2x1xf32> to vector<2x2xf32>
    %442 = arith.divf %438, %441 : vector<2x2xf32>
    %443 = vector.extract_strided_slice %398 {offsets = [0, 8], sizes = [2, 8], strides = [1, 1]} : vector<2x32xf32> to vector<2x8xf32>
    %cst_119 = arith.constant dense<0.000000e+00> : vector<2x8xf32>
    %444 = tpu.matmul %442, %443, %cst_119 {dimension_numbers = #tpu.dot_dimension_numbers<[1], [0], [0], [1], [0, 0, 1, 1], [], []>} : vector<2x2xf32>, vector<2x8xf32>, vector<2x8xf32> -> vector<2x8xf32>
    %445 = vector.extract_strided_slice %396 {offsets = [0, 16], sizes = [2, 8], strides = [1, 1]} : vector<2x32xf32> to vector<2x8xf32>
    %446 = vector.extract_strided_slice %397 {offsets = [0, 16], sizes = [1, 8], strides = [1, 1]} : vector<2x32xf32> to vector<1x8xf32>
    %447 = vector.broadcast %446 : vector<1x8xf32> to vector<2x8xf32>
    %448 = arith.mulf %445, %447 : vector<2x8xf32>
    %cst_120 = arith.constant dense<0.000000e+00> : vector<2xf32>
    %449 = vector.multi_reduction <add>, %448, %cst_120 [1] : vector<2x8xf32> to vector<2xf32>
    %450 = vector.shape_cast %449 : vector<2xf32> to vector<2x1xf32>
    %451 = vector.extract_strided_slice %397 {offsets = [1, 16], sizes = [1, 8], strides = [1, 1]} : vector<2x32xf32> to vector<1x8xf32>
    %452 = vector.broadcast %451 : vector<1x8xf32> to vector<2x8xf32>
    %453 = arith.mulf %445, %452 : vector<2x8xf32>
    %cst_121 = arith.constant dense<0.000000e+00> : vector<2xf32>
    %454 = vector.multi_reduction <add>, %453, %cst_121 [1] : vector<2x8xf32> to vector<2xf32>
    %455 = vector.shape_cast %454 : vector<2xf32> to vector<2x1xf32>
    %456 = tpu.concatenate %450, %455 in 1 : vector<2x1xf32>, vector<2x1xf32> -> vector<2x2xf32>
    %cst_122 = arith.constant dense<0xFF800000> : vector<2xf32>
    %457 = vector.multi_reduction <maximumf>, %456, %cst_122 [1] : vector<2x2xf32> to vector<2xf32>
    %458 = vector.shape_cast %457 : vector<2xf32> to vector<2x1xf32>
    %459 = vector.broadcast %458 : vector<2x1xf32> to vector<2x2xf32>
    %460 = arith.subf %456, %459 : vector<2x2xf32>
    %461 = math.exp %460 : vector<2x2xf32>
    %cst_123 = arith.constant dense<0.000000e+00> : vector<2xf32>
    %462 = vector.multi_reduction <add>, %461, %cst_123 [1] : vector<2x2xf32> to vector<2xf32>
    %463 = vector.shape_cast %462 : vector<2xf32> to vector<2x1xf32>
    %464 = vector.broadcast %463 : vector<2x1xf32> to vector<2x2xf32>
    %465 = arith.divf %461, %464 : vector<2x2xf32>
    %466 = vector.extract_strided_slice %398 {offsets = [0, 16], sizes = [2, 8], strides = [1, 1]} : vector<2x32xf32> to vector<2x8xf32>
    %cst_124 = arith.constant dense<0.000000e+00> : vector<2x8xf32>
    %467 = tpu.matmul %465, %466, %cst_124 {dimension_numbers = #tpu.dot_dimension_numbers<[1], [0], [0], [1], [0, 0, 1, 1], [], []>} : vector<2x2xf32>, vector<2x8xf32>, vector<2x8xf32> -> vector<2x8xf32>
    %468 = vector.extract_strided_slice %396 {offsets = [0, 24], sizes = [2, 8], strides = [1, 1]} : vector<2x32xf32> to vector<2x8xf32>
    %469 = vector.extract_strided_slice %397 {offsets = [0, 24], sizes = [1, 8], strides = [1, 1]} : vector<2x32xf32> to vector<1x8xf32>
    %470 = vector.broadcast %469 : vector<1x8xf32> to vector<2x8xf32>
    %471 = arith.mulf %468, %470 : vector<2x8xf32>
    %cst_125 = arith.constant dense<0.000000e+00> : vector<2xf32>
    %472 = vector.multi_reduction <add>, %471, %cst_125 [1] : vector<2x8xf32> to vector<2xf32>
    %473 = vector.shape_cast %472 : vector<2xf32> to vector<2x1xf32>
    %474 = vector.extract_strided_slice %397 {offsets = [1, 24], sizes = [1, 8], strides = [1, 1]} : vector<2x32xf32> to vector<1x8xf32>
    %475 = vector.broadcast %474 : vector<1x8xf32> to vector<2x8xf32>
    %476 = arith.mulf %468, %475 : vector<2x8xf32>
    %cst_126 = arith.constant dense<0.000000e+00> : vector<2xf32>
    %477 = vector.multi_reduction <add>, %476, %cst_126 [1] : vector<2x8xf32> to vector<2xf32>
    %478 = vector.shape_cast %477 : vector<2xf32> to vector<2x1xf32>
    %479 = tpu.concatenate %473, %478 in 1 : vector<2x1xf32>, vector<2x1xf32> -> vector<2x2xf32>
    %cst_127 = arith.constant dense<0xFF800000> : vector<2xf32>
    %480 = vector.multi_reduction <maximumf>, %479, %cst_127 [1] : vector<2x2xf32> to vector<2xf32>
    %481 = vector.shape_cast %480 : vector<2xf32> to vector<2x1xf32>
    %482 = vector.broadcast %481 : vector<2x1xf32> to vector<2x2xf32>
    %483 = arith.subf %479, %482 : vector<2x2xf32>
    %484 = math.exp %483 : vector<2x2xf32>
    %cst_128 = arith.constant dense<0.000000e+00> : vector<2xf32>
    %485 = vector.multi_reduction <add>, %484, %cst_128 [1] : vector<2x2xf32> to vector<2xf32>
    %486 = vector.shape_cast %485 : vector<2xf32> to vector<2x1xf32>
    %487 = vector.broadcast %486 : vector<2x1xf32> to vector<2x2xf32>
    %488 = arith.divf %484, %487 : vector<2x2xf32>
    %489 = vector.extract_strided_slice %398 {offsets = [0, 24], sizes = [2, 8], strides = [1, 1]} : vector<2x32xf32> to vector<2x8xf32>
    %cst_129 = arith.constant dense<0.000000e+00> : vector<2x8xf32>
    %490 = tpu.matmul %488, %489, %cst_129 {dimension_numbers = #tpu.dot_dimension_numbers<[1], [0], [0], [1], [0, 0, 1, 1], [], []>} : vector<2x2xf32>, vector<2x8xf32>, vector<2x8xf32> -> vector<2x8xf32>
    %491 = tpu.concatenate %421, %444, %467, %490 in 1 : vector<2x8xf32>, vector<2x8xf32>, vector<2x8xf32>, vector<2x8xf32> -> vector<2x32xf32>
    %492 = vector.extract_strided_slice %383 {offsets = [2, 0], sizes = [2, 32], strides = [1, 1]} : vector<4x32xf32> to vector<2x32xf32>
    %493 = vector.extract_strided_slice %389 {offsets = [2, 0], sizes = [2, 32], strides = [1, 1]} : vector<4x32xf32> to vector<2x32xf32>
    %494 = vector.extract_strided_slice %395 {offsets = [2, 0], sizes = [2, 32], strides = [1, 1]} : vector<4x32xf32> to vector<2x32xf32>
    %495 = vector.extract_strided_slice %492 {offsets = [0, 0], sizes = [2, 8], strides = [1, 1]} : vector<2x32xf32> to vector<2x8xf32>
    %496 = vector.extract_strided_slice %493 {offsets = [0, 0], sizes = [1, 8], strides = [1, 1]} : vector<2x32xf32> to vector<1x8xf32>
    %497 = vector.broadcast %496 : vector<1x8xf32> to vector<2x8xf32>
    %498 = arith.mulf %495, %497 : vector<2x8xf32>
    %cst_130 = arith.constant dense<0.000000e+00> : vector<2xf32>
    %499 = vector.multi_reduction <add>, %498, %cst_130 [1] : vector<2x8xf32> to vector<2xf32>
    %500 = vector.shape_cast %499 : vector<2xf32> to vector<2x1xf32>
    %501 = vector.extract_strided_slice %493 {offsets = [1, 0], sizes = [1, 8], strides = [1, 1]} : vector<2x32xf32> to vector<1x8xf32>
    %502 = vector.broadcast %501 : vector<1x8xf32> to vector<2x8xf32>
    %503 = arith.mulf %495, %502 : vector<2x8xf32>
    %cst_131 = arith.constant dense<0.000000e+00> : vector<2xf32>
    %504 = vector.multi_reduction <add>, %503, %cst_131 [1] : vector<2x8xf32> to vector<2xf32>
    %505 = vector.shape_cast %504 : vector<2xf32> to vector<2x1xf32>
    %506 = tpu.concatenate %500, %505 in 1 : vector<2x1xf32>, vector<2x1xf32> -> vector<2x2xf32>
    %cst_132 = arith.constant dense<0xFF800000> : vector<2xf32>
    %507 = vector.multi_reduction <maximumf>, %506, %cst_132 [1] : vector<2x2xf32> to vector<2xf32>
    %508 = vector.shape_cast %507 : vector<2xf32> to vector<2x1xf32>
    %509 = vector.broadcast %508 : vector<2x1xf32> to vector<2x2xf32>
    %510 = arith.subf %506, %509 : vector<2x2xf32>
    %511 = math.exp %510 : vector<2x2xf32>
    %cst_133 = arith.constant dense<0.000000e+00> : vector<2xf32>
    %512 = vector.multi_reduction <add>, %511, %cst_133 [1] : vector<2x2xf32> to vector<2xf32>
    %513 = vector.shape_cast %512 : vector<2xf32> to vector<2x1xf32>
    %514 = vector.broadcast %513 : vector<2x1xf32> to vector<2x2xf32>
    %515 = arith.divf %511, %514 : vector<2x2xf32>
    %516 = vector.extract_strided_slice %494 {offsets = [0, 0], sizes = [2, 8], strides = [1, 1]} : vector<2x32xf32> to vector<2x8xf32>
    %cst_134 = arith.constant dense<0.000000e+00> : vector<2x8xf32>
    %517 = tpu.matmul %515, %516, %cst_134 {dimension_numbers = #tpu.dot_dimension_numbers<[1], [0], [0], [1], [0, 0, 1, 1], [], []>} : vector<2x2xf32>, vector<2x8xf32>, vector<2x8xf32> -> vector<2x8xf32>
    %518 = vector.extract_strided_slice %492 {offsets = [0, 8], sizes = [2, 8], strides = [1, 1]} : vector<2x32xf32> to vector<2x8xf32>
    %519 = vector.extract_strided_slice %493 {offsets = [0, 8], sizes = [1, 8], strides = [1, 1]} : vector<2x32xf32> to vector<1x8xf32>
    %520 = vector.broadcast %519 : vector<1x8xf32> to vector<2x8xf32>
    %521 = arith.mulf %518, %520 : vector<2x8xf32>
    %cst_135 = arith.constant dense<0.000000e+00> : vector<2xf32>
    %522 = vector.multi_reduction <add>, %521, %cst_135 [1] : vector<2x8xf32> to vector<2xf32>
    %523 = vector.shape_cast %522 : vector<2xf32> to vector<2x1xf32>
    %524 = vector.extract_strided_slice %493 {offsets = [1, 8], sizes = [1, 8], strides = [1, 1]} : vector<2x32xf32> to vector<1x8xf32>
    %525 = vector.broadcast %524 : vector<1x8xf32> to vector<2x8xf32>
    %526 = arith.mulf %518, %525 : vector<2x8xf32>
    %cst_136 = arith.constant dense<0.000000e+00> : vector<2xf32>
    %527 = vector.multi_reduction <add>, %526, %cst_136 [1] : vector<2x8xf32> to vector<2xf32>
    %528 = vector.shape_cast %527 : vector<2xf32> to vector<2x1xf32>
    %529 = tpu.concatenate %523, %528 in 1 : vector<2x1xf32>, vector<2x1xf32> -> vector<2x2xf32>
    %cst_137 = arith.constant dense<0xFF800000> : vector<2xf32>
    %530 = vector.multi_reduction <maximumf>, %529, %cst_137 [1] : vector<2x2xf32> to vector<2xf32>
    %531 = vector.shape_cast %530 : vector<2xf32> to vector<2x1xf32>
    %532 = vector.broadcast %531 : vector<2x1xf32> to vector<2x2xf32>
    %533 = arith.subf %529, %532 : vector<2x2xf32>
    %534 = math.exp %533 : vector<2x2xf32>
    %cst_138 = arith.constant dense<0.000000e+00> : vector<2xf32>
    %535 = vector.multi_reduction <add>, %534, %cst_138 [1] : vector<2x2xf32> to vector<2xf32>
    %536 = vector.shape_cast %535 : vector<2xf32> to vector<2x1xf32>
    %537 = vector.broadcast %536 : vector<2x1xf32> to vector<2x2xf32>
    %538 = arith.divf %534, %537 : vector<2x2xf32>
    %539 = vector.extract_strided_slice %494 {offsets = [0, 8], sizes = [2, 8], strides = [1, 1]} : vector<2x32xf32> to vector<2x8xf32>
    %cst_139 = arith.constant dense<0.000000e+00> : vector<2x8xf32>
    %540 = tpu.matmul %538, %539, %cst_139 {dimension_numbers = #tpu.dot_dimension_numbers<[1], [0], [0], [1], [0, 0, 1, 1], [], []>} : vector<2x2xf32>, vector<2x8xf32>, vector<2x8xf32> -> vector<2x8xf32>
    %541 = vector.extract_strided_slice %492 {offsets = [0, 16], sizes = [2, 8], strides = [1, 1]} : vector<2x32xf32> to vector<2x8xf32>
    %542 = vector.extract_strided_slice %493 {offsets = [0, 16], sizes = [1, 8], strides = [1, 1]} : vector<2x32xf32> to vector<1x8xf32>
    %543 = vector.broadcast %542 : vector<1x8xf32> to vector<2x8xf32>
    %544 = arith.mulf %541, %543 : vector<2x8xf32>
    %cst_140 = arith.constant dense<0.000000e+00> : vector<2xf32>
    %545 = vector.multi_reduction <add>, %544, %cst_140 [1] : vector<2x8xf32> to vector<2xf32>
    %546 = vector.shape_cast %545 : vector<2xf32> to vector<2x1xf32>
    %547 = vector.extract_strided_slice %493 {offsets = [1, 16], sizes = [1, 8], strides = [1, 1]} : vector<2x32xf32> to vector<1x8xf32>
    %548 = vector.broadcast %547 : vector<1x8xf32> to vector<2x8xf32>
    %549 = arith.mulf %541, %548 : vector<2x8xf32>
    %cst_141 = arith.constant dense<0.000000e+00> : vector<2xf32>
    %550 = vector.multi_reduction <add>, %549, %cst_141 [1] : vector<2x8xf32> to vector<2xf32>
    %551 = vector.shape_cast %550 : vector<2xf32> to vector<2x1xf32>
    %552 = tpu.concatenate %546, %551 in 1 : vector<2x1xf32>, vector<2x1xf32> -> vector<2x2xf32>
    %cst_142 = arith.constant dense<0xFF800000> : vector<2xf32>
    %553 = vector.multi_reduction <maximumf>, %552, %cst_142 [1] : vector<2x2xf32> to vector<2xf32>
    %554 = vector.shape_cast %553 : vector<2xf32> to vector<2x1xf32>
    %555 = vector.broadcast %554 : vector<2x1xf32> to vector<2x2xf32>
    %556 = arith.subf %552, %555 : vector<2x2xf32>
    %557 = math.exp %556 : vector<2x2xf32>
    %cst_143 = arith.constant dense<0.000000e+00> : vector<2xf32>
    %558 = vector.multi_reduction <add>, %557, %cst_143 [1] : vector<2x2xf32> to vector<2xf32>
    %559 = vector.shape_cast %558 : vector<2xf32> to vector<2x1xf32>
    %560 = vector.broadcast %559 : vector<2x1xf32> to vector<2x2xf32>
    %561 = arith.divf %557, %560 : vector<2x2xf32>
    %562 = vector.extract_strided_slice %494 {offsets = [0, 16], sizes = [2, 8], strides = [1, 1]} : vector<2x32xf32> to vector<2x8xf32>
    %cst_144 = arith.constant dense<0.000000e+00> : vector<2x8xf32>
    %563 = tpu.matmul %561, %562, %cst_144 {dimension_numbers = #tpu.dot_dimension_numbers<[1], [0], [0], [1], [0, 0, 1, 1], [], []>} : vector<2x2xf32>, vector<2x8xf32>, vector<2x8xf32> -> vector<2x8xf32>
    %564 = vector.extract_strided_slice %492 {offsets = [0, 24], sizes = [2, 8], strides = [1, 1]} : vector<2x32xf32> to vector<2x8xf32>
    %565 = vector.extract_strided_slice %493 {offsets = [0, 24], sizes = [1, 8], strides = [1, 1]} : vector<2x32xf32> to vector<1x8xf32>
    %566 = vector.broadcast %565 : vector<1x8xf32> to vector<2x8xf32>
    %567 = arith.mulf %564, %566 : vector<2x8xf32>
    %cst_145 = arith.constant dense<0.000000e+00> : vector<2xf32>
    %568 = vector.multi_reduction <add>, %567, %cst_145 [1] : vector<2x8xf32> to vector<2xf32>
    %569 = vector.shape_cast %568 : vector<2xf32> to vector<2x1xf32>
    %570 = vector.extract_strided_slice %493 {offsets = [1, 24], sizes = [1, 8], strides = [1, 1]} : vector<2x32xf32> to vector<1x8xf32>
    %571 = vector.broadcast %570 : vector<1x8xf32> to vector<2x8xf32>
    %572 = arith.mulf %564, %571 : vector<2x8xf32>
    %cst_146 = arith.constant dense<0.000000e+00> : vector<2xf32>
    %573 = vector.multi_reduction <add>, %572, %cst_146 [1] : vector<2x8xf32> to vector<2xf32>
    %574 = vector.shape_cast %573 : vector<2xf32> to vector<2x1xf32>
    %575 = tpu.concatenate %569, %574 in 1 : vector<2x1xf32>, vector<2x1xf32> -> vector<2x2xf32>
    %cst_147 = arith.constant dense<0xFF800000> : vector<2xf32>
    %576 = vector.multi_reduction <maximumf>, %575, %cst_147 [1] : vector<2x2xf32> to vector<2xf32>
    %577 = vector.shape_cast %576 : vector<2xf32> to vector<2x1xf32>
    %578 = vector.broadcast %577 : vector<2x1xf32> to vector<2x2xf32>
    %579 = arith.subf %575, %578 : vector<2x2xf32>
    %580 = math.exp %579 : vector<2x2xf32>
    %cst_148 = arith.constant dense<0.000000e+00> : vector<2xf32>
    %581 = vector.multi_reduction <add>, %580, %cst_148 [1] : vector<2x2xf32> to vector<2xf32>
    %582 = vector.shape_cast %581 : vector<2xf32> to vector<2x1xf32>
    %583 = vector.broadcast %582 : vector<2x1xf32> to vector<2x2xf32>
    %584 = arith.divf %580, %583 : vector<2x2xf32>
    %585 = vector.extract_strided_slice %494 {offsets = [0, 24], sizes = [2, 8], strides = [1, 1]} : vector<2x32xf32> to vector<2x8xf32>
    %cst_149 = arith.constant dense<0.000000e+00> : vector<2x8xf32>
    %586 = tpu.matmul %584, %585, %cst_149 {dimension_numbers = #tpu.dot_dimension_numbers<[1], [0], [0], [1], [0, 0, 1, 1], [], []>} : vector<2x2xf32>, vector<2x8xf32>, vector<2x8xf32> -> vector<2x8xf32>
    %587 = tpu.concatenate %517, %540, %563, %586 in 1 : vector<2x8xf32>, vector<2x8xf32>, vector<2x8xf32>, vector<2x8xf32> -> vector<2x32xf32>
    %588 = tpu.concatenate %491, %587 in 0 : vector<2x32xf32>, vector<2x32xf32> -> vector<4x32xf32>
    %c0_150 = arith.constant 0 : index
    %c0_151 = arith.constant 0 : index
    %589 = vector.load %arg40[%c0_150, %c0_151] : memref<33x32xf32, #tpu.memory_space<vmem>>, vector<33x32xf32>
    %590 = vector.extract_strided_slice %589 {offsets = [0, 0], sizes = [32, 32], strides = [1, 1]} : vector<33x32xf32> to vector<32x32xf32>
    %cst_152 = arith.constant dense<0.000000e+00> : vector<4x32xf32>
    %591 = tpu.matmul %588, %590, %cst_152 {dimension_numbers = #tpu.dot_dimension_numbers<[1], [0], [0], [1], [0, 0, 1, 1], [], []>} : vector<4x32xf32>, vector<32x32xf32>, vector<4x32xf32> -> vector<4x32xf32>
    %592 = vector.extract_strided_slice %589 {offsets = [32, 0], sizes = [1, 32], strides = [1, 1]} : vector<33x32xf32> to vector<1x32xf32>
    %593 = vector.broadcast %592 : vector<1x32xf32> to vector<4x32xf32>
    %594 = arith.addf %591, %593 : vector<4x32xf32>
    %595 = arith.addf %353, %594 : vector<4x32xf32>
    %c0_153 = arith.constant 0 : index
    %c0_154 = arith.constant 0 : index
    %596 = vector.load %arg39[%c0_153, %c0_154] : memref<2x32xf32, #tpu.memory_space<vmem>>, vector<2x32xf32>
    %597 = vector.extract_strided_slice %596 {offsets = [0, 0], sizes = [1, 32], strides = [1, 1]} : vector<2x32xf32> to vector<1x32xf32>
    %598 = vector.extract_strided_slice %596 {offsets = [1, 0], sizes = [1, 32], strides = [1, 1]} : vector<2x32xf32> to vector<1x32xf32>
    %cst_155 = arith.constant dense<0.000000e+00> : vector<4xf32>
    %599 = vector.multi_reduction <add>, %595, %cst_155 [1] : vector<4x32xf32> to vector<4xf32>
    %600 = vector.shape_cast %599 : vector<4xf32> to vector<4x1xf32>
    %cst_156 = arith.constant 3.200000e+01 : f32
    %601 = vector.broadcast %cst_156 : f32 to vector<4x1xf32>
    %602 = arith.divf %600, %601 : vector<4x1xf32>
    %603 = vector.broadcast %602 : vector<4x1xf32> to vector<4x32xf32>
    %604 = arith.subf %595, %603 : vector<4x32xf32>
    %605 = arith.mulf %604, %604 : vector<4x32xf32>
    %cst_157 = arith.constant dense<0.000000e+00> : vector<4xf32>
    %606 = vector.multi_reduction <add>, %605, %cst_157 [1] : vector<4x32xf32> to vector<4xf32>
    %607 = vector.shape_cast %606 : vector<4xf32> to vector<4x1xf32>
    %cst_158 = arith.constant 3.200000e+01 : f32
    %608 = vector.broadcast %cst_158 : f32 to vector<4x1xf32>
    %609 = arith.divf %607, %608 : vector<4x1xf32>
    %cst_159 = arith.constant 9.99999974E-6 : f32
    %610 = vector.broadcast %cst_159 : f32 to vector<4x1xf32>
    %611 = arith.addf %609, %610 : vector<4x1xf32>
    %612 = math.rsqrt %611 : vector<4x1xf32>
    %613 = vector.broadcast %612 : vector<4x1xf32> to vector<4x32xf32>
    %614 = arith.mulf %604, %613 : vector<4x32xf32>
    %615 = vector.broadcast %597 : vector<1x32xf32> to vector<4x32xf32>
    %616 = arith.mulf %614, %615 : vector<4x32xf32>
    %617 = vector.broadcast %598 : vector<1x32xf32> to vector<4x32xf32>
    %618 = arith.addf %616, %617 : vector<4x32xf32>
    %c0_160 = arith.constant 0 : index
    %c0_161 = arith.constant 0 : index
    %619 = vector.load %arg36[%c0_160, %c0_161] : memref<33x128xf32, #tpu.memory_space<vmem>>, vector<33x128xf32>
    %620 = vector.extract_strided_slice %619 {offsets = [0, 0], sizes = [32, 128], strides = [1, 1]} : vector<33x128xf32> to vector<32x128xf32>
    %cst_162 = arith.constant dense<0.000000e+00> : vector<4x128xf32>
    %621 = tpu.matmul %618, %620, %cst_162 {dimension_numbers = #tpu.dot_dimension_numbers<[1], [0], [0], [1], [0, 0, 1, 1], [], []>} : vector<4x32xf32>, vector<32x128xf32>, vector<4x128xf32> -> vector<4x128xf32>
    %622 = vector.extract_strided_slice %619 {offsets = [32, 0], sizes = [1, 128], strides = [1, 1]} : vector<33x128xf32> to vector<1x128xf32>
    %623 = vector.broadcast %622 : vector<1x128xf32> to vector<4x128xf32>
    %624 = arith.addf %621, %623 : vector<4x128xf32>
    %cst_163 = arith.constant 5.000000e-01 : f32
    %625 = vector.broadcast %cst_163 : f32 to vector<4x128xf32>
    %626 = arith.mulf %625, %624 : vector<4x128xf32>
    %cst_164 = arith.constant 0.707106769 : f32
    %627 = vector.broadcast %cst_164 : f32 to vector<4x128xf32>
    %628 = arith.mulf %624, %627 : vector<4x128xf32>
    %cst_165 = arith.constant 0.000000e+00 : f32
    %629 = vector.broadcast %cst_165 : f32 to vector<4x128xf32>
    %630 = arith.cmpf oge, %628, %629 : vector<4x128xf32>
    %cst_166 = arith.constant 1.000000e+00 : f32
    %cst_167 = arith.constant -1.000000e+00 : f32
    %631 = vector.broadcast %cst_166 : f32 to vector<4x128xf32>
    %632 = vector.broadcast %cst_167 : f32 to vector<4x128xf32>
    %633 = arith.select %630, %631, %632 : vector<4x128xi1>, vector<4x128xf32>
    %634 = math.absf %628 : vector<4x128xf32>
    %cst_168 = arith.constant 0.327591091 : f32
    %635 = vector.broadcast %cst_168 : f32 to vector<4x128xf32>
    %636 = arith.mulf %635, %634 : vector<4x128xf32>
    %cst_169 = arith.constant 1.000000e+00 : f32
    %637 = vector.broadcast %cst_169 : f32 to vector<4x128xf32>
    %638 = arith.addf %637, %636 : vector<4x128xf32>
    %cst_170 = arith.constant 1.000000e+00 : f32
    %639 = vector.broadcast %cst_170 : f32 to vector<4x128xf32>
    %640 = arith.divf %639, %638 : vector<4x128xf32>
    %cst_171 = arith.constant 1.06140542 : f32
    %641 = vector.broadcast %cst_171 : f32 to vector<4x128xf32>
    %642 = arith.mulf %641, %640 : vector<4x128xf32>
    %cst_172 = arith.constant -1.45315206 : f32
    %643 = vector.broadcast %cst_172 : f32 to vector<4x128xf32>
    %644 = arith.addf %642, %643 : vector<4x128xf32>
    %645 = arith.mulf %644, %640 : vector<4x128xf32>
    %cst_173 = arith.constant 1.42141378 : f32
    %646 = vector.broadcast %cst_173 : f32 to vector<4x128xf32>
    %647 = arith.addf %645, %646 : vector<4x128xf32>
    %648 = arith.mulf %647, %640 : vector<4x128xf32>
    %cst_174 = arith.constant -0.284496725 : f32
    %649 = vector.broadcast %cst_174 : f32 to vector<4x128xf32>
    %650 = arith.addf %648, %649 : vector<4x128xf32>
    %651 = arith.mulf %650, %640 : vector<4x128xf32>
    %cst_175 = arith.constant 0.254829586 : f32
    %652 = vector.broadcast %cst_175 : f32 to vector<4x128xf32>
    %653 = arith.addf %651, %652 : vector<4x128xf32>
    %654 = arith.mulf %653, %640 : vector<4x128xf32>
    %cst_176 = arith.constant 0.000000e+00 : f32
    %655 = vector.broadcast %cst_176 : f32 to vector<4x128xf32>
    %656 = arith.subf %655, %634 : vector<4x128xf32>
    %657 = arith.mulf %656, %634 : vector<4x128xf32>
    %658 = math.exp %657 : vector<4x128xf32>
    %659 = arith.mulf %654, %658 : vector<4x128xf32>
    %cst_177 = arith.constant 1.000000e+00 : f32
    %660 = vector.broadcast %cst_177 : f32 to vector<4x128xf32>
    %661 = arith.subf %660, %659 : vector<4x128xf32>
    %662 = arith.mulf %633, %661 : vector<4x128xf32>
    %cst_178 = arith.constant 1.000000e+00 : f32
    %663 = vector.broadcast %cst_178 : f32 to vector<4x128xf32>
    %664 = arith.addf %663, %662 : vector<4x128xf32>
    %665 = arith.mulf %626, %664 : vector<4x128xf32>
    %c0_179 = arith.constant 0 : index
    %c0_180 = arith.constant 0 : index
    %666 = vector.load %arg37[%c0_179, %c0_180] : memref<129x32xf32, #tpu.memory_space<vmem>>, vector<129x32xf32>
    %667 = vector.extract_strided_slice %666 {offsets = [0, 0], sizes = [128, 32], strides = [1, 1]} : vector<129x32xf32> to vector<128x32xf32>
    %cst_181 = arith.constant dense<0.000000e+00> : vector<4x32xf32>
    %668 = tpu.matmul %665, %667, %cst_181 {dimension_numbers = #tpu.dot_dimension_numbers<[1], [0], [0], [1], [0, 0, 1, 1], [], []>} : vector<4x128xf32>, vector<128x32xf32>, vector<4x32xf32> -> vector<4x32xf32>
    %669 = vector.extract_strided_slice %666 {offsets = [128, 0], sizes = [1, 32], strides = [1, 1]} : vector<129x32xf32> to vector<1x32xf32>
    %670 = vector.broadcast %669 : vector<1x32xf32> to vector<4x32xf32>
    %671 = arith.addf %668, %670 : vector<4x32xf32>
    %672 = arith.addf %595, %671 : vector<4x32xf32>
    %c0_182 = arith.constant 0 : index
    %c0_183 = arith.constant 0 : index
    %673 = vector.load %arg59[%c0_182, %c0_183] : memref<41x32xf32, #tpu.memory_space<vmem>>, vector<41x32xf32>
    %674 = vector.extract_strided_slice %673 {offsets = [0, 0], sizes = [40, 32], strides = [1, 1]} : vector<41x32xf32> to vector<40x32xf32>
    %cst_184 = arith.constant dense<0.000000e+00> : vector<2x32xf32>
    %675 = tpu.matmul %1, %674, %cst_184 {dimension_numbers = #tpu.dot_dimension_numbers<[1], [0], [0], [1], [0, 0, 1, 1], [], []>} : vector<2x40xf32>, vector<40x32xf32>, vector<2x32xf32> -> vector<2x32xf32>
    %676 = vector.extract_strided_slice %673 {offsets = [40, 0], sizes = [1, 32], strides = [1, 1]} : vector<41x32xf32> to vector<1x32xf32>
    %677 = vector.broadcast %676 : vector<1x32xf32> to vector<2x32xf32>
    %678 = arith.addf %675, %677 : vector<2x32xf32>
    %cst_185 = arith.constant 0.000000e+00 : f32
    %679 = vector.broadcast %cst_185 : f32 to vector<2x32xf32>
    %680 = arith.maximumf %678, %679 : vector<2x32xf32>
    %c0_186 = arith.constant 0 : index
    %c0_187 = arith.constant 0 : index
    %681 = vector.load %arg58[%c0_186, %c0_187] : memref<1x32xf32, #tpu.memory_space<vmem>>, vector<1x32xf32>
    %682 = vector.broadcast %681 : vector<1x32xf32> to vector<2x32xf32>
    %683 = arith.addf %680, %682 : vector<2x32xf32>
    %c0_188 = arith.constant 0 : index
    %c0_189 = arith.constant 0 : index
    %684 = vector.load %arg48[%c0_188, %c0_189] : memref<2x32xf32, #tpu.memory_space<vmem>>, vector<2x32xf32>
    %685 = vector.extract_strided_slice %684 {offsets = [0, 0], sizes = [1, 32], strides = [1, 1]} : vector<2x32xf32> to vector<1x32xf32>
    %686 = vector.extract_strided_slice %684 {offsets = [1, 0], sizes = [1, 32], strides = [1, 1]} : vector<2x32xf32> to vector<1x32xf32>
    %cst_190 = arith.constant dense<0.000000e+00> : vector<2xf32>
    %687 = vector.multi_reduction <add>, %683, %cst_190 [1] : vector<2x32xf32> to vector<2xf32>
    %688 = vector.shape_cast %687 : vector<2xf32> to vector<2x1xf32>
    %cst_191 = arith.constant 3.200000e+01 : f32
    %689 = vector.broadcast %cst_191 : f32 to vector<2x1xf32>
    %690 = arith.divf %688, %689 : vector<2x1xf32>
    %691 = vector.broadcast %690 : vector<2x1xf32> to vector<2x32xf32>
    %692 = arith.subf %683, %691 : vector<2x32xf32>
    %693 = arith.mulf %692, %692 : vector<2x32xf32>
    %cst_192 = arith.constant dense<0.000000e+00> : vector<2xf32>
    %694 = vector.multi_reduction <add>, %693, %cst_192 [1] : vector<2x32xf32> to vector<2xf32>
    %695 = vector.shape_cast %694 : vector<2xf32> to vector<2x1xf32>
    %cst_193 = arith.constant 3.200000e+01 : f32
    %696 = vector.broadcast %cst_193 : f32 to vector<2x1xf32>
    %697 = arith.divf %695, %696 : vector<2x1xf32>
    %cst_194 = arith.constant 9.99999974E-6 : f32
    %698 = vector.broadcast %cst_194 : f32 to vector<2x1xf32>
    %699 = arith.addf %697, %698 : vector<2x1xf32>
    %700 = math.rsqrt %699 : vector<2x1xf32>
    %701 = vector.broadcast %700 : vector<2x1xf32> to vector<2x32xf32>
    %702 = arith.mulf %692, %701 : vector<2x32xf32>
    %703 = vector.broadcast %685 : vector<1x32xf32> to vector<2x32xf32>
    %704 = arith.mulf %702, %703 : vector<2x32xf32>
    %705 = vector.broadcast %686 : vector<1x32xf32> to vector<2x32xf32>
    %706 = arith.addf %704, %705 : vector<2x32xf32>
    %c0_195 = arith.constant 0 : index
    %c0_196 = arith.constant 0 : index
    %707 = vector.load %arg51[%c0_195, %c0_196] : memref<33x96xf32, #tpu.memory_space<vmem>>, vector<33x96xf32>
    %708 = vector.extract_strided_slice %707 {offsets = [0, 64], sizes = [33, 32], strides = [1, 1]} : vector<33x96xf32> to vector<33x32xf32>
    %709 = vector.extract_strided_slice %708 {offsets = [0, 0], sizes = [32, 32], strides = [1, 1]} : vector<33x32xf32> to vector<32x32xf32>
    %cst_197 = arith.constant dense<0.000000e+00> : vector<2x32xf32>
    %710 = tpu.matmul %706, %709, %cst_197 {dimension_numbers = #tpu.dot_dimension_numbers<[1], [0], [0], [1], [0, 0, 1, 1], [], []>} : vector<2x32xf32>, vector<32x32xf32>, vector<2x32xf32> -> vector<2x32xf32>
    %711 = vector.extract_strided_slice %708 {offsets = [32, 0], sizes = [1, 32], strides = [1, 1]} : vector<33x32xf32> to vector<1x32xf32>
    %712 = vector.broadcast %711 : vector<1x32xf32> to vector<2x32xf32>
    %713 = arith.addf %710, %712 : vector<2x32xf32>
    %c0_198 = arith.constant 0 : index
    %c0_199 = arith.constant 0 : index
    %714 = vector.load %arg50[%c0_198, %c0_199] : memref<33x32xf32, #tpu.memory_space<vmem>>, vector<33x32xf32>
    %715 = vector.extract_strided_slice %714 {offsets = [0, 0], sizes = [32, 32], strides = [1, 1]} : vector<33x32xf32> to vector<32x32xf32>
    %cst_200 = arith.constant dense<0.000000e+00> : vector<2x32xf32>
    %716 = tpu.matmul %713, %715, %cst_200 {dimension_numbers = #tpu.dot_dimension_numbers<[1], [0], [0], [1], [0, 0, 1, 1], [], []>} : vector<2x32xf32>, vector<32x32xf32>, vector<2x32xf32> -> vector<2x32xf32>
    %717 = vector.extract_strided_slice %714 {offsets = [32, 0], sizes = [1, 32], strides = [1, 1]} : vector<33x32xf32> to vector<1x32xf32>
    %718 = vector.broadcast %717 : vector<1x32xf32> to vector<2x32xf32>
    %719 = arith.addf %716, %718 : vector<2x32xf32>
    %720 = arith.addf %683, %719 : vector<2x32xf32>
    %c0_201 = arith.constant 0 : index
    %c0_202 = arith.constant 0 : index
    %721 = vector.load %arg49[%c0_201, %c0_202] : memref<2x32xf32, #tpu.memory_space<vmem>>, vector<2x32xf32>
    %722 = vector.extract_strided_slice %721 {offsets = [0, 0], sizes = [1, 32], strides = [1, 1]} : vector<2x32xf32> to vector<1x32xf32>
    %723 = vector.extract_strided_slice %721 {offsets = [1, 0], sizes = [1, 32], strides = [1, 1]} : vector<2x32xf32> to vector<1x32xf32>
    %cst_203 = arith.constant dense<0.000000e+00> : vector<2xf32>
    %724 = vector.multi_reduction <add>, %720, %cst_203 [1] : vector<2x32xf32> to vector<2xf32>
    %725 = vector.shape_cast %724 : vector<2xf32> to vector<2x1xf32>
    %cst_204 = arith.constant 3.200000e+01 : f32
    %726 = vector.broadcast %cst_204 : f32 to vector<2x1xf32>
    %727 = arith.divf %725, %726 : vector<2x1xf32>
    %728 = vector.broadcast %727 : vector<2x1xf32> to vector<2x32xf32>
    %729 = arith.subf %720, %728 : vector<2x32xf32>
    %730 = arith.mulf %729, %729 : vector<2x32xf32>
    %cst_205 = arith.constant dense<0.000000e+00> : vector<2xf32>
    %731 = vector.multi_reduction <add>, %730, %cst_205 [1] : vector<2x32xf32> to vector<2xf32>
    %732 = vector.shape_cast %731 : vector<2xf32> to vector<2x1xf32>
    %cst_206 = arith.constant 3.200000e+01 : f32
    %733 = vector.broadcast %cst_206 : f32 to vector<2x1xf32>
    %734 = arith.divf %732, %733 : vector<2x1xf32>
    %cst_207 = arith.constant 9.99999974E-6 : f32
    %735 = vector.broadcast %cst_207 : f32 to vector<2x1xf32>
    %736 = arith.addf %734, %735 : vector<2x1xf32>
    %737 = math.rsqrt %736 : vector<2x1xf32>
    %738 = vector.broadcast %737 : vector<2x1xf32> to vector<2x32xf32>
    %739 = arith.mulf %729, %738 : vector<2x32xf32>
    %740 = vector.broadcast %722 : vector<1x32xf32> to vector<2x32xf32>
    %741 = arith.mulf %739, %740 : vector<2x32xf32>
    %742 = vector.broadcast %723 : vector<1x32xf32> to vector<2x32xf32>
    %743 = arith.addf %741, %742 : vector<2x32xf32>
    %c0_208 = arith.constant 0 : index
    %c0_209 = arith.constant 0 : index
    %744 = vector.load %arg46[%c0_208, %c0_209] : memref<33x128xf32, #tpu.memory_space<vmem>>, vector<33x128xf32>
    %745 = vector.extract_strided_slice %744 {offsets = [0, 0], sizes = [32, 128], strides = [1, 1]} : vector<33x128xf32> to vector<32x128xf32>
    %cst_210 = arith.constant dense<0.000000e+00> : vector<2x128xf32>
    %746 = tpu.matmul %743, %745, %cst_210 {dimension_numbers = #tpu.dot_dimension_numbers<[1], [0], [0], [1], [0, 0, 1, 1], [], []>} : vector<2x32xf32>, vector<32x128xf32>, vector<2x128xf32> -> vector<2x128xf32>
    %747 = vector.extract_strided_slice %744 {offsets = [32, 0], sizes = [1, 128], strides = [1, 1]} : vector<33x128xf32> to vector<1x128xf32>
    %748 = vector.broadcast %747 : vector<1x128xf32> to vector<2x128xf32>
    %749 = arith.addf %746, %748 : vector<2x128xf32>
    %cst_211 = arith.constant 5.000000e-01 : f32
    %750 = vector.broadcast %cst_211 : f32 to vector<2x128xf32>
    %751 = arith.mulf %750, %749 : vector<2x128xf32>
    %cst_212 = arith.constant 0.707106769 : f32
    %752 = vector.broadcast %cst_212 : f32 to vector<2x128xf32>
    %753 = arith.mulf %749, %752 : vector<2x128xf32>
    %cst_213 = arith.constant 0.000000e+00 : f32
    %754 = vector.broadcast %cst_213 : f32 to vector<2x128xf32>
    %755 = arith.cmpf oge, %753, %754 : vector<2x128xf32>
    %cst_214 = arith.constant 1.000000e+00 : f32
    %cst_215 = arith.constant -1.000000e+00 : f32
    %756 = vector.broadcast %cst_214 : f32 to vector<2x128xf32>
    %757 = vector.broadcast %cst_215 : f32 to vector<2x128xf32>
    %758 = arith.select %755, %756, %757 : vector<2x128xi1>, vector<2x128xf32>
    %759 = math.absf %753 : vector<2x128xf32>
    %cst_216 = arith.constant 0.327591091 : f32
    %760 = vector.broadcast %cst_216 : f32 to vector<2x128xf32>
    %761 = arith.mulf %760, %759 : vector<2x128xf32>
    %cst_217 = arith.constant 1.000000e+00 : f32
    %762 = vector.broadcast %cst_217 : f32 to vector<2x128xf32>
    %763 = arith.addf %762, %761 : vector<2x128xf32>
    %cst_218 = arith.constant 1.000000e+00 : f32
    %764 = vector.broadcast %cst_218 : f32 to vector<2x128xf32>
    %765 = arith.divf %764, %763 : vector<2x128xf32>
    %cst_219 = arith.constant 1.06140542 : f32
    %766 = vector.broadcast %cst_219 : f32 to vector<2x128xf32>
    %767 = arith.mulf %766, %765 : vector<2x128xf32>
    %cst_220 = arith.constant -1.45315206 : f32
    %768 = vector.broadcast %cst_220 : f32 to vector<2x128xf32>
    %769 = arith.addf %767, %768 : vector<2x128xf32>
    %770 = arith.mulf %769, %765 : vector<2x128xf32>
    %cst_221 = arith.constant 1.42141378 : f32
    %771 = vector.broadcast %cst_221 : f32 to vector<2x128xf32>
    %772 = arith.addf %770, %771 : vector<2x128xf32>
    %773 = arith.mulf %772, %765 : vector<2x128xf32>
    %cst_222 = arith.constant -0.284496725 : f32
    %774 = vector.broadcast %cst_222 : f32 to vector<2x128xf32>
    %775 = arith.addf %773, %774 : vector<2x128xf32>
    %776 = arith.mulf %775, %765 : vector<2x128xf32>
    %cst_223 = arith.constant 0.254829586 : f32
    %777 = vector.broadcast %cst_223 : f32 to vector<2x128xf32>
    %778 = arith.addf %776, %777 : vector<2x128xf32>
    %779 = arith.mulf %778, %765 : vector<2x128xf32>
    %cst_224 = arith.constant 0.000000e+00 : f32
    %780 = vector.broadcast %cst_224 : f32 to vector<2x128xf32>
    %781 = arith.subf %780, %759 : vector<2x128xf32>
    %782 = arith.mulf %781, %759 : vector<2x128xf32>
    %783 = math.exp %782 : vector<2x128xf32>
    %784 = arith.mulf %779, %783 : vector<2x128xf32>
    %cst_225 = arith.constant 1.000000e+00 : f32
    %785 = vector.broadcast %cst_225 : f32 to vector<2x128xf32>
    %786 = arith.subf %785, %784 : vector<2x128xf32>
    %787 = arith.mulf %758, %786 : vector<2x128xf32>
    %cst_226 = arith.constant 1.000000e+00 : f32
    %788 = vector.broadcast %cst_226 : f32 to vector<2x128xf32>
    %789 = arith.addf %788, %787 : vector<2x128xf32>
    %790 = arith.mulf %751, %789 : vector<2x128xf32>
    %c0_227 = arith.constant 0 : index
    %c0_228 = arith.constant 0 : index
    %791 = vector.load %arg47[%c0_227, %c0_228] : memref<129x32xf32, #tpu.memory_space<vmem>>, vector<129x32xf32>
    %792 = vector.extract_strided_slice %791 {offsets = [0, 0], sizes = [128, 32], strides = [1, 1]} : vector<129x32xf32> to vector<128x32xf32>
    %cst_229 = arith.constant dense<0.000000e+00> : vector<2x32xf32>
    %793 = tpu.matmul %790, %792, %cst_229 {dimension_numbers = #tpu.dot_dimension_numbers<[1], [0], [0], [1], [0, 0, 1, 1], [], []>} : vector<2x128xf32>, vector<128x32xf32>, vector<2x32xf32> -> vector<2x32xf32>
    %794 = vector.extract_strided_slice %791 {offsets = [128, 0], sizes = [1, 32], strides = [1, 1]} : vector<129x32xf32> to vector<1x32xf32>
    %795 = vector.broadcast %794 : vector<1x32xf32> to vector<2x32xf32>
    %796 = arith.addf %793, %795 : vector<2x32xf32>
    %797 = arith.addf %720, %796 : vector<2x32xf32>
    %c0_230 = arith.constant 0 : index
    %c0_231 = arith.constant 0 : index
    %798 = vector.load %arg54[%c0_230, %c0_231] : memref<2x32xf32, #tpu.memory_space<vmem>>, vector<2x32xf32>
    %799 = vector.extract_strided_slice %798 {offsets = [0, 0], sizes = [1, 32], strides = [1, 1]} : vector<2x32xf32> to vector<1x32xf32>
    %800 = vector.extract_strided_slice %798 {offsets = [1, 0], sizes = [1, 32], strides = [1, 1]} : vector<2x32xf32> to vector<1x32xf32>
    %cst_232 = arith.constant dense<0.000000e+00> : vector<2xf32>
    %801 = vector.multi_reduction <add>, %797, %cst_232 [1] : vector<2x32xf32> to vector<2xf32>
    %802 = vector.shape_cast %801 : vector<2xf32> to vector<2x1xf32>
    %cst_233 = arith.constant 3.200000e+01 : f32
    %803 = vector.broadcast %cst_233 : f32 to vector<2x1xf32>
    %804 = arith.divf %802, %803 : vector<2x1xf32>
    %805 = vector.broadcast %804 : vector<2x1xf32> to vector<2x32xf32>
    %806 = arith.subf %797, %805 : vector<2x32xf32>
    %807 = arith.mulf %806, %806 : vector<2x32xf32>
    %cst_234 = arith.constant dense<0.000000e+00> : vector<2xf32>
    %808 = vector.multi_reduction <add>, %807, %cst_234 [1] : vector<2x32xf32> to vector<2xf32>
    %809 = vector.shape_cast %808 : vector<2xf32> to vector<2x1xf32>
    %cst_235 = arith.constant 3.200000e+01 : f32
    %810 = vector.broadcast %cst_235 : f32 to vector<2x1xf32>
    %811 = arith.divf %809, %810 : vector<2x1xf32>
    %cst_236 = arith.constant 9.99999974E-6 : f32
    %812 = vector.broadcast %cst_236 : f32 to vector<2x1xf32>
    %813 = arith.addf %811, %812 : vector<2x1xf32>
    %814 = math.rsqrt %813 : vector<2x1xf32>
    %815 = vector.broadcast %814 : vector<2x1xf32> to vector<2x32xf32>
    %816 = arith.mulf %806, %815 : vector<2x32xf32>
    %817 = vector.broadcast %799 : vector<1x32xf32> to vector<2x32xf32>
    %818 = arith.mulf %816, %817 : vector<2x32xf32>
    %819 = vector.broadcast %800 : vector<1x32xf32> to vector<2x32xf32>
    %820 = arith.addf %818, %819 : vector<2x32xf32>
    %c0_237 = arith.constant 0 : index
    %c0_238 = arith.constant 0 : index
    %821 = vector.load %arg57[%c0_237, %c0_238] : memref<33x96xf32, #tpu.memory_space<vmem>>, vector<33x96xf32>
    %822 = vector.extract_strided_slice %821 {offsets = [0, 64], sizes = [33, 32], strides = [1, 1]} : vector<33x96xf32> to vector<33x32xf32>
    %823 = vector.extract_strided_slice %822 {offsets = [0, 0], sizes = [32, 32], strides = [1, 1]} : vector<33x32xf32> to vector<32x32xf32>
    %cst_239 = arith.constant dense<0.000000e+00> : vector<2x32xf32>
    %824 = tpu.matmul %820, %823, %cst_239 {dimension_numbers = #tpu.dot_dimension_numbers<[1], [0], [0], [1], [0, 0, 1, 1], [], []>} : vector<2x32xf32>, vector<32x32xf32>, vector<2x32xf32> -> vector<2x32xf32>
    %825 = vector.extract_strided_slice %822 {offsets = [32, 0], sizes = [1, 32], strides = [1, 1]} : vector<33x32xf32> to vector<1x32xf32>
    %826 = vector.broadcast %825 : vector<1x32xf32> to vector<2x32xf32>
    %827 = arith.addf %824, %826 : vector<2x32xf32>
    %c0_240 = arith.constant 0 : index
    %c0_241 = arith.constant 0 : index
    %828 = vector.load %arg56[%c0_240, %c0_241] : memref<33x32xf32, #tpu.memory_space<vmem>>, vector<33x32xf32>
    %829 = vector.extract_strided_slice %828 {offsets = [0, 0], sizes = [32, 32], strides = [1, 1]} : vector<33x32xf32> to vector<32x32xf32>
    %cst_242 = arith.constant dense<0.000000e+00> : vector<2x32xf32>
    %830 = tpu.matmul %827, %829, %cst_242 {dimension_numbers = #tpu.dot_dimension_numbers<[1], [0], [0], [1], [0, 0, 1, 1], [], []>} : vector<2x32xf32>, vector<32x32xf32>, vector<2x32xf32> -> vector<2x32xf32>
    %831 = vector.extract_strided_slice %828 {offsets = [32, 0], sizes = [1, 32], strides = [1, 1]} : vector<33x32xf32> to vector<1x32xf32>
    %832 = vector.broadcast %831 : vector<1x32xf32> to vector<2x32xf32>
    %833 = arith.addf %830, %832 : vector<2x32xf32>
    %834 = arith.addf %797, %833 : vector<2x32xf32>
    %c0_243 = arith.constant 0 : index
    %c0_244 = arith.constant 0 : index
    %835 = vector.load %arg55[%c0_243, %c0_244] : memref<2x32xf32, #tpu.memory_space<vmem>>, vector<2x32xf32>
    %836 = vector.extract_strided_slice %835 {offsets = [0, 0], sizes = [1, 32], strides = [1, 1]} : vector<2x32xf32> to vector<1x32xf32>
    %837 = vector.extract_strided_slice %835 {offsets = [1, 0], sizes = [1, 32], strides = [1, 1]} : vector<2x32xf32> to vector<1x32xf32>
    %cst_245 = arith.constant dense<0.000000e+00> : vector<2xf32>
    %838 = vector.multi_reduction <add>, %834, %cst_245 [1] : vector<2x32xf32> to vector<2xf32>
    %839 = vector.shape_cast %838 : vector<2xf32> to vector<2x1xf32>
    %cst_246 = arith.constant 3.200000e+01 : f32
    %840 = vector.broadcast %cst_246 : f32 to vector<2x1xf32>
    %841 = arith.divf %839, %840 : vector<2x1xf32>
    %842 = vector.broadcast %841 : vector<2x1xf32> to vector<2x32xf32>
    %843 = arith.subf %834, %842 : vector<2x32xf32>
    %844 = arith.mulf %843, %843 : vector<2x32xf32>
    %cst_247 = arith.constant dense<0.000000e+00> : vector<2xf32>
    %845 = vector.multi_reduction <add>, %844, %cst_247 [1] : vector<2x32xf32> to vector<2xf32>
    %846 = vector.shape_cast %845 : vector<2xf32> to vector<2x1xf32>
    %cst_248 = arith.constant 3.200000e+01 : f32
    %847 = vector.broadcast %cst_248 : f32 to vector<2x1xf32>
    %848 = arith.divf %846, %847 : vector<2x1xf32>
    %cst_249 = arith.constant 9.99999974E-6 : f32
    %849 = vector.broadcast %cst_249 : f32 to vector<2x1xf32>
    %850 = arith.addf %848, %849 : vector<2x1xf32>
    %851 = math.rsqrt %850 : vector<2x1xf32>
    %852 = vector.broadcast %851 : vector<2x1xf32> to vector<2x32xf32>
    %853 = arith.mulf %843, %852 : vector<2x32xf32>
    %854 = vector.broadcast %836 : vector<1x32xf32> to vector<2x32xf32>
    %855 = arith.mulf %853, %854 : vector<2x32xf32>
    %856 = vector.broadcast %837 : vector<1x32xf32> to vector<2x32xf32>
    %857 = arith.addf %855, %856 : vector<2x32xf32>
    %c0_250 = arith.constant 0 : index
    %c0_251 = arith.constant 0 : index
    %858 = vector.load %arg52[%c0_250, %c0_251] : memref<33x128xf32, #tpu.memory_space<vmem>>, vector<33x128xf32>
    %859 = vector.extract_strided_slice %858 {offsets = [0, 0], sizes = [32, 128], strides = [1, 1]} : vector<33x128xf32> to vector<32x128xf32>
    %cst_252 = arith.constant dense<0.000000e+00> : vector<2x128xf32>
    %860 = tpu.matmul %857, %859, %cst_252 {dimension_numbers = #tpu.dot_dimension_numbers<[1], [0], [0], [1], [0, 0, 1, 1], [], []>} : vector<2x32xf32>, vector<32x128xf32>, vector<2x128xf32> -> vector<2x128xf32>
    %861 = vector.extract_strided_slice %858 {offsets = [32, 0], sizes = [1, 128], strides = [1, 1]} : vector<33x128xf32> to vector<1x128xf32>
    %862 = vector.broadcast %861 : vector<1x128xf32> to vector<2x128xf32>
    %863 = arith.addf %860, %862 : vector<2x128xf32>
    %cst_253 = arith.constant 5.000000e-01 : f32
    %864 = vector.broadcast %cst_253 : f32 to vector<2x128xf32>
    %865 = arith.mulf %864, %863 : vector<2x128xf32>
    %cst_254 = arith.constant 0.707106769 : f32
    %866 = vector.broadcast %cst_254 : f32 to vector<2x128xf32>
    %867 = arith.mulf %863, %866 : vector<2x128xf32>
    %cst_255 = arith.constant 0.000000e+00 : f32
    %868 = vector.broadcast %cst_255 : f32 to vector<2x128xf32>
    %869 = arith.cmpf oge, %867, %868 : vector<2x128xf32>
    %cst_256 = arith.constant 1.000000e+00 : f32
    %cst_257 = arith.constant -1.000000e+00 : f32
    %870 = vector.broadcast %cst_256 : f32 to vector<2x128xf32>
    %871 = vector.broadcast %cst_257 : f32 to vector<2x128xf32>
    %872 = arith.select %869, %870, %871 : vector<2x128xi1>, vector<2x128xf32>
    %873 = math.absf %867 : vector<2x128xf32>
    %cst_258 = arith.constant 0.327591091 : f32
    %874 = vector.broadcast %cst_258 : f32 to vector<2x128xf32>
    %875 = arith.mulf %874, %873 : vector<2x128xf32>
    %cst_259 = arith.constant 1.000000e+00 : f32
    %876 = vector.broadcast %cst_259 : f32 to vector<2x128xf32>
    %877 = arith.addf %876, %875 : vector<2x128xf32>
    %cst_260 = arith.constant 1.000000e+00 : f32
    %878 = vector.broadcast %cst_260 : f32 to vector<2x128xf32>
    %879 = arith.divf %878, %877 : vector<2x128xf32>
    %cst_261 = arith.constant 1.06140542 : f32
    %880 = vector.broadcast %cst_261 : f32 to vector<2x128xf32>
    %881 = arith.mulf %880, %879 : vector<2x128xf32>
    %cst_262 = arith.constant -1.45315206 : f32
    %882 = vector.broadcast %cst_262 : f32 to vector<2x128xf32>
    %883 = arith.addf %881, %882 : vector<2x128xf32>
    %884 = arith.mulf %883, %879 : vector<2x128xf32>
    %cst_263 = arith.constant 1.42141378 : f32
    %885 = vector.broadcast %cst_263 : f32 to vector<2x128xf32>
    %886 = arith.addf %884, %885 : vector<2x128xf32>
    %887 = arith.mulf %886, %879 : vector<2x128xf32>
    %cst_264 = arith.constant -0.284496725 : f32
    %888 = vector.broadcast %cst_264 : f32 to vector<2x128xf32>
    %889 = arith.addf %887, %888 : vector<2x128xf32>
    %890 = arith.mulf %889, %879 : vector<2x128xf32>
    %cst_265 = arith.constant 0.254829586 : f32
    %891 = vector.broadcast %cst_265 : f32 to vector<2x128xf32>
    %892 = arith.addf %890, %891 : vector<2x128xf32>
    %893 = arith.mulf %892, %879 : vector<2x128xf32>
    %cst_266 = arith.constant 0.000000e+00 : f32
    %894 = vector.broadcast %cst_266 : f32 to vector<2x128xf32>
    %895 = arith.subf %894, %873 : vector<2x128xf32>
    %896 = arith.mulf %895, %873 : vector<2x128xf32>
    %897 = math.exp %896 : vector<2x128xf32>
    %898 = arith.mulf %893, %897 : vector<2x128xf32>
    %cst_267 = arith.constant 1.000000e+00 : f32
    %899 = vector.broadcast %cst_267 : f32 to vector<2x128xf32>
    %900 = arith.subf %899, %898 : vector<2x128xf32>
    %901 = arith.mulf %872, %900 : vector<2x128xf32>
    %cst_268 = arith.constant 1.000000e+00 : f32
    %902 = vector.broadcast %cst_268 : f32 to vector<2x128xf32>
    %903 = arith.addf %902, %901 : vector<2x128xf32>
    %904 = arith.mulf %865, %903 : vector<2x128xf32>
    %c0_269 = arith.constant 0 : index
    %c0_270 = arith.constant 0 : index
    %905 = vector.load %arg53[%c0_269, %c0_270] : memref<129x32xf32, #tpu.memory_space<vmem>>, vector<129x32xf32>
    %906 = vector.extract_strided_slice %905 {offsets = [0, 0], sizes = [128, 32], strides = [1, 1]} : vector<129x32xf32> to vector<128x32xf32>
    %cst_271 = arith.constant dense<0.000000e+00> : vector<2x32xf32>
    %907 = tpu.matmul %904, %906, %cst_271 {dimension_numbers = #tpu.dot_dimension_numbers<[1], [0], [0], [1], [0, 0, 1, 1], [], []>} : vector<2x128xf32>, vector<128x32xf32>, vector<2x32xf32> -> vector<2x32xf32>
    %908 = vector.extract_strided_slice %905 {offsets = [128, 0], sizes = [1, 32], strides = [1, 1]} : vector<129x32xf32> to vector<1x32xf32>
    %909 = vector.broadcast %908 : vector<1x32xf32> to vector<2x32xf32>
    %910 = arith.addf %907, %909 : vector<2x32xf32>
    %911 = arith.addf %834, %910 : vector<2x32xf32>
    %c0_272 = arith.constant 0 : index
    %c0_273 = arith.constant 0 : index
    %912 = vector.load %arg10[%c0_272, %c0_273] : memref<33x96xf32, #tpu.memory_space<vmem>>, vector<33x96xf32>
    %913 = vector.extract_strided_slice %912 {offsets = [0, 64], sizes = [33, 32], strides = [1, 1]} : vector<33x96xf32> to vector<33x32xf32>
    %914 = vector.extract_strided_slice %913 {offsets = [0, 0], sizes = [32, 32], strides = [1, 1]} : vector<33x32xf32> to vector<32x32xf32>
    %cst_274 = arith.constant dense<0.000000e+00> : vector<2x32xf32>
    %915 = tpu.matmul %911, %914, %cst_274 {dimension_numbers = #tpu.dot_dimension_numbers<[1], [0], [0], [1], [0, 0, 1, 1], [], []>} : vector<2x32xf32>, vector<32x32xf32>, vector<2x32xf32> -> vector<2x32xf32>
    %916 = vector.extract_strided_slice %913 {offsets = [32, 0], sizes = [1, 32], strides = [1, 1]} : vector<33x32xf32> to vector<1x32xf32>
    %917 = vector.broadcast %916 : vector<1x32xf32> to vector<2x32xf32>
    %918 = arith.addf %915, %917 : vector<2x32xf32>
    %c0_275 = arith.constant 0 : index
    %c0_276 = arith.constant 0 : index
    %919 = vector.load %arg9[%c0_275, %c0_276] : memref<33x32xf32, #tpu.memory_space<vmem>>, vector<33x32xf32>
    %920 = vector.extract_strided_slice %919 {offsets = [0, 0], sizes = [32, 32], strides = [1, 1]} : vector<33x32xf32> to vector<32x32xf32>
    %cst_277 = arith.constant dense<0.000000e+00> : vector<2x32xf32>
    %921 = tpu.matmul %918, %920, %cst_277 {dimension_numbers = #tpu.dot_dimension_numbers<[1], [0], [0], [1], [0, 0, 1, 1], [], []>} : vector<2x32xf32>, vector<32x32xf32>, vector<2x32xf32> -> vector<2x32xf32>
    %922 = vector.extract_strided_slice %919 {offsets = [32, 0], sizes = [1, 32], strides = [1, 1]} : vector<33x32xf32> to vector<1x32xf32>
    %923 = vector.broadcast %922 : vector<1x32xf32> to vector<2x32xf32>
    %924 = arith.addf %921, %923 : vector<2x32xf32>
    %925 = vector.extract_strided_slice %924 {offsets = [0, 0], sizes = [1, 32], strides = [1, 1]} : vector<2x32xf32> to vector<1x32xf32>
    %926 = vector.extract_strided_slice %924 {offsets = [0, 0], sizes = [1, 32], strides = [1, 1]} : vector<2x32xf32> to vector<1x32xf32>
    %927 = vector.extract_strided_slice %924 {offsets = [1, 0], sizes = [1, 32], strides = [1, 1]} : vector<2x32xf32> to vector<1x32xf32>
    %928 = vector.extract_strided_slice %924 {offsets = [1, 0], sizes = [1, 32], strides = [1, 1]} : vector<2x32xf32> to vector<1x32xf32>
    %929 = tpu.concatenate %925, %926, %927, %928 in 0 : vector<1x32xf32>, vector<1x32xf32>, vector<1x32xf32>, vector<1x32xf32> -> vector<4x32xf32>
    %930 = arith.addf %672, %929 : vector<4x32xf32>
    %c0_278 = arith.constant 0 : index
    %c0_279 = arith.constant 0 : index
    %931 = vector.load %arg7[%c0_278, %c0_279] : memref<2x32xf32, #tpu.memory_space<vmem>>, vector<2x32xf32>
    %932 = vector.extract_strided_slice %931 {offsets = [0, 0], sizes = [1, 32], strides = [1, 1]} : vector<2x32xf32> to vector<1x32xf32>
    %933 = vector.extract_strided_slice %931 {offsets = [1, 0], sizes = [1, 32], strides = [1, 1]} : vector<2x32xf32> to vector<1x32xf32>
    %cst_280 = arith.constant dense<0.000000e+00> : vector<4xf32>
    %934 = vector.multi_reduction <add>, %930, %cst_280 [1] : vector<4x32xf32> to vector<4xf32>
    %935 = vector.shape_cast %934 : vector<4xf32> to vector<4x1xf32>
    %cst_281 = arith.constant 3.200000e+01 : f32
    %936 = vector.broadcast %cst_281 : f32 to vector<4x1xf32>
    %937 = arith.divf %935, %936 : vector<4x1xf32>
    %938 = vector.broadcast %937 : vector<4x1xf32> to vector<4x32xf32>
    %939 = arith.subf %930, %938 : vector<4x32xf32>
    %940 = arith.mulf %939, %939 : vector<4x32xf32>
    %cst_282 = arith.constant dense<0.000000e+00> : vector<4xf32>
    %941 = vector.multi_reduction <add>, %940, %cst_282 [1] : vector<4x32xf32> to vector<4xf32>
    %942 = vector.shape_cast %941 : vector<4xf32> to vector<4x1xf32>
    %cst_283 = arith.constant 3.200000e+01 : f32
    %943 = vector.broadcast %cst_283 : f32 to vector<4x1xf32>
    %944 = arith.divf %942, %943 : vector<4x1xf32>
    %cst_284 = arith.constant 9.99999974E-6 : f32
    %945 = vector.broadcast %cst_284 : f32 to vector<4x1xf32>
    %946 = arith.addf %944, %945 : vector<4x1xf32>
    %947 = math.rsqrt %946 : vector<4x1xf32>
    %948 = vector.broadcast %947 : vector<4x1xf32> to vector<4x32xf32>
    %949 = arith.mulf %939, %948 : vector<4x32xf32>
    %950 = vector.broadcast %932 : vector<1x32xf32> to vector<4x32xf32>
    %951 = arith.mulf %949, %950 : vector<4x32xf32>
    %952 = vector.broadcast %933 : vector<1x32xf32> to vector<4x32xf32>
    %953 = arith.addf %951, %952 : vector<4x32xf32>
    %c0_285 = arith.constant 0 : index
    %c0_286 = arith.constant 0 : index
    %954 = vector.load %arg5[%c0_285, %c0_286] : memref<33x128xf32, #tpu.memory_space<vmem>>, vector<33x128xf32>
    %955 = vector.extract_strided_slice %954 {offsets = [0, 0], sizes = [32, 128], strides = [1, 1]} : vector<33x128xf32> to vector<32x128xf32>
    %cst_287 = arith.constant dense<0.000000e+00> : vector<4x128xf32>
    %956 = tpu.matmul %953, %955, %cst_287 {dimension_numbers = #tpu.dot_dimension_numbers<[1], [0], [0], [1], [0, 0, 1, 1], [], []>} : vector<4x32xf32>, vector<32x128xf32>, vector<4x128xf32> -> vector<4x128xf32>
    %957 = vector.extract_strided_slice %954 {offsets = [32, 0], sizes = [1, 128], strides = [1, 1]} : vector<33x128xf32> to vector<1x128xf32>
    %958 = vector.broadcast %957 : vector<1x128xf32> to vector<4x128xf32>
    %959 = arith.addf %956, %958 : vector<4x128xf32>
    %cst_288 = arith.constant 5.000000e-01 : f32
    %960 = vector.broadcast %cst_288 : f32 to vector<4x128xf32>
    %961 = arith.mulf %960, %959 : vector<4x128xf32>
    %cst_289 = arith.constant 0.707106769 : f32
    %962 = vector.broadcast %cst_289 : f32 to vector<4x128xf32>
    %963 = arith.mulf %959, %962 : vector<4x128xf32>
    %cst_290 = arith.constant 0.000000e+00 : f32
    %964 = vector.broadcast %cst_290 : f32 to vector<4x128xf32>
    %965 = arith.cmpf oge, %963, %964 : vector<4x128xf32>
    %cst_291 = arith.constant 1.000000e+00 : f32
    %cst_292 = arith.constant -1.000000e+00 : f32
    %966 = vector.broadcast %cst_291 : f32 to vector<4x128xf32>
    %967 = vector.broadcast %cst_292 : f32 to vector<4x128xf32>
    %968 = arith.select %965, %966, %967 : vector<4x128xi1>, vector<4x128xf32>
    %969 = math.absf %963 : vector<4x128xf32>
    %cst_293 = arith.constant 0.327591091 : f32
    %970 = vector.broadcast %cst_293 : f32 to vector<4x128xf32>
    %971 = arith.mulf %970, %969 : vector<4x128xf32>
    %cst_294 = arith.constant 1.000000e+00 : f32
    %972 = vector.broadcast %cst_294 : f32 to vector<4x128xf32>
    %973 = arith.addf %972, %971 : vector<4x128xf32>
    %cst_295 = arith.constant 1.000000e+00 : f32
    %974 = vector.broadcast %cst_295 : f32 to vector<4x128xf32>
    %975 = arith.divf %974, %973 : vector<4x128xf32>
    %cst_296 = arith.constant 1.06140542 : f32
    %976 = vector.broadcast %cst_296 : f32 to vector<4x128xf32>
    %977 = arith.mulf %976, %975 : vector<4x128xf32>
    %cst_297 = arith.constant -1.45315206 : f32
    %978 = vector.broadcast %cst_297 : f32 to vector<4x128xf32>
    %979 = arith.addf %977, %978 : vector<4x128xf32>
    %980 = arith.mulf %979, %975 : vector<4x128xf32>
    %cst_298 = arith.constant 1.42141378 : f32
    %981 = vector.broadcast %cst_298 : f32 to vector<4x128xf32>
    %982 = arith.addf %980, %981 : vector<4x128xf32>
    %983 = arith.mulf %982, %975 : vector<4x128xf32>
    %cst_299 = arith.constant -0.284496725 : f32
    %984 = vector.broadcast %cst_299 : f32 to vector<4x128xf32>
    %985 = arith.addf %983, %984 : vector<4x128xf32>
    %986 = arith.mulf %985, %975 : vector<4x128xf32>
    %cst_300 = arith.constant 0.254829586 : f32
    %987 = vector.broadcast %cst_300 : f32 to vector<4x128xf32>
    %988 = arith.addf %986, %987 : vector<4x128xf32>
    %989 = arith.mulf %988, %975 : vector<4x128xf32>
    %cst_301 = arith.constant 0.000000e+00 : f32
    %990 = vector.broadcast %cst_301 : f32 to vector<4x128xf32>
    %991 = arith.subf %990, %969 : vector<4x128xf32>
    %992 = arith.mulf %991, %969 : vector<4x128xf32>
    %993 = math.exp %992 : vector<4x128xf32>
    %994 = arith.mulf %989, %993 : vector<4x128xf32>
    %cst_302 = arith.constant 1.000000e+00 : f32
    %995 = vector.broadcast %cst_302 : f32 to vector<4x128xf32>
    %996 = arith.subf %995, %994 : vector<4x128xf32>
    %997 = arith.mulf %968, %996 : vector<4x128xf32>
    %cst_303 = arith.constant 1.000000e+00 : f32
    %998 = vector.broadcast %cst_303 : f32 to vector<4x128xf32>
    %999 = arith.addf %998, %997 : vector<4x128xf32>
    %1000 = arith.mulf %961, %999 : vector<4x128xf32>
    %c0_304 = arith.constant 0 : index
    %c0_305 = arith.constant 0 : index
    %1001 = vector.load %arg6[%c0_304, %c0_305] : memref<129x32xf32, #tpu.memory_space<vmem>>, vector<129x32xf32>
    %1002 = vector.extract_strided_slice %1001 {offsets = [0, 0], sizes = [128, 32], strides = [1, 1]} : vector<129x32xf32> to vector<128x32xf32>
    %cst_306 = arith.constant dense<0.000000e+00> : vector<4x32xf32>
    %1003 = tpu.matmul %1000, %1002, %cst_306 {dimension_numbers = #tpu.dot_dimension_numbers<[1], [0], [0], [1], [0, 0, 1, 1], [], []>} : vector<4x128xf32>, vector<128x32xf32>, vector<4x32xf32> -> vector<4x32xf32>
    %1004 = vector.extract_strided_slice %1001 {offsets = [128, 0], sizes = [1, 32], strides = [1, 1]} : vector<129x32xf32> to vector<1x32xf32>
    %1005 = vector.broadcast %1004 : vector<1x32xf32> to vector<4x32xf32>
    %1006 = arith.addf %1003, %1005 : vector<4x32xf32>
    %1007 = arith.addf %953, %1006 : vector<4x32xf32>
    %c0_307 = arith.constant 0 : index
    %c0_308 = arith.constant 0 : index
    %1008 = vector.load %arg8[%c0_307, %c0_308] : memref<2x32xf32, #tpu.memory_space<vmem>>, vector<2x32xf32>
    %1009 = vector.extract_strided_slice %1008 {offsets = [0, 0], sizes = [1, 32], strides = [1, 1]} : vector<2x32xf32> to vector<1x32xf32>
    %1010 = vector.extract_strided_slice %1008 {offsets = [1, 0], sizes = [1, 32], strides = [1, 1]} : vector<2x32xf32> to vector<1x32xf32>
    %cst_309 = arith.constant dense<0.000000e+00> : vector<4xf32>
    %1011 = vector.multi_reduction <add>, %1007, %cst_309 [1] : vector<4x32xf32> to vector<4xf32>
    %1012 = vector.shape_cast %1011 : vector<4xf32> to vector<4x1xf32>
    %cst_310 = arith.constant 3.200000e+01 : f32
    %1013 = vector.broadcast %cst_310 : f32 to vector<4x1xf32>
    %1014 = arith.divf %1012, %1013 : vector<4x1xf32>
    %1015 = vector.broadcast %1014 : vector<4x1xf32> to vector<4x32xf32>
    %1016 = arith.subf %1007, %1015 : vector<4x32xf32>
    %1017 = arith.mulf %1016, %1016 : vector<4x32xf32>
    %cst_311 = arith.constant dense<0.000000e+00> : vector<4xf32>
    %1018 = vector.multi_reduction <add>, %1017, %cst_311 [1] : vector<4x32xf32> to vector<4xf32>
    %1019 = vector.shape_cast %1018 : vector<4xf32> to vector<4x1xf32>
    %cst_312 = arith.constant 3.200000e+01 : f32
    %1020 = vector.broadcast %cst_312 : f32 to vector<4x1xf32>
    %1021 = arith.divf %1019, %1020 : vector<4x1xf32>
    %cst_313 = arith.constant 9.99999974E-6 : f32
    %1022 = vector.broadcast %cst_313 : f32 to vector<4x1xf32>
    %1023 = arith.addf %1021, %1022 : vector<4x1xf32>
    %1024 = math.rsqrt %1023 : vector<4x1xf32>
    %1025 = vector.broadcast %1024 : vector<4x1xf32> to vector<4x32xf32>
    %1026 = arith.mulf %1016, %1025 : vector<4x32xf32>
    %1027 = vector.broadcast %1009 : vector<1x32xf32> to vector<4x32xf32>
    %1028 = arith.mulf %1026, %1027 : vector<4x32xf32>
    %1029 = vector.broadcast %1010 : vector<1x32xf32> to vector<4x32xf32>
    %1030 = arith.addf %1028, %1029 : vector<4x32xf32>
    %c0_314 = arith.constant 0 : index
    %c0_315 = arith.constant 0 : index
    %1031 = vector.load %arg16[%c0_314, %c0_315] : memref<33x96xf32, #tpu.memory_space<vmem>>, vector<33x96xf32>
    %1032 = vector.extract_strided_slice %1031 {offsets = [0, 0], sizes = [33, 32], strides = [1, 1]} : vector<33x96xf32> to vector<33x32xf32>
    %1033 = vector.extract_strided_slice %1032 {offsets = [0, 0], sizes = [32, 32], strides = [1, 1]} : vector<33x32xf32> to vector<32x32xf32>
    %cst_316 = arith.constant dense<0.000000e+00> : vector<2x32xf32>
    %1034 = tpu.matmul %911, %1033, %cst_316 {dimension_numbers = #tpu.dot_dimension_numbers<[1], [0], [0], [1], [0, 0, 1, 1], [], []>} : vector<2x32xf32>, vector<32x32xf32>, vector<2x32xf32> -> vector<2x32xf32>
    %1035 = vector.extract_strided_slice %1032 {offsets = [32, 0], sizes = [1, 32], strides = [1, 1]} : vector<33x32xf32> to vector<1x32xf32>
    %1036 = vector.broadcast %1035 : vector<1x32xf32> to vector<2x32xf32>
    %1037 = arith.addf %1034, %1036 : vector<2x32xf32>
    %1038 = vector.extract_strided_slice %1031 {offsets = [0, 32], sizes = [33, 32], strides = [1, 1]} : vector<33x96xf32> to vector<33x32xf32>
    %1039 = vector.extract_strided_slice %1038 {offsets = [0, 0], sizes = [32, 32], strides = [1, 1]} : vector<33x32xf32> to vector<32x32xf32>
    %cst_317 = arith.constant dense<0.000000e+00> : vector<4x32xf32>
    %1040 = tpu.matmul %1030, %1039, %cst_317 {dimension_numbers = #tpu.dot_dimension_numbers<[1], [0], [0], [1], [0, 0, 1, 1], [], []>} : vector<4x32xf32>, vector<32x32xf32>, vector<4x32xf32> -> vector<4x32xf32>
    %1041 = vector.extract_strided_slice %1038 {offsets = [32, 0], sizes = [1, 32], strides = [1, 1]} : vector<33x32xf32> to vector<1x32xf32>
    %1042 = vector.broadcast %1041 : vector<1x32xf32> to vector<4x32xf32>
    %1043 = arith.addf %1040, %1042 : vector<4x32xf32>
    %1044 = vector.extract_strided_slice %1031 {offsets = [0, 64], sizes = [33, 32], strides = [1, 1]} : vector<33x96xf32> to vector<33x32xf32>
    %1045 = vector.extract_strided_slice %1044 {offsets = [0, 0], sizes = [32, 32], strides = [1, 1]} : vector<33x32xf32> to vector<32x32xf32>
    %cst_318 = arith.constant dense<0.000000e+00> : vector<4x32xf32>
    %1046 = tpu.matmul %1030, %1045, %cst_318 {dimension_numbers = #tpu.dot_dimension_numbers<[1], [0], [0], [1], [0, 0, 1, 1], [], []>} : vector<4x32xf32>, vector<32x32xf32>, vector<4x32xf32> -> vector<4x32xf32>
    %1047 = vector.extract_strided_slice %1044 {offsets = [32, 0], sizes = [1, 32], strides = [1, 1]} : vector<33x32xf32> to vector<1x32xf32>
    %1048 = vector.broadcast %1047 : vector<1x32xf32> to vector<4x32xf32>
    %1049 = arith.addf %1046, %1048 : vector<4x32xf32>
    %1050 = vector.extract_strided_slice %1037 {offsets = [0, 0], sizes = [1, 32], strides = [1, 1]} : vector<2x32xf32> to vector<1x32xf32>
    %1051 = vector.extract_strided_slice %1043 {offsets = [0, 0], sizes = [2, 32], strides = [1, 1]} : vector<4x32xf32> to vector<2x32xf32>
    %1052 = vector.extract_strided_slice %1049 {offsets = [0, 0], sizes = [2, 32], strides = [1, 1]} : vector<4x32xf32> to vector<2x32xf32>
    %1053 = vector.extract_strided_slice %1050 {offsets = [0, 0], sizes = [1, 8], strides = [1, 1]} : vector<1x32xf32> to vector<1x8xf32>
    %1054 = vector.extract_strided_slice %1051 {offsets = [0, 0], sizes = [1, 8], strides = [1, 1]} : vector<2x32xf32> to vector<1x8xf32>
    %1055 = arith.mulf %1053, %1054 : vector<1x8xf32>
    %cst_319 = arith.constant dense<0.000000e+00> : vector<1xf32>
    %1056 = vector.multi_reduction <add>, %1055, %cst_319 [1] : vector<1x8xf32> to vector<1xf32>
    %1057 = vector.shape_cast %1056 : vector<1xf32> to vector<1x1xf32>
    %1058 = vector.extract_strided_slice %1051 {offsets = [1, 0], sizes = [1, 8], strides = [1, 1]} : vector<2x32xf32> to vector<1x8xf32>
    %1059 = arith.mulf %1053, %1058 : vector<1x8xf32>
    %cst_320 = arith.constant dense<0.000000e+00> : vector<1xf32>
    %1060 = vector.multi_reduction <add>, %1059, %cst_320 [1] : vector<1x8xf32> to vector<1xf32>
    %1061 = vector.shape_cast %1060 : vector<1xf32> to vector<1x1xf32>
    %1062 = tpu.concatenate %1057, %1061 in 1 : vector<1x1xf32>, vector<1x1xf32> -> vector<1x2xf32>
    %cst_321 = arith.constant dense<0xFF800000> : vector<1xf32>
    %1063 = vector.multi_reduction <maximumf>, %1062, %cst_321 [1] : vector<1x2xf32> to vector<1xf32>
    %1064 = vector.shape_cast %1063 : vector<1xf32> to vector<1x1xf32>
    %1065 = vector.broadcast %1064 : vector<1x1xf32> to vector<1x2xf32>
    %1066 = arith.subf %1062, %1065 : vector<1x2xf32>
    %1067 = math.exp %1066 : vector<1x2xf32>
    %cst_322 = arith.constant dense<0.000000e+00> : vector<1xf32>
    %1068 = vector.multi_reduction <add>, %1067, %cst_322 [1] : vector<1x2xf32> to vector<1xf32>
    %1069 = vector.shape_cast %1068 : vector<1xf32> to vector<1x1xf32>
    %1070 = vector.broadcast %1069 : vector<1x1xf32> to vector<1x2xf32>
    %1071 = arith.divf %1067, %1070 : vector<1x2xf32>
    %1072 = vector.extract_strided_slice %1052 {offsets = [0, 0], sizes = [2, 8], strides = [1, 1]} : vector<2x32xf32> to vector<2x8xf32>
    %cst_323 = arith.constant dense<0.000000e+00> : vector<1x8xf32>
    %1073 = tpu.matmul %1071, %1072, %cst_323 {dimension_numbers = #tpu.dot_dimension_numbers<[1], [0], [0], [1], [0, 0, 1, 1], [], []>} : vector<1x2xf32>, vector<2x8xf32>, vector<1x8xf32> -> vector<1x8xf32>
    %1074 = vector.extract_strided_slice %1050 {offsets = [0, 8], sizes = [1, 8], strides = [1, 1]} : vector<1x32xf32> to vector<1x8xf32>
    %1075 = vector.extract_strided_slice %1051 {offsets = [0, 8], sizes = [1, 8], strides = [1, 1]} : vector<2x32xf32> to vector<1x8xf32>
    %1076 = arith.mulf %1074, %1075 : vector<1x8xf32>
    %cst_324 = arith.constant dense<0.000000e+00> : vector<1xf32>
    %1077 = vector.multi_reduction <add>, %1076, %cst_324 [1] : vector<1x8xf32> to vector<1xf32>
    %1078 = vector.shape_cast %1077 : vector<1xf32> to vector<1x1xf32>
    %1079 = vector.extract_strided_slice %1051 {offsets = [1, 8], sizes = [1, 8], strides = [1, 1]} : vector<2x32xf32> to vector<1x8xf32>
    %1080 = arith.mulf %1074, %1079 : vector<1x8xf32>
    %cst_325 = arith.constant dense<0.000000e+00> : vector<1xf32>
    %1081 = vector.multi_reduction <add>, %1080, %cst_325 [1] : vector<1x8xf32> to vector<1xf32>
    %1082 = vector.shape_cast %1081 : vector<1xf32> to vector<1x1xf32>
    %1083 = tpu.concatenate %1078, %1082 in 1 : vector<1x1xf32>, vector<1x1xf32> -> vector<1x2xf32>
    %cst_326 = arith.constant dense<0xFF800000> : vector<1xf32>
    %1084 = vector.multi_reduction <maximumf>, %1083, %cst_326 [1] : vector<1x2xf32> to vector<1xf32>
    %1085 = vector.shape_cast %1084 : vector<1xf32> to vector<1x1xf32>
    %1086 = vector.broadcast %1085 : vector<1x1xf32> to vector<1x2xf32>
    %1087 = arith.subf %1083, %1086 : vector<1x2xf32>
    %1088 = math.exp %1087 : vector<1x2xf32>
    %cst_327 = arith.constant dense<0.000000e+00> : vector<1xf32>
    %1089 = vector.multi_reduction <add>, %1088, %cst_327 [1] : vector<1x2xf32> to vector<1xf32>
    %1090 = vector.shape_cast %1089 : vector<1xf32> to vector<1x1xf32>
    %1091 = vector.broadcast %1090 : vector<1x1xf32> to vector<1x2xf32>
    %1092 = arith.divf %1088, %1091 : vector<1x2xf32>
    %1093 = vector.extract_strided_slice %1052 {offsets = [0, 8], sizes = [2, 8], strides = [1, 1]} : vector<2x32xf32> to vector<2x8xf32>
    %cst_328 = arith.constant dense<0.000000e+00> : vector<1x8xf32>
    %1094 = tpu.matmul %1092, %1093, %cst_328 {dimension_numbers = #tpu.dot_dimension_numbers<[1], [0], [0], [1], [0, 0, 1, 1], [], []>} : vector<1x2xf32>, vector<2x8xf32>, vector<1x8xf32> -> vector<1x8xf32>
    %1095 = vector.extract_strided_slice %1050 {offsets = [0, 16], sizes = [1, 8], strides = [1, 1]} : vector<1x32xf32> to vector<1x8xf32>
    %1096 = vector.extract_strided_slice %1051 {offsets = [0, 16], sizes = [1, 8], strides = [1, 1]} : vector<2x32xf32> to vector<1x8xf32>
    %1097 = arith.mulf %1095, %1096 : vector<1x8xf32>
    %cst_329 = arith.constant dense<0.000000e+00> : vector<1xf32>
    %1098 = vector.multi_reduction <add>, %1097, %cst_329 [1] : vector<1x8xf32> to vector<1xf32>
    %1099 = vector.shape_cast %1098 : vector<1xf32> to vector<1x1xf32>
    %1100 = vector.extract_strided_slice %1051 {offsets = [1, 16], sizes = [1, 8], strides = [1, 1]} : vector<2x32xf32> to vector<1x8xf32>
    %1101 = arith.mulf %1095, %1100 : vector<1x8xf32>
    %cst_330 = arith.constant dense<0.000000e+00> : vector<1xf32>
    %1102 = vector.multi_reduction <add>, %1101, %cst_330 [1] : vector<1x8xf32> to vector<1xf32>
    %1103 = vector.shape_cast %1102 : vector<1xf32> to vector<1x1xf32>
    %1104 = tpu.concatenate %1099, %1103 in 1 : vector<1x1xf32>, vector<1x1xf32> -> vector<1x2xf32>
    %cst_331 = arith.constant dense<0xFF800000> : vector<1xf32>
    %1105 = vector.multi_reduction <maximumf>, %1104, %cst_331 [1] : vector<1x2xf32> to vector<1xf32>
    %1106 = vector.shape_cast %1105 : vector<1xf32> to vector<1x1xf32>
    %1107 = vector.broadcast %1106 : vector<1x1xf32> to vector<1x2xf32>
    %1108 = arith.subf %1104, %1107 : vector<1x2xf32>
    %1109 = math.exp %1108 : vector<1x2xf32>
    %cst_332 = arith.constant dense<0.000000e+00> : vector<1xf32>
    %1110 = vector.multi_reduction <add>, %1109, %cst_332 [1] : vector<1x2xf32> to vector<1xf32>
    %1111 = vector.shape_cast %1110 : vector<1xf32> to vector<1x1xf32>
    %1112 = vector.broadcast %1111 : vector<1x1xf32> to vector<1x2xf32>
    %1113 = arith.divf %1109, %1112 : vector<1x2xf32>
    %1114 = vector.extract_strided_slice %1052 {offsets = [0, 16], sizes = [2, 8], strides = [1, 1]} : vector<2x32xf32> to vector<2x8xf32>
    %cst_333 = arith.constant dense<0.000000e+00> : vector<1x8xf32>
    %1115 = tpu.matmul %1113, %1114, %cst_333 {dimension_numbers = #tpu.dot_dimension_numbers<[1], [0], [0], [1], [0, 0, 1, 1], [], []>} : vector<1x2xf32>, vector<2x8xf32>, vector<1x8xf32> -> vector<1x8xf32>
    %1116 = vector.extract_strided_slice %1050 {offsets = [0, 24], sizes = [1, 8], strides = [1, 1]} : vector<1x32xf32> to vector<1x8xf32>
    %1117 = vector.extract_strided_slice %1051 {offsets = [0, 24], sizes = [1, 8], strides = [1, 1]} : vector<2x32xf32> to vector<1x8xf32>
    %1118 = arith.mulf %1116, %1117 : vector<1x8xf32>
    %cst_334 = arith.constant dense<0.000000e+00> : vector<1xf32>
    %1119 = vector.multi_reduction <add>, %1118, %cst_334 [1] : vector<1x8xf32> to vector<1xf32>
    %1120 = vector.shape_cast %1119 : vector<1xf32> to vector<1x1xf32>
    %1121 = vector.extract_strided_slice %1051 {offsets = [1, 24], sizes = [1, 8], strides = [1, 1]} : vector<2x32xf32> to vector<1x8xf32>
    %1122 = arith.mulf %1116, %1121 : vector<1x8xf32>
    %cst_335 = arith.constant dense<0.000000e+00> : vector<1xf32>
    %1123 = vector.multi_reduction <add>, %1122, %cst_335 [1] : vector<1x8xf32> to vector<1xf32>
    %1124 = vector.shape_cast %1123 : vector<1xf32> to vector<1x1xf32>
    %1125 = tpu.concatenate %1120, %1124 in 1 : vector<1x1xf32>, vector<1x1xf32> -> vector<1x2xf32>
    %cst_336 = arith.constant dense<0xFF800000> : vector<1xf32>
    %1126 = vector.multi_reduction <maximumf>, %1125, %cst_336 [1] : vector<1x2xf32> to vector<1xf32>
    %1127 = vector.shape_cast %1126 : vector<1xf32> to vector<1x1xf32>
    %1128 = vector.broadcast %1127 : vector<1x1xf32> to vector<1x2xf32>
    %1129 = arith.subf %1125, %1128 : vector<1x2xf32>
    %1130 = math.exp %1129 : vector<1x2xf32>
    %cst_337 = arith.constant dense<0.000000e+00> : vector<1xf32>
    %1131 = vector.multi_reduction <add>, %1130, %cst_337 [1] : vector<1x2xf32> to vector<1xf32>
    %1132 = vector.shape_cast %1131 : vector<1xf32> to vector<1x1xf32>
    %1133 = vector.broadcast %1132 : vector<1x1xf32> to vector<1x2xf32>
    %1134 = arith.divf %1130, %1133 : vector<1x2xf32>
    %1135 = vector.extract_strided_slice %1052 {offsets = [0, 24], sizes = [2, 8], strides = [1, 1]} : vector<2x32xf32> to vector<2x8xf32>
    %cst_338 = arith.constant dense<0.000000e+00> : vector<1x8xf32>
    %1136 = tpu.matmul %1134, %1135, %cst_338 {dimension_numbers = #tpu.dot_dimension_numbers<[1], [0], [0], [1], [0, 0, 1, 1], [], []>} : vector<1x2xf32>, vector<2x8xf32>, vector<1x8xf32> -> vector<1x8xf32>
    %1137 = tpu.concatenate %1073, %1094, %1115, %1136 in 1 : vector<1x8xf32>, vector<1x8xf32>, vector<1x8xf32>, vector<1x8xf32> -> vector<1x32xf32>
    %1138 = vector.extract_strided_slice %1037 {offsets = [1, 0], sizes = [1, 32], strides = [1, 1]} : vector<2x32xf32> to vector<1x32xf32>
    %1139 = vector.extract_strided_slice %1043 {offsets = [2, 0], sizes = [2, 32], strides = [1, 1]} : vector<4x32xf32> to vector<2x32xf32>
    %1140 = vector.extract_strided_slice %1049 {offsets = [2, 0], sizes = [2, 32], strides = [1, 1]} : vector<4x32xf32> to vector<2x32xf32>
    %1141 = vector.extract_strided_slice %1138 {offsets = [0, 0], sizes = [1, 8], strides = [1, 1]} : vector<1x32xf32> to vector<1x8xf32>
    %1142 = vector.extract_strided_slice %1139 {offsets = [0, 0], sizes = [1, 8], strides = [1, 1]} : vector<2x32xf32> to vector<1x8xf32>
    %1143 = arith.mulf %1141, %1142 : vector<1x8xf32>
    %cst_339 = arith.constant dense<0.000000e+00> : vector<1xf32>
    %1144 = vector.multi_reduction <add>, %1143, %cst_339 [1] : vector<1x8xf32> to vector<1xf32>
    %1145 = vector.shape_cast %1144 : vector<1xf32> to vector<1x1xf32>
    %1146 = vector.extract_strided_slice %1139 {offsets = [1, 0], sizes = [1, 8], strides = [1, 1]} : vector<2x32xf32> to vector<1x8xf32>
    %1147 = arith.mulf %1141, %1146 : vector<1x8xf32>
    %cst_340 = arith.constant dense<0.000000e+00> : vector<1xf32>
    %1148 = vector.multi_reduction <add>, %1147, %cst_340 [1] : vector<1x8xf32> to vector<1xf32>
    %1149 = vector.shape_cast %1148 : vector<1xf32> to vector<1x1xf32>
    %1150 = tpu.concatenate %1145, %1149 in 1 : vector<1x1xf32>, vector<1x1xf32> -> vector<1x2xf32>
    %cst_341 = arith.constant dense<0xFF800000> : vector<1xf32>
    %1151 = vector.multi_reduction <maximumf>, %1150, %cst_341 [1] : vector<1x2xf32> to vector<1xf32>
    %1152 = vector.shape_cast %1151 : vector<1xf32> to vector<1x1xf32>
    %1153 = vector.broadcast %1152 : vector<1x1xf32> to vector<1x2xf32>
    %1154 = arith.subf %1150, %1153 : vector<1x2xf32>
    %1155 = math.exp %1154 : vector<1x2xf32>
    %cst_342 = arith.constant dense<0.000000e+00> : vector<1xf32>
    %1156 = vector.multi_reduction <add>, %1155, %cst_342 [1] : vector<1x2xf32> to vector<1xf32>
    %1157 = vector.shape_cast %1156 : vector<1xf32> to vector<1x1xf32>
    %1158 = vector.broadcast %1157 : vector<1x1xf32> to vector<1x2xf32>
    %1159 = arith.divf %1155, %1158 : vector<1x2xf32>
    %1160 = vector.extract_strided_slice %1140 {offsets = [0, 0], sizes = [2, 8], strides = [1, 1]} : vector<2x32xf32> to vector<2x8xf32>
    %cst_343 = arith.constant dense<0.000000e+00> : vector<1x8xf32>
    %1161 = tpu.matmul %1159, %1160, %cst_343 {dimension_numbers = #tpu.dot_dimension_numbers<[1], [0], [0], [1], [0, 0, 1, 1], [], []>} : vector<1x2xf32>, vector<2x8xf32>, vector<1x8xf32> -> vector<1x8xf32>
    %1162 = vector.extract_strided_slice %1138 {offsets = [0, 8], sizes = [1, 8], strides = [1, 1]} : vector<1x32xf32> to vector<1x8xf32>
    %1163 = vector.extract_strided_slice %1139 {offsets = [0, 8], sizes = [1, 8], strides = [1, 1]} : vector<2x32xf32> to vector<1x8xf32>
    %1164 = arith.mulf %1162, %1163 : vector<1x8xf32>
    %cst_344 = arith.constant dense<0.000000e+00> : vector<1xf32>
    %1165 = vector.multi_reduction <add>, %1164, %cst_344 [1] : vector<1x8xf32> to vector<1xf32>
    %1166 = vector.shape_cast %1165 : vector<1xf32> to vector<1x1xf32>
    %1167 = vector.extract_strided_slice %1139 {offsets = [1, 8], sizes = [1, 8], strides = [1, 1]} : vector<2x32xf32> to vector<1x8xf32>
    %1168 = arith.mulf %1162, %1167 : vector<1x8xf32>
    %cst_345 = arith.constant dense<0.000000e+00> : vector<1xf32>
    %1169 = vector.multi_reduction <add>, %1168, %cst_345 [1] : vector<1x8xf32> to vector<1xf32>
    %1170 = vector.shape_cast %1169 : vector<1xf32> to vector<1x1xf32>
    %1171 = tpu.concatenate %1166, %1170 in 1 : vector<1x1xf32>, vector<1x1xf32> -> vector<1x2xf32>
    %cst_346 = arith.constant dense<0xFF800000> : vector<1xf32>
    %1172 = vector.multi_reduction <maximumf>, %1171, %cst_346 [1] : vector<1x2xf32> to vector<1xf32>
    %1173 = vector.shape_cast %1172 : vector<1xf32> to vector<1x1xf32>
    %1174 = vector.broadcast %1173 : vector<1x1xf32> to vector<1x2xf32>
    %1175 = arith.subf %1171, %1174 : vector<1x2xf32>
    %1176 = math.exp %1175 : vector<1x2xf32>
    %cst_347 = arith.constant dense<0.000000e+00> : vector<1xf32>
    %1177 = vector.multi_reduction <add>, %1176, %cst_347 [1] : vector<1x2xf32> to vector<1xf32>
    %1178 = vector.shape_cast %1177 : vector<1xf32> to vector<1x1xf32>
    %1179 = vector.broadcast %1178 : vector<1x1xf32> to vector<1x2xf32>
    %1180 = arith.divf %1176, %1179 : vector<1x2xf32>
    %1181 = vector.extract_strided_slice %1140 {offsets = [0, 8], sizes = [2, 8], strides = [1, 1]} : vector<2x32xf32> to vector<2x8xf32>
    %cst_348 = arith.constant dense<0.000000e+00> : vector<1x8xf32>
    %1182 = tpu.matmul %1180, %1181, %cst_348 {dimension_numbers = #tpu.dot_dimension_numbers<[1], [0], [0], [1], [0, 0, 1, 1], [], []>} : vector<1x2xf32>, vector<2x8xf32>, vector<1x8xf32> -> vector<1x8xf32>
    %1183 = vector.extract_strided_slice %1138 {offsets = [0, 16], sizes = [1, 8], strides = [1, 1]} : vector<1x32xf32> to vector<1x8xf32>
    %1184 = vector.extract_strided_slice %1139 {offsets = [0, 16], sizes = [1, 8], strides = [1, 1]} : vector<2x32xf32> to vector<1x8xf32>
    %1185 = arith.mulf %1183, %1184 : vector<1x8xf32>
    %cst_349 = arith.constant dense<0.000000e+00> : vector<1xf32>
    %1186 = vector.multi_reduction <add>, %1185, %cst_349 [1] : vector<1x8xf32> to vector<1xf32>
    %1187 = vector.shape_cast %1186 : vector<1xf32> to vector<1x1xf32>
    %1188 = vector.extract_strided_slice %1139 {offsets = [1, 16], sizes = [1, 8], strides = [1, 1]} : vector<2x32xf32> to vector<1x8xf32>
    %1189 = arith.mulf %1183, %1188 : vector<1x8xf32>
    %cst_350 = arith.constant dense<0.000000e+00> : vector<1xf32>
    %1190 = vector.multi_reduction <add>, %1189, %cst_350 [1] : vector<1x8xf32> to vector<1xf32>
    %1191 = vector.shape_cast %1190 : vector<1xf32> to vector<1x1xf32>
    %1192 = tpu.concatenate %1187, %1191 in 1 : vector<1x1xf32>, vector<1x1xf32> -> vector<1x2xf32>
    %cst_351 = arith.constant dense<0xFF800000> : vector<1xf32>
    %1193 = vector.multi_reduction <maximumf>, %1192, %cst_351 [1] : vector<1x2xf32> to vector<1xf32>
    %1194 = vector.shape_cast %1193 : vector<1xf32> to vector<1x1xf32>
    %1195 = vector.broadcast %1194 : vector<1x1xf32> to vector<1x2xf32>
    %1196 = arith.subf %1192, %1195 : vector<1x2xf32>
    %1197 = math.exp %1196 : vector<1x2xf32>
    %cst_352 = arith.constant dense<0.000000e+00> : vector<1xf32>
    %1198 = vector.multi_reduction <add>, %1197, %cst_352 [1] : vector<1x2xf32> to vector<1xf32>
    %1199 = vector.shape_cast %1198 : vector<1xf32> to vector<1x1xf32>
    %1200 = vector.broadcast %1199 : vector<1x1xf32> to vector<1x2xf32>
    %1201 = arith.divf %1197, %1200 : vector<1x2xf32>
    %1202 = vector.extract_strided_slice %1140 {offsets = [0, 16], sizes = [2, 8], strides = [1, 1]} : vector<2x32xf32> to vector<2x8xf32>
    %cst_353 = arith.constant dense<0.000000e+00> : vector<1x8xf32>
    %1203 = tpu.matmul %1201, %1202, %cst_353 {dimension_numbers = #tpu.dot_dimension_numbers<[1], [0], [0], [1], [0, 0, 1, 1], [], []>} : vector<1x2xf32>, vector<2x8xf32>, vector<1x8xf32> -> vector<1x8xf32>
    %1204 = vector.extract_strided_slice %1138 {offsets = [0, 24], sizes = [1, 8], strides = [1, 1]} : vector<1x32xf32> to vector<1x8xf32>
    %1205 = vector.extract_strided_slice %1139 {offsets = [0, 24], sizes = [1, 8], strides = [1, 1]} : vector<2x32xf32> to vector<1x8xf32>
    %1206 = arith.mulf %1204, %1205 : vector<1x8xf32>
    %cst_354 = arith.constant dense<0.000000e+00> : vector<1xf32>
    %1207 = vector.multi_reduction <add>, %1206, %cst_354 [1] : vector<1x8xf32> to vector<1xf32>
    %1208 = vector.shape_cast %1207 : vector<1xf32> to vector<1x1xf32>
    %1209 = vector.extract_strided_slice %1139 {offsets = [1, 24], sizes = [1, 8], strides = [1, 1]} : vector<2x32xf32> to vector<1x8xf32>
    %1210 = arith.mulf %1204, %1209 : vector<1x8xf32>
    %cst_355 = arith.constant dense<0.000000e+00> : vector<1xf32>
    %1211 = vector.multi_reduction <add>, %1210, %cst_355 [1] : vector<1x8xf32> to vector<1xf32>
    %1212 = vector.shape_cast %1211 : vector<1xf32> to vector<1x1xf32>
    %1213 = tpu.concatenate %1208, %1212 in 1 : vector<1x1xf32>, vector<1x1xf32> -> vector<1x2xf32>
    %cst_356 = arith.constant dense<0xFF800000> : vector<1xf32>
    %1214 = vector.multi_reduction <maximumf>, %1213, %cst_356 [1] : vector<1x2xf32> to vector<1xf32>
    %1215 = vector.shape_cast %1214 : vector<1xf32> to vector<1x1xf32>
    %1216 = vector.broadcast %1215 : vector<1x1xf32> to vector<1x2xf32>
    %1217 = arith.subf %1213, %1216 : vector<1x2xf32>
    %1218 = math.exp %1217 : vector<1x2xf32>
    %cst_357 = arith.constant dense<0.000000e+00> : vector<1xf32>
    %1219 = vector.multi_reduction <add>, %1218, %cst_357 [1] : vector<1x2xf32> to vector<1xf32>
    %1220 = vector.shape_cast %1219 : vector<1xf32> to vector<1x1xf32>
    %1221 = vector.broadcast %1220 : vector<1x1xf32> to vector<1x2xf32>
    %1222 = arith.divf %1218, %1221 : vector<1x2xf32>
    %1223 = vector.extract_strided_slice %1140 {offsets = [0, 24], sizes = [2, 8], strides = [1, 1]} : vector<2x32xf32> to vector<2x8xf32>
    %cst_358 = arith.constant dense<0.000000e+00> : vector<1x8xf32>
    %1224 = tpu.matmul %1222, %1223, %cst_358 {dimension_numbers = #tpu.dot_dimension_numbers<[1], [0], [0], [1], [0, 0, 1, 1], [], []>} : vector<1x2xf32>, vector<2x8xf32>, vector<1x8xf32> -> vector<1x8xf32>
    %1225 = tpu.concatenate %1161, %1182, %1203, %1224 in 1 : vector<1x8xf32>, vector<1x8xf32>, vector<1x8xf32>, vector<1x8xf32> -> vector<1x32xf32>
    %1226 = tpu.concatenate %1137, %1225 in 0 : vector<1x32xf32>, vector<1x32xf32> -> vector<2x32xf32>
    %c0_359 = arith.constant 0 : index
    %c0_360 = arith.constant 0 : index
    %1227 = vector.load %arg15[%c0_359, %c0_360] : memref<33x32xf32, #tpu.memory_space<vmem>>, vector<33x32xf32>
    %1228 = vector.extract_strided_slice %1227 {offsets = [0, 0], sizes = [32, 32], strides = [1, 1]} : vector<33x32xf32> to vector<32x32xf32>
    %cst_361 = arith.constant dense<0.000000e+00> : vector<2x32xf32>
    %1229 = tpu.matmul %1226, %1228, %cst_361 {dimension_numbers = #tpu.dot_dimension_numbers<[1], [0], [0], [1], [0, 0, 1, 1], [], []>} : vector<2x32xf32>, vector<32x32xf32>, vector<2x32xf32> -> vector<2x32xf32>
    %1230 = vector.extract_strided_slice %1227 {offsets = [32, 0], sizes = [1, 32], strides = [1, 1]} : vector<33x32xf32> to vector<1x32xf32>
    %1231 = vector.broadcast %1230 : vector<1x32xf32> to vector<2x32xf32>
    %1232 = arith.addf %1229, %1231 : vector<2x32xf32>
    %1233 = arith.addf %911, %1232 : vector<2x32xf32>
    %c0_362 = arith.constant 0 : index
    %c0_363 = arith.constant 0 : index
    %1234 = vector.load %arg13[%c0_362, %c0_363] : memref<2x32xf32, #tpu.memory_space<vmem>>, vector<2x32xf32>
    %1235 = vector.extract_strided_slice %1234 {offsets = [0, 0], sizes = [1, 32], strides = [1, 1]} : vector<2x32xf32> to vector<1x32xf32>
    %1236 = vector.extract_strided_slice %1234 {offsets = [1, 0], sizes = [1, 32], strides = [1, 1]} : vector<2x32xf32> to vector<1x32xf32>
    %cst_364 = arith.constant dense<0.000000e+00> : vector<2xf32>
    %1237 = vector.multi_reduction <add>, %1233, %cst_364 [1] : vector<2x32xf32> to vector<2xf32>
    %1238 = vector.shape_cast %1237 : vector<2xf32> to vector<2x1xf32>
    %cst_365 = arith.constant 3.200000e+01 : f32
    %1239 = vector.broadcast %cst_365 : f32 to vector<2x1xf32>
    %1240 = arith.divf %1238, %1239 : vector<2x1xf32>
    %1241 = vector.broadcast %1240 : vector<2x1xf32> to vector<2x32xf32>
    %1242 = arith.subf %1233, %1241 : vector<2x32xf32>
    %1243 = arith.mulf %1242, %1242 : vector<2x32xf32>
    %cst_366 = arith.constant dense<0.000000e+00> : vector<2xf32>
    %1244 = vector.multi_reduction <add>, %1243, %cst_366 [1] : vector<2x32xf32> to vector<2xf32>
    %1245 = vector.shape_cast %1244 : vector<2xf32> to vector<2x1xf32>
    %cst_367 = arith.constant 3.200000e+01 : f32
    %1246 = vector.broadcast %cst_367 : f32 to vector<2x1xf32>
    %1247 = arith.divf %1245, %1246 : vector<2x1xf32>
    %cst_368 = arith.constant 9.99999974E-6 : f32
    %1248 = vector.broadcast %cst_368 : f32 to vector<2x1xf32>
    %1249 = arith.addf %1247, %1248 : vector<2x1xf32>
    %1250 = math.rsqrt %1249 : vector<2x1xf32>
    %1251 = vector.broadcast %1250 : vector<2x1xf32> to vector<2x32xf32>
    %1252 = arith.mulf %1242, %1251 : vector<2x32xf32>
    %1253 = vector.broadcast %1235 : vector<1x32xf32> to vector<2x32xf32>
    %1254 = arith.mulf %1252, %1253 : vector<2x32xf32>
    %1255 = vector.broadcast %1236 : vector<1x32xf32> to vector<2x32xf32>
    %1256 = arith.addf %1254, %1255 : vector<2x32xf32>
    %c0_369 = arith.constant 0 : index
    %c0_370 = arith.constant 0 : index
    %1257 = vector.load %arg11[%c0_369, %c0_370] : memref<33x128xf32, #tpu.memory_space<vmem>>, vector<33x128xf32>
    %1258 = vector.extract_strided_slice %1257 {offsets = [0, 0], sizes = [32, 128], strides = [1, 1]} : vector<33x128xf32> to vector<32x128xf32>
    %cst_371 = arith.constant dense<0.000000e+00> : vector<2x128xf32>
    %1259 = tpu.matmul %1256, %1258, %cst_371 {dimension_numbers = #tpu.dot_dimension_numbers<[1], [0], [0], [1], [0, 0, 1, 1], [], []>} : vector<2x32xf32>, vector<32x128xf32>, vector<2x128xf32> -> vector<2x128xf32>
    %1260 = vector.extract_strided_slice %1257 {offsets = [32, 0], sizes = [1, 128], strides = [1, 1]} : vector<33x128xf32> to vector<1x128xf32>
    %1261 = vector.broadcast %1260 : vector<1x128xf32> to vector<2x128xf32>
    %1262 = arith.addf %1259, %1261 : vector<2x128xf32>
    %cst_372 = arith.constant 5.000000e-01 : f32
    %1263 = vector.broadcast %cst_372 : f32 to vector<2x128xf32>
    %1264 = arith.mulf %1263, %1262 : vector<2x128xf32>
    %cst_373 = arith.constant 0.707106769 : f32
    %1265 = vector.broadcast %cst_373 : f32 to vector<2x128xf32>
    %1266 = arith.mulf %1262, %1265 : vector<2x128xf32>
    %cst_374 = arith.constant 0.000000e+00 : f32
    %1267 = vector.broadcast %cst_374 : f32 to vector<2x128xf32>
    %1268 = arith.cmpf oge, %1266, %1267 : vector<2x128xf32>
    %cst_375 = arith.constant 1.000000e+00 : f32
    %cst_376 = arith.constant -1.000000e+00 : f32
    %1269 = vector.broadcast %cst_375 : f32 to vector<2x128xf32>
    %1270 = vector.broadcast %cst_376 : f32 to vector<2x128xf32>
    %1271 = arith.select %1268, %1269, %1270 : vector<2x128xi1>, vector<2x128xf32>
    %1272 = math.absf %1266 : vector<2x128xf32>
    %cst_377 = arith.constant 0.327591091 : f32
    %1273 = vector.broadcast %cst_377 : f32 to vector<2x128xf32>
    %1274 = arith.mulf %1273, %1272 : vector<2x128xf32>
    %cst_378 = arith.constant 1.000000e+00 : f32
    %1275 = vector.broadcast %cst_378 : f32 to vector<2x128xf32>
    %1276 = arith.addf %1275, %1274 : vector<2x128xf32>
    %cst_379 = arith.constant 1.000000e+00 : f32
    %1277 = vector.broadcast %cst_379 : f32 to vector<2x128xf32>
    %1278 = arith.divf %1277, %1276 : vector<2x128xf32>
    %cst_380 = arith.constant 1.06140542 : f32
    %1279 = vector.broadcast %cst_380 : f32 to vector<2x128xf32>
    %1280 = arith.mulf %1279, %1278 : vector<2x128xf32>
    %cst_381 = arith.constant -1.45315206 : f32
    %1281 = vector.broadcast %cst_381 : f32 to vector<2x128xf32>
    %1282 = arith.addf %1280, %1281 : vector<2x128xf32>
    %1283 = arith.mulf %1282, %1278 : vector<2x128xf32>
    %cst_382 = arith.constant 1.42141378 : f32
    %1284 = vector.broadcast %cst_382 : f32 to vector<2x128xf32>
    %1285 = arith.addf %1283, %1284 : vector<2x128xf32>
    %1286 = arith.mulf %1285, %1278 : vector<2x128xf32>
    %cst_383 = arith.constant -0.284496725 : f32
    %1287 = vector.broadcast %cst_383 : f32 to vector<2x128xf32>
    %1288 = arith.addf %1286, %1287 : vector<2x128xf32>
    %1289 = arith.mulf %1288, %1278 : vector<2x128xf32>
    %cst_384 = arith.constant 0.254829586 : f32
    %1290 = vector.broadcast %cst_384 : f32 to vector<2x128xf32>
    %1291 = arith.addf %1289, %1290 : vector<2x128xf32>
    %1292 = arith.mulf %1291, %1278 : vector<2x128xf32>
    %cst_385 = arith.constant 0.000000e+00 : f32
    %1293 = vector.broadcast %cst_385 : f32 to vector<2x128xf32>
    %1294 = arith.subf %1293, %1272 : vector<2x128xf32>
    %1295 = arith.mulf %1294, %1272 : vector<2x128xf32>
    %1296 = math.exp %1295 : vector<2x128xf32>
    %1297 = arith.mulf %1292, %1296 : vector<2x128xf32>
    %cst_386 = arith.constant 1.000000e+00 : f32
    %1298 = vector.broadcast %cst_386 : f32 to vector<2x128xf32>
    %1299 = arith.subf %1298, %1297 : vector<2x128xf32>
    %1300 = arith.mulf %1271, %1299 : vector<2x128xf32>
    %cst_387 = arith.constant 1.000000e+00 : f32
    %1301 = vector.broadcast %cst_387 : f32 to vector<2x128xf32>
    %1302 = arith.addf %1301, %1300 : vector<2x128xf32>
    %1303 = arith.mulf %1264, %1302 : vector<2x128xf32>
    %c0_388 = arith.constant 0 : index
    %c0_389 = arith.constant 0 : index
    %1304 = vector.load %arg12[%c0_388, %c0_389] : memref<129x32xf32, #tpu.memory_space<vmem>>, vector<129x32xf32>
    %1305 = vector.extract_strided_slice %1304 {offsets = [0, 0], sizes = [128, 32], strides = [1, 1]} : vector<129x32xf32> to vector<128x32xf32>
    %cst_390 = arith.constant dense<0.000000e+00> : vector<2x32xf32>
    %1306 = tpu.matmul %1303, %1305, %cst_390 {dimension_numbers = #tpu.dot_dimension_numbers<[1], [0], [0], [1], [0, 0, 1, 1], [], []>} : vector<2x128xf32>, vector<128x32xf32>, vector<2x32xf32> -> vector<2x32xf32>
    %1307 = vector.extract_strided_slice %1304 {offsets = [128, 0], sizes = [1, 32], strides = [1, 1]} : vector<129x32xf32> to vector<1x32xf32>
    %1308 = vector.broadcast %1307 : vector<1x32xf32> to vector<2x32xf32>
    %1309 = arith.addf %1306, %1308 : vector<2x32xf32>
    %1310 = arith.addf %1256, %1309 : vector<2x32xf32>
    %c0_391 = arith.constant 0 : index
    %c0_392 = arith.constant 0 : index
    %1311 = vector.load %arg14[%c0_391, %c0_392] : memref<2x32xf32, #tpu.memory_space<vmem>>, vector<2x32xf32>
    %1312 = vector.extract_strided_slice %1311 {offsets = [0, 0], sizes = [1, 32], strides = [1, 1]} : vector<2x32xf32> to vector<1x32xf32>
    %1313 = vector.extract_strided_slice %1311 {offsets = [1, 0], sizes = [1, 32], strides = [1, 1]} : vector<2x32xf32> to vector<1x32xf32>
    %cst_393 = arith.constant dense<0.000000e+00> : vector<2xf32>
    %1314 = vector.multi_reduction <add>, %1310, %cst_393 [1] : vector<2x32xf32> to vector<2xf32>
    %1315 = vector.shape_cast %1314 : vector<2xf32> to vector<2x1xf32>
    %cst_394 = arith.constant 3.200000e+01 : f32
    %1316 = vector.broadcast %cst_394 : f32 to vector<2x1xf32>
    %1317 = arith.divf %1315, %1316 : vector<2x1xf32>
    %1318 = vector.broadcast %1317 : vector<2x1xf32> to vector<2x32xf32>
    %1319 = arith.subf %1310, %1318 : vector<2x32xf32>
    %1320 = arith.mulf %1319, %1319 : vector<2x32xf32>
    %cst_395 = arith.constant dense<0.000000e+00> : vector<2xf32>
    %1321 = vector.multi_reduction <add>, %1320, %cst_395 [1] : vector<2x32xf32> to vector<2xf32>
    %1322 = vector.shape_cast %1321 : vector<2xf32> to vector<2x1xf32>
    %cst_396 = arith.constant 3.200000e+01 : f32
    %1323 = vector.broadcast %cst_396 : f32 to vector<2x1xf32>
    %1324 = arith.divf %1322, %1323 : vector<2x1xf32>
    %cst_397 = arith.constant 9.99999974E-6 : f32
    %1325 = vector.broadcast %cst_397 : f32 to vector<2x1xf32>
    %1326 = arith.addf %1324, %1325 : vector<2x1xf32>
    %1327 = math.rsqrt %1326 : vector<2x1xf32>
    %1328 = vector.broadcast %1327 : vector<2x1xf32> to vector<2x32xf32>
    %1329 = arith.mulf %1319, %1328 : vector<2x32xf32>
    %1330 = vector.broadcast %1312 : vector<1x32xf32> to vector<2x32xf32>
    %1331 = arith.mulf %1329, %1330 : vector<2x32xf32>
    %1332 = vector.broadcast %1313 : vector<1x32xf32> to vector<2x32xf32>
    %1333 = arith.addf %1331, %1332 : vector<2x32xf32>
    %1334 = vector.extract_strided_slice %1030 {offsets = [0, 0], sizes = [1, 32], strides = [1, 1]} : vector<4x32xf32> to vector<1x32xf32>
    %1335 = vector.extract_strided_slice %1030 {offsets = [2, 0], sizes = [1, 32], strides = [1, 1]} : vector<4x32xf32> to vector<1x32xf32>
    %1336 = tpu.concatenate %1334, %1335 in 0 : vector<1x32xf32>, vector<1x32xf32> -> vector<2x32xf32>
    %1337 = tpu.concatenate %1336, %1333 in 1 : vector<2x32xf32>, vector<2x32xf32> -> vector<2x64xf32>
    %c0_398 = arith.constant 0 : index
    %c0_399 = arith.constant 0 : index
    %1338 = vector.load %arg44[%c0_398, %c0_399] : memref<65x32xf32, #tpu.memory_space<vmem>>, vector<65x32xf32>
    %1339 = vector.extract_strided_slice %1338 {offsets = [0, 0], sizes = [64, 32], strides = [1, 1]} : vector<65x32xf32> to vector<64x32xf32>
    %cst_400 = arith.constant dense<0.000000e+00> : vector<2x32xf32>
    %1340 = tpu.matmul %1337, %1339, %cst_400 {dimension_numbers = #tpu.dot_dimension_numbers<[1], [0], [0], [1], [0, 0, 1, 1], [], []>} : vector<2x64xf32>, vector<64x32xf32>, vector<2x32xf32> -> vector<2x32xf32>
    %1341 = vector.extract_strided_slice %1338 {offsets = [64, 0], sizes = [1, 32], strides = [1, 1]} : vector<65x32xf32> to vector<1x32xf32>
    %1342 = vector.broadcast %1341 : vector<1x32xf32> to vector<2x32xf32>
    %1343 = arith.addf %1340, %1342 : vector<2x32xf32>
    %c0_401 = arith.constant 0 : index
    %c0_402 = arith.constant 0 : index
    %1344 = vector.load %arg45[%c0_401, %c0_402] : memref<2x32xf32, #tpu.memory_space<vmem>>, vector<2x32xf32>
    %1345 = vector.extract_strided_slice %1344 {offsets = [0, 0], sizes = [1, 32], strides = [1, 1]} : vector<2x32xf32> to vector<1x32xf32>
    %1346 = vector.extract_strided_slice %1344 {offsets = [1, 0], sizes = [1, 32], strides = [1, 1]} : vector<2x32xf32> to vector<1x32xf32>
    %cst_403 = arith.constant dense<0.000000e+00> : vector<2xf32>
    %1347 = vector.multi_reduction <add>, %1343, %cst_403 [1] : vector<2x32xf32> to vector<2xf32>
    %1348 = vector.shape_cast %1347 : vector<2xf32> to vector<2x1xf32>
    %cst_404 = arith.constant 3.200000e+01 : f32
    %1349 = vector.broadcast %cst_404 : f32 to vector<2x1xf32>
    %1350 = arith.divf %1348, %1349 : vector<2x1xf32>
    %1351 = vector.broadcast %1350 : vector<2x1xf32> to vector<2x32xf32>
    %1352 = arith.subf %1343, %1351 : vector<2x32xf32>
    %1353 = arith.mulf %1352, %1352 : vector<2x32xf32>
    %cst_405 = arith.constant dense<0.000000e+00> : vector<2xf32>
    %1354 = vector.multi_reduction <add>, %1353, %cst_405 [1] : vector<2x32xf32> to vector<2xf32>
    %1355 = vector.shape_cast %1354 : vector<2xf32> to vector<2x1xf32>
    %cst_406 = arith.constant 3.200000e+01 : f32
    %1356 = vector.broadcast %cst_406 : f32 to vector<2x1xf32>
    %1357 = arith.divf %1355, %1356 : vector<2x1xf32>
    %cst_407 = arith.constant 9.99999974E-6 : f32
    %1358 = vector.broadcast %cst_407 : f32 to vector<2x1xf32>
    %1359 = arith.addf %1357, %1358 : vector<2x1xf32>
    %1360 = math.rsqrt %1359 : vector<2x1xf32>
    %1361 = vector.broadcast %1360 : vector<2x1xf32> to vector<2x32xf32>
    %1362 = arith.mulf %1352, %1361 : vector<2x32xf32>
    %1363 = vector.broadcast %1345 : vector<1x32xf32> to vector<2x32xf32>
    %1364 = arith.mulf %1362, %1363 : vector<2x32xf32>
    %1365 = vector.broadcast %1346 : vector<1x32xf32> to vector<2x32xf32>
    %1366 = arith.addf %1364, %1365 : vector<2x32xf32>
    %cst_408 = arith.constant 5.000000e-01 : f32
    %1367 = vector.broadcast %cst_408 : f32 to vector<2x32xf32>
    %1368 = arith.mulf %1367, %1366 : vector<2x32xf32>
    %cst_409 = arith.constant 0.707106769 : f32
    %1369 = vector.broadcast %cst_409 : f32 to vector<2x32xf32>
    %1370 = arith.mulf %1366, %1369 : vector<2x32xf32>
    %cst_410 = arith.constant 0.000000e+00 : f32
    %1371 = vector.broadcast %cst_410 : f32 to vector<2x32xf32>
    %1372 = arith.cmpf oge, %1370, %1371 : vector<2x32xf32>
    %cst_411 = arith.constant 1.000000e+00 : f32
    %cst_412 = arith.constant -1.000000e+00 : f32
    %1373 = vector.broadcast %cst_411 : f32 to vector<2x32xf32>
    %1374 = vector.broadcast %cst_412 : f32 to vector<2x32xf32>
    %1375 = arith.select %1372, %1373, %1374 : vector<2x32xi1>, vector<2x32xf32>
    %1376 = math.absf %1370 : vector<2x32xf32>
    %cst_413 = arith.constant 0.327591091 : f32
    %1377 = vector.broadcast %cst_413 : f32 to vector<2x32xf32>
    %1378 = arith.mulf %1377, %1376 : vector<2x32xf32>
    %cst_414 = arith.constant 1.000000e+00 : f32
    %1379 = vector.broadcast %cst_414 : f32 to vector<2x32xf32>
    %1380 = arith.addf %1379, %1378 : vector<2x32xf32>
    %cst_415 = arith.constant 1.000000e+00 : f32
    %1381 = vector.broadcast %cst_415 : f32 to vector<2x32xf32>
    %1382 = arith.divf %1381, %1380 : vector<2x32xf32>
    %cst_416 = arith.constant 1.06140542 : f32
    %1383 = vector.broadcast %cst_416 : f32 to vector<2x32xf32>
    %1384 = arith.mulf %1383, %1382 : vector<2x32xf32>
    %cst_417 = arith.constant -1.45315206 : f32
    %1385 = vector.broadcast %cst_417 : f32 to vector<2x32xf32>
    %1386 = arith.addf %1384, %1385 : vector<2x32xf32>
    %1387 = arith.mulf %1386, %1382 : vector<2x32xf32>
    %cst_418 = arith.constant 1.42141378 : f32
    %1388 = vector.broadcast %cst_418 : f32 to vector<2x32xf32>
    %1389 = arith.addf %1387, %1388 : vector<2x32xf32>
    %1390 = arith.mulf %1389, %1382 : vector<2x32xf32>
    %cst_419 = arith.constant -0.284496725 : f32
    %1391 = vector.broadcast %cst_419 : f32 to vector<2x32xf32>
    %1392 = arith.addf %1390, %1391 : vector<2x32xf32>
    %1393 = arith.mulf %1392, %1382 : vector<2x32xf32>
    %cst_420 = arith.constant 0.254829586 : f32
    %1394 = vector.broadcast %cst_420 : f32 to vector<2x32xf32>
    %1395 = arith.addf %1393, %1394 : vector<2x32xf32>
    %1396 = arith.mulf %1395, %1382 : vector<2x32xf32>
    %cst_421 = arith.constant 0.000000e+00 : f32
    %1397 = vector.broadcast %cst_421 : f32 to vector<2x32xf32>
    %1398 = arith.subf %1397, %1376 : vector<2x32xf32>
    %1399 = arith.mulf %1398, %1376 : vector<2x32xf32>
    %1400 = math.exp %1399 : vector<2x32xf32>
    %1401 = arith.mulf %1396, %1400 : vector<2x32xf32>
    %cst_422 = arith.constant 1.000000e+00 : f32
    %1402 = vector.broadcast %cst_422 : f32 to vector<2x32xf32>
    %1403 = arith.subf %1402, %1401 : vector<2x32xf32>
    %1404 = arith.mulf %1375, %1403 : vector<2x32xf32>
    %cst_423 = arith.constant 1.000000e+00 : f32
    %1405 = vector.broadcast %cst_423 : f32 to vector<2x32xf32>
    %1406 = arith.addf %1405, %1404 : vector<2x32xf32>
    %1407 = arith.mulf %1368, %1406 : vector<2x32xf32>
    %c0_424 = arith.constant 0 : index
    %c0_425 = arith.constant 0 : index
    %1408 = vector.load %arg19[%c0_424, %c0_425] : memref<2x32xf32, #tpu.memory_space<vmem>>, vector<2x32xf32>
    %1409 = vector.extract_strided_slice %1408 {offsets = [0, 0], sizes = [1, 32], strides = [1, 1]} : vector<2x32xf32> to vector<1x32xf32>
    %1410 = vector.extract_strided_slice %1408 {offsets = [1, 0], sizes = [1, 32], strides = [1, 1]} : vector<2x32xf32> to vector<1x32xf32>
    %cst_426 = arith.constant dense<0.000000e+00> : vector<2xf32>
    %1411 = vector.multi_reduction <add>, %1407, %cst_426 [1] : vector<2x32xf32> to vector<2xf32>
    %1412 = vector.shape_cast %1411 : vector<2xf32> to vector<2x1xf32>
    %cst_427 = arith.constant 3.200000e+01 : f32
    %1413 = vector.broadcast %cst_427 : f32 to vector<2x1xf32>
    %1414 = arith.divf %1412, %1413 : vector<2x1xf32>
    %1415 = vector.broadcast %1414 : vector<2x1xf32> to vector<2x32xf32>
    %1416 = arith.subf %1407, %1415 : vector<2x32xf32>
    %1417 = arith.mulf %1416, %1416 : vector<2x32xf32>
    %cst_428 = arith.constant dense<0.000000e+00> : vector<2xf32>
    %1418 = vector.multi_reduction <add>, %1417, %cst_428 [1] : vector<2x32xf32> to vector<2xf32>
    %1419 = vector.shape_cast %1418 : vector<2xf32> to vector<2x1xf32>
    %cst_429 = arith.constant 3.200000e+01 : f32
    %1420 = vector.broadcast %cst_429 : f32 to vector<2x1xf32>
    %1421 = arith.divf %1419, %1420 : vector<2x1xf32>
    %cst_430 = arith.constant 9.99999974E-6 : f32
    %1422 = vector.broadcast %cst_430 : f32 to vector<2x1xf32>
    %1423 = arith.addf %1421, %1422 : vector<2x1xf32>
    %1424 = math.rsqrt %1423 : vector<2x1xf32>
    %1425 = vector.broadcast %1424 : vector<2x1xf32> to vector<2x32xf32>
    %1426 = arith.mulf %1416, %1425 : vector<2x32xf32>
    %1427 = vector.broadcast %1409 : vector<1x32xf32> to vector<2x32xf32>
    %1428 = arith.mulf %1426, %1427 : vector<2x32xf32>
    %1429 = vector.broadcast %1410 : vector<1x32xf32> to vector<2x32xf32>
    %1430 = arith.addf %1428, %1429 : vector<2x32xf32>
    %c0_431 = arith.constant 0 : index
    %c0_432 = arith.constant 0 : index
    %1431 = vector.load %arg22[%c0_431, %c0_432] : memref<33x96xf32, #tpu.memory_space<vmem>>, vector<33x96xf32>
    %1432 = vector.extract_strided_slice %1431 {offsets = [0, 64], sizes = [33, 32], strides = [1, 1]} : vector<33x96xf32> to vector<33x32xf32>
    %1433 = vector.extract_strided_slice %1432 {offsets = [0, 0], sizes = [32, 32], strides = [1, 1]} : vector<33x32xf32> to vector<32x32xf32>
    %cst_433 = arith.constant dense<0.000000e+00> : vector<2x32xf32>
    %1434 = tpu.matmul %1430, %1433, %cst_433 {dimension_numbers = #tpu.dot_dimension_numbers<[1], [0], [0], [1], [0, 0, 1, 1], [], []>} : vector<2x32xf32>, vector<32x32xf32>, vector<2x32xf32> -> vector<2x32xf32>
    %1435 = vector.extract_strided_slice %1432 {offsets = [32, 0], sizes = [1, 32], strides = [1, 1]} : vector<33x32xf32> to vector<1x32xf32>
    %1436 = vector.broadcast %1435 : vector<1x32xf32> to vector<2x32xf32>
    %1437 = arith.addf %1434, %1436 : vector<2x32xf32>
    %c0_434 = arith.constant 0 : index
    %c0_435 = arith.constant 0 : index
    %1438 = vector.load %arg21[%c0_434, %c0_435] : memref<33x32xf32, #tpu.memory_space<vmem>>, vector<33x32xf32>
    %1439 = vector.extract_strided_slice %1438 {offsets = [0, 0], sizes = [32, 32], strides = [1, 1]} : vector<33x32xf32> to vector<32x32xf32>
    %cst_436 = arith.constant dense<0.000000e+00> : vector<2x32xf32>
    %1440 = tpu.matmul %1437, %1439, %cst_436 {dimension_numbers = #tpu.dot_dimension_numbers<[1], [0], [0], [1], [0, 0, 1, 1], [], []>} : vector<2x32xf32>, vector<32x32xf32>, vector<2x32xf32> -> vector<2x32xf32>
    %1441 = vector.extract_strided_slice %1438 {offsets = [32, 0], sizes = [1, 32], strides = [1, 1]} : vector<33x32xf32> to vector<1x32xf32>
    %1442 = vector.broadcast %1441 : vector<1x32xf32> to vector<2x32xf32>
    %1443 = arith.addf %1440, %1442 : vector<2x32xf32>
    %1444 = arith.addf %1407, %1443 : vector<2x32xf32>
    %c0_437 = arith.constant 0 : index
    %c0_438 = arith.constant 0 : index
    %1445 = vector.load %arg20[%c0_437, %c0_438] : memref<2x32xf32, #tpu.memory_space<vmem>>, vector<2x32xf32>
    %1446 = vector.extract_strided_slice %1445 {offsets = [0, 0], sizes = [1, 32], strides = [1, 1]} : vector<2x32xf32> to vector<1x32xf32>
    %1447 = vector.extract_strided_slice %1445 {offsets = [1, 0], sizes = [1, 32], strides = [1, 1]} : vector<2x32xf32> to vector<1x32xf32>
    %cst_439 = arith.constant dense<0.000000e+00> : vector<2xf32>
    %1448 = vector.multi_reduction <add>, %1444, %cst_439 [1] : vector<2x32xf32> to vector<2xf32>
    %1449 = vector.shape_cast %1448 : vector<2xf32> to vector<2x1xf32>
    %cst_440 = arith.constant 3.200000e+01 : f32
    %1450 = vector.broadcast %cst_440 : f32 to vector<2x1xf32>
    %1451 = arith.divf %1449, %1450 : vector<2x1xf32>
    %1452 = vector.broadcast %1451 : vector<2x1xf32> to vector<2x32xf32>
    %1453 = arith.subf %1444, %1452 : vector<2x32xf32>
    %1454 = arith.mulf %1453, %1453 : vector<2x32xf32>
    %cst_441 = arith.constant dense<0.000000e+00> : vector<2xf32>
    %1455 = vector.multi_reduction <add>, %1454, %cst_441 [1] : vector<2x32xf32> to vector<2xf32>
    %1456 = vector.shape_cast %1455 : vector<2xf32> to vector<2x1xf32>
    %cst_442 = arith.constant 3.200000e+01 : f32
    %1457 = vector.broadcast %cst_442 : f32 to vector<2x1xf32>
    %1458 = arith.divf %1456, %1457 : vector<2x1xf32>
    %cst_443 = arith.constant 9.99999974E-6 : f32
    %1459 = vector.broadcast %cst_443 : f32 to vector<2x1xf32>
    %1460 = arith.addf %1458, %1459 : vector<2x1xf32>
    %1461 = math.rsqrt %1460 : vector<2x1xf32>
    %1462 = vector.broadcast %1461 : vector<2x1xf32> to vector<2x32xf32>
    %1463 = arith.mulf %1453, %1462 : vector<2x32xf32>
    %1464 = vector.broadcast %1446 : vector<1x32xf32> to vector<2x32xf32>
    %1465 = arith.mulf %1463, %1464 : vector<2x32xf32>
    %1466 = vector.broadcast %1447 : vector<1x32xf32> to vector<2x32xf32>
    %1467 = arith.addf %1465, %1466 : vector<2x32xf32>
    %c0_444 = arith.constant 0 : index
    %c0_445 = arith.constant 0 : index
    %1468 = vector.load %arg17[%c0_444, %c0_445] : memref<33x128xf32, #tpu.memory_space<vmem>>, vector<33x128xf32>
    %1469 = vector.extract_strided_slice %1468 {offsets = [0, 0], sizes = [32, 128], strides = [1, 1]} : vector<33x128xf32> to vector<32x128xf32>
    %cst_446 = arith.constant dense<0.000000e+00> : vector<2x128xf32>
    %1470 = tpu.matmul %1467, %1469, %cst_446 {dimension_numbers = #tpu.dot_dimension_numbers<[1], [0], [0], [1], [0, 0, 1, 1], [], []>} : vector<2x32xf32>, vector<32x128xf32>, vector<2x128xf32> -> vector<2x128xf32>
    %1471 = vector.extract_strided_slice %1468 {offsets = [32, 0], sizes = [1, 128], strides = [1, 1]} : vector<33x128xf32> to vector<1x128xf32>
    %1472 = vector.broadcast %1471 : vector<1x128xf32> to vector<2x128xf32>
    %1473 = arith.addf %1470, %1472 : vector<2x128xf32>
    %cst_447 = arith.constant 5.000000e-01 : f32
    %1474 = vector.broadcast %cst_447 : f32 to vector<2x128xf32>
    %1475 = arith.mulf %1474, %1473 : vector<2x128xf32>
    %cst_448 = arith.constant 0.707106769 : f32
    %1476 = vector.broadcast %cst_448 : f32 to vector<2x128xf32>
    %1477 = arith.mulf %1473, %1476 : vector<2x128xf32>
    %cst_449 = arith.constant 0.000000e+00 : f32
    %1478 = vector.broadcast %cst_449 : f32 to vector<2x128xf32>
    %1479 = arith.cmpf oge, %1477, %1478 : vector<2x128xf32>
    %cst_450 = arith.constant 1.000000e+00 : f32
    %cst_451 = arith.constant -1.000000e+00 : f32
    %1480 = vector.broadcast %cst_450 : f32 to vector<2x128xf32>
    %1481 = vector.broadcast %cst_451 : f32 to vector<2x128xf32>
    %1482 = arith.select %1479, %1480, %1481 : vector<2x128xi1>, vector<2x128xf32>
    %1483 = math.absf %1477 : vector<2x128xf32>
    %cst_452 = arith.constant 0.327591091 : f32
    %1484 = vector.broadcast %cst_452 : f32 to vector<2x128xf32>
    %1485 = arith.mulf %1484, %1483 : vector<2x128xf32>
    %cst_453 = arith.constant 1.000000e+00 : f32
    %1486 = vector.broadcast %cst_453 : f32 to vector<2x128xf32>
    %1487 = arith.addf %1486, %1485 : vector<2x128xf32>
    %cst_454 = arith.constant 1.000000e+00 : f32
    %1488 = vector.broadcast %cst_454 : f32 to vector<2x128xf32>
    %1489 = arith.divf %1488, %1487 : vector<2x128xf32>
    %cst_455 = arith.constant 1.06140542 : f32
    %1490 = vector.broadcast %cst_455 : f32 to vector<2x128xf32>
    %1491 = arith.mulf %1490, %1489 : vector<2x128xf32>
    %cst_456 = arith.constant -1.45315206 : f32
    %1492 = vector.broadcast %cst_456 : f32 to vector<2x128xf32>
    %1493 = arith.addf %1491, %1492 : vector<2x128xf32>
    %1494 = arith.mulf %1493, %1489 : vector<2x128xf32>
    %cst_457 = arith.constant 1.42141378 : f32
    %1495 = vector.broadcast %cst_457 : f32 to vector<2x128xf32>
    %1496 = arith.addf %1494, %1495 : vector<2x128xf32>
    %1497 = arith.mulf %1496, %1489 : vector<2x128xf32>
    %cst_458 = arith.constant -0.284496725 : f32
    %1498 = vector.broadcast %cst_458 : f32 to vector<2x128xf32>
    %1499 = arith.addf %1497, %1498 : vector<2x128xf32>
    %1500 = arith.mulf %1499, %1489 : vector<2x128xf32>
    %cst_459 = arith.constant 0.254829586 : f32
    %1501 = vector.broadcast %cst_459 : f32 to vector<2x128xf32>
    %1502 = arith.addf %1500, %1501 : vector<2x128xf32>
    %1503 = arith.mulf %1502, %1489 : vector<2x128xf32>
    %cst_460 = arith.constant 0.000000e+00 : f32
    %1504 = vector.broadcast %cst_460 : f32 to vector<2x128xf32>
    %1505 = arith.subf %1504, %1483 : vector<2x128xf32>
    %1506 = arith.mulf %1505, %1483 : vector<2x128xf32>
    %1507 = math.exp %1506 : vector<2x128xf32>
    %1508 = arith.mulf %1503, %1507 : vector<2x128xf32>
    %cst_461 = arith.constant 1.000000e+00 : f32
    %1509 = vector.broadcast %cst_461 : f32 to vector<2x128xf32>
    %1510 = arith.subf %1509, %1508 : vector<2x128xf32>
    %1511 = arith.mulf %1482, %1510 : vector<2x128xf32>
    %cst_462 = arith.constant 1.000000e+00 : f32
    %1512 = vector.broadcast %cst_462 : f32 to vector<2x128xf32>
    %1513 = arith.addf %1512, %1511 : vector<2x128xf32>
    %1514 = arith.mulf %1475, %1513 : vector<2x128xf32>
    %c0_463 = arith.constant 0 : index
    %c0_464 = arith.constant 0 : index
    %1515 = vector.load %arg18[%c0_463, %c0_464] : memref<129x32xf32, #tpu.memory_space<vmem>>, vector<129x32xf32>
    %1516 = vector.extract_strided_slice %1515 {offsets = [0, 0], sizes = [128, 32], strides = [1, 1]} : vector<129x32xf32> to vector<128x32xf32>
    %cst_465 = arith.constant dense<0.000000e+00> : vector<2x32xf32>
    %1517 = tpu.matmul %1514, %1516, %cst_465 {dimension_numbers = #tpu.dot_dimension_numbers<[1], [0], [0], [1], [0, 0, 1, 1], [], []>} : vector<2x128xf32>, vector<128x32xf32>, vector<2x32xf32> -> vector<2x32xf32>
    %1518 = vector.extract_strided_slice %1515 {offsets = [128, 0], sizes = [1, 32], strides = [1, 1]} : vector<129x32xf32> to vector<1x32xf32>
    %1519 = vector.broadcast %1518 : vector<1x32xf32> to vector<2x32xf32>
    %1520 = arith.addf %1517, %1519 : vector<2x32xf32>
    %1521 = arith.addf %1444, %1520 : vector<2x32xf32>
    %c0_466 = arith.constant 0 : index
    %c0_467 = arith.constant 0 : index
    %1522 = vector.load %arg25[%c0_466, %c0_467] : memref<2x32xf32, #tpu.memory_space<vmem>>, vector<2x32xf32>
    %1523 = vector.extract_strided_slice %1522 {offsets = [0, 0], sizes = [1, 32], strides = [1, 1]} : vector<2x32xf32> to vector<1x32xf32>
    %1524 = vector.extract_strided_slice %1522 {offsets = [1, 0], sizes = [1, 32], strides = [1, 1]} : vector<2x32xf32> to vector<1x32xf32>
    %cst_468 = arith.constant dense<0.000000e+00> : vector<2xf32>
    %1525 = vector.multi_reduction <add>, %1521, %cst_468 [1] : vector<2x32xf32> to vector<2xf32>
    %1526 = vector.shape_cast %1525 : vector<2xf32> to vector<2x1xf32>
    %cst_469 = arith.constant 3.200000e+01 : f32
    %1527 = vector.broadcast %cst_469 : f32 to vector<2x1xf32>
    %1528 = arith.divf %1526, %1527 : vector<2x1xf32>
    %1529 = vector.broadcast %1528 : vector<2x1xf32> to vector<2x32xf32>
    %1530 = arith.subf %1521, %1529 : vector<2x32xf32>
    %1531 = arith.mulf %1530, %1530 : vector<2x32xf32>
    %cst_470 = arith.constant dense<0.000000e+00> : vector<2xf32>
    %1532 = vector.multi_reduction <add>, %1531, %cst_470 [1] : vector<2x32xf32> to vector<2xf32>
    %1533 = vector.shape_cast %1532 : vector<2xf32> to vector<2x1xf32>
    %cst_471 = arith.constant 3.200000e+01 : f32
    %1534 = vector.broadcast %cst_471 : f32 to vector<2x1xf32>
    %1535 = arith.divf %1533, %1534 : vector<2x1xf32>
    %cst_472 = arith.constant 9.99999974E-6 : f32
    %1536 = vector.broadcast %cst_472 : f32 to vector<2x1xf32>
    %1537 = arith.addf %1535, %1536 : vector<2x1xf32>
    %1538 = math.rsqrt %1537 : vector<2x1xf32>
    %1539 = vector.broadcast %1538 : vector<2x1xf32> to vector<2x32xf32>
    %1540 = arith.mulf %1530, %1539 : vector<2x32xf32>
    %1541 = vector.broadcast %1523 : vector<1x32xf32> to vector<2x32xf32>
    %1542 = arith.mulf %1540, %1541 : vector<2x32xf32>
    %1543 = vector.broadcast %1524 : vector<1x32xf32> to vector<2x32xf32>
    %1544 = arith.addf %1542, %1543 : vector<2x32xf32>
    %c0_473 = arith.constant 0 : index
    %c0_474 = arith.constant 0 : index
    %1545 = vector.load %arg28[%c0_473, %c0_474] : memref<33x96xf32, #tpu.memory_space<vmem>>, vector<33x96xf32>
    %1546 = vector.extract_strided_slice %1545 {offsets = [0, 64], sizes = [33, 32], strides = [1, 1]} : vector<33x96xf32> to vector<33x32xf32>
    %1547 = vector.extract_strided_slice %1546 {offsets = [0, 0], sizes = [32, 32], strides = [1, 1]} : vector<33x32xf32> to vector<32x32xf32>
    %cst_475 = arith.constant dense<0.000000e+00> : vector<2x32xf32>
    %1548 = tpu.matmul %1544, %1547, %cst_475 {dimension_numbers = #tpu.dot_dimension_numbers<[1], [0], [0], [1], [0, 0, 1, 1], [], []>} : vector<2x32xf32>, vector<32x32xf32>, vector<2x32xf32> -> vector<2x32xf32>
    %1549 = vector.extract_strided_slice %1546 {offsets = [32, 0], sizes = [1, 32], strides = [1, 1]} : vector<33x32xf32> to vector<1x32xf32>
    %1550 = vector.broadcast %1549 : vector<1x32xf32> to vector<2x32xf32>
    %1551 = arith.addf %1548, %1550 : vector<2x32xf32>
    %c0_476 = arith.constant 0 : index
    %c0_477 = arith.constant 0 : index
    %1552 = vector.load %arg27[%c0_476, %c0_477] : memref<33x32xf32, #tpu.memory_space<vmem>>, vector<33x32xf32>
    %1553 = vector.extract_strided_slice %1552 {offsets = [0, 0], sizes = [32, 32], strides = [1, 1]} : vector<33x32xf32> to vector<32x32xf32>
    %cst_478 = arith.constant dense<0.000000e+00> : vector<2x32xf32>
    %1554 = tpu.matmul %1551, %1553, %cst_478 {dimension_numbers = #tpu.dot_dimension_numbers<[1], [0], [0], [1], [0, 0, 1, 1], [], []>} : vector<2x32xf32>, vector<32x32xf32>, vector<2x32xf32> -> vector<2x32xf32>
    %1555 = vector.extract_strided_slice %1552 {offsets = [32, 0], sizes = [1, 32], strides = [1, 1]} : vector<33x32xf32> to vector<1x32xf32>
    %1556 = vector.broadcast %1555 : vector<1x32xf32> to vector<2x32xf32>
    %1557 = arith.addf %1554, %1556 : vector<2x32xf32>
    %1558 = arith.addf %1521, %1557 : vector<2x32xf32>
    %c0_479 = arith.constant 0 : index
    %c0_480 = arith.constant 0 : index
    %1559 = vector.load %arg26[%c0_479, %c0_480] : memref<2x32xf32, #tpu.memory_space<vmem>>, vector<2x32xf32>
    %1560 = vector.extract_strided_slice %1559 {offsets = [0, 0], sizes = [1, 32], strides = [1, 1]} : vector<2x32xf32> to vector<1x32xf32>
    %1561 = vector.extract_strided_slice %1559 {offsets = [1, 0], sizes = [1, 32], strides = [1, 1]} : vector<2x32xf32> to vector<1x32xf32>
    %cst_481 = arith.constant dense<0.000000e+00> : vector<2xf32>
    %1562 = vector.multi_reduction <add>, %1558, %cst_481 [1] : vector<2x32xf32> to vector<2xf32>
    %1563 = vector.shape_cast %1562 : vector<2xf32> to vector<2x1xf32>
    %cst_482 = arith.constant 3.200000e+01 : f32
    %1564 = vector.broadcast %cst_482 : f32 to vector<2x1xf32>
    %1565 = arith.divf %1563, %1564 : vector<2x1xf32>
    %1566 = vector.broadcast %1565 : vector<2x1xf32> to vector<2x32xf32>
    %1567 = arith.subf %1558, %1566 : vector<2x32xf32>
    %1568 = arith.mulf %1567, %1567 : vector<2x32xf32>
    %cst_483 = arith.constant dense<0.000000e+00> : vector<2xf32>
    %1569 = vector.multi_reduction <add>, %1568, %cst_483 [1] : vector<2x32xf32> to vector<2xf32>
    %1570 = vector.shape_cast %1569 : vector<2xf32> to vector<2x1xf32>
    %cst_484 = arith.constant 3.200000e+01 : f32
    %1571 = vector.broadcast %cst_484 : f32 to vector<2x1xf32>
    %1572 = arith.divf %1570, %1571 : vector<2x1xf32>
    %cst_485 = arith.constant 9.99999974E-6 : f32
    %1573 = vector.broadcast %cst_485 : f32 to vector<2x1xf32>
    %1574 = arith.addf %1572, %1573 : vector<2x1xf32>
    %1575 = math.rsqrt %1574 : vector<2x1xf32>
    %1576 = vector.broadcast %1575 : vector<2x1xf32> to vector<2x32xf32>
    %1577 = arith.mulf %1567, %1576 : vector<2x32xf32>
    %1578 = vector.broadcast %1560 : vector<1x32xf32> to vector<2x32xf32>
    %1579 = arith.mulf %1577, %1578 : vector<2x32xf32>
    %1580 = vector.broadcast %1561 : vector<1x32xf32> to vector<2x32xf32>
    %1581 = arith.addf %1579, %1580 : vector<2x32xf32>
    %c0_486 = arith.constant 0 : index
    %c0_487 = arith.constant 0 : index
    %1582 = vector.load %arg23[%c0_486, %c0_487] : memref<33x128xf32, #tpu.memory_space<vmem>>, vector<33x128xf32>
    %1583 = vector.extract_strided_slice %1582 {offsets = [0, 0], sizes = [32, 128], strides = [1, 1]} : vector<33x128xf32> to vector<32x128xf32>
    %cst_488 = arith.constant dense<0.000000e+00> : vector<2x128xf32>
    %1584 = tpu.matmul %1581, %1583, %cst_488 {dimension_numbers = #tpu.dot_dimension_numbers<[1], [0], [0], [1], [0, 0, 1, 1], [], []>} : vector<2x32xf32>, vector<32x128xf32>, vector<2x128xf32> -> vector<2x128xf32>
    %1585 = vector.extract_strided_slice %1582 {offsets = [32, 0], sizes = [1, 128], strides = [1, 1]} : vector<33x128xf32> to vector<1x128xf32>
    %1586 = vector.broadcast %1585 : vector<1x128xf32> to vector<2x128xf32>
    %1587 = arith.addf %1584, %1586 : vector<2x128xf32>
    %cst_489 = arith.constant 5.000000e-01 : f32
    %1588 = vector.broadcast %cst_489 : f32 to vector<2x128xf32>
    %1589 = arith.mulf %1588, %1587 : vector<2x128xf32>
    %cst_490 = arith.constant 0.707106769 : f32
    %1590 = vector.broadcast %cst_490 : f32 to vector<2x128xf32>
    %1591 = arith.mulf %1587, %1590 : vector<2x128xf32>
    %cst_491 = arith.constant 0.000000e+00 : f32
    %1592 = vector.broadcast %cst_491 : f32 to vector<2x128xf32>
    %1593 = arith.cmpf oge, %1591, %1592 : vector<2x128xf32>
    %cst_492 = arith.constant 1.000000e+00 : f32
    %cst_493 = arith.constant -1.000000e+00 : f32
    %1594 = vector.broadcast %cst_492 : f32 to vector<2x128xf32>
    %1595 = vector.broadcast %cst_493 : f32 to vector<2x128xf32>
    %1596 = arith.select %1593, %1594, %1595 : vector<2x128xi1>, vector<2x128xf32>
    %1597 = math.absf %1591 : vector<2x128xf32>
    %cst_494 = arith.constant 0.327591091 : f32
    %1598 = vector.broadcast %cst_494 : f32 to vector<2x128xf32>
    %1599 = arith.mulf %1598, %1597 : vector<2x128xf32>
    %cst_495 = arith.constant 1.000000e+00 : f32
    %1600 = vector.broadcast %cst_495 : f32 to vector<2x128xf32>
    %1601 = arith.addf %1600, %1599 : vector<2x128xf32>
    %cst_496 = arith.constant 1.000000e+00 : f32
    %1602 = vector.broadcast %cst_496 : f32 to vector<2x128xf32>
    %1603 = arith.divf %1602, %1601 : vector<2x128xf32>
    %cst_497 = arith.constant 1.06140542 : f32
    %1604 = vector.broadcast %cst_497 : f32 to vector<2x128xf32>
    %1605 = arith.mulf %1604, %1603 : vector<2x128xf32>
    %cst_498 = arith.constant -1.45315206 : f32
    %1606 = vector.broadcast %cst_498 : f32 to vector<2x128xf32>
    %1607 = arith.addf %1605, %1606 : vector<2x128xf32>
    %1608 = arith.mulf %1607, %1603 : vector<2x128xf32>
    %cst_499 = arith.constant 1.42141378 : f32
    %1609 = vector.broadcast %cst_499 : f32 to vector<2x128xf32>
    %1610 = arith.addf %1608, %1609 : vector<2x128xf32>
    %1611 = arith.mulf %1610, %1603 : vector<2x128xf32>
    %cst_500 = arith.constant -0.284496725 : f32
    %1612 = vector.broadcast %cst_500 : f32 to vector<2x128xf32>
    %1613 = arith.addf %1611, %1612 : vector<2x128xf32>
    %1614 = arith.mulf %1613, %1603 : vector<2x128xf32>
    %cst_501 = arith.constant 0.254829586 : f32
    %1615 = vector.broadcast %cst_501 : f32 to vector<2x128xf32>
    %1616 = arith.addf %1614, %1615 : vector<2x128xf32>
    %1617 = arith.mulf %1616, %1603 : vector<2x128xf32>
    %cst_502 = arith.constant 0.000000e+00 : f32
    %1618 = vector.broadcast %cst_502 : f32 to vector<2x128xf32>
    %1619 = arith.subf %1618, %1597 : vector<2x128xf32>
    %1620 = arith.mulf %1619, %1597 : vector<2x128xf32>
    %1621 = math.exp %1620 : vector<2x128xf32>
    %1622 = arith.mulf %1617, %1621 : vector<2x128xf32>
    %cst_503 = arith.constant 1.000000e+00 : f32
    %1623 = vector.broadcast %cst_503 : f32 to vector<2x128xf32>
    %1624 = arith.subf %1623, %1622 : vector<2x128xf32>
    %1625 = arith.mulf %1596, %1624 : vector<2x128xf32>
    %cst_504 = arith.constant 1.000000e+00 : f32
    %1626 = vector.broadcast %cst_504 : f32 to vector<2x128xf32>
    %1627 = arith.addf %1626, %1625 : vector<2x128xf32>
    %1628 = arith.mulf %1589, %1627 : vector<2x128xf32>
    %c0_505 = arith.constant 0 : index
    %c0_506 = arith.constant 0 : index
    %1629 = vector.load %arg24[%c0_505, %c0_506] : memref<129x32xf32, #tpu.memory_space<vmem>>, vector<129x32xf32>
    %1630 = vector.extract_strided_slice %1629 {offsets = [0, 0], sizes = [128, 32], strides = [1, 1]} : vector<129x32xf32> to vector<128x32xf32>
    %cst_507 = arith.constant dense<0.000000e+00> : vector<2x32xf32>
    %1631 = tpu.matmul %1628, %1630, %cst_507 {dimension_numbers = #tpu.dot_dimension_numbers<[1], [0], [0], [1], [0, 0, 1, 1], [], []>} : vector<2x128xf32>, vector<128x32xf32>, vector<2x32xf32> -> vector<2x32xf32>
    %1632 = vector.extract_strided_slice %1629 {offsets = [128, 0], sizes = [1, 32], strides = [1, 1]} : vector<129x32xf32> to vector<1x32xf32>
    %1633 = vector.broadcast %1632 : vector<1x32xf32> to vector<2x32xf32>
    %1634 = arith.addf %1631, %1633 : vector<2x32xf32>
    %1635 = arith.addf %1558, %1634 : vector<2x32xf32>
    %c0_508 = arith.constant 0 : index
    %c0_509 = arith.constant 0 : index
    %1636 = vector.load %arg2[%c0_508, %c0_509] : memref<33x16xf32, #tpu.memory_space<vmem>>, vector<33x16xf32>
    %1637 = vector.extract_strided_slice %1636 {offsets = [0, 0], sizes = [32, 16], strides = [1, 1]} : vector<33x16xf32> to vector<32x16xf32>
    %cst_510 = arith.constant dense<0.000000e+00> : vector<2x16xf32>
    %1638 = tpu.matmul %1635, %1637, %cst_510 {dimension_numbers = #tpu.dot_dimension_numbers<[1], [0], [0], [1], [0, 0, 1, 1], [], []>} : vector<2x32xf32>, vector<32x16xf32>, vector<2x16xf32> -> vector<2x16xf32>
    %1639 = vector.extract_strided_slice %1636 {offsets = [32, 0], sizes = [1, 16], strides = [1, 1]} : vector<33x16xf32> to vector<1x16xf32>
    %1640 = vector.broadcast %1639 : vector<1x16xf32> to vector<2x16xf32>
    %1641 = arith.addf %1638, %1640 : vector<2x16xf32>
    %c0_511 = arith.constant 0 : index
    %c0_512 = arith.constant 0 : index
    %1642 = vector.load %arg4[%c0_511, %c0_512] : memref<2x16xf32, #tpu.memory_space<vmem>>, vector<2x16xf32>
    %1643 = vector.extract_strided_slice %1642 {offsets = [0, 0], sizes = [1, 16], strides = [1, 1]} : vector<2x16xf32> to vector<1x16xf32>
    %1644 = vector.extract_strided_slice %1642 {offsets = [1, 0], sizes = [1, 16], strides = [1, 1]} : vector<2x16xf32> to vector<1x16xf32>
    %cst_513 = arith.constant dense<0.000000e+00> : vector<2xf32>
    %1645 = vector.multi_reduction <add>, %1641, %cst_513 [1] : vector<2x16xf32> to vector<2xf32>
    %1646 = vector.shape_cast %1645 : vector<2xf32> to vector<2x1xf32>
    %cst_514 = arith.constant 1.600000e+01 : f32
    %1647 = vector.broadcast %cst_514 : f32 to vector<2x1xf32>
    %1648 = arith.divf %1646, %1647 : vector<2x1xf32>
    %1649 = vector.broadcast %1648 : vector<2x1xf32> to vector<2x16xf32>
    %1650 = arith.subf %1641, %1649 : vector<2x16xf32>
    %1651 = arith.mulf %1650, %1650 : vector<2x16xf32>
    %cst_515 = arith.constant dense<0.000000e+00> : vector<2xf32>
    %1652 = vector.multi_reduction <add>, %1651, %cst_515 [1] : vector<2x16xf32> to vector<2xf32>
    %1653 = vector.shape_cast %1652 : vector<2xf32> to vector<2x1xf32>
    %cst_516 = arith.constant 1.600000e+01 : f32
    %1654 = vector.broadcast %cst_516 : f32 to vector<2x1xf32>
    %1655 = arith.divf %1653, %1654 : vector<2x1xf32>
    %cst_517 = arith.constant 9.99999974E-6 : f32
    %1656 = vector.broadcast %cst_517 : f32 to vector<2x1xf32>
    %1657 = arith.addf %1655, %1656 : vector<2x1xf32>
    %1658 = math.rsqrt %1657 : vector<2x1xf32>
    %1659 = vector.broadcast %1658 : vector<2x1xf32> to vector<2x16xf32>
    %1660 = arith.mulf %1650, %1659 : vector<2x16xf32>
    %1661 = vector.broadcast %1643 : vector<1x16xf32> to vector<2x16xf32>
    %1662 = arith.mulf %1660, %1661 : vector<2x16xf32>
    %1663 = vector.broadcast %1644 : vector<1x16xf32> to vector<2x16xf32>
    %1664 = arith.addf %1662, %1663 : vector<2x16xf32>
    %cst_518 = arith.constant 5.000000e-01 : f32
    %1665 = vector.broadcast %cst_518 : f32 to vector<2x16xf32>
    %1666 = arith.mulf %1665, %1664 : vector<2x16xf32>
    %cst_519 = arith.constant 0.707106769 : f32
    %1667 = vector.broadcast %cst_519 : f32 to vector<2x16xf32>
    %1668 = arith.mulf %1664, %1667 : vector<2x16xf32>
    %cst_520 = arith.constant 0.000000e+00 : f32
    %1669 = vector.broadcast %cst_520 : f32 to vector<2x16xf32>
    %1670 = arith.cmpf oge, %1668, %1669 : vector<2x16xf32>
    %cst_521 = arith.constant 1.000000e+00 : f32
    %cst_522 = arith.constant -1.000000e+00 : f32
    %1671 = vector.broadcast %cst_521 : f32 to vector<2x16xf32>
    %1672 = vector.broadcast %cst_522 : f32 to vector<2x16xf32>
    %1673 = arith.select %1670, %1671, %1672 : vector<2x16xi1>, vector<2x16xf32>
    %1674 = math.absf %1668 : vector<2x16xf32>
    %cst_523 = arith.constant 0.327591091 : f32
    %1675 = vector.broadcast %cst_523 : f32 to vector<2x16xf32>
    %1676 = arith.mulf %1675, %1674 : vector<2x16xf32>
    %cst_524 = arith.constant 1.000000e+00 : f32
    %1677 = vector.broadcast %cst_524 : f32 to vector<2x16xf32>
    %1678 = arith.addf %1677, %1676 : vector<2x16xf32>
    %cst_525 = arith.constant 1.000000e+00 : f32
    %1679 = vector.broadcast %cst_525 : f32 to vector<2x16xf32>
    %1680 = arith.divf %1679, %1678 : vector<2x16xf32>
    %cst_526 = arith.constant 1.06140542 : f32
    %1681 = vector.broadcast %cst_526 : f32 to vector<2x16xf32>
    %1682 = arith.mulf %1681, %1680 : vector<2x16xf32>
    %cst_527 = arith.constant -1.45315206 : f32
    %1683 = vector.broadcast %cst_527 : f32 to vector<2x16xf32>
    %1684 = arith.addf %1682, %1683 : vector<2x16xf32>
    %1685 = arith.mulf %1684, %1680 : vector<2x16xf32>
    %cst_528 = arith.constant 1.42141378 : f32
    %1686 = vector.broadcast %cst_528 : f32 to vector<2x16xf32>
    %1687 = arith.addf %1685, %1686 : vector<2x16xf32>
    %1688 = arith.mulf %1687, %1680 : vector<2x16xf32>
    %cst_529 = arith.constant -0.284496725 : f32
    %1689 = vector.broadcast %cst_529 : f32 to vector<2x16xf32>
    %1690 = arith.addf %1688, %1689 : vector<2x16xf32>
    %1691 = arith.mulf %1690, %1680 : vector<2x16xf32>
    %cst_530 = arith.constant 0.254829586 : f32
    %1692 = vector.broadcast %cst_530 : f32 to vector<2x16xf32>
    %1693 = arith.addf %1691, %1692 : vector<2x16xf32>
    %1694 = arith.mulf %1693, %1680 : vector<2x16xf32>
    %cst_531 = arith.constant 0.000000e+00 : f32
    %1695 = vector.broadcast %cst_531 : f32 to vector<2x16xf32>
    %1696 = arith.subf %1695, %1674 : vector<2x16xf32>
    %1697 = arith.mulf %1696, %1674 : vector<2x16xf32>
    %1698 = math.exp %1697 : vector<2x16xf32>
    %1699 = arith.mulf %1694, %1698 : vector<2x16xf32>
    %cst_532 = arith.constant 1.000000e+00 : f32
    %1700 = vector.broadcast %cst_532 : f32 to vector<2x16xf32>
    %1701 = arith.subf %1700, %1699 : vector<2x16xf32>
    %1702 = arith.mulf %1673, %1701 : vector<2x16xf32>
    %cst_533 = arith.constant 1.000000e+00 : f32
    %1703 = vector.broadcast %cst_533 : f32 to vector<2x16xf32>
    %1704 = arith.addf %1703, %1702 : vector<2x16xf32>
    %1705 = arith.mulf %1666, %1704 : vector<2x16xf32>
    %c0_534 = arith.constant 0 : index
    %c0_535 = arith.constant 0 : index
    %1706 = vector.load %arg3[%c0_534, %c0_535] : memref<17x2xf32, #tpu.memory_space<vmem>>, vector<17x2xf32>
    %1707 = vector.extract_strided_slice %1706 {offsets = [0, 0], sizes = [16, 2], strides = [1, 1]} : vector<17x2xf32> to vector<16x2xf32>
    %cst_536 = arith.constant dense<0.000000e+00> : vector<2x2xf32>
    %1708 = tpu.matmul %1705, %1707, %cst_536 {dimension_numbers = #tpu.dot_dimension_numbers<[1], [0], [0], [1], [0, 0, 1, 1], [], []>} : vector<2x16xf32>, vector<16x2xf32>, vector<2x2xf32> -> vector<2x2xf32>
    %1709 = vector.extract_strided_slice %1706 {offsets = [16, 0], sizes = [1, 2], strides = [1, 1]} : vector<17x2xf32> to vector<1x2xf32>
    %1710 = vector.broadcast %1709 : vector<1x2xf32> to vector<2x2xf32>
    %1711 = arith.addf %1708, %1710 : vector<2x2xf32>
    %c0_537 = arith.constant 0 : index
    %c0_538 = arith.constant 0 : index
    %1712 = vector.load %arg60[%c0_537, %c0_538] : memref<2x2xf32, #tpu.memory_space<vmem>>, vector<2x2xf32>
    tpu.vector_store %arg60[%c0_537, %c0_538], %1711 {strides = array<i32>} : memref<2x2xf32, #tpu.memory_space<vmem>>, vector<2x2xf32>,
    return
  }
}

</mosaic_0001>

<bundles_post_ra>
// kernel: fwd.1
= control target key start
LH: loop header
LB: loop body
LE: loop exit
PB: predicated region body
PF: predicated region fallthrough
CT: control target
= control target key end

     0   :  { %s9665_s6 = smov 1   ;;  %s9666_s10 = smov 2   ;;  %s11303_s0 = inlined_call_operand.smem [shape: u32[61], index: -1, kind: input, shape index: {}] }
   0x1   :  { %s9752_s5 = sld [smem:[%s11303_s0]]   ;;  %s9667_s14 = smov 3  }
   0x2   :  { %s9757_s9 = sld [smem:[%s11303_s0 + %s9665_s6]]   ;;  %s9668_s18 = smov 4  }
   0x3   :  { %s9762_s13 = sld [smem:[%s11303_s0 + %s9666_s10]]   ;;  %s9669_s22 = smov 5  }
   0x4   :  { %s9767_s17 = sld [smem:[%s11303_s0 + %s9667_s14]]   ;;  %s9670_s26 = smov 6  }
   0x5   :  { %s9772_s21 = sld [smem:[%s11303_s0 + %s9668_s18]]   ;;  %s9671_s30 = smov 7  }
   0x6   :  { %s9777_s25 = sld [smem:[%s11303_s0 + %s9669_s22]]   ;;  %s9672_s4 = smov 8  }
   0x7   :  { %s9782_s29 = sld [smem:[%s11303_s0 + %s9670_s26]]   ;;  %s9673_s10 = smov 9  }
   0x8   :  { %11334 = sst [smem:[#allocation16_spill]] %s9757_s9  ;;  %s9674_s15 = smov 10  }
   0x9   :  { %11335 = sst [smem:[#allocation17_spill]] %s9762_s13  ;;  %s9675_s20 = smov 11  }
   0xa   :  { %11336 = sst [smem:[#allocation18_spill]] %s9767_s17  ;;  %s9676_s26 = smov 12  }
   0xb   :  { %11337 = sst [smem:[#allocation19_spill]] %s9772_s21  ;;  %s9677_s1 = smov 13  }
   0xc   :  { %11338 = sst [smem:[#allocation20_spill]] %s9777_s25  ;;  %s9678_s7 = smov 14  }
   0xd   :  { %11339 = sst [smem:[#allocation21_spill]] %s9782_s29  ;;  %s9680_s22 = smov 16  }
   0xe   :  { %s9787_s3 = sld [smem:[%s11303_s0 + %s9671_s30]]   ;;  %s9681_s28 = smov 17  }
   0xf   :  { %s9792_s8 = sld [smem:[%s11303_s0 + %s9672_s4]]  }
  0x10   :  { %s9797_s14 = sld [smem:[%s11303_s0 + %s9673_s10]]  }
  0x11   :  { %s9802_s19 = sld [smem:[%s11303_s0 + %s9674_s15]]   ;;  %s9679_s15 = smov 15  }
  0x12   :  { %s9807_s24 = sld [smem:[%s11303_s0 + %s9675_s20]]  }
  0x13   :  { %s9812_s30 = sld [smem:[%s11303_s0 + %s9676_s26]]  }
  0x14   :  { %11340 = sst [smem:[#allocation22_spill]] %s9787_s3 }
  0x15   :  { %11341 = sst [smem:[#allocation23_spill]] %s9792_s8 }
  0x16   :  { %11342 = sst [smem:[#allocation24_spill]] %s9797_s14 }
  0x17   :  { %11343 = sst [smem:[#allocation25_spill]] %s9802_s19 }
  0x18   :  { %11344 = sst [smem:[#allocation26_spill]] %s9807_s24 }
  0x19   :  { %11345 = sst [smem:[#allocation27_spill]] %s9812_s30 }
  0x1a   :  { %s9817_s6 = sld [smem:[%s11303_s0 + %s9677_s1]]  }
  0x1b   :  { %s9822_s12 = sld [smem:[%s11303_s0 + %s9678_s7]]   ;;  %s9682_s7 = smov 18  }
  0x1c   :  { %s9827_s20 = sld [smem:[%s11303_s0 + %s9679_s15]]   ;;  %s9683_s15 = smov 19  }
  0x1d   :  { %s9832_s27 = sld [smem:[%s11303_s0 + %s9680_s22]]   ;;  %s9684_s22 = smov 20  }
  0x1e   :  { %s9837_s4 = sld [smem:[%s11303_s0 + %s9681_s28]]   ;;  %s9685_s28 = smov 21  }
  0x1f   :  { %s9842_s21 = sld [smem:[%s11303_s0 + %s9682_s7]]   ;;  %s9686_s7 = smov 22  }
  0x20   :  { %11346 = sst [smem:[#allocation28_spill]] %s9817_s6 }
  0x21   :  { %11347 = sst [smem:[#allocation29_spill]] %s9822_s12 }
  0x22   :  { %11348 = sst [smem:[#allocation30_spill]] %s9827_s20 }
  0x23   :  { %11349 = sst [smem:[#allocation31_spill]] %s9832_s27 }
  0x24   :  { %11350 = sst [smem:[#allocation32_spill]] %s9837_s4 }
  0x25   :  { %11351 = sst [smem:[#allocation33_spill]] %s9842_s21 }
  0x26   :  { %s9847_s17 = sld [smem:[%s11303_s0 + %s9683_s15]]   ;;  %s9687_s15 = smov 23  }
  0x27   :  { %s9852_s13 = sld [smem:[%s11303_s0 + %s9684_s22]]   ;;  %s9688_s22 = smov 24  }
  0x28   :  { %s9857_s4 = sld [smem:[%s11303_s0 + %s9685_s28]]   ;;  %s9689_s28 = smov 25  }
  0x29   :  { %s9862_s21 = sld [smem:[%s11303_s0 + %s9686_s7]]   ;;  %s9690_s7 = smov 26  }
  0x2c   :  { %11352 = sst [smem:[#allocation34_spill]] %s9847_s17 }
  0x2d   :  { %11353 = sst [smem:[#allocation35_spill]] %s9852_s13 }
  0x2e   :  { %11354 = sst [smem:[#allocation36_spill]] %s9857_s4 }
  0x2f   :  { %11355 = sst [smem:[#allocation37_spill]] %s9862_s21 }
  0x30   :  { %s9867_s17 = sld [smem:[%s11303_s0 + %s9687_s15]]   ;;  %s9691_s15 = smov 27  }
  0x31   :  { %s9872_s13 = sld [smem:[%s11303_s0 + %s9688_s22]]   ;;  %s9692_s22 = smov 28  }
  0x32   :  { %s9877_s4 = sld [smem:[%s11303_s0 + %s9689_s28]]   ;;  %s9693_s28 = smov 29  }
  0x33   :  { %s9882_s21 = sld [smem:[%s11303_s0 + %s9690_s7]]   ;;  %s9694_s7 = smov 30  }
  0x36   :  { %11356 = sst [smem:[#allocation38_spill]] %s9867_s17 }
  0x37   :  { %11357 = sst [smem:[#allocation39_spill]] %s9872_s13 }
  0x38   :  { %11358 = sst [smem:[#allocation40_spill]] %s9877_s4 }
  0x39   :  { %11359 = sst [smem:[#allocation41_spill]] %s9882_s21 }
  0x3a   :  { %s9887_s17 = sld [smem:[%s11303_s0 + %s9691_s15]]   ;;  %s9695_s15 = smov 31  }
  0x3b   :  { %s9892_s13 = sld [smem:[%s11303_s0 + %s9692_s22]]   ;;  %s9696_s22 = smov 32  }
  0x3c   :  { %s9897_s4 = sld [smem:[%s11303_s0 + %s9693_s28]]   ;;  %s9697_s28 = smov 33  }
  0x3d   :  { %s9902_s21 = sld [smem:[%s11303_s0 + %s9694_s7]]   ;;  %s9698_s7 = smov 34  }
  0x3e   :  { %s9917_s12 = sld [smem:[%s11303_s0 + %s9697_s28]]   ;;  %s9701_s28 = smov 37  }
  0x3f   :  { %s9922_s30 = sld [smem:[%s11303_s0 + %s9698_s7]]   ;;  %s9702_s7 = smov 38  }
  0x40   :  { %11360 = sst [smem:[#allocation42_spill]] %s9887_s17 }
  0x41   :  { %11361 = sst [smem:[#allocation43_spill]] %s9892_s13 }
  0x42   :  { %s9907_s17 = sld [smem:[%s11303_s0 + %s9695_s15]]   ;;  %s9699_s15 = smov 35  }
  0x43   :  { %s9912_s13 = sld [smem:[%s11303_s0 + %s9696_s22]]   ;;  %s9700_s22 = smov 36  }
  0x44   :  { %s9927_s6 = sld [smem:[%s11303_s0 + %s9699_s15]]   ;;  %s9703_s15 = smov 39  }
  0x45   :  { %s9932_s24 = sld [smem:[%s11303_s0 + %s9700_s22]]   ;;  %s9704_s22 = smov 40  }
  0x46   :  { %s9937_s20 = sld [smem:[%s11303_s0 + %s9701_s28]]   ;;  %s9705_s28 = smov 41  }
  0x47   :  { %s9942_s8 = sld [smem:[%s11303_s0 + %s9702_s7]]   ;;  %s9706_s7 = smov 42  }
  0x48   :  { %s9947_s29 = sld [smem:[%s11303_s0 + %s9703_s15]]   ;;  %s9707_s15 = smov 43  }
  0x49   :  { %s9952_s3 = sld [smem:[%s11303_s0 + %s9704_s22]]   ;;  %s9708_s22 = smov 44  }
  0x4a   :  { %s9957_s25 = sld [smem:[%s11303_s0 + %s9705_s28]]   ;;  %s9709_s28 = smov 45  }
  0x4b   :  { %11362 = sst [smem:[#allocation44_spill]] %s9932_s24 }
  0x4c   :  { %11363 = sst [smem:[#allocation45_spill]] %s9937_s20 }
  0x4d   :  { %11364 = sst [smem:[#allocation46_spill]] %s9942_s8 }
  0x4e   :  { %11365 = sst [smem:[#allocation47_spill]] %s9947_s29 }
  0x4f   :  { %11366 = sst [smem:[#allocation48_spill]] %s9952_s3 }
  0x50   :  { %s9962_s14 = sld [smem:[%s11303_s0 + %s9706_s7]]   ;;  %s9710_s7 = smov 46  }
  0x51   :  { %s9967_s27 = sld [smem:[%s11303_s0 + %s9707_s15]]   ;;  %s9711_s15 = smov 47  }
  0x52   :  { %s9972_s19 = sld [smem:[%s11303_s0 + %s9708_s22]]   ;;  %s9712_s22 = smov 48  }
  0x53   :  { %s9977_s20 = sld [smem:[%s11303_s0 + %s9709_s28]]   ;;  %s9713_s28 = smov 49  }
  0x54   :  { %s9982_s9 = sld [smem:[%s11303_s0 + %s9710_s7]]   ;;  %s9714_s7 = smov 50  }
  0x55   :  { %s9987_s29 = sld [smem:[%s11303_s0 + %s9711_s15]]   ;;  %s9715_s15 = smov 51  }
  0x58   :  { %11367 = sst [smem:[#allocation49_spill]] %s9972_s19 }
  0x59   :  { %11368 = sst [smem:[#allocation50_spill]] %s9977_s20 }
  0x5a   :  { %11369 = sst [smem:[#allocation51_spill]] %s9982_s9 }
  0x5b   :  { %11370 = sst [smem:[#allocation52_spill]] %s9987_s29 }
  0x5c   :  { %s9992_s19 = sld [smem:[%s11303_s0 + %s9712_s22]]   ;;  %s9716_s22 = smov 52  }
  0x5d   :  { %s9997_s20 = sld [smem:[%s11303_s0 + %s9713_s28]]   ;;  %s9717_s28 = smov 53  }
  0x5e   :  { %s10002_s9 = sld [smem:[%s11303_s0 + %s9714_s7]]   ;;  %s9718_s7 = smov 54  }
  0x5f   :  { %s10007_s29 = sld [smem:[%s11303_s0 + %s9715_s15]]   ;;  %s9719_s15 = smov 55  }
  0x60   :  { %s10017_s24 = sld [smem:[%s11303_s0 + %s9717_s28]]   ;;  %s9721_s28 = smov 57  }
  0x62   :  { %11371 = sst [smem:[#allocation53_spill]] %s9992_s19 }
  0x63   :  { %s10012_s19 = sld [smem:[%s11303_s0 + %s9716_s22]]   ;;  %s9720_s22 = smov 56  }
  0x64   :  { %11372 = sst [smem:[#allocation54_spill]] %s10002_s9 }
  0x65   :  { %11373 = sst [smem:[#allocation55_spill]] %s10007_s29 }
  0x66   :  { %11375 = sst [smem:[#allocation57_spill]] %s10017_s24 }
  0x67   :  { %s10022_s9 = sld [smem:[%s11303_s0 + %s9718_s7]]   ;;  %s9722_s7 = smov 58  }
  0x68   :  { %s10027_s29 = sld [smem:[%s11303_s0 + %s9719_s15]]   ;;  %s9723_s15 = smov 59  }
  0x69   :  { %11374 = sst [smem:[#allocation56_spill]] %s10012_s19 }
  0x6a   :  { %s10032_s19 = sld [smem:[%s11303_s0 + %s9720_s22]]   ;;  %s9724_s22 = smov 60  }
  0x6b   :  { %s10037_s24 = sld [smem:[%s11303_s0 + %s9721_s28]]  }
  0x6c   :  { %s10042_s3 = sld [smem:[%s11303_s0 + %s9722_s7]]  }
  0x6d   :  { %s10047_s8 = sld [smem:[%s11303_s0 + %s9723_s15]]  }
  0x70   :  { %11376 = sst [smem:[#allocation58_spill]] %s10032_s19 }
  0x71   :  { %s10052_s19 = sld [smem:[%s11303_s0 + %s9724_s22]]  }
  0x72   :  { %126 = vsyncpa [#allocation3], 0 }
  0x73   :  { %127 = vsyncpa [#allocation6], 0 }
  0x74   :  { %128 = vsyncpa [#allocation9], 0 }
  0x75   :  { %129 = vsyncpa [#allocation4], 0  ;;  %s9725_s28 = smov [#allocation5]   ;;  %s9726_s2 = smov [#allocation8]  }
  0x76   :  { %s242_s1 = sshll.u32 %s9725_s28, 4  ;;  %s270_s7 = sshll.u32 %s9726_s2, 4  ;;  %s243_s1 = int_to_ptr.vmem [resolvable:$true] %s242_s1  ;;  %s271_s7 = int_to_ptr.vmem [resolvable:$true] %s270_s7 }
  0x77   :  { %s9525_s10 = scalar_lea.hbm %s9997_s20, 32 }
  0x78   :  { %p9526_p0 = scmp.ne.s32.totalorder %s9997_s20, %s9525_s10  ;;  %p9529_p1 = scmp.lt.u32.totalorder %s9525_s10, %s9997_s20 }
  0x7a   :  { %p9531_p2 = pnand %p9529_p1, %p9526_p0 }
  0x7c   :  { %9534 = shalt.err (!%p9531_p2)
}
  0x7d   :  { %s9535_s0 = scalar_lea.vmem %s243_s1, 32  ;;  %p9540_p4 = scmp.lt.s32.totalorder %s243_s1, %s243_s1 }
  0x7e   :  { %p9536_p3 = scmp.ne.s32.totalorder %s243_s1, %s9535_s0  ;;  %p9541_p5 = scmp.lt.s32.totalorder %s9535_s0, %s9535_s0 }
  0x80   :  { %p9542_p6 = por %p9541_p5, %p9540_p4 }
  0x82   :  { %p9543_p7 = pnand %p9542_p6, %p9536_p3 }
  0x84   :  { %9546 = shalt.err (!%p9543_p7)
}
  0x85   :  { %245 = dma.hbm_to_vmem [thread:$0]  %s9997_s20, 32, %s243_s1, [#allocation6]  }
  0x86   :  { %s9547_s11 = scalar_lea.hbm %s10027_s29, 32 }
  0x87   :  { %p9548_p8 = scmp.ne.s32.totalorder %s10027_s29, %s9547_s11  ;;  %p9551_p9 = scmp.lt.u32.totalorder %s9547_s11, %s10027_s29 }
  0x89   :  { %p9553_p10 = pnand %p9551_p9, %p9548_p8 }
  0x8b   :  { %9556 = shalt.err (!%p9553_p10)
}
  0x8c   :  { %s9557_s15 = scalar_lea.vmem %s271_s7, 32  ;;  %p9562_p12 = scmp.lt.s32.totalorder %s271_s7, %s271_s7 }
  0x8d   :  { %p9558_p11 = scmp.ne.s32.totalorder %s271_s7, %s9557_s15  ;;  %p9563_p13 = scmp.lt.s32.totalorder %s9557_s15, %s9557_s15 }
  0x8f   :  { %p9564_p0 = por %p9563_p13, %p9562_p12 }
  0x91   :  { %p9565_p1 = pnand %p9564_p0, %p9558_p11 }
  0x93   :  { %9568 = shalt.err (!%p9565_p1)
}
  0x94   :  { %273 = dma.hbm_to_vmem [thread:$0]  %s10027_s29, 32, %s271_s7, [#allocation9]  }
  0x95   :  { %s9727_s16 = smov [#allocation2]   ;;  %s9728_s20 = smov [#allocation7]  }
  0x96   :  { %s194_s18 = sshll.u32 %s9727_s16, 4  ;;  %s260_s22 = sshll.u32 %s9728_s20, 4  ;;  %s195_s18 = int_to_ptr.vmem [resolvable:$true] %s194_s18  ;;  %s261_s22 = int_to_ptr.vmem [resolvable:$true] %s260_s22 }
  0x97   :  { %s9569_s23 = scalar_lea.hbm %s9897_s4, 16 }
  0x98   :  { %p9570_p2 = scmp.ne.s32.totalorder %s9897_s4, %s9569_s23  ;;  %p9573_p3 = scmp.lt.u32.totalorder %s9569_s23, %s9897_s4 }
  0x9a   :  { %p9575_p4 = pnand %p9573_p3, %p9570_p2 }
  0x9c   :  { %9578 = shalt.err (!%p9575_p4)
}
  0x9d   :  { %s9579_s26 = scalar_lea.vmem %s195_s18, 16  ;;  %s9583_s28 = scalar_lea.vmem %s195_s18, 32 }
  0x9e   :  { %p9580_p5 = scmp.ne.s32.totalorder %s195_s18, %s9579_s26  ;;  %p9584_p6 = scmp.lt.s32.totalorder %s195_s18, %s195_s18 }
  0x9f   :  { %p9585_p7 = scmp.lt.s32.totalorder %s9583_s28, %s9579_s26 }
  0xa1   :  { %p9586_p8 = por %p9585_p7, %p9584_p6 }
  0xa3   :  { %p9587_p9 = pnand %p9586_p8, %p9580_p5 }
  0xa5   :  { %9590 = shalt.err (!%p9587_p9)
}
  0xa6   :  { %197 = dma.hbm_to_vmem [thread:$0]  %s9897_s4, 16, %s195_s18, [#allocation3]  }
  0xa7   :  { %s9591_s29 = scalar_lea.hbm %s10022_s9, 32 }
  0xa8   :  { %p9592_p10 = scmp.ne.s32.totalorder %s10022_s9, %s9591_s29  ;;  %p9595_p11 = scmp.lt.u32.totalorder %s9591_s29, %s10022_s9 }
  0xaa   :  { %p9597_p12 = pnand %p9595_p11, %p9592_p10 }
  0xac   :  { %9600 = shalt.err (!%p9597_p12)
}
  0xad   :  { %s9601_s1 = scalar_lea.vmem %s261_s22, 32  ;;  %p9606_p0 = scmp.lt.s32.totalorder %s261_s22, %s261_s22 }
  0xae   :  { %p9602_p13 = scmp.ne.s32.totalorder %s261_s22, %s9601_s1  ;;  %p9607_p1 = scmp.lt.s32.totalorder %s9601_s1, %s9601_s1 }
  0xb0   :  { %p9608_p2 = por %p9607_p1, %p9606_p0 }
  0xb2   :  { %p9609_p3 = pnand %p9608_p2, %p9602_p13 }
  0xb4   :  { %9612 = shalt.err (!%p9609_p3)
}
  0xb5   :  { %263 = dma.hbm_to_vmem [thread:$0]  %s10022_s9, 32, %s261_s22, [#allocation6]  }
  0xb6   :  { %s9729_s2 = smov [#allocation10]   ;;  %s9613_s4 = scalar_lea.hbm %s10042_s3, 16 }
  0xb7   :  { %s284_s7 = sshll.u32 %s9729_s2, 4  ;;  %p9614_p4 = scmp.ne.s32.totalorder %s10042_s3, %s9613_s4  ;;  %s285_s7 = int_to_ptr.vmem [resolvable:$true] %s284_s7 }
  0xb8   :  { %p9617_p5 = scmp.lt.u32.totalorder %s9613_s4, %s10042_s3 }
  0xba   :  { %p9619_p6 = pnand %p9617_p5, %p9614_p4 }
  0xbc   :  { %9622 = shalt.err (!%p9619_p6)
}
  0xbd   :  { %s9623_s10 = scalar_lea.vmem %s285_s7, 16  ;;  %s9627_s0 = scalar_lea.vmem %s285_s7, 32 }
  0xbe   :  { %p9624_p7 = scmp.ne.s32.totalorder %s285_s7, %s9623_s10  ;;  %p9628_p8 = scmp.lt.s32.totalorder %s285_s7, %s285_s7 }
  0xbf   :  { %p9629_p9 = scmp.lt.s32.totalorder %s9627_s0, %s9623_s10 }
  0xc1   :  { %p9630_p10 = por %p9629_p9, %p9628_p8 }
  0xc3   :  { %p9631_p11 = pnand %p9630_p10, %p9624_p7 }
  0xc5   :  { %9634 = shalt.err (!%p9631_p11)
}
  0xc6   :  { %287 = dma.hbm_to_vmem [thread:$0]  %s10042_s3, 16, %s285_s7, [#allocation9]  }
  0xc7   :  { %9657 = dma.done.wait [#allocation3], 16  }
  0xc8   :  { %9658 = vsyncadd [#allocation3], 4294967280 }
  0xc9   :  { %9659 = dma.done.wait [#allocation6], 64  }
  0xca   :  { %9660 = vsyncadd [#allocation6], 4294967232 }
  0xcb   :  { %9661 = dma.done.wait [#allocation9], 48  }
  0xcc   :  { %9662 = vsyncadd [#allocation9], 4294967248  ;;  %v9730_v0 = vmov 0.0|0.0   ;;  %vm9731_vm0 = vmmov 0   ;;  %v9732_v1 = vmov 0.0   ;;  %v307_v2 = vld [vmem:[%s9962_s14] sm:$0xff]  ;;  %v408_v24 = vlaneseq }
  0xcd   :  { %8754 = vmatprep.subr.bf16.mxu0 %v9730_v0  ;;  %7971 = vmatprep.mubr.msk.f32.mxu0 %vm9731_vm0, %v9732_v1  ;;  %v308_v3 = vld [vmem:[%s9962_s14 + $0x8] sm:$0xff]  ;;  %v309_v4 = vld [vmem:[%s9962_s14 + $0x10] sm:$0xff]  ;;  %v310_v6 = vld [vmem:[%s9962_s14 + $0x18] sm:$0xff]  ;;  %vm318_vm1 = vcmask 392192   ;;  %vm393_vm2 = vcmask 254976   ;;  %vm430_vm3 = vcmask 1040384  }
  0xce   :  { %8763 = vmatprep.subr.bf16.mxu1 %v9730_v0  ;;  %7982 = vmatprep.mubr.msk.f32.mxu1 %vm9731_vm0, %v9732_v1  ;;  %v8755_v5 = vpack.c.bf16 %v308_v3, %v307_v2  ;;  %v8758_v7 = vpack.c.bf16 %v310_v6, %v309_v4  ;;  %v311_v8 = vld [vmem:[%s9962_s14 + $0x20] sm:$0xff]  ;;  %v312_v9 = vld [vmem:[%s9962_s14 + $0x28] sm:$0xff]  ;;  %v7474_v12 = vld [vmem:[%s9962_s14 + $0x30] ss:$0 sm:$0xff]  ;;  %v10095_v26 = vshrl.u32 %v408_v24, 7  ;;  %vm432_vm4 = vcmask 1041408  }
  0xcf   :  { %v8761_v10 = vpack.c.bf16 %v312_v9, %v311_v8  ;;  %v305_v11 = vld [vmem:[%s9752_s5] sm:$0x3]  ;;  %vm11333_vm5 = vcmask 1042432   ;;  %vm437_vm6 = vcmask 257024   ;;  %v462_v45 = vld [vmem:[%s9927_s6 + $0x8] sm:$0xff]  ;;  %s9733_s5 = smov 96  }
  0xd0   :  { %8756 = vmatpush3.bf16.msra.mxu0 %v8755_v5  ;;  %v10098_v27 = vsub.s32 0, %v10095_v26  ;;  %v392_v28 = vld [vmem:[%s9967_s27] sm:$0x3]  ;;  %v10102_v29 = vsub.s32 1, %v10095_v26  ;;  %v463_v47 = vld [vmem:[%s9927_s6 + $0x10] sm:$0xff]  ;;  %v464_v48 = vld [vmem:[%s9927_s6 + $0x18] sm:$0xff] }
  0xd1   :  { %8757 = vmatprep.subr.bf16.mxu0 %v9730_v0  ;;  %v418_v35 = vld [vmem:[#allocation2] sm:$0x1]  ;;  %v9256_v49 = vpack.i.bf16 %v464_v48, %v463_v47  ;;  %s9734_s9 = smov 64   ;;  %v8767_v57 = vpack.c.bf16 %v464_v48, %v463_v47  ;;  %vm470_vm7 = vcmask 261120   ;;  %s9736_s3 = smov 112   ;;  %vm724_vm8 = vcmask 58368  }
  0xd2   :  { %v411_v30 = vrot.slane %v392_v28, %v10098_v27  ;;  %v416_v33 = vrot.slane %v392_v28, %v10102_v29  ;;  %v426_v37 = vrot.slane %v418_v35, %v10098_v27  ;;  %v461_v44 = vld [vmem:[%s9927_s6] sm:$0xff]  ;;  %v1161_v28 = vsub.s32 3, %v10095_v26  ;;  %s9737_s14 = smov 104   ;;  %s9739_s27 = smov 16  }
  0xd3   :  { %v9241_v46 = vpack.i.bf16 %v462_v45, %v461_v44  ;;  %v10124_v55 = vld [vmem:[%s9927_s6 + $0x20] ss:$0 sm:$0xff]  ;;  %v8764_v56 = vpack.c.bf16 %v462_v45, %v461_v44  ;;  %vm1155_vm9 = vcmask 60418   ;;  %vm736_vm10 = vcmask 7168   ;;  %s9738_s6 = smov 8   ;;  %s9740_s11 = smov 24  }
  0xd4   :  { %8759 = vmatpush3.bf16.msra.mxu0 %v8758_v7  ;;  %v436_v62 = vld [vmem:[%s9912_s13] sm:$0x3]  ;;  %s9735_s13 = smov 120   ;;  %vm738_vm11 = vcmask 9216   ;;  %vm1168_vm12 = vcmask 11266   ;;  %vm750_vm13 = vcmask 15360  }
  0xd5   :  { %8760 = vmatprep.subr.bf16.mxu0 %v9730_v0  ;;  %8765 = vmatpush3.bf16.msra.mxu1 %v8764_v56  ;;  %v454_v3 = vrot.slane %v436_v62, %v10098_v27  ;;  %v459_v8 = vrot.slane %v436_v62, %v10102_v29  ;;  %vm1146_vm14 = vcmask 130048   ;;  %vm1144_vm15 = vcmask 64512   ;;  %s11382_s15 = sld [smem:[#allocation45_spill]]  ;;  %s11385_s18 = sld [smem:[#allocation54_spill]] }
  0xd6   :  { %8766 = vmatprep.subr.bf16.mxu1 %v9730_v0  ;;  %s11384_s16 = sld [smem:[#allocation53_spill]]  ;;  %s11386_s20 = sld [smem:[#allocation51_spill]] }
  0xd7   :  { %s11387_s22 = sld [smem:[#allocation52_spill]]  ;;  %s11388_s23 = sld [smem:[#allocation58_spill]] }
  0xd8   :  { %8762 = vmatpush3.bf16.msra.mxu0 %v8761_v10  ;;  %s11390_s26 = sld [smem:[#allocation57_spill]]  ;;  %s11392_s29 = sld [smem:[#allocation31_spill]] }
  0xd9   :  { %8012 = vmatprep.subr.mxu0 %v9732_v1  ;;  %8768 = vmatpush3.bf16.msra.mxu1 %v8767_v57  ;;  %s11391_s28 = sld [smem:[#allocation25_spill]]  ;;  %s11393_s1 = sld [smem:[#allocation24_spill]] }
  0xda   :  { %8769 = vmatprep.subr.bf16.mxu1 %v9730_v0  ;;  %s11394_s2 = sld [smem:[#allocation20_spill]]  ;;  %s11396_s7 = sld [smem:[#allocation22_spill]] }
  0xdb   :  { %7972 = vmatmul.mubr.msk.f32.vlgmr.msra.gmra.mrb[0].mxu0 %vm318_vm1, %v305_v11  ;;  %vm1148_vm1 = vcmask 195584   ;;  %s11397_s4 = sld [smem:[#allocation21_spill]]  ;;  %s11398_s10 = sld [smem:[#allocation23_spill]] }
  0xdc   :  { %8014 = vmatprep.mubr.msk.f32.mxu0 %vm9731_vm0, %v9732_v1  ;;  %s11399_s0 = sld [smem:[#allocation30_spill]] }
 0x1ae   :  { %v388_v13 = vpop.f32.mrb[0].mxu0 }
 0x1af   :  { %v389_v14 = vadd.f32 %v7474_v12, %v388_v13  ;;  %v7973_v15 = vpop.f32.mrb[1].mxu0 }
 0x1b1   :  { %v394_v16 = vsel %vm393_vm2, %v389_v14, 0.0 }
 0x1b2   :  { %395 = vadd.xlane.f32.xlu0 %v394_v16 }
 0x23f   :  { %v396_v17 = vpop.xlane.xlu0 %395 }
 0x240   :  { %v398_v18 = vmul.f32 0.03125, %v396_v17 }
 0x242   :  { %v399_v19 = vsub.f32 %v389_v14, %v398_v18 }
 0x244   :  { %v400_v20 = vmul.f32 %v399_v19, %v399_v19 }
 0x246   :  { %v401_v21 = vsel %vm393_vm2, %v400_v20, 0.0 }
 0x247   :  { %402 = vadd.xlane.f32.xlu0 %v401_v21 }
 0x25d   :  { %9242 = vrot.lane.b32.xlu0 %v9241_v46, %s9733_s5 }
 0x261   :  { %9257 = vrot.lane.b32.xlu0 %v9256_v49, %s9734_s9 }
 0x2d4   :  { %v403_v22 = vpop.xlane.xlu0 %402 }
 0x2d5   :  { %v404_v23 = vmul.f32 0.03125, %v403_v22 }
 0x2d7   :  { %v405_v25 = vadd.f32 1e-05, %v404_v23 }
 0x2d8   :  { %v9243_v63 = vpop.permute.xlu0 %9242 }
 0x2d9   :  { %9351 = vrsqrt.f32 %v405_v25  ;;  %v9245_v5 = vunpack.i.h.bf16 %v9243_v63  ;;  %v9244_v6 = vunpack.i.l.bf16 %v9243_v63  ;;  %v1152_v25 = vsub.s32 2, %v10095_v26 }
 0x2db   :  { %v8770_v12 = vpack.c.bf16 %v9245_v5, %v9244_v6 }
 0x2dc   :  { %v9258_v18 = vpop.permute.xlu0 %9257 }
 0x2dd   :  { %v9260_v20 = vunpack.i.h.bf16 %v9258_v18  ;;  %v9259_v21 = vunpack.i.l.bf16 %v9258_v18 }
 0x2df   :  { %v8779_v22 = vpack.c.bf16 %v9260_v20, %v9259_v21 }
 0x2e3   :  { %v9352_v31 = vpop.eup %9351 }
 0x2e4   :  { %v407_v32 = vmul.f32 %v9352_v31, %v399_v19 }
 0x2e6   :  { %v412_v34 = vmul.f32 %v411_v30, %v407_v32 }
 0x2e8   :  { %v417_v36 = vadd.f32 %v416_v33, %v412_v34 }
 0x2ea   :  { %v420_v38 = vrot.slane %v417_v36, 7  ;;  %v428_v39 = vrot.slane %v417_v36, 6 }
 0x2ec   :  { %v431_v40 = vsel %vm430_vm3, %v418_v35, %v420_v38 }
 0x2ed   :  { %v433_v41 = vsel %vm432_vm4, %v431_v40, %v426_v37 }
 0x2ee   :  { %v10110_v42 = vsel %vm11333_vm5, %v433_v41, %v428_v39 }
 0x2ef   :  { %v438_v43 = vsel %vm437_vm6, %v10110_v42, 0.0 }
 0x2f0   :  { %439 = vadd.xlane.f32.xlu1 %v438_v43 }
 0x37d   :  { %v440_v50 = vpop.xlane.xlu1 %439 }
 0x37e   :  { %v441_v51 = vmul.f32 0.03125, %v440_v50 }
 0x380   :  { %v442_v52 = vsub.f32 %v10110_v42, %v441_v51 }
 0x382   :  { %v443_v53 = vmul.f32 %v442_v52, %v442_v52 }
 0x384   :  { %v444_v54 = vsel %vm437_vm6, %v443_v53, 0.0 }
 0x385   :  { %445 = vadd.xlane.f32.xlu1 %v444_v54 }
 0x396   :  { %9247 = vrot.lane.b32.xlu1 %v9256_v49, %s9733_s5 }
 0x39a   :  { %561 = vrot.lane.b32.xlu1 %v10124_v55, %s9733_s5 }
 0x39e   :  { %9252 = vrot.lane.b32.xlu1 %v9241_v46, %s9734_s9 }
 0x412   :  { %v446_v58 = vpop.xlane.xlu1 %445 }
 0x413   :  { %v447_v59 = vmul.f32 0.03125, %v446_v58 }
 0x415   :  { %v448_v60 = vadd.f32 1e-05, %v447_v59 }
 0x416   :  { %v9248_v61 = vpop.permute.xlu1 %9247 }
 0x417   :  { %9353 = vrsqrt.f32 %v448_v60  ;;  %v9250_v10 = vunpack.i.h.bf16 %v9248_v61  ;;  %v9249_v11 = vunpack.i.l.bf16 %v9248_v61 }
 0x419   :  { %v8773_v15 = vpack.c.bf16 %v9250_v10, %v9249_v11 }
 0x41a   :  { %v562_v2 = vpop.permute.xlu1 %561 }
 0x41e   :  { %v9253_v14 = vpop.permute.xlu1 %9252 }
 0x41f   :  { %v9255_v16 = vunpack.i.h.bf16 %v9253_v14  ;;  %v9254_v17 = vunpack.i.l.bf16 %v9253_v14 }
 0x421   :  { %v9354_v4 = vpop.eup %9353  ;;  %v8776_v19 = vpack.c.bf16 %v9255_v16, %v9254_v17 }
 0x422   :  { %v450_v7 = vmul.f32 %v9354_v4, %v442_v52 }
 0x424   :  { %v455_v9 = vmul.f32 %v454_v3, %v450_v7 }
 0x426   :  { %v460_v13 = vadd.f32 %v459_v8, %v455_v9 }
 0x428   :  { %7983 = vmatmul.mubr.msk.f32.vlgmr.msra.gmra.mrb[0].mxu1 %vm470_vm7, %v460_v13 }
 0x429   :  { %8771 = vmatpush3.bf16.msra.mxu1 %v8770_v12  ;;  %7993 = vmatprep.mubr.msk.f32.mxu1 %vm9731_vm0, %v9732_v1 }
 0x42a   :  { %8772 = vmatprep.subr.bf16.mxu1 %v9730_v0 }
 0x42d   :  { %8774 = vmatpush3.bf16.msra.mxu1 %v8773_v15 }
 0x42e   :  { %8775 = vmatprep.subr.bf16.mxu1 %v9730_v0 }
 0x430   :  { %7994 = vmatmul.mubr.msk.f32.vlgmr.msra.gmra.mrb[2].mxu1 %vm470_vm7, %v460_v13 }
 0x431   :  { %8777 = vmatpush3.bf16.msra.mxu1 %v8776_v19  ;;  %8004 = vmatprep.mubr.msk.f32.mxu1 %vm9731_vm0, %v9732_v1 }
 0x432   :  { %8778 = vmatprep.subr.bf16.mxu1 %v9730_v0 }
 0x435   :  { %8780 = vmatpush3.bf16.msra.mxu1 %v8779_v22 }
 0x436   :  { %8007 = vmatprep.subr.mxu1 %v9732_v1 }
 0x438   :  { %8005 = vmatmul.mubr.msk.f32.vlgmr.msra.gmra.mrb[4].mxu1 %vm470_vm7, %v460_v13 }
 0x439   :  { %8009 = vmatprep.mubr.msk.f32.mxu1 %vm9731_vm0, %v9732_v1 }
 0x4fb   :  { %v540_v23 = vpop.f32.mrb[0].mxu1 }
 0x4fc   :  { %v7984_v24 = vpop.f32.mrb[1].mxu1  ;;  %v541_v33 = vadd.f32 %v10124_v55, %v540_v23 }
 0x503   :  { %v630_v30 = vpop.f32.mrb[2].mxu1 }
 0x504   :  { %v631_v31 = vadd.f32 %v630_v30, %v562_v2  ;;  %v7995_v32 = vpop.f32.mrb[3].mxu1 }
 0x506   :  { %v722_v34 = vrot.slane %v631_v31, %v10098_v27  ;;  %v731_v35 = vrot.slane %v631_v31, %v10102_v29  ;;  %v1153_v36 = vrot.slane %v631_v31, %v1152_v25  ;;  %v1162_v37 = vrot.slane %v631_v31, %v1161_v28 }
 0x508   :  { %v732_v38 = vmul.f32 %v731_v35, %v541_v33  ;;  %v723_v39 = vmul.f32 %v722_v34, %v541_v33  ;;  %v1163_v40 = vmul.f32 %v1162_v37, %v541_v33  ;;  %v1154_v41 = vmul.f32 %v1153_v36, %v541_v33 }
 0x50a   :  { %835 = vrot.lane.b32.xlu0 %v732_v38, %s9735_s13  ;;  %828 = vrot.lane.b32.xlu1 %v723_v39, %s9735_s13  ;;  %v733_v45 = vsel %vm724_vm8, %v732_v38, 0.0  ;;  %v1164_v46 = vsel %vm1155_vm9, %v1163_v40, 0.0  ;;  %v725_v47 = vsel %vm724_vm8, %v723_v39, 0.0  ;;  %v1156_v48 = vsel %vm1155_vm9, %v1154_v41, 0.0 }
 0x50b   :  { %v10158_v43 = vpop.f32.mrb[4].mxu1 }
 0x50c   :  { %v8006_v44 = vpop.f32.mrb[5].mxu1 }
 0x50e   :  { %936 = vrot.lane.b32.xlu0 %v732_v38, %s9736_s3  ;;  %930 = vrot.lane.b32.xlu1 %v723_v39, %s9736_s3 }
 0x512   :  { %1037 = vrot.lane.b32.xlu0 %v732_v38, %s9737_s14  ;;  %1031 = vrot.lane.b32.xlu1 %v723_v39, %s9737_s14 }
 0x516   :  { %1265 = vrot.lane.b32.xlu0 %v1163_v40, %s9735_s13  ;;  %1258 = vrot.lane.b32.xlu1 %v1154_v41, %s9735_s13 }
 0x51a   :  { %1367 = vrot.lane.b32.xlu0 %v1163_v40, %s9736_s3  ;;  %1361 = vrot.lane.b32.xlu1 %v1154_v41, %s9736_s3 }
 0x51e   :  { %1469 = vrot.lane.b32.xlu0 %v1163_v40, %s9737_s14  ;;  %1463 = vrot.lane.b32.xlu1 %v1154_v41, %s9737_s14 }
 0x53d   :  { %734 = vadd.xlane.f32.xlu0 %v733_v45 }
 0x541   :  { %1165 = vadd.xlane.f32.xlu0 %v1164_v46 }
 0x542   :  { %726 = vadd.xlane.f32.xlu1 %v725_v47 }
 0x546   :  { %1157 = vadd.xlane.f32.xlu1 %v1156_v48 }
 0x57c   :  { %v836_v49 = vpop.permute.xlu0 %835  ;;  %v829_v50 = vpop.permute.xlu1 %828 }
 0x57d   :  { %v831_v51 = vsel %vm724_vm8, %v829_v50, 0.0  ;;  %v838_v54 = vsel %vm724_vm8, %v836_v49, 0.0 }
 0x57e   :  { %832 = vadd.xlane.f32.xlu0 %v831_v51 }
 0x580   :  { %v937_v52 = vpop.permute.xlu0 %936  ;;  %v931_v53 = vpop.permute.xlu1 %930 }
 0x581   :  { %v933_v56 = vsel %vm724_vm8, %v931_v53, 0.0  ;;  %v939_v59 = vsel %vm724_vm8, %v937_v52, 0.0 }
 0x582   :  { %839 = vadd.xlane.f32.xlu0 %v838_v54  ;;  %934 = vadd.xlane.f32.xlu1 %v933_v56 }
 0x584   :  { %v1038_v57 = vpop.permute.xlu0 %1037  ;;  %v1032_v58 = vpop.permute.xlu1 %1031 }
 0x585   :  { %v1034_v60 = vsel %vm724_vm8, %v1032_v58, 0.0  ;;  %v1040_v63 = vsel %vm724_vm8, %v1038_v57, 0.0 }
 0x586   :  { %940 = vadd.xlane.f32.xlu0 %v939_v59  ;;  %1035 = vadd.xlane.f32.xlu1 %v1034_v60 }
 0x588   :  { %v1266_v61 = vpop.permute.xlu0 %1265  ;;  %v1259_v62 = vpop.permute.xlu1 %1258 }
 0x589   :  { %v1261_v2 = vsel %vm1155_vm9, %v1259_v62, 0.0  ;;  %v1268_v5 = vsel %vm1155_vm9, %v1266_v61, 0.0 }
 0x58a   :  { %1041 = vadd.xlane.f32.xlu0 %v1040_v63  ;;  %1262 = vadd.xlane.f32.xlu1 %v1261_v2 }
 0x58c   :  { %v1368_v3 = vpop.permute.xlu0 %1367  ;;  %v1362_v4 = vpop.permute.xlu1 %1361 }
 0x58d   :  { %v1364_v6 = vsel %vm1155_vm9, %v1362_v4, 0.0  ;;  %v1370_v8 = vsel %vm1155_vm9, %v1368_v3, 0.0 }
 0x58e   :  { %1269 = vadd.xlane.f32.xlu0 %v1268_v5  ;;  %1365 = vadd.xlane.f32.xlu1 %v1364_v6 }
 0x590   :  { %v1464_v7 = vpop.permute.xlu1 %1463  ;;  %v1470_v10 = vpop.permute.xlu0 %1469 }
 0x591   :  { %v1466_v9 = vsel %vm1155_vm9, %v1464_v7, 0.0  ;;  %v1472_v11 = vsel %vm1155_vm9, %v1470_v10, 0.0 }
 0x592   :  { %1371 = vadd.xlane.f32.xlu0 %v1370_v8  ;;  %1467 = vadd.xlane.f32.xlu1 %v1466_v9 }
 0x596   :  { %1473 = vadd.xlane.f32.xlu0 %v1472_v11 }
 0x5ca   :  { %v735_v12 = vpop.xlane.xlu0 %734 }
 0x5ce   :  { %v1166_v16 = vpop.xlane.xlu0 %1165 }
 0x5cf   :  { %v727_v13 = vpop.xlane.xlu1 %726 }
 0x5d0   :  { %v737_v14 = vsel %vm736_vm10, %v727_v13, %v735_v12 }
 0x5d1   :  { %v739_v15 = vsel %vm738_vm11, %v737_v14, -inf }
 0x5d2   :  { %740 = vmax.xlane.f32.xlu1 %v739_v15 }
 0x5d3   :  { %v1158_v17 = vpop.xlane.xlu1 %1157 }
 0x5d4   :  { %v1167_v32 = vsel %vm736_vm10, %v1158_v17, %v1166_v16 }
 0x5d5   :  { %v1169_v36 = vsel %vm1168_vm12, %v1167_v32, -inf }
 0x60b   :  { %v833_v18 = vpop.xlane.xlu0 %832 }
 0x60f   :  { %v840_v19 = vpop.xlane.xlu0 %839  ;;  %v935_v20 = vpop.xlane.xlu1 %934 }
 0x610   :  { %v841_v21 = vsel %vm736_vm10, %v833_v18, %v840_v19 }
 0x611   :  { %v842_v22 = vsel %vm738_vm11, %v841_v21, -inf }
 0x612   :  { %843 = vmax.xlane.f32.xlu0 %v842_v22 }
 0x613   :  { %v941_v23 = vpop.xlane.xlu0 %940  ;;  %v1036_v24 = vpop.xlane.xlu1 %1035 }
 0x614   :  { %v942_v30 = vsel %vm736_vm10, %v935_v20, %v941_v23 }
 0x615   :  { %v943_v31 = vsel %vm738_vm11, %v942_v30, -inf }
 0x616   :  { %944 = vmax.xlane.f32.xlu1 %v943_v31 }
 0x617   :  { %v1042_v33 = vpop.xlane.xlu0 %1041  ;;  %v1263_v35 = vpop.xlane.xlu1 %1262 }
 0x618   :  { %v1043_v34 = vsel %vm736_vm10, %v1036_v24, %v1042_v33 }
 0x619   :  { %v1044_v37 = vsel %vm738_vm11, %v1043_v34, -inf }
 0x61a   :  { %1170 = vmax.xlane.f32.xlu1 %v1169_v36  ;;  %1045 = vmax.xlane.f32.xlu0 %v1044_v37 }
 0x61b   :  { %v1270_v38 = vpop.xlane.xlu0 %1269  ;;  %v1366_v41 = vpop.xlane.xlu1 %1365 }
 0x61c   :  { %v1271_v39 = vsel %vm736_vm10, %v1263_v35, %v1270_v38 }
 0x61d   :  { %v1272_v40 = vsel %vm1168_vm12, %v1271_v39, -inf }
 0x61e   :  { %1273 = vmax.xlane.f32.xlu0 %v1272_v40 }
 0x61f   :  { %v1372_v44 = vpop.xlane.xlu0 %1371  ;;  %v1468_v47 = vpop.xlane.xlu1 %1467 }
 0x620   :  { %v1373_v45 = vsel %vm736_vm10, %v1366_v41, %v1372_v44 }
 0x621   :  { %v1374_v46 = vsel %vm1168_vm12, %v1373_v45, -inf }
 0x622   :  { %1375 = vmax.xlane.f32.xlu1 %v1374_v46 }
 0x623   :  { %v1474_v60 = vpop.xlane.xlu0 %1473 }
 0x633   :  { %646 = vrot.lane.b32.xlu1 %v10124_v55, %s9734_s9 }
 0x65f   :  { %v741_v48 = vpop.xlane.xlu1 %740 }
 0x660   :  { %v742_v58 = vsub.f32 %v737_v14, %v741_v48 }
 0x662   :  { %v743_v59 = vmul.f32 1.442695, %v742_v58 }
 0x69f   :  { %v844_v3 = vpop.xlane.xlu0 %843 }
 0x6a0   :  { %v845_v4 = vsub.f32 %v841_v21, %v844_v3 }
 0x6a2   :  { %v846_v6 = vmul.f32 1.442695, %v845_v4 }
 0x6a3   :  { %v945_v49 = vpop.xlane.xlu1 %944 }
 0x6a4   :  { %v946_v7 = vsub.f32 %v942_v30, %v945_v49 }
 0x6a6   :  { %v947_v8 = vmul.f32 1.442695, %v946_v7 }
 0x6a7   :  { %v1171_v50 = vpop.xlane.xlu1 %1170  ;;  %v1046_v5 = vpop.xlane.xlu0 %1045 }
 0x6a8   :  { %v1172_v51 = vsub.f32 %v1167_v32, %v1171_v50  ;;  %v1047_v9 = vsub.f32 %v1043_v34, %v1046_v5 }
 0x6aa   :  { %v1173_v52 = vmul.f32 1.442695, %v1172_v51  ;;  %v1048_v11 = vmul.f32 1.442695, %v1047_v9 }
 0x6ab   :  { %v1274_v10 = vpop.xlane.xlu0 %1273 }
 0x6ac   :  { %9355 = vpow2.f32 %v1173_v52  ;;  %v1275_v12 = vsub.f32 %v1271_v39, %v1274_v10 }
 0x6ad   :  { %9357 = vpow2.f32 %v743_v59 }
 0x6ae   :  { %9359 = vpow2.f32 %v846_v6  ;;  %v1276_v13 = vmul.f32 1.442695, %v1275_v12 }
 0x6af   :  { %v1376_v53 = vpop.xlane.xlu1 %1375  ;;  %9361 = vpow2.f32 %v947_v8 }
 0x6b0   :  { %9363 = vpow2.f32 %v1048_v11  ;;  %v1377_v14 = vsub.f32 %v1373_v45, %v1376_v53 }
 0x6b1   :  { %9365 = vpow2.f32 %v1276_v13 }
 0x6b2   :  { %v1378_v16 = vmul.f32 1.442695, %v1377_v14 }
 0x6b3   :  { %v647_v54 = vpop.permute.xlu1 %646 }
 0x6b4   :  { %v716_v56 = vadd.f32 %v10158_v43, %v647_v54  ;;  %v1475_v43 = vsel %vm736_vm10, %v1468_v47, %v1474_v60  ;;  %9367 = vpow2.f32 %v1378_v16  ;;  %v1585_v16 = vld [vmem:[%s9922_s30 + $0x8] sm:$0xff] }
 0x6b5   :  { %v1476_v61 = vsel %vm1168_vm12, %v1475_v43, -inf }
 0x6b6   :  { %853 = vrot.lane.b32.xlu0 %v716_v56, %s9735_s13  ;;  %8008 = vmatpush3.msk.msra.mxu1 %vm432_vm4, %v716_v56  ;;  %v10205_v57 = vpop.eup %9355  ;;  %v10215_v2 = vrot.slane %v716_v56, 2 }
 0x6b7   :  { %8017 = vmatprep.subr.mxu1 %v9732_v1  ;;  %v1175_v55 = vsel %vm1168_vm12, %v10205_v57, 0.0  ;;  %v9358_v62 = vpop.eup %9357 }
 0x6b8   :  { %1176 = vadd.xlane.f32.xlu1 %v1175_v55  ;;  %v745_v63 = vsel %vm738_vm11, %v9358_v62, 0.0  ;;  %v9360_v15 = vpop.eup %9359 }
 0x6b9   :  { %v848_v17 = vsel %vm738_vm11, %v9360_v15, 0.0  ;;  %v9362_v18 = vpop.eup %9361 }
 0x6ba   :  { %v949_v19 = vsel %vm738_vm11, %v9362_v18, 0.0  ;;  %v9364_v20 = vpop.eup %9363 }
 0x6bb   :  { %v1050_v21 = vsel %vm738_vm11, %v9364_v20, 0.0  ;;  %v10224_v22 = vpop.eup %9365 }
 0x6bc   :  { %v1278_v23 = vsel %vm1168_vm12, %v10224_v22, 0.0 }
 0x6be   :  { %v10228_v24 = vpop.eup %9367 }
 0x6bf   :  { %v1380_v30 = vsel %vm1168_vm12, %v10228_v24, 0.0 }
 0x6c9   :  { %954 = vrot.lane.b32.xlu1 %v716_v56, %s9736_s3 }
 0x6d5   :  { %1477 = vmax.xlane.f32.xlu0 %v1476_v61 }
 0x6d9   :  { %746 = vadd.xlane.f32.xlu0 %v745_v63 }
 0x6ef   :  { %1055 = vrot.lane.b32.xlu0 %v716_v56, %s9737_s14 }
 0x6f3   :  { %1285 = vrot.lane.b32.xlu0 %v10215_v2, %s9735_s13 }
 0x6f7   :  { %1387 = vrot.lane.b32.xlu0 %v10215_v2, %s9736_s3 }
 0x716   :  { %849 = vadd.xlane.f32.xlu0 %v848_v17 }
 0x71a   :  { %950 = vadd.xlane.f32.xlu0 %v949_v19 }
 0x71e   :  { %1051 = vadd.xlane.f32.xlu0 %v1050_v21 }
 0x722   :  { %1279 = vadd.xlane.f32.xlu0 %v1278_v23 }
 0x726   :  { %1381 = vadd.xlane.f32.xlu0 %v1380_v30 }
 0x728   :  { %v854_v31 = vpop.permute.xlu0 %853 }
 0x729   :  { %8013 = vmatpush3.msk.msra.mxu0 %vm432_vm4, %v854_v31  ;;  %v1586_v31 = vld [vmem:[%s9922_s30 + $0x10] sm:$0xff] }
 0x72a   :  { %8022 = vmatprep.subr.mxu0 %v9732_v1 }
 0x745   :  { %v1177_v36 = vpop.xlane.xlu1 %1176 }
 0x749   :  { %v955_v41 = vpop.permute.xlu1 %954 }
 0x762   :  { %v1478_v32 = vpop.xlane.xlu0 %1477 }
 0x763   :  { %v1479_v33 = vsub.f32 %v1475_v43, %v1478_v32  ;;  %v1587_v32 = vld [vmem:[%s9922_s30 + $0x18] sm:$0xff] }
 0x765   :  { %v1480_v34 = vmul.f32 1.442695, %v1479_v33  ;;  %v8785_v33 = vpack.c.bf16 %v1587_v32, %v1586_v31  ;;  %v1808_v32 = vld [vmem:[%s9907_s17 + $0x40] sm:$0xff] }
 0x766   :  { %v747_v35 = vpop.xlane.xlu0 %746 }
 0x767   :  { %9369 = vpow2.f32 %v1480_v34 }
 0x768   :  { %9371 = vrcp.f32 %v747_v35 }
 0x76a   :  { %v1056_v44 = vpop.permute.xlu0 %1055 }
 0x76e   :  { %v1286_v45 = vpop.permute.xlu0 %1285 }
 0x771   :  { %v10234_v37 = vpop.eup %9369 }
 0x772   :  { %v9372_v38 = vpop.eup %9371  ;;  %v1482_v39 = vsel %vm1168_vm12, %v10234_v37, 0.0  ;;  %v1388_v46 = vpop.permute.xlu0 %1387 }
 0x773   :  { %1483 = vadd.xlane.f32.xlu0 %v1482_v39  ;;  %v749_v40 = vmul.f32 %v9372_v38, %v9358_v62 }
 0x775   :  { %8010 = vmatmul.mubr.msk.f32.vlgmr.msra.gmra.mrb[6].mxu1 %vm750_vm13, %v749_v40 }
 0x776   :  { %8018 = vmatpush3.msk.msra.mxu1 %vm432_vm4, %v955_v41  ;;  %8019 = vmatprep.mubr.msk.f32.mxu1 %vm9731_vm0, %v9732_v1 }
 0x777   :  { %8027 = vmatprep.subr.mxu1 %v9732_v1 }
 0x789   :  { %1489 = vrot.lane.b32.xlu0 %v10215_v2, %s9737_s14 }
 0x7a3   :  { %v850_v47 = vpop.xlane.xlu0 %849 }
 0x7a4   :  { %9373 = vrcp.f32 %v850_v47 }
 0x7a5   :  { %9375 = vrcp.f32 %v1177_v36 }
 0x7a7   :  { %v951_v48 = vpop.xlane.xlu0 %950 }
 0x7a8   :  { %9377 = vrcp.f32 %v951_v48 }
 0x7ab   :  { %v1052_v49 = vpop.xlane.xlu0 %1051 }
 0x7ac   :  { %9379 = vrcp.f32 %v1052_v49 }
 0x7ae   :  { %v9374_v50 = vpop.eup %9373 }
 0x7af   :  { %v1280_v51 = vpop.xlane.xlu0 %1279  ;;  %v852_v52 = vmul.f32 %v9374_v50, %v9360_v15  ;;  %v9376_v53 = vpop.eup %9375  ;;  %v1584_v15 = vld [vmem:[%s9922_s30] sm:$0xff] }
 0x7b0   :  { %9381 = vrcp.f32 %v1280_v51  ;;  %v1179_v58 = vmul.f32 %v9376_v53, %v10205_v57  ;;  %v8782_v17 = vpack.c.bf16 %v1585_v16, %v1584_v15  ;;  %v1800_v15 = vld [vmem:[%s9907_s17] sm:$0xff]  ;;  %v1801_v16 = vld [vmem:[%s9907_s17 + $0x8] sm:$0xff] }
 0x7b1   :  { %8015 = vmatmul.mubr.msk.f32.vlgmr.msra.gmra.mrb[2].mxu0 %vm750_vm13, %v852_v52  ;;  %v7496_v52 = vld [vmem:[%s9922_s30 + $0x20] ss:$0 sm:$0xff]  ;;  %s11380_s30 = sld [smem:[#allocation47_spill]] }
 0x7b2   :  { %v9378_v54 = vpop.eup %9377  ;;  %8023 = vmatpush3.msk.msra.mxu0 %vm432_vm4, %v1056_v44  ;;  %8024 = vmatprep.mubr.msk.f32.mxu0 %vm9731_vm0, %v9732_v1  ;;  %v1181_v43 = vrot.slane %v1179_v58, 2 }
 0x7b3   :  { %v1382_v56 = vpop.xlane.xlu0 %1381  ;;  %v953_v55 = vmul.f32 %v9378_v54, %v9362_v18  ;;  %8032 = vmatprep.subr.mxu0 %v9732_v1 }
 0x7b4   :  { %9383 = vrcp.f32 %v1382_v56 }
 0x7b5   :  { %8020 = vmatmul.mubr.msk.f32.vlgmr.msra.gmra.mrb[8].mxu1 %vm750_vm13, %v953_v55 }
 0x7b6   :  { %v9380_v59 = vpop.eup %9379  ;;  %8028 = vmatpush3.msk.msra.mxu1 %vm432_vm4, %v10215_v2  ;;  %8029 = vmatprep.mubr.msk.f32.mxu1 %vm9731_vm0, %v9732_v1 }
 0x7b7   :  { %8037 = vmatprep.subr.mxu1 %v9732_v1  ;;  %v1054_v60 = vmul.f32 %v9380_v59, %v9364_v20 }
 0x7b9   :  { %8025 = vmatmul.mubr.msk.f32.vlgmr.msra.gmra.mrb[4].mxu0 %vm750_vm13, %v1054_v60  ;;  %8030 = vmatmul.mubr.msk.f32.vlgmr.msra.gmra.mrb[10].mxu1 %vm750_vm13, %v1181_v43 }
 0x7ba   :  { %v9382_v61 = vpop.eup %9381  ;;  %8033 = vmatpush3.msk.msra.mxu0 %vm432_vm4, %v1286_v45  ;;  %8038 = vmatpush3.msk.msra.mxu1 %vm432_vm4, %v1388_v46 }
 0x7bb   :  { %8034 = vmatprep.mubr.msk.f32.mxu0 %vm9731_vm0, %v9732_v1  ;;  %v1282_v57 = vmul.f32 %v9382_v61, %v10224_v22  ;;  %8039 = vmatprep.mubr.msk.f32.mxu1 %vm9731_vm0, %v9732_v1 }
 0x7bc   :  { %8042 = vmatprep.subr.mxu0 %v9732_v1  ;;  %8781 = vmatprep.subr.bf16.mxu1 %v9730_v0 }
 0x7bd   :  { %v1284_v62 = vrot.slane %v1282_v57, 2 }
 0x7be   :  { %v9384_v63 = vpop.eup %9383 }
 0x7bf   :  { %8035 = vmatmul.mubr.msk.f32.vlgmr.msra.gmra.mrb[6].mxu0 %vm750_vm13, %v1284_v62  ;;  %v1384_v2 = vmul.f32 %v9384_v63, %v10228_v24  ;;  %v1691_v62 = vld [vmem:[%s9902_s21] sm:$0xff]  ;;  %v1692_v63 = vld [vmem:[%s9902_s21 + $0x8] sm:$0xff] }
 0x7c0   :  { %8044 = vmatprep.mubr.msk.f32.mxu0 %vm9731_vm0, %v9732_v1 }
 0x7c1   :  { %v1386_v3 = vrot.slane %v1384_v2, 2  ;;  %v8788_v2 = vpack.c.bf16 %v1692_v63, %v1691_v62 }
 0x7c3   :  { %8040 = vmatmul.mubr.msk.f32.vlgmr.msra.gmra.mrb[12].mxu1 %vm750_vm13, %v1386_v3  ;;  %v1693_v3 = vld [vmem:[%s9902_s21 + $0x10] sm:$0xff] }
 0x7c4   :  { %8055 = vmatprep.mubr.msk.f32.mxu1 %vm9731_vm0, %v9732_v1  ;;  %8783 = vmatpush3.bf16.msra.mxu1 %v8782_v17  ;;  %v8794_v17 = vpack.c.bf16 %v1801_v16, %v1800_v15 }
 0x7c5   :  { %8784 = vmatprep.subr.bf16.mxu1 %v9730_v0 }
 0x7c8   :  { %8786 = vmatpush3.bf16.msra.mxu1 %v8785_v33  ;;  %v1809_v33 = vld [vmem:[%s9907_s17 + $0x48] sm:$0xff] }
 0x7c9   :  { %8793 = vmatprep.subr.bf16.mxu1 %v9730_v0 }
 0x800   :  { %v1484_v4 = vpop.xlane.xlu0 %1483 }
 0x801   :  { %9385 = vrcp.f32 %v1484_v4  ;;  %v1694_v4 = vld [vmem:[%s9902_s21 + $0x18] sm:$0xff] }
 0x804   :  { %v1490_v5 = vpop.permute.xlu0 %1489 }
 0x805   :  { %8043 = vmatpush3.msk.msra.mxu0 %vm432_vm4, %v1490_v5 }
 0x806   :  { %8787 = vmatprep.subr.bf16.mxu0 %v9730_v0 }
 0x80b   :  { %v9386_v6 = vpop.eup %9385 }
 0x80c   :  { %v1486_v7 = vmul.f32 %v9386_v6, %v10234_v37 }
 0x80e   :  { %v1488_v8 = vrot.slane %v1486_v7, 2 }
 0x810   :  { %8045 = vmatmul.mubr.msk.f32.vlgmr.msra.gmra.mrb[8].mxu0 %vm750_vm13, %v1488_v8  ;;  %v1667_v8 = vld [vmem:[%s9917_s12] sm:$0x3]  ;;  %s11381_s12 = sld [smem:[#allocation16_spill]] }
 0x811   :  { %8066 = vmatprep.mubr.msk.f32.mxu0 %vm9731_vm0, %v9732_v1  ;;  %8789 = vmatpush3.bf16.msra.mxu0 %v8788_v2 }
 0x812   :  { %8790 = vmatprep.subr.bf16.mxu0 %v9730_v0 }
 0x848   :  { %v823_v9 = vpop.f32.mrb[6].mxu1 }
 0x849   :  { %v8011_v10 = vpop.f32.mrb[7].mxu1 }
 0x884   :  { %v926_v11 = vpop.f32.mrb[2].mxu0 }
 0x885   :  { %1133 = vrot.lane.b32.xlu0 %v926_v11, %s9738_s6  ;;  %v8016_v12 = vpop.f32.mrb[3].mxu0 }
 0x886   :  { %v1689_v12 = vrot.slane %v1667_v8, %v10102_v29 }
 0x888   :  { %v1027_v13 = vpop.f32.mrb[8].mxu1 }
 0x889   :  { %v8021_v14 = vpop.f32.mrb[9].mxu1 }
 0x88c   :  { %v1128_v18 = vpop.f32.mrb[4].mxu0  ;;  %v1253_v19 = vpop.f32.mrb[10].mxu1 }
 0x88d   :  { %v8026_v20 = vpop.f32.mrb[5].mxu0  ;;  %v8031_v21 = vpop.f32.mrb[11].mxu1 }
 0x88e   :  { %v1804_v21 = vld [vmem:[%s9907_s17 + $0x20] sm:$0xff] }
 0x892   :  { %v1357_v22 = vpop.f32.mrb[6].mxu0 }
 0x893   :  { %1566 = vrot.lane.b32.xlu0 %v1357_v22, %s9738_s6  ;;  %v8036_v23 = vpop.f32.mrb[7].mxu0  ;;  %v1805_v22 = vld [vmem:[%s9907_s17 + $0x28] sm:$0xff] }
 0x894   :  { %v8800_v23 = vpack.c.bf16 %v1805_v22, %v1804_v21  ;;  %v10361_v22 = vld [vmem:[%s9957_s25 + $0x20] ss:$0 sm:$0xff] }
 0x896   :  { %v1459_v24 = vpop.f32.mrb[12].mxu1 }
 0x897   :  { %1570 = vrot.lane.b32.xlu1 %v1459_v24, %s9739_s27  ;;  %v8041_v30 = vpop.f32.mrb[13].mxu1  ;;  %1137 = vrot.lane.b32.xlu0 %v1027_v13, %s9739_s27  ;;  %v1806_v24 = vld [vmem:[%s9907_s17 + $0x30] sm:$0xff] }
 0x898   :  { %v1807_v30 = vld [vmem:[%s9907_s17 + $0x38] sm:$0xff] }
 0x899   :  { %v8803_v31 = vpack.c.bf16 %v1807_v30, %v1806_v24 }
 0x8e3   :  { %v1561_v34 = vpop.f32.mrb[8].mxu0 }
 0x8e4   :  { %1574 = vrot.lane.b32.xlu1 %v1561_v34, %s9740_s11  ;;  %v8046_v35 = vpop.f32.mrb[9].mxu0  ;;  %v8806_v34 = vpack.c.bf16 %v1809_v33, %v1808_v32  ;;  %v1918_v32 = vld [vmem:[%s9957_s25 + $0x10] sm:$0xff]  ;;  %v1919_v33 = vld [vmem:[%s9957_s25 + $0x18] sm:$0xff] }
 0x8e5   :  { %v1810_v35 = vld [vmem:[%s9907_s17 + $0x50] sm:$0xff] }
 0x8e8   :  { %1141 = vrot.lane.b32.xlu1 %v1128_v18, %s9740_s11  ;;  %v1802_v18 = vld [vmem:[%s9907_s17 + $0x10] sm:$0xff] }
 0x8f7   :  { %v1134_v36 = vpop.permute.xlu0 %1133 }
 0x8f8   :  { %v1145_v46 = vsel %vm1144_vm15, %v823_v9, %v1134_v36  ;;  %v1684_v9 = vrot.slane %v1667_v8, %v10098_v27  ;;  %v1811_v36 = vld [vmem:[%s9907_s17 + $0x58] sm:$0xff] }
 0x905   :  { %v1567_v37 = vpop.permute.xlu0 %1566 }
 0x906   :  { %v1577_v39 = vsel %vm1144_vm15, %v1253_v19, %v1567_v37  ;;  %v1803_v19 = vld [vmem:[%s9907_s17 + $0x18] sm:$0xff]  ;;  %v8809_v37 = vpack.c.bf16 %v1811_v36, %v1810_v35  ;;  %v8821_v36 = vpack.c.bf16 %v1919_v33, %v1918_v32 }
 0x907   :  { %v8797_v20 = vpack.c.bf16 %v1803_v19, %v1802_v18  ;;  %v1916_v19 = vld [vmem:[%s9957_s25] sm:$0xff] }
 0x909   :  { %v1571_v38 = vpop.permute.xlu1 %1570  ;;  %v1138_v44 = vpop.permute.xlu0 %1137 }
 0x90a   :  { %v1578_v40 = vsel %vm1146_vm14, %v1577_v39, %v1571_v38  ;;  %v1147_v47 = vsel %vm1146_vm14, %v1145_v46, %v1138_v44  ;;  %v1812_v38 = vld [vmem:[%s9907_s17 + $0x60] sm:$0xff]  ;;  %v1813_v39 = vld [vmem:[%s9907_s17 + $0x68] sm:$0xff]  ;;  %v1815_v44 = vld [vmem:[%s9907_s17 + $0x78] sm:$0xff] }
 0x90b   :  { %v7498_v46 = vld [vmem:[%s9902_s21 + $0x20] ss:$0 sm:$0xff]  ;;  %s11378_s21 = sld [smem:[#allocation48_spill]] }
 0x956   :  { %v1575_v41 = vpop.permute.xlu1 %1574 }
 0x957   :  { %v1579_v45 = vsel %vm1148_vm1, %v1578_v40, %v1575_v41  ;;  %v8812_v40 = vpack.c.bf16 %v1813_v39, %v1812_v38  ;;  %v1814_v41 = vld [vmem:[%s9907_s17 + $0x70] sm:$0xff] }
 0x958   :  { %v1581_v48 = vrot.slane %v1579_v45, 6  ;;  %v8815_v45 = vpack.c.bf16 %v1815_v44, %v1814_v41 }
 0x95a   :  { %v1142_v49 = vpop.permute.xlu1 %1141 }
 0x95b   :  { %v1149_v50 = vsel %vm1148_vm1, %v1147_v47, %v1142_v49 }
 0x95c   :  { %v1583_v51 = vsel %vm432_vm4, %v1149_v50, %v1581_v48 }
 0x95d   :  { %8056 = vmatmul.mubr.msk.f32.vlgmr.msra.gmra.mrb[14].mxu1 %vm470_vm7, %v1583_v51 }
 0x95e   :  { %8101 = vmatprep.mubr.msk.f32.mxu1 %vm9731_vm0, %v9732_v1  ;;  %8795 = vmatpush3.bf16.msra.mxu1 %v8794_v17 }
 0x95f   :  { %8796 = vmatprep.subr.bf16.mxu1 %v9730_v0 }
 0x962   :  { %8798 = vmatpush3.bf16.msra.mxu1 %v8797_v20  ;;  %v1917_v20 = vld [vmem:[%s9957_s25 + $0x8] sm:$0xff]  ;;  %s11379_s25 = sld [smem:[#allocation44_spill]] }
 0x963   :  { %8799 = vmatprep.subr.bf16.mxu1 %v9730_v0  ;;  %v9261_v21 = vpack.i.bf16 %v1917_v20, %v1916_v19  ;;  %v8818_v35 = vpack.c.bf16 %v1917_v20, %v1916_v19 }
 0x966   :  { %8801 = vmatpush3.bf16.msra.mxu1 %v8800_v23 }
 0x967   :  { %8802 = vmatprep.subr.bf16.mxu1 %v9730_v0 }
 0x96a   :  { %8804 = vmatpush3.bf16.msra.mxu1 %v8803_v31 }
 0x96b   :  { %8805 = vmatprep.subr.bf16.mxu1 %v9730_v0 }
 0x96e   :  { %8807 = vmatpush3.bf16.msra.mxu1 %v8806_v34  ;;  %v9266_v34 = vpack.i.bf16 %v1919_v33, %v1918_v32 }
 0x96f   :  { %8808 = vmatprep.subr.bf16.mxu1 %v9730_v0 }
 0x972   :  { %8810 = vmatpush3.bf16.msra.mxu1 %v8809_v37 }
 0x973   :  { %8811 = vmatprep.subr.bf16.mxu1 %v9730_v0 }
 0x976   :  { %8813 = vmatpush3.bf16.msra.mxu1 %v8812_v40 }
 0x977   :  { %8814 = vmatprep.subr.bf16.mxu1 %v9730_v0 }
 0x97a   :  { %8816 = vmatpush3.bf16.msra.mxu1 %v8815_v45 }
 0x97b   :  { %8147 = vmatprep.subr.mxu1 %v9732_v1 }
 0xa30   :  { %v1662_v53 = vpop.f32.mrb[14].mxu1 }
 0xa31   :  { %v1663_v54 = vadd.f32 %v7496_v52, %v1662_v53  ;;  %v8057_v56 = vpop.f32.mrb[15].mxu1 }
 0xa33   :  { %v10305_v55 = vadd.f32 %v1663_v54, %v10110_v42  ;;  %v8791_v42 = vpack.c.bf16 %v1694_v4, %v1693_v3 }
 0xa35   :  { %v1668_v58 = vsel %vm437_vm6, %v10305_v55, 0.0  ;;  %8792 = vmatpush3.bf16.msra.mxu0 %v8791_v42 }
 0xa36   :  { %1669 = vadd.xlane.f32.xlu0 %v1668_v58  ;;  %8817 = vmatprep.subr.bf16.mxu0 %v9730_v0 }
 0xac3   :  { %v1670_v59 = vpop.xlane.xlu0 %1669 }
 0xac4   :  { %v1671_v60 = vmul.f32 0.03125, %v1670_v59 }
 0xac6   :  { %v1672_v43 = vsub.f32 %v10305_v55, %v1671_v60 }
 0xac8   :  { %v1673_v61 = vmul.f32 %v1672_v43, %v1672_v43 }
 0xaca   :  { %v1674_v57 = vsel %vm437_vm6, %v1673_v61, 0.0 }
 0xacb   :  { %1675 = vadd.xlane.f32.xlu1 %v1674_v57 }
 0xadc   :  { %9262 = vrot.lane.b32.xlu1 %v9261_v21, %s9733_s5 }
 0xae0   :  { %2015 = vrot.lane.b32.xlu1 %v10361_v22, %s9733_s5 }
 0xae4   :  { %9272 = vrot.lane.b32.xlu1 %v9261_v21, %s9734_s9 }
 0xb58   :  { %v1676_v5 = vpop.xlane.xlu1 %1675 }
 0xb59   :  { %v1677_v6 = vmul.f32 0.03125, %v1676_v5 }
 0xb5b   :  { %v1678_v7 = vadd.f32 1e-05, %v1677_v6 }
 0xb5c   :  { %v9263_v40 = vpop.permute.xlu1 %9262 }
 0xb5d   :  { %9387 = vrsqrt.f32 %v1678_v7  ;;  %v9741_v7 = vmov -1.0  }
 0xb60   :  { %v2016_v44 = vpop.permute.xlu1 %2015 }
 0xb67   :  { %v9388_v10 = vpop.eup %9387 }
 0xb68   :  { %v1680_v11 = vmul.f32 %v9388_v10, %v1672_v43 }
 0xb6a   :  { %v1685_v13 = vmul.f32 %v1684_v9, %v1680_v11 }
 0xb6c   :  { %v1690_v14 = vadd.f32 %v1689_v12, %v1685_v13  ;;  %v7500_v13 = vld [vmem:[%s9907_s17 + $0x80] ss:$0 sm:$0xff]  ;;  %s11377_s17 = sld [smem:[#allocation46_spill]] }
 0xb6e   :  { %8067 = vmatmul.mubr.msk.f32.vlgmr.msra.gmra.mrb[10].mxu0 %vm470_vm7, %v1690_v14 }
 0xb6f   :  { %8112 = vmatprep.mubr.msk.f32.mxu0 %vm9731_vm0, %v9732_v1  ;;  %8819 = vmatpush3.bf16.msra.mxu0 %v8818_v35 }
 0xb70   :  { %8820 = vmatprep.subr.bf16.mxu0 %v9730_v0 }
 0xb72   :  { %v1892_v41 = vld [vmem:[%s11377_s17] sm:$0x3]  ;;  %s11406_s17 = sld [smem:[#allocation37_spill]] }
 0xb73   :  { %8822 = vmatpush3.bf16.msra.mxu0 %v8821_v36  ;;  %v1909_v45 = vrot.slane %v1892_v41, %v10098_v27 }
 0xb74   :  { %8823 = vmatprep.subr.bf16.mxu0 %v9730_v0 }
 0xc41   :  { %v1769_v47 = vpop.f32.mrb[10].mxu0 }
 0xc42   :  { %v1770_v48 = vadd.f32 %v7498_v46, %v1769_v47  ;;  %v8068_v49 = vpop.f32.mrb[11].mxu0  ;;  %v9265_v47 = vunpack.i.h.bf16 %v9263_v40 }
 0xc44   :  { %v1774_v50 = vmul.f32 0.70710677, %v1770_v48  ;;  %v1773_v10 = vmul.f32 0.5, %v1770_v48  ;;  %v9264_v48 = vunpack.i.l.bf16 %v9263_v40 }
 0xc46   :  { %v1777_v51 = vand.u32 2147483647, %v1774_v50  ;;  %vm1775_vm5 = vcmp.ge.f32.partialorder %v1774_v50, 0.0 }
 0xc47   :  { %v1776_v8 = vsel %vm1775_vm5, 1.0, %v9741_v7  ;;  %vm3347_vm5 = vcmask 326656  }
 0xc48   :  { %v1778_v52 = vmul.f32 0.3275911, %v1777_v51  ;;  %v1791_v54 = vsub.f32 0.0, %v1777_v51 }
 0xc4a   :  { %v1779_v53 = vadd.f32 1.0, %v1778_v52  ;;  %v1792_v58 = vmul.f32 %v1791_v54, %v1777_v51  ;;  %v1914_v51 = vrot.slane %v1892_v41, %v10102_v29 }
 0xc4c   :  { %9389 = vrcp.f32 %v1779_v53  ;;  %v1793_v43 = vmul.f32 1.442695, %v1792_v58  ;;  %v8824_v53 = vpack.c.bf16 %v9265_v47, %v9264_v48 }
 0xc4e   :  { %9391 = vpow2.f32 %v1793_v43 }
 0xc56   :  { %v9390_v56 = vpop.eup %9389 }
 0xc57   :  { %v1782_v59 = vmul.f32 1.0614054, %v9390_v56 }
 0xc58   :  { %v9392_v42 = vpop.eup %9391 }
 0xc59   :  { %v1783_v60 = vadd.f32 -1.4531521, %v1782_v59  ;;  %v9273_v59 = vpop.permute.xlu1 %9272 }
 0xc5a   :  { %v9275_v43 = vunpack.i.h.bf16 %v9273_v59 }
 0xc5b   :  { %v1784_v61 = vmul.f32 %v9390_v56, %v1783_v60 }
 0xc5d   :  { %v1785_v57 = vadd.f32 1.4214138, %v1784_v61  ;;  %v9274_v61 = vunpack.i.l.bf16 %v9273_v59 }
 0xc5f   :  { %v1786_v62 = vmul.f32 %v9390_v56, %v1785_v57 }
 0xc61   :  { %v1787_v63 = vadd.f32 -0.28449672, %v1786_v62  ;;  %v8830_v62 = vpack.c.bf16 %v9275_v43, %v9274_v61 }
 0xc63   :  { %v1788_v2 = vmul.f32 %v9390_v56, %v1787_v63 }
 0xc65   :  { %v1789_v3 = vadd.f32 0.2548296, %v1788_v2 }
 0xc67   :  { %v1790_v4 = vmul.f32 %v9390_v56, %v1789_v3 }
 0xc69   :  { %v1795_v5 = vmul.f32 %v9392_v42, %v1790_v4 }
 0xc6b   :  { %v1796_v6 = vsub.f32 1.0, %v1795_v5 }
 0xc6d   :  { %v1797_v9 = vmul.f32 %v1796_v6, %v1776_v8 }
 0xc6f   :  { %v1798_v11 = vadd.f32 1.0, %v1797_v9 }
 0xc71   :  { %v1799_v12 = vmul.f32 %v1798_v11, %v1773_v10 }
 0xc73   :  { %8102 = vmatmul.mubr.f32.vlgmr.msra.gmra.mrb[16].mxu1 %v1799_v12 }
 0xc74   :  { %8149 = vmatprep.mubr.msk.f32.mxu1 %vm9731_vm0, %v9732_v1 }
 0xd46   :  { %v1887_v14 = vpop.f32.mrb[16].mxu1 }
 0xd47   :  { %v1888_v15 = vadd.f32 %v7500_v13, %v1887_v14  ;;  %v8103_v16 = vpop.f32.mrb[17].mxu1 }
 0xd49   :  { %v10353_v17 = vadd.f32 %v1888_v15, %v10305_v55 }
 0xd4b   :  { %v1893_v18 = vsel %vm437_vm6, %v10353_v17, 0.0 }
 0xd4c   :  { %1894 = vadd.xlane.f32.xlu0 %v1893_v18 }
 0xdd9   :  { %v1895_v55 = vpop.xlane.xlu0 %1894 }
 0xdda   :  { %v1896_v23 = vmul.f32 0.03125, %v1895_v55 }
 0xddc   :  { %v1897_v24 = vsub.f32 %v10353_v17, %v1896_v23 }
 0xdde   :  { %v1898_v30 = vmul.f32 %v1897_v24, %v1897_v24 }
 0xde0   :  { %v1899_v31 = vsel %vm437_vm6, %v1898_v30, 0.0 }
 0xde1   :  { %1900 = vadd.xlane.f32.xlu0 %v1899_v31 }
 0xdf7   :  { %9267 = vrot.lane.b32.xlu0 %v9266_v34, %s9733_s5 }
 0xdfb   :  { %9277 = vrot.lane.b32.xlu0 %v9266_v34, %s9734_s9 }
 0xe6e   :  { %v1901_v37 = vpop.xlane.xlu0 %1900 }
 0xe6f   :  { %v1902_v38 = vmul.f32 0.03125, %v1901_v37 }
 0xe71   :  { %v1903_v39 = vadd.f32 1e-05, %v1902_v38 }
 0xe72   :  { %v9268_v50 = vpop.permute.xlu0 %9267 }
 0xe73   :  { %9393 = vrsqrt.f32 %v1903_v39  ;;  %v9270_v54 = vunpack.i.h.bf16 %v9268_v50  ;;  %v9269_v56 = vunpack.i.l.bf16 %v9268_v50 }
 0xe75   :  { %v8827_v60 = vpack.c.bf16 %v9270_v54, %v9269_v56 }
 0xe76   :  { %v9278_v57 = vpop.permute.xlu0 %9277 }
 0xe77   :  { %v9280_v63 = vunpack.i.h.bf16 %v9278_v57  ;;  %v9279_v2 = vunpack.i.l.bf16 %v9278_v57 }
 0xe79   :  { %v8833_v3 = vpack.c.bf16 %v9280_v63, %v9279_v2 }
 0xe7d   :  { %v9394_v46 = vpop.eup %9393 }
 0xe7e   :  { %v1905_v49 = vmul.f32 %v9394_v46, %v1897_v24 }
 0xe80   :  { %v1910_v52 = vmul.f32 %v1909_v45, %v1905_v49 }
 0xe82   :  { %v1915_v58 = vadd.f32 %v1914_v51, %v1910_v52 }
 0xe84   :  { %8113 = vmatmul.mubr.msk.f32.vlgmr.msra.gmra.mrb[12].mxu0 %vm470_vm7, %v1915_v58 }
 0xe85   :  { %8825 = vmatpush3.bf16.msra.mxu0 %v8824_v53  ;;  %8123 = vmatprep.mubr.msk.f32.mxu0 %vm9731_vm0, %v9732_v1 }
 0xe86   :  { %8826 = vmatprep.subr.bf16.mxu0 %v9730_v0 }
 0xe89   :  { %8828 = vmatpush3.bf16.msra.mxu0 %v8827_v60 }
 0xe8a   :  { %8829 = vmatprep.subr.bf16.mxu0 %v9730_v0 }
 0xe8c   :  { %8124 = vmatmul.mubr.msk.f32.vlgmr.msra.gmra.mrb[14].mxu0 %vm470_vm7, %v1915_v58 }
 0xe8d   :  { %8831 = vmatpush3.bf16.msra.mxu0 %v8830_v62  ;;  %8134 = vmatprep.mubr.msk.f32.mxu0 %vm9731_vm0, %v9732_v1 }
 0xe8e   :  { %8832 = vmatprep.subr.bf16.mxu0 %v9730_v0 }
 0xe91   :  { %8834 = vmatpush3.bf16.msra.mxu0 %v8833_v3 }
 0xe92   :  { %8137 = vmatprep.subr.mxu0 %v9732_v1 }
 0xe94   :  { %8135 = vmatmul.mubr.msk.f32.vlgmr.msra.gmra.mrb[16].mxu0 %vm470_vm7, %v1915_v58 }
 0xe95   :  { %8139 = vmatprep.mubr.msk.f32.mxu0 %vm9731_vm0, %v9732_v1 }
 0xf57   :  { %v1994_v4 = vpop.f32.mrb[12].mxu0 }
 0xf58   :  { %v8114_v42 = vpop.f32.mrb[13].mxu0  ;;  %v1995_v9 = vadd.f32 %v10361_v22, %v1994_v4 }
 0xf5f   :  { %v2084_v5 = vpop.f32.mrb[14].mxu0 }
 0xf60   :  { %v2085_v6 = vadd.f32 %v2084_v5, %v2016_v44  ;;  %v8125_v8 = vpop.f32.mrb[15].mxu0 }
 0xf62   :  { %v2176_v10 = vrot.slane %v2085_v6, %v10098_v27  ;;  %v2184_v11 = vrot.slane %v2085_v6, %v10102_v29  ;;  %v2600_v12 = vrot.slane %v2085_v6, %v1152_v25  ;;  %v2608_v13 = vrot.slane %v2085_v6, %v1161_v28 }
 0xf64   :  { %v2185_v14 = vmul.f32 %v2184_v11, %v1995_v9  ;;  %v2177_v15 = vmul.f32 %v2176_v10, %v1995_v9  ;;  %v2609_v16 = vmul.f32 %v2608_v13, %v1995_v9  ;;  %v2601_v18 = vmul.f32 %v2600_v12, %v1995_v9 }
 0xf66   :  { %2285 = vrot.lane.b32.xlu0 %v2185_v14, %s9735_s13  ;;  %2278 = vrot.lane.b32.xlu1 %v2177_v15, %s9735_s13  ;;  %v2186_v26 = vsel %vm724_vm8, %v2185_v14, 0.0  ;;  %v2602_v25 = vsel %vm1155_vm9, %v2601_v18, 0.0  ;;  %v2178_v28 = vsel %vm724_vm8, %v2177_v15, 0.0  ;;  %v2610_v21 = vsel %vm1155_vm9, %v2609_v16, 0.0 }
 0xf67   :  { %v10399_v19 = vpop.f32.mrb[16].mxu0 }
 0xf68   :  { %v8136_v20 = vpop.f32.mrb[17].mxu0 }
 0xf6a   :  { %2386 = vrot.lane.b32.xlu0 %v2185_v14, %s9736_s3  ;;  %2380 = vrot.lane.b32.xlu1 %v2177_v15, %s9736_s3 }
 0xf6e   :  { %2487 = vrot.lane.b32.xlu0 %v2185_v14, %s9737_s14  ;;  %2481 = vrot.lane.b32.xlu1 %v2177_v15, %s9737_s14 }
 0xf72   :  { %2710 = vrot.lane.b32.xlu0 %v2609_v16, %s9735_s13  ;;  %2703 = vrot.lane.b32.xlu1 %v2601_v18, %s9735_s13 }
 0xf76   :  { %2812 = vrot.lane.b32.xlu0 %v2609_v16, %s9736_s3  ;;  %2806 = vrot.lane.b32.xlu1 %v2601_v18, %s9736_s3 }
 0xf7a   :  { %2914 = vrot.lane.b32.xlu0 %v2609_v16, %s9737_s14  ;;  %2908 = vrot.lane.b32.xlu1 %v2601_v18, %s9737_s14 }
 0xf99   :  { %2187 = vadd.xlane.f32.xlu0 %v2186_v26 }
 0xf9d   :  { %2603 = vadd.xlane.f32.xlu0 %v2602_v25 }
 0xf9e   :  { %2179 = vadd.xlane.f32.xlu1 %v2178_v28 }
 0xfa2   :  { %2611 = vadd.xlane.f32.xlu1 %v2610_v21 }
 0xfd8   :  { %v2286_v55 = vpop.permute.xlu0 %2285  ;;  %v2279_v23 = vpop.permute.xlu1 %2278 }
 0xfd9   :  { %v2281_v24 = vsel %vm724_vm8, %v2279_v23, 0.0  ;;  %v2288_v30 = vsel %vm724_vm8, %v2286_v55, 0.0 }
 0xfda   :  { %2282 = vadd.xlane.f32.xlu0 %v2281_v24  ;;  %2289 = vadd.xlane.f32.xlu1 %v2288_v30 }
 0xfdc   :  { %v2387_v31 = vpop.permute.xlu0 %2386  ;;  %v2381_v32 = vpop.permute.xlu1 %2380 }
 0xfdd   :  { %v2383_v33 = vsel %vm724_vm8, %v2381_v32, 0.0  ;;  %v2389_v34 = vsel %vm724_vm8, %v2387_v31, 0.0 }
 0xfde   :  { %2384 = vadd.xlane.f32.xlu0 %v2383_v33  ;;  %2390 = vadd.xlane.f32.xlu1 %v2389_v34 }
 0xfe0   :  { %v2488_v35 = vpop.permute.xlu0 %2487  ;;  %v2482_v36 = vpop.permute.xlu1 %2481 }
 0xfe1   :  { %v2484_v37 = vsel %vm724_vm8, %v2482_v36, 0.0  ;;  %v2490_v38 = vsel %vm724_vm8, %v2488_v35, 0.0 }
 0xfe2   :  { %2485 = vadd.xlane.f32.xlu0 %v2484_v37  ;;  %2491 = vadd.xlane.f32.xlu1 %v2490_v38 }
 0xfe4   :  { %v2711_v39 = vpop.permute.xlu0 %2710  ;;  %v2704_v40 = vpop.permute.xlu1 %2703 }
 0xfe5   :  { %v2706_v41 = vsel %vm1155_vm9, %v2704_v40, 0.0  ;;  %v2713_v44 = vsel %vm1155_vm9, %v2711_v39, 0.0 }
 0xfe6   :  { %2707 = vadd.xlane.f32.xlu0 %v2706_v41  ;;  %2714 = vadd.xlane.f32.xlu1 %v2713_v44 }
 0xfe8   :  { %v2813_v45 = vpop.permute.xlu0 %2812  ;;  %v2807_v46 = vpop.permute.xlu1 %2806 }
 0xfe9   :  { %v2809_v47 = vsel %vm1155_vm9, %v2807_v46, 0.0  ;;  %v2815_v48 = vsel %vm1155_vm9, %v2813_v45, 0.0 }
 0xfea   :  { %2810 = vadd.xlane.f32.xlu0 %v2809_v47  ;;  %2816 = vadd.xlane.f32.xlu1 %v2815_v48 }
 0xfec   :  { %v2915_v49 = vpop.permute.xlu0 %2914  ;;  %v2909_v50 = vpop.permute.xlu1 %2908 }
 0xfed   :  { %v2911_v51 = vsel %vm1155_vm9, %v2909_v50, 0.0  ;;  %v2917_v52 = vsel %vm1155_vm9, %v2915_v49, 0.0 }
 0xfee   :  { %2912 = vadd.xlane.f32.xlu0 %v2911_v51  ;;  %2918 = vadd.xlane.f32.xlu1 %v2917_v52 }
0x1026   :  { %v2188_v53 = vpop.xlane.xlu0 %2187 }
0x102a   :  { %v2604_v59 = vpop.xlane.xlu0 %2603 }
0x102b   :  { %v2180_v54 = vpop.xlane.xlu1 %2179 }
0x102c   :  { %v2189_v56 = vsel %vm736_vm10, %v2180_v54, %v2188_v53 }
0x102d   :  { %v2190_v58 = vsel %vm738_vm11, %v2189_v56, -inf }
0x102e   :  { %2191 = vmax.xlane.f32.xlu0 %v2190_v58 }
0x102f   :  { %v2612_v60 = vpop.xlane.xlu1 %2611 }
0x1030   :  { %v2613_v42 = vsel %vm736_vm10, %v2604_v59, %v2612_v60 }
0x1031   :  { %v2614_v9 = vsel %vm1168_vm12, %v2613_v42, -inf }
0x1067   :  { %v2283_v43 = vpop.xlane.xlu0 %2282  ;;  %v2290_v61 = vpop.xlane.xlu1 %2289 }
0x1068   :  { %v2291_v57 = vsel %vm736_vm10, %v2283_v43, %v2290_v61 }
0x1069   :  { %v2292_v62 = vsel %vm738_vm11, %v2291_v57, -inf }
0x106a   :  { %2293 = vmax.xlane.f32.xlu1 %v2292_v62 }
0x106b   :  { %v2385_v63 = vpop.xlane.xlu0 %2384  ;;  %v2391_v2 = vpop.xlane.xlu1 %2390 }
0x106c   :  { %v2392_v3 = vsel %vm736_vm10, %v2385_v63, %v2391_v2 }
0x106d   :  { %v2393_v4 = vsel %vm738_vm11, %v2392_v3, -inf }
0x106e   :  { %2394 = vmax.xlane.f32.xlu0 %v2393_v4 }
0x106f   :  { %v2486_v5 = vpop.xlane.xlu0 %2485  ;;  %v2492_v6 = vpop.xlane.xlu1 %2491 }
0x1070   :  { %v2493_v8 = vsel %vm736_vm10, %v2486_v5, %v2492_v6 }
0x1071   :  { %v2494_v10 = vsel %vm738_vm11, %v2493_v8, -inf }
0x1072   :  { %2615 = vmax.xlane.f32.xlu0 %v2614_v9  ;;  %2495 = vmax.xlane.f32.xlu1 %v2494_v10 }
0x1073   :  { %v2708_v11 = vpop.xlane.xlu0 %2707  ;;  %v2715_v12 = vpop.xlane.xlu1 %2714 }
0x1074   :  { %v2716_v13 = vsel %vm736_vm10, %v2708_v11, %v2715_v12 }
0x1075   :  { %v2717_v14 = vsel %vm1168_vm12, %v2716_v13, -inf }
0x1076   :  { %2718 = vmax.xlane.f32.xlu1 %v2717_v14 }
0x1077   :  { %v2811_v15 = vpop.xlane.xlu0 %2810  ;;  %v2817_v16 = vpop.xlane.xlu1 %2816 }
0x1078   :  { %v2818_v18 = vsel %vm736_vm10, %v2811_v15, %v2817_v16 }
0x1079   :  { %v2819_v20 = vsel %vm1168_vm12, %v2818_v18, -inf }
0x107a   :  { %2820 = vmax.xlane.f32.xlu0 %v2819_v20 }
0x107b   :  { %v2913_v26 = vpop.xlane.xlu0 %2912 }
0x1090   :  { %2100 = vrot.lane.b32.xlu0 %v10361_v22, %s9734_s9 }
0x10bb   :  { %v2192_v25 = vpop.xlane.xlu0 %2191 }
0x10bc   :  { %v2193_v36 = vsub.f32 %v2189_v56, %v2192_v25 }
0x10be   :  { %v2194_v37 = vmul.f32 1.442695, %v2193_v36 }
0x10fb   :  { %v2395_v28 = vpop.xlane.xlu0 %2394 }
0x10fc   :  { %v2396_v46 = vsub.f32 %v2392_v3, %v2395_v28 }
0x10fe   :  { %v2397_v47 = vmul.f32 1.442695, %v2396_v46 }
0x10ff   :  { %v2616_v21 = vpop.xlane.xlu0 %2615 }
0x1100   :  { %v2617_v38 = vsub.f32 %v2613_v42, %v2616_v21 }
0x1102   :  { %v2618_v41 = vmul.f32 1.442695, %v2617_v38 }
0x1107   :  { %v2821_v55 = vpop.xlane.xlu0 %2820 }
0x1108   :  { %v2822_v23 = vsub.f32 %v2818_v18, %v2821_v55 }
0x110a   :  { %v2823_v24 = vmul.f32 1.442695, %v2822_v23 }
0x110b   :  { %v2101_v30 = vpop.permute.xlu0 %2100 }
0x110c   :  { %9395 = vpow2.f32 %v2823_v24  ;;  %v2170_v31 = vadd.f32 %v10399_v19, %v2101_v30  ;;  %v2919_v19 = vpop.xlane.xlu1 %2918 }
0x110d   :  { %v2920_v34 = vsel %vm736_vm10, %v2913_v26, %v2919_v19  ;;  %9397 = vpow2.f32 %v2194_v37 }
0x110e   :  { %2303 = vrot.lane.b32.xlu1 %v2170_v31, %s9735_s13  ;;  %8138 = vmatpush3.msk.msra.mxu0 %vm432_vm4, %v2170_v31  ;;  %v10452_v33 = vrot.slane %v2170_v31, 2  ;;  %v2921_v35 = vsel %vm1168_vm12, %v2920_v34, -inf  ;;  %9399 = vpow2.f32 %v2618_v41 }
0x110f   :  { %8142 = vmatprep.subr.mxu0 %v9732_v1 }
0x1110   :  { %v2294_v39 = vpop.xlane.xlu1 %2293 }
0x1111   :  { %v2295_v40 = vsub.f32 %v2291_v57, %v2294_v39 }
0x1112   :  { %2404 = vrot.lane.b32.xlu1 %v2170_v31, %s9736_s3 }
0x1113   :  { %v2296_v45 = vmul.f32 1.442695, %v2295_v40 }
0x1114   :  { %v2496_v44 = vpop.xlane.xlu1 %2495 }
0x1115   :  { %9401 = vpow2.f32 %v2296_v45  ;;  %v2497_v48 = vsub.f32 %v2493_v8, %v2496_v44 }
0x1116   :  { %v10448_v22 = vpop.eup %9395  ;;  %9403 = vpow2.f32 %v2397_v47 }
0x1117   :  { %v2825_v32 = vsel %vm1168_vm12, %v10448_v22, 0.0  ;;  %v9398_v50 = vpop.eup %9397  ;;  %v2498_v51 = vmul.f32 1.442695, %v2497_v48 }
0x1118   :  { %2826 = vadd.xlane.f32.xlu0 %v2825_v32  ;;  %v2719_v49 = vpop.xlane.xlu1 %2718  ;;  %v2196_v53 = vsel %vm738_vm11, %v9398_v50, 0.0  ;;  %v9400_v54 = vpop.eup %9399 }
0x1119   :  { %v2720_v52 = vsub.f32 %v2716_v13, %v2719_v49  ;;  %9405 = vpow2.f32 %v2498_v51  ;;  %v2620_v58 = vsel %vm1168_vm12, %v9400_v54, 0.0 }
0x111b   :  { %v2721_v56 = vmul.f32 1.442695, %v2720_v52  ;;  %v3029_v52 = vld [vmem:[%s11378_s21] sm:$0xff] }
0x111d   :  { %9407 = vpow2.f32 %v2721_v56 }
0x111f   :  { %v9402_v59 = vpop.eup %9401 }
0x1120   :  { %v2298_v60 = vsel %vm738_vm11, %v9402_v59, 0.0  ;;  %v9404_v43 = vpop.eup %9403 }
0x1121   :  { %v2399_v61 = vsel %vm738_vm11, %v9404_v43, 0.0 }
0x1123   :  { %v9406_v57 = vpop.eup %9405 }
0x1124   :  { %v2500_v62 = vsel %vm738_vm11, %v9406_v57, 0.0 }
0x1127   :  { %v10464_v63 = vpop.eup %9407 }
0x1128   :  { %v2723_v2 = vsel %vm1168_vm12, %v10464_v63, 0.0 }
0x112e   :  { %2730 = vrot.lane.b32.xlu0 %v10452_v33, %s9735_s13 }
0x1136   :  { %2922 = vmax.xlane.f32.xlu1 %v2921_v35 }
0x1147   :  { %2505 = vrot.lane.b32.xlu1 %v2170_v31, %s9737_s14 }
0x116b   :  { %2197 = vadd.xlane.f32.xlu1 %v2196_v53  ;;  %v3030_v53 = vld [vmem:[%s11378_s21 + $0x8] sm:$0xff] }
0x116f   :  { %2621 = vadd.xlane.f32.xlu1 %v2620_v58 }
0x1173   :  { %2299 = vadd.xlane.f32.xlu1 %v2298_v60 }
0x1177   :  { %2400 = vadd.xlane.f32.xlu1 %v2399_v61 }
0x117b   :  { %2501 = vadd.xlane.f32.xlu1 %v2500_v62 }
0x117f   :  { %2724 = vadd.xlane.f32.xlu1 %v2723_v2  ;;  %v3032_v2 = vld [vmem:[%s11378_s21 + $0x18] sm:$0xff] }
0x1180   :  { %v2304_v3 = vpop.permute.xlu1 %2303 }
0x1184   :  { %v2405_v4 = vpop.permute.xlu1 %2404 }
0x1185   :  { %8148 = vmatpush3.msk.msra.mxu1 %vm432_vm4, %v2405_v4 }
0x1186   :  { %8157 = vmatprep.subr.mxu1 %v9732_v1 }
0x1190   :  { %2832 = vrot.lane.b32.xlu1 %v10452_v33, %s9736_s3 }
0x11a5   :  { %v2827_v15 = vpop.xlane.xlu0 %2826 }
0x11a9   :  { %v2731_v35 = vpop.permute.xlu0 %2730 }
0x11c3   :  { %v2923_v42 = vpop.xlane.xlu1 %2922 }
0x11c4   :  { %v2924_v5 = vsub.f32 %v2920_v34, %v2923_v42 }
0x11c6   :  { %v2925_v6 = vmul.f32 1.442695, %v2924_v5 }
0x11c7   :  { %v2506_v10 = vpop.permute.xlu1 %2505 }
0x11c8   :  { %9409 = vpow2.f32 %v2925_v6 }
0x11d2   :  { %v10472_v8 = vpop.eup %9409 }
0x11d3   :  { %v2927_v9 = vsel %vm1168_vm12, %v10472_v8, 0.0 }
0x11d4   :  { %2928 = vadd.xlane.f32.xlu1 %v2927_v9 }
0x11e5   :  { %2934 = vrot.lane.b32.xlu1 %v10452_v33, %s9737_s14 }
0x11f8   :  { %v2198_v11 = vpop.xlane.xlu1 %2197 }
0x11f9   :  { %9411 = vrcp.f32 %v2198_v11 }
0x11fc   :  { %v2622_v12 = vpop.xlane.xlu1 %2621 }
0x1200   :  { %v2300_v13 = vpop.xlane.xlu1 %2299 }
0x1201   :  { %9413 = vrcp.f32 %v2300_v13 }
0x1202   :  { %9415 = vrcp.f32 %v2622_v12 }
0x1203   :  { %v9412_v14 = vpop.eup %9411 }
0x1204   :  { %v2401_v16 = vpop.xlane.xlu1 %2400  ;;  %v2200_v18 = vmul.f32 %v9412_v14, %v9398_v50 }
0x1205   :  { %9417 = vrcp.f32 %v2401_v16 }
0x1206   :  { %8140 = vmatmul.mubr.msk.f32.vlgmr.msra.gmra.mrb[18].mxu0 %vm750_vm13, %v2200_v18  ;;  %9419 = vrcp.f32 %v2827_v15 }
0x1207   :  { %8143 = vmatpush3.msk.msra.mxu0 %vm432_vm4, %v2304_v3  ;;  %8144 = vmatprep.mubr.msk.f32.mxu0 %vm9731_vm0, %v9732_v1 }
0x1208   :  { %v2502_v20 = vpop.xlane.xlu1 %2501  ;;  %8152 = vmatprep.subr.mxu0 %v9732_v1 }
0x1209   :  { %9421 = vrcp.f32 %v2502_v20 }
0x120b   :  { %v9414_v26 = vpop.eup %9413 }
0x120c   :  { %v2725_v25 = vpop.xlane.xlu1 %2724  ;;  %v2302_v28 = vmul.f32 %v9414_v26, %v9402_v59  ;;  %v9416_v21 = vpop.eup %9415 }
0x120d   :  { %9423 = vrcp.f32 %v2725_v25  ;;  %v2624_v24 = vmul.f32 %v9416_v21, %v9400_v54  ;;  %v8836_v54 = vpack.c.bf16 %v3030_v53, %v3029_v52  ;;  %v7521_v25 = vld [vmem:[%s11378_s21 + $0x20] ss:$0 sm:$0xff]  ;;  %v3339_v53 = vld [vmem:[%s10047_s8 + $0x10] sm:$0xff] }
0x120e   :  { %8145 = vmatmul.mubr.msk.f32.vlgmr.msra.gmra.mrb[20].mxu0 %vm750_vm13, %v2302_v28 }
0x120f   :  { %v9418_v55 = vpop.eup %9417  ;;  %8153 = vmatpush3.msk.msra.mxu0 %vm432_vm4, %v2506_v10  ;;  %8154 = vmatprep.mubr.msk.f32.mxu0 %vm9731_vm0, %v9732_v1  ;;  %v2626_v19 = vrot.slane %v2624_v24, 2 }
0x1210   :  { %v2403_v23 = vmul.f32 %v9418_v55, %v9404_v43  ;;  %8162 = vmatprep.subr.mxu0 %v9732_v1  ;;  %v9420_v30 = vpop.eup %9419  ;;  %v2833_v36 = vpop.permute.xlu1 %2832 }
0x1211   :  { %v2829_v34 = vmul.f32 %v9420_v30, %v10448_v22 }
0x1212   :  { %8150 = vmatmul.mubr.msk.f32.vlgmr.msra.gmra.mrb[18].mxu1 %vm750_vm13, %v2403_v23 }
0x1213   :  { %v9422_v31 = vpop.eup %9421  ;;  %8158 = vmatpush3.msk.msra.mxu1 %vm432_vm4, %v10452_v33  ;;  %8159 = vmatprep.mubr.msk.f32.mxu1 %vm9731_vm0, %v9732_v1  ;;  %v2831_v33 = vrot.slane %v2829_v34, 2 }
0x1214   :  { %8167 = vmatprep.subr.mxu1 %v9732_v1  ;;  %v2504_v32 = vmul.f32 %v9422_v31, %v9406_v57 }
0x1216   :  { %8155 = vmatmul.mubr.msk.f32.vlgmr.msra.gmra.mrb[22].mxu0 %vm750_vm13, %v2504_v32  ;;  %8160 = vmatmul.mubr.msk.f32.vlgmr.msra.gmra.mrb[20].mxu1 %vm750_vm13, %v2626_v19 }
0x1217   :  { %v9424_v37 = vpop.eup %9423  ;;  %8163 = vmatpush3.msk.msra.mxu0 %vm432_vm4, %v2731_v35  ;;  %8168 = vmatpush3.msk.msra.mxu1 %vm432_vm4, %v2833_v36  ;;  %v3136_v35 = vld [vmem:[%s11379_s25] sm:$0xff]  ;;  %v3137_v36 = vld [vmem:[%s11379_s25 + $0x8] sm:$0xff] }
0x1218   :  { %8169 = vmatprep.mubr.msk.f32.mxu1 %vm9731_vm0, %v9732_v1  ;;  %8164 = vmatprep.mubr.msk.f32.mxu0 %vm9731_vm0, %v9732_v1  ;;  %v2727_v22 = vmul.f32 %v9424_v37, %v10464_v63  ;;  %v3031_v63 = vld [vmem:[%s11378_s21 + $0x10] sm:$0xff]  ;;  %v8842_v37 = vpack.c.bf16 %v3137_v36, %v3136_v35  ;;  %s11407_s21 = sld [smem:[#allocation34_spill]] }
0x1219   :  { %8172 = vmatprep.subr.mxu0 %v9732_v1  ;;  %8835 = vmatprep.subr.bf16.mxu1 %v9730_v0  ;;  %v8839_v3 = vpack.c.bf16 %v3032_v2, %v3031_v63  ;;  %v3249_v2 = vld [vmem:[%s11382_s15 + $0x20] sm:$0xff] }
0x121a   :  { %8170 = vmatmul.mubr.msk.f32.vlgmr.msra.gmra.mrb[22].mxu1 %vm750_vm13, %v2831_v33  ;;  %v2729_v38 = vrot.slane %v2727_v22, 2  ;;  %v3139_v33 = vld [vmem:[%s11379_s25 + $0x18] sm:$0xff] }
0x121b   :  { %8185 = vmatprep.mubr.msk.f32.mxu1 %vm9731_vm0, %v9732_v1  ;;  %8837 = vmatpush3.bf16.msra.mxu1 %v8836_v54  ;;  %v3340_v54 = vld [vmem:[%s10047_s8 + $0x18] sm:$0xff] }
0x121c   :  { %8165 = vmatmul.mubr.msk.f32.vlgmr.msra.gmra.mrb[24].mxu0 %vm750_vm13, %v2729_v38  ;;  %8838 = vmatprep.subr.bf16.mxu1 %v9730_v0 }
0x121d   :  { %8174 = vmatprep.mubr.msk.f32.mxu0 %vm9731_vm0, %v9732_v1 }
0x121f   :  { %8840 = vmatpush3.bf16.msra.mxu1 %v8839_v3  ;;  %v3250_v3 = vld [vmem:[%s11382_s15 + $0x28] sm:$0xff] }
0x1220   :  { %8847 = vmatprep.subr.bf16.mxu1 %v9730_v0 }
0x1261   :  { %v2929_v39 = vpop.xlane.xlu1 %2928 }
0x1262   :  { %9425 = vrcp.f32 %v2929_v39 }
0x1265   :  { %v2935_v40 = vpop.permute.xlu1 %2934 }
0x1266   :  { %8173 = vmatpush3.msk.msra.mxu0 %vm432_vm4, %v2935_v40 }
0x1267   :  { %8841 = vmatprep.subr.bf16.mxu0 %v9730_v0 }
0x126c   :  { %v9426_v41 = vpop.eup %9425 }
0x126d   :  { %v2931_v44 = vmul.f32 %v9426_v41, %v10472_v8  ;;  %v3112_v41 = vld [vmem:[%s11380_s30] sm:$0x3]  ;;  %s11409_s30 = sld [smem:[#allocation32_spill]] }
0x126f   :  { %v2933_v45 = vrot.slane %v2931_v44, 2  ;;  %v3129_v44 = vrot.slane %v3112_v41, %v10098_v27 }
0x1271   :  { %8175 = vmatmul.mubr.msk.f32.vlgmr.msra.gmra.mrb[26].mxu0 %vm750_vm13, %v2933_v45 }
0x1272   :  { %8196 = vmatprep.mubr.msk.f32.mxu0 %vm9731_vm0, %v9732_v1  ;;  %8843 = vmatpush3.bf16.msra.mxu0 %v8842_v37  ;;  %v7528_v37 = vld [vmem:[#allocation10] ss:$0 sm:$0xff] }
0x1273   :  { %8844 = vmatprep.subr.bf16.mxu0 %v9730_v0 }
0x12d9   :  { %v2273_v46 = vpop.f32.mrb[18].mxu0 }
0x12da   :  { %v8141_v47 = vpop.f32.mrb[19].mxu0 }
0x12db   :  { %v3134_v47 = vrot.slane %v3112_v41, %v10102_v29 }
0x12e1   :  { %v2376_v48 = vpop.f32.mrb[20].mxu0 }
0x12e2   :  { %2583 = vrot.lane.b32.xlu1 %v2376_v48, %s9738_s6  ;;  %v8146_v49 = vpop.f32.mrb[21].mxu0  ;;  %v3337_v48 = vld [vmem:[%s10047_s8] sm:$0xff] }
0x12e3   :  { %v3338_v49 = vld [vmem:[%s10047_s8 + $0x8] sm:$0xff] }
0x12e5   :  { %v2477_v50 = vpop.f32.mrb[18].mxu1 }
0x12e6   :  { %v8151_v51 = vpop.f32.mrb[19].mxu1  ;;  %2587 = vrot.lane.b32.xlu0 %v2477_v50, %s9739_s27 }
0x12e7   :  { %v8872_v51 = vpack.c.bf16 %v3338_v49, %v3337_v48 }
0x12e9   :  { %v2578_v56 = vpop.f32.mrb[22].mxu0  ;;  %v2698_v58 = vpop.f32.mrb[20].mxu1 }
0x12ea   :  { %v8156_v59 = vpop.f32.mrb[23].mxu0  ;;  %v8161_v60 = vpop.f32.mrb[21].mxu1 }
0x12eb   :  { %v306_v59 = vld [vmem:[%s11381_s12] sm:$0x3]  ;;  %s11410_s12 = sld [smem:[#allocation35_spill]] }
0x12ec   :  { %v3245_v60 = vld [vmem:[%s11382_s15] sm:$0xff] }
0x12ed   :  { %v2904_v43 = vpop.f32.mrb[22].mxu1 }
0x12ee   :  { %v8171_v61 = vpop.f32.mrb[23].mxu1 }
0x12ef   :  { %v2802_v57 = vpop.f32.mrb[24].mxu0 }
0x12f0   :  { %3011 = vrot.lane.b32.xlu1 %v2802_v57, %s9738_s6  ;;  %v8166_v62 = vpop.f32.mrb[25].mxu0  ;;  %v3247_v57 = vld [vmem:[%s11382_s15 + $0x10] sm:$0xff] }
0x12f1   :  { %v3248_v62 = vld [vmem:[%s11382_s15 + $0x18] sm:$0xff] }
0x12f2   :  { %v8851_v63 = vpack.c.bf16 %v3248_v62, %v3247_v57 }
0x12f4   :  { %3015 = vrot.lane.b32.xlu1 %v2904_v43, %s9739_s27  ;;  %v3246_v43 = vld [vmem:[%s11382_s15 + $0x8] sm:$0xff] }
0x12f5   :  { %v8848_v61 = vpack.c.bf16 %v3246_v43, %v3245_v60 }
0x1344   :  { %v3006_v4 = vpop.f32.mrb[26].mxu0 }
0x1345   :  { %3019 = vrot.lane.b32.xlu1 %v3006_v4, %s9740_s11  ;;  %v8176_v42 = vpop.f32.mrb[27].mxu0  ;;  %v8854_v4 = vpack.c.bf16 %v3250_v3, %v3249_v2 }
0x1346   :  { %v3251_v42 = vld [vmem:[%s11382_s15 + $0x30] sm:$0xff] }
0x1349   :  { %2591 = vrot.lane.b32.xlu1 %v2578_v56, %s9740_s11  ;;  %v8875_v56 = vpack.c.bf16 %v3340_v54, %v3339_v53 }
0x1354   :  { %v2584_v5 = vpop.permute.xlu1 %2583 }
0x1355   :  { %v2594_v14 = vsel %vm1144_vm15, %v2273_v46, %v2584_v5  ;;  %v3252_v5 = vld [vmem:[%s11382_s15 + $0x38] sm:$0xff] }
0x1358   :  { %v2588_v12 = vpop.permute.xlu0 %2587 }
0x1359   :  { %v2595_v15 = vsel %vm1146_vm14, %v2594_v14, %v2588_v12  ;;  %v3256_v12 = vld [vmem:[%s11382_s15 + $0x58] sm:$0xff]  ;;  %v3257_v14 = vld [vmem:[%s11382_s15 + $0x60] sm:$0xff] }
0x1362   :  { %v3012_v6 = vpop.permute.xlu1 %3011 }
0x1363   :  { %v3022_v9 = vsel %vm1144_vm15, %v2698_v58, %v3012_v6  ;;  %v3341_v58 = vld [vmem:[%s10047_s8 + $0x20] sm:$0xff]  ;;  %v8857_v6 = vpack.c.bf16 %v3252_v5, %v3251_v42 }
0x1366   :  { %v3016_v8 = vpop.permute.xlu1 %3015 }
0x1367   :  { %v3023_v10 = vsel %vm1146_vm14, %v3022_v9, %v3016_v8  ;;  %v3253_v8 = vld [vmem:[%s11382_s15 + $0x40] sm:$0xff]  ;;  %v3254_v9 = vld [vmem:[%s11382_s15 + $0x48] sm:$0xff] }
0x13b7   :  { %v3020_v11 = vpop.permute.xlu1 %3019 }
0x13b8   :  { %v3024_v13 = vsel %vm1148_vm1, %v3023_v10, %v3020_v11  ;;  %v8860_v10 = vpack.c.bf16 %v3254_v9, %v3253_v8  ;;  %v3255_v11 = vld [vmem:[%s11382_s15 + $0x50] sm:$0xff] }
0x13b9   :  { %v3026_v16 = vrot.slane %v3024_v13, 6  ;;  %v8863_v13 = vpack.c.bf16 %v3256_v12, %v3255_v11 }
0x13bb   :  { %v2592_v18 = vpop.permute.xlu1 %2591 }
0x13bc   :  { %v2596_v20 = vsel %vm1148_vm1, %v2595_v15, %v2592_v18  ;;  %v3258_v15 = vld [vmem:[%s11382_s15 + $0x68] sm:$0xff]  ;;  %v3259_v18 = vld [vmem:[%s11382_s15 + $0x70] sm:$0xff] }
0x13bd   :  { %v3028_v26 = vsel %vm432_vm4, %v2596_v20, %v3026_v16  ;;  %v8866_v16 = vpack.c.bf16 %v3258_v15, %v3257_v14  ;;  %v3260_v20 = vld [vmem:[%s11382_s15 + $0x78] sm:$0xff] }
0x13be   :  { %8186 = vmatmul.mubr.msk.f32.vlgmr.msra.gmra.mrb[24].mxu1 %vm470_vm7, %v3028_v26  ;;  %v8869_v26 = vpack.c.bf16 %v3260_v20, %v3259_v18 }
0x13bf   :  { %8231 = vmatprep.mubr.msk.f32.mxu1 %vm9731_vm0, %v9732_v1  ;;  %8849 = vmatpush3.bf16.msra.mxu1 %v8848_v61 }
0x13c0   :  { %8850 = vmatprep.subr.bf16.mxu1 %v9730_v0 }
0x13c3   :  { %8852 = vmatpush3.bf16.msra.mxu1 %v8851_v63 }
0x13c4   :  { %8853 = vmatprep.subr.bf16.mxu1 %v9730_v0 }
0x13c7   :  { %8855 = vmatpush3.bf16.msra.mxu1 %v8854_v4 }
0x13c8   :  { %8856 = vmatprep.subr.bf16.mxu1 %v9730_v0 }
0x13cb   :  { %8858 = vmatpush3.bf16.msra.mxu1 %v8857_v6 }
0x13cc   :  { %8859 = vmatprep.subr.bf16.mxu1 %v9730_v0 }
0x13cf   :  { %8861 = vmatpush3.bf16.msra.mxu1 %v8860_v10 }
0x13d0   :  { %8862 = vmatprep.subr.bf16.mxu1 %v9730_v0 }
0x13d3   :  { %8864 = vmatpush3.bf16.msra.mxu1 %v8863_v13 }
0x13d4   :  { %8865 = vmatprep.subr.bf16.mxu1 %v9730_v0 }
0x13d7   :  { %8867 = vmatpush3.bf16.msra.mxu1 %v8866_v16 }
0x13d8   :  { %8868 = vmatprep.subr.bf16.mxu1 %v9730_v0 }
0x13db   :  { %8870 = vmatpush3.bf16.msra.mxu1 %v8869_v26 }
0x13dc   :  { %8895 = vmatprep.subr.bf16.mxu1 %v9730_v0 }
0x1491   :  { %v3107_v28 = vpop.f32.mrb[24].mxu1 }
0x1492   :  { %v3108_v21 = vadd.f32 %v7521_v25, %v3107_v28  ;;  %v8187_v55 = vpop.f32.mrb[25].mxu1  ;;  %v7523_v25 = vld [vmem:[%s11379_s25 + $0x20] ss:$0 sm:$0xff] }
0x1494   :  { %v10542_v23 = vadd.f32 %v3108_v21, %v10353_v17  ;;  %v3138_v17 = vld [vmem:[%s11379_s25 + $0x10] sm:$0xff]  ;;  %s11408_s25 = sld [smem:[#allocation36_spill]] }
0x1495   :  { %v8845_v22 = vpack.c.bf16 %v3139_v33, %v3138_v17 }
0x1496   :  { %v3113_v24 = vsel %vm437_vm6, %v10542_v23, 0.0 }
0x1497   :  { %3114 = vadd.xlane.f32.xlu0 %v3113_v24  ;;  %8846 = vmatpush3.bf16.msra.mxu0 %v8845_v22 }
0x1498   :  { %8871 = vmatprep.subr.bf16.mxu0 %v9730_v0 }
0x1524   :  { %v3115_v30 = vpop.xlane.xlu0 %3114 }
0x1525   :  { %v3116_v31 = vmul.f32 0.03125, %v3115_v30 }
0x1527   :  { %v3117_v32 = vsub.f32 %v10542_v23, %v3116_v31 }
0x1529   :  { %v3118_v19 = vmul.f32 %v3117_v32, %v3117_v32 }
0x152b   :  { %v3119_v34 = vsel %vm437_vm6, %v3118_v19, 0.0 }
0x152c   :  { %3120 = vadd.xlane.f32.xlu1 %v3119_v34 }
0x15b9   :  { %v3121_v38 = vpop.xlane.xlu1 %3120 }
0x15ba   :  { %v3122_v39 = vmul.f32 0.03125, %v3121_v38 }
0x15bc   :  { %v3123_v40 = vadd.f32 1e-05, %v3122_v39 }
0x15be   :  { %9427 = vrsqrt.f32 %v3123_v40 }
0x15c8   :  { %v9428_v45 = vpop.eup %9427 }
0x15c9   :  { %v3125_v46 = vmul.f32 %v9428_v45, %v3117_v32  ;;  %v7526_v32 = vld [vmem:[%s10047_s8 + $0x28] ss:$0 sm:$0xff]  ;;  %s11383_s8 = sld [smem:[#allocation55_spill]] }
0x15cb   :  { %v3130_v50 = vmul.f32 %v3129_v44, %v3125_v46 }
0x15cd   :  { %v3135_v52 = vadd.f32 %v3134_v47, %v3130_v50 }
0x15cf   :  { %8197 = vmatmul.mubr.msk.f32.vlgmr.msra.gmra.mrb[28].mxu0 %vm470_vm7, %v3135_v52  ;;  %v3456_v57 = vld [vmem:[%s11383_s8 + $0x10] sm:$0xff]  ;;  %v3457_v62 = vld [vmem:[%s11383_s8 + $0x18] sm:$0xff]  ;;  %v3454_v6 = vld [vmem:[%s11383_s8] sm:$0xff] }
0x15d0   :  { %8873 = vmatpush3.bf16.msra.mxu0 %v8872_v51  ;;  %8244 = vmatprep.mubr.msk.f32.mxu0 %vm9731_vm0, %v9732_v1  ;;  %v9286_v63 = vpack.i.bf16 %v3457_v62, %v3456_v57  ;;  %v3455_v8 = vld [vmem:[%s11383_s8 + $0x8] sm:$0xff]  ;;  %v7529_v10 = vld [vmem:[%s11383_s8 + $0x20] ss:$0 sm:$0xff]  ;;  %s11412_s8 = sld [smem:[#allocation43_spill]] }
0x15d1   :  { %8874 = vmatprep.subr.bf16.mxu0 %v9730_v0  ;;  %v9281_v9 = vpack.i.bf16 %v3455_v8, %v3454_v6 }
0x15d2   :  { %9287 = vrot.lane.b32.xlu1 %v9286_v63, %s9734_s9 }
0x15d4   :  { %8876 = vmatpush3.bf16.msra.mxu0 %v8875_v56 }
0x15d5   :  { %8242 = vmatprep.subr.mxu0 %v9732_v1 }
0x15d6   :  { %3480 = vrot.lane.b32.xlu1 %v7529_v10, %s9734_s9  ;;  %v3772_v10 = vld [vmem:[%s11387_s22] sm:$0xff] }
0x15d8   :  { %8243 = vmatpush3.msra.mxu0 %v3341_v58 }
0x15d9   :  { %8245 = vmatmul.mubr.msk.f32.vlgmr.msra.gmra.mrb[30].mxu0 %vm3347_vm5, %v306_v59  ;;  %8877 = vmatprep.subr.bf16.mxu0 %v9730_v0  ;;  %vm11395_vm5 = vcmask 1042432  }
0x15da   :  { %8255 = vmatprep.mubr.msk.f32.mxu0 %vm9731_vm0, %v9732_v1 }
0x1644   :  { %v9288_v15 = vpop.permute.xlu1 %9287 }
0x1645   :  { %v9290_v20 = vunpack.i.h.bf16 %v9288_v15 }
0x16a2   :  { %v3214_v28 = vpop.f32.mrb[28].mxu0 }
0x16a3   :  { %v3215_v21 = vadd.f32 %v7523_v25, %v3214_v28  ;;  %v8198_v55 = vpop.f32.mrb[29].mxu0  ;;  %v9289_v28 = vunpack.i.l.bf16 %v9288_v15  ;;  %v3775_v15 = vld [vmem:[%s11387_s22 + $0x18] sm:$0xff] }
0x16a5   :  { %v3219_v24 = vmul.f32 0.70710677, %v3215_v21  ;;  %v3218_v60 = vmul.f32 0.5, %v3215_v21  ;;  %v8881_v55 = vpack.c.bf16 %v9290_v20, %v9289_v28  ;;  %v3777_v20 = vld [vmem:[%s11387_s22 + $0x28] sm:$0xff]  ;;  %v3779_v28 = vld [vmem:[%s11387_s22 + $0x38] sm:$0xff] }
0x16a7   :  { %v3222_v30 = vand.u32 2147483647, %v3219_v24  ;;  %vm3220_vm8 = vcmp.ge.f32.partialorder %v3219_v24, 0.0  ;;  %v3430_v24 = vld [vmem:[%s11384_s16] sm:$0x3]  ;;  %s11413_s16 = sld [smem:[#allocation40_spill]] }
0x16a8   :  { %v3221_v58 = vsel %vm3220_vm8, 1.0, %v9741_v7 }
0x16a9   :  { %v3223_v31 = vmul.f32 0.3275911, %v3222_v30  ;;  %v3236_v22 = vsub.f32 0.0, %v3222_v30 }
0x16ab   :  { %v3224_v19 = vadd.f32 1.0, %v3223_v31  ;;  %v3237_v40 = vmul.f32 %v3236_v22, %v3222_v30  ;;  %v3447_v30 = vrot.slane %v3430_v24, %v10098_v27  ;;  %v3558_v22 = vld [vmem:[%s11385_s18 + $0x10] sm:$0xff] }
0x16ac   :  { %v3417_v34 = vpop.f32.mrb[30].mxu0 }
0x16ad   :  { %9429 = vrcp.f32 %v3224_v19  ;;  %v3418_v35 = vadd.f32 %v7526_v32, %v3417_v34  ;;  %v8246_v36 = vpop.f32.mrb[31].mxu0  ;;  %v3238_v45 = vmul.f32 1.442695, %v3237_v40  ;;  %v3452_v19 = vrot.slane %v3430_v24, %v10102_v29  ;;  %v3556_v34 = vld [vmem:[%s11385_s18] sm:$0xff]  ;;  %v3481_v40 = vpop.permute.xlu1 %3480  ;;  %v3781_v24 = vld [vmem:[%s11387_s22 + $0x48] sm:$0xff] }
0x16af   :  { %v3421_v17 = vmax.f32 %v3418_v35, 0.0  ;;  %9431 = vpow2.f32 %v3238_v45  ;;  %v3557_v35 = vld [vmem:[%s11385_s18 + $0x8] sm:$0xff] }
0x16b1   :  { %v10597_v33 = vadd.f32 %v7528_v37, %v3421_v17  ;;  %v8884_v37 = vpack.c.bf16 %v3557_v35, %v3556_v34  ;;  %v3784_v34 = vld [vmem:[%s11387_s22 + $0x60] sm:$0xff]  ;;  %v3785_v35 = vld [vmem:[%s11387_s22 + $0x68] sm:$0xff] }
0x16b3   :  { %v3431_v38 = vsel %vm393_vm2, %v10597_v33, 0.0 }
0x16b4   :  { %3432 = vadd.xlane.f32.xlu0 %v3431_v38  ;;  %v3559_v38 = vld [vmem:[%s11385_s18 + $0x18] sm:$0xff] }
0x16b7   :  { %v9430_v39 = vpop.eup %9429 }
0x16b8   :  { %v3227_v41 = vmul.f32 1.0614054, %v9430_v39 }
0x16b9   :  { %v9432_v53 = vpop.eup %9431 }
0x16ba   :  { %v3228_v44 = vadd.f32 -1.4531521, %v3227_v41 }
0x16bc   :  { %v3229_v46 = vmul.f32 %v9430_v39, %v3228_v44 }
0x16be   :  { %v3230_v47 = vadd.f32 1.4214138, %v3229_v46  ;;  %v7531_v46 = vld [vmem:[%s11385_s18 + $0x20] ss:$0 sm:$0xff]  ;;  %s11414_s18 = sld [smem:[#allocation42_spill]] }
0x16c0   :  { %v3231_v48 = vmul.f32 %v9430_v39, %v3230_v47 }
0x16c2   :  { %v3232_v49 = vadd.f32 -0.28449672, %v3231_v48 }
0x16c4   :  { %v3233_v50 = vmul.f32 %v9430_v39, %v3232_v49 }
0x16c6   :  { %v3234_v51 = vadd.f32 0.2548296, %v3233_v50 }
0x16c8   :  { %v3235_v52 = vmul.f32 %v9430_v39, %v3234_v51  ;;  %v8887_v39 = vpack.c.bf16 %v3559_v38, %v3558_v22  ;;  %v7533_v38 = vld [vmem:[%s11386_s20 + $0x20] ss:$0 sm:$0xff] }
0x16ca   :  { %v3240_v54 = vmul.f32 %v9432_v53, %v3235_v52 }
0x16cc   :  { %v3241_v56 = vsub.f32 1.0, %v3240_v54 }
0x16ce   :  { %v3242_v59 = vmul.f32 %v3241_v56, %v3221_v58 }
0x16d0   :  { %v3243_v43 = vadd.f32 1.0, %v3242_v59  ;;  %v3663_v59 = vld [vmem:[%s11386_s20] sm:$0xff] }
0x16d2   :  { %v3244_v61 = vmul.f32 %v3243_v43, %v3218_v60  ;;  %v3664_v60 = vld [vmem:[%s11386_s20 + $0x8] sm:$0xff] }
0x16d3   :  { %v8890_v43 = vpack.c.bf16 %v3664_v60, %v3663_v59 }
0x16d4   :  { %8232 = vmatmul.mubr.f32.vlgmr.msra.gmra.mrb[26].mxu1 %v3244_v61  ;;  %v3666_v61 = vld [vmem:[%s11386_s20 + $0x18] sm:$0xff] }
0x16d5   :  { %8312 = vmatprep.mubr.msk.f32.mxu1 %vm9731_vm0, %v9732_v1 }
0x1741   :  { %v3433_v2 = vpop.xlane.xlu0 %3432 }
0x1742   :  { %v3434_v3 = vmul.f32 0.03125, %v3433_v2 }
0x1744   :  { %v3435_v4 = vsub.f32 %v10597_v33, %v3434_v3  ;;  %v3639_v3 = vld [vmem:[#allocation5] sm:$0x3] }
0x1745   :  { %v3661_v6 = vrot.slane %v3639_v3, %v10102_v29 }
0x1746   :  { %v3436_v42 = vmul.f32 %v3435_v4, %v3435_v4 }
0x1748   :  { %v3437_v5 = vsel %vm393_vm2, %v3436_v42, 0.0 }
0x1749   :  { %3438 = vadd.xlane.f32.xlu0 %v3437_v5 }
0x175f   :  { %9282 = vrot.lane.b32.xlu0 %v9281_v9, %s9734_s9 }
0x17a7   :  { %v10614_v11 = vpop.f32.mrb[26].mxu1 }
0x17a8   :  { %v8233_v12 = vpop.f32.mrb[27].mxu1 }
0x17a9   :  { %v3773_v12 = vld [vmem:[%s11387_s22 + $0x8] sm:$0xff] }
0x17d6   :  { %v3439_v13 = vpop.xlane.xlu0 %3438 }
0x17d7   :  { %v3440_v14 = vmul.f32 0.03125, %v3439_v13  ;;  %v8896_v13 = vpack.c.bf16 %v3773_v12, %v3772_v10 }
0x17d9   :  { %v3441_v16 = vadd.f32 1e-05, %v3440_v14  ;;  %8897 = vmatpush3.bf16.msra.mxu1 %v8896_v13  ;;  %v3774_v14 = vld [vmem:[%s11387_s22 + $0x10] sm:$0xff] }
0x17da   :  { %v9283_v18 = vpop.permute.xlu0 %9282  ;;  %8898 = vmatprep.subr.bf16.mxu1 %v9730_v0 }
0x17db   :  { %9433 = vrsqrt.f32 %v3441_v16  ;;  %v9285_v26 = vunpack.i.h.bf16 %v9283_v18  ;;  %v9284_v25 = vunpack.i.l.bf16 %v9283_v18  ;;  %v8899_v16 = vpack.c.bf16 %v3775_v15, %v3774_v14  ;;  %v3776_v18 = vld [vmem:[%s11387_s22 + $0x20] sm:$0xff]  ;;  %v3889_v15 = vld [vmem:[%s10037_s24 + $0x8] sm:$0xff] }
0x17dc   :  { %v3888_v14 = vld [vmem:[%s10037_s24] sm:$0xff] }
0x17dd   :  { %v8878_v21 = vpack.c.bf16 %v9285_v26, %v9284_v25  ;;  %8900 = vmatpush3.bf16.msra.mxu1 %v8899_v16  ;;  %v8902_v26 = vpack.c.bf16 %v3777_v20, %v3776_v18  ;;  %v3778_v25 = vld [vmem:[%s11387_s22 + $0x30] sm:$0xff]  ;;  %v9291_v16 = vpack.i.bf16 %v3889_v15, %v3888_v14 }
0x17de   :  { %8901 = vmatprep.subr.bf16.mxu1 %v9730_v0 }
0x17df   :  { %8879 = vmatpush3.bf16.msra.mxu0 %v8878_v21  ;;  %v8905_v21 = vpack.c.bf16 %v3779_v28, %v3778_v25 }
0x17e0   :  { %8880 = vmatprep.subr.bf16.mxu0 %v9730_v0 }
0x17e1   :  { %8903 = vmatpush3.bf16.msra.mxu1 %v8902_v26 }
0x17e2   :  { %8904 = vmatprep.subr.bf16.mxu1 %v9730_v0 }
0x17e3   :  { %8882 = vmatpush3.bf16.msra.mxu0 %v8881_v55  ;;  %v3780_v55 = vld [vmem:[%s11387_s22 + $0x40] sm:$0xff] }
0x17e4   :  { %8883 = vmatprep.subr.bf16.mxu0 %v9730_v0 }
0x17e5   :  { %v9434_v31 = vpop.eup %9433  ;;  %8906 = vmatpush3.bf16.msra.mxu1 %v8905_v21  ;;  %v3891_v21 = vld [vmem:[%s10037_s24 + $0x18] sm:$0xff] }
0x17e6   :  { %v3443_v32 = vmul.f32 %v9434_v31, %v3435_v4  ;;  %v3656_v4 = vrot.slane %v3639_v3, %v10098_v27  ;;  %8907 = vmatprep.subr.bf16.mxu1 %v9730_v0  ;;  %v3782_v31 = vld [vmem:[%s11387_s22 + $0x50] sm:$0xff] }
0x17e8   :  { %v3448_v36 = vmul.f32 %v3447_v30, %v3443_v32  ;;  %v8908_v30 = vpack.c.bf16 %v3781_v24, %v3780_v55  ;;  %v3783_v32 = vld [vmem:[%s11387_s22 + $0x58] sm:$0xff] }
0x17ea   :  { %v3453_v17 = vadd.f32 %v3452_v19, %v3448_v36  ;;  %8909 = vmatpush3.bf16.msra.mxu1 %v8908_v30  ;;  %v8911_v19 = vpack.c.bf16 %v3783_v32, %v3782_v31  ;;  %v8914_v36 = vpack.c.bf16 %v3785_v35, %v3784_v34 }
0x17eb   :  { %8910 = vmatprep.subr.bf16.mxu1 %v9730_v0 }
0x17ec   :  { %8256 = vmatmul.mubr.msk.f32.vlgmr.msra.gmra.mrb[32].mxu0 %vm470_vm7, %v3453_v17  ;;  %v3787_v17 = vld [vmem:[%s11387_s22 + $0x78] sm:$0xff] }
0x17ed   :  { %8885 = vmatpush3.bf16.msra.mxu0 %v8884_v37  ;;  %8266 = vmatprep.mubr.msk.f32.mxu0 %vm9731_vm0, %v9732_v1  ;;  %v3786_v37 = vld [vmem:[%s11387_s22 + $0x70] sm:$0xff] }
0x17ee   :  { %8886 = vmatprep.subr.bf16.mxu0 %v9730_v0  ;;  %8912 = vmatpush3.bf16.msra.mxu1 %v8911_v19  ;;  %v8917_v22 = vpack.c.bf16 %v3787_v17, %v3786_v37  ;;  %v7536_v19 = vld [vmem:[%s10037_s24 + $0x20] ss:$0 sm:$0xff] }
0x17ef   :  { %8913 = vmatprep.subr.bf16.mxu1 %v9730_v0 }
0x17f1   :  { %8888 = vmatpush3.bf16.msra.mxu0 %v8887_v39 }
0x17f2   :  { %8889 = vmatprep.subr.bf16.mxu0 %v9730_v0  ;;  %8915 = vmatpush3.bf16.msra.mxu1 %v8914_v36 }
0x17f3   :  { %8916 = vmatprep.subr.bf16.mxu1 %v9730_v0 }
0x17f6   :  { %8918 = vmatpush3.bf16.msra.mxu1 %v8917_v22 }
0x17f7   :  { %8961 = vmatprep.subr.bf16.mxu1 %v9730_v0 }
0x18bf   :  { %v3552_v41 = vpop.f32.mrb[32].mxu0 }
0x18c0   :  { %v3553_v44 = vadd.f32 %v3552_v41, %v3481_v40  ;;  %v8257_v45 = vpop.f32.mrb[33].mxu0 }
0x18c2   :  { %8267 = vmatmul.mubr.msk.f32.vlgmr.msra.gmra.mrb[34].mxu0 %vm470_vm7, %v3553_v44 }
0x18c3   :  { %8277 = vmatprep.mubr.msk.f32.mxu0 %vm9731_vm0, %v9732_v1  ;;  %8891 = vmatpush3.bf16.msra.mxu0 %v8890_v43 }
0x18c4   :  { %8892 = vmatprep.subr.bf16.mxu0 %v9730_v0 }
0x1995   :  { %v3634_v47 = vpop.f32.mrb[34].mxu0 }
0x1996   :  { %v3635_v48 = vadd.f32 %v7531_v46, %v3634_v47  ;;  %v8268_v49 = vpop.f32.mrb[35].mxu0 }
0x1998   :  { %v10635_v50 = vadd.f32 %v3635_v48, %v10597_v33  ;;  %v3665_v33 = vld [vmem:[%s11386_s20 + $0x10] sm:$0xff]  ;;  %s11416_s20 = sld [smem:[#allocation41_spill]] }
0x1999   :  { %v8893_v57 = vpack.c.bf16 %v3666_v61, %v3665_v33 }
0x199a   :  { %v3640_v51 = vsel %vm393_vm2, %v10635_v50, 0.0 }
0x199b   :  { %3641 = vadd.xlane.f32.xlu1 %v3640_v51  ;;  %8894 = vmatpush3.bf16.msra.mxu0 %v8893_v57 }
0x199c   :  { %8919 = vmatprep.subr.bf16.mxu0 %v9730_v0 }
0x19ac   :  { %9292 = vrot.lane.b32.xlu1 %v9291_v16, %s9734_s9 }
0x19b0   :  { %3914 = vrot.lane.b32.xlu1 %v7536_v19, %s9734_s9 }
0x1a28   :  { %v3642_v52 = vpop.xlane.xlu1 %3641 }
0x1a29   :  { %v3643_v53 = vmul.f32 0.03125, %v3642_v52 }
0x1a2b   :  { %v3644_v54 = vsub.f32 %v10635_v50, %v3643_v53 }
0x1a2c   :  { %v9293_v24 = vpop.permute.xlu1 %9292 }
0x1a2d   :  { %v3645_v56 = vmul.f32 %v3644_v54, %v3644_v54  ;;  %v9295_v30 = vunpack.i.h.bf16 %v9293_v24  ;;  %v9294_v31 = vunpack.i.l.bf16 %v9293_v24  ;;  %v4207_v24 = vld [vmem:[%s11390_s26 + $0x8] sm:$0xff] }
0x1a2f   :  { %v3646_v58 = vsel %vm393_vm2, %v3645_v56, 0.0  ;;  %v8920_v32 = vpack.c.bf16 %v9295_v30, %v9294_v31  ;;  %v4208_v31 = vld [vmem:[%s11390_s26 + $0x10] sm:$0xff] }
0x1a30   :  { %3647 = vadd.xlane.f32.xlu0 %v3646_v58 }
0x1abd   :  { %v3648_v62 = vpop.xlane.xlu0 %3647 }
0x1abe   :  { %v3649_v63 = vmul.f32 0.03125, %v3648_v62 }
0x1ac0   :  { %v3650_v2 = vadd.f32 1e-05, %v3649_v63 }
0x1ac2   :  { %9435 = vrsqrt.f32 %v3650_v2 }
0x1acc   :  { %v9436_v42 = vpop.eup %9435 }
0x1acd   :  { %v3652_v5 = vmul.f32 %v9436_v42, %v3644_v54 }
0x1acf   :  { %v3657_v8 = vmul.f32 %v3656_v4, %v3652_v5 }
0x1ad1   :  { %v3662_v9 = vadd.f32 %v3661_v6, %v3657_v8  ;;  %v7535_v6 = vld [vmem:[%s11387_s22 + $0x80] ss:$0 sm:$0xff]  ;;  %s11417_s22 = sld [smem:[#allocation39_spill]] }
0x1ad3   :  { %8278 = vmatmul.mubr.msk.f32.vlgmr.msra.gmra.mrb[36].mxu0 %vm470_vm7, %v3662_v9 }
0x1ad4   :  { %8323 = vmatprep.mubr.msk.f32.mxu0 %vm9731_vm0, %v9732_v1  ;;  %8921 = vmatpush3.bf16.msra.mxu0 %v8920_v32  ;;  %v4209_v32 = vld [vmem:[%s11390_s26 + $0x18] sm:$0xff] }
0x1ad5   :  { %8922 = vmatprep.subr.bf16.mxu0 %v9730_v0  ;;  %v8941_v19 = vpack.c.bf16 %v4209_v32, %v4208_v31 }
0x1ba6   :  { %v3741_v39 = vpop.f32.mrb[36].mxu0 }
0x1ba7   :  { %v3742_v40 = vadd.f32 %v7533_v38, %v3741_v39  ;;  %v8279_v41 = vpop.f32.mrb[37].mxu0  ;;  %v3864_v39 = vld [vmem:[#allocation7] sm:$0x3] }
0x1ba9   :  { %v3746_v44 = vmul.f32 0.70710677, %v3742_v40  ;;  %v3745_v4 = vmul.f32 0.5, %v3742_v40  ;;  %v3881_v40 = vrot.slane %v3864_v39, %v10098_v27 }
0x1bab   :  { %v3749_v45 = vand.u32 2147483647, %v3746_v44  ;;  %vm3747_vm9 = vcmp.ge.f32.partialorder %v3746_v44, 0.0 }
0x1bac   :  { %v3748_v2 = vsel %vm3747_vm9, 1.0, %v9741_v7  ;;  %vm5418_vm9 = vcmask 58369  }
0x1bad   :  { %v3750_v46 = vmul.f32 0.3275911, %v3749_v45  ;;  %v3763_v48 = vsub.f32 0.0, %v3749_v45 }
0x1baf   :  { %v3751_v47 = vadd.f32 1.0, %v3750_v46  ;;  %v3764_v51 = vmul.f32 %v3763_v48, %v3749_v45  ;;  %v3886_v45 = vrot.slane %v3864_v39, %v10102_v29  ;;  %v3990_v46 = vld [vmem:[%s11388_s23] sm:$0xff]  ;;  %v4215_v39 = vld [vmem:[%s11390_s26 + $0x48] sm:$0xff] }
0x1bb1   :  { %9437 = vrcp.f32 %v3751_v47  ;;  %v3765_v54 = vmul.f32 1.442695, %v3764_v51  ;;  %v3991_v47 = vld [vmem:[%s11388_s23 + $0x8] sm:$0xff] }
0x1bb3   :  { %9439 = vpow2.f32 %v3765_v54 }
0x1bbb   :  { %v9438_v49 = vpop.eup %9437 }
0x1bbc   :  { %v3754_v52 = vmul.f32 1.0614054, %v9438_v49 }
0x1bbd   :  { %v9440_v57 = vpop.eup %9439 }
0x1bbe   :  { %v3755_v53 = vadd.f32 -1.4531521, %v3754_v52  ;;  %v3992_v52 = vld [vmem:[%s11388_s23 + $0x10] sm:$0xff] }
0x1bc0   :  { %v3756_v56 = vmul.f32 %v9438_v49, %v3755_v53  ;;  %v3993_v53 = vld [vmem:[%s11388_s23 + $0x18] sm:$0xff] }
0x1bc1   :  { %v8929_v54 = vpack.c.bf16 %v3993_v53, %v3992_v52  ;;  %v4298_v53 = vld [vmem:[%s11391_s28] sm:$0xff] }
0x1bc2   :  { %v3757_v58 = vadd.f32 1.4214138, %v3756_v56  ;;  %v3915_v56 = vpop.permute.xlu1 %3914 }
0x1bc4   :  { %v3758_v59 = vmul.f32 %v9438_v49, %v3757_v58 }
0x1bc6   :  { %v3759_v60 = vadd.f32 -0.28449672, %v3758_v59 }
0x1bc8   :  { %v3760_v43 = vmul.f32 %v9438_v49, %v3759_v60 }
0x1bca   :  { %v3761_v33 = vadd.f32 0.2548296, %v3760_v43  ;;  %v7538_v43 = vld [vmem:[%s11388_s23 + $0x20] ss:$0 sm:$0xff]  ;;  %s11418_s23 = sld [smem:[#allocation17_spill]] }
0x1bcc   :  { %v3762_v61 = vmul.f32 %v9438_v49, %v3761_v33  ;;  %v8926_v49 = vpack.c.bf16 %v3991_v47, %v3990_v46  ;;  %v4218_v46 = vld [vmem:[%s11390_s26 + $0x60] sm:$0xff]  ;;  %v4219_v47 = vld [vmem:[%s11390_s26 + $0x68] sm:$0xff] }
0x1bce   :  { %v3767_v62 = vmul.f32 %v9440_v57, %v3762_v61 }
0x1bd0   :  { %v3768_v63 = vsub.f32 1.0, %v3767_v62 }
0x1bd2   :  { %v3769_v3 = vmul.f32 %v3768_v63, %v3748_v2 }
0x1bd4   :  { %v3770_v42 = vadd.f32 1.0, %v3769_v3 }
0x1bd6   :  { %v3771_v5 = vmul.f32 %v3770_v42, %v3745_v4 }
0x1bd8   :  { %8313 = vmatmul.mubr.f32.vlgmr.msra.gmra.mrb[28].mxu1 %v3771_v5 }
0x1bd9   :  { %8391 = vmatprep.mubr.msk.f32.mxu1 %vm9731_vm0, %v9732_v1 }
0x1cab   :  { %v3859_v8 = vpop.f32.mrb[28].mxu1 }
0x1cac   :  { %v3860_v9 = vadd.f32 %v7535_v6, %v3859_v8  ;;  %v8314_v10 = vpop.f32.mrb[29].mxu1 }
0x1cae   :  { %v10682_v12 = vadd.f32 %v3860_v9, %v10635_v50  ;;  %v3890_v50 = vld [vmem:[%s10037_s24 + $0x10] sm:$0xff]  ;;  %s11389_s24 = sld [smem:[#allocation56_spill]] }
0x1caf   :  { %v9296_v55 = vpack.i.bf16 %v3891_v21, %v3890_v50 }
0x1cb0   :  { %v3865_v13 = vsel %vm393_vm2, %v10682_v12, 0.0 }
0x1cb1   :  { %3866 = vadd.xlane.f32.xlu0 %v3865_v13 }
0x1cb4   :  { %v4097_v6 = vld [vmem:[%s11389_s24] sm:$0xff]  ;;  %v4098_v8 = vld [vmem:[%s11389_s24 + $0x8] sm:$0xff]  ;;  %v4099_v10 = vld [vmem:[%s11389_s24 + $0x10] sm:$0xff] }
0x1cb5   :  { %v8932_v9 = vpack.c.bf16 %v4098_v8, %v4097_v6 }
0x1d3e   :  { %v3867_v18 = vpop.xlane.xlu0 %3866 }
0x1d3f   :  { %v3868_v20 = vmul.f32 0.03125, %v3867_v18  ;;  %v4073_v18 = vld [vmem:[#allocation8] sm:$0x3] }
0x1d41   :  { %v3869_v26 = vsub.f32 %v10682_v12, %v3868_v20  ;;  %v4090_v20 = vrot.slane %v4073_v18, %v10098_v27 }
0x1d43   :  { %v3870_v25 = vmul.f32 %v3869_v26, %v3869_v26 }
0x1d45   :  { %v3871_v28 = vsel %vm393_vm2, %v3870_v25, 0.0 }
0x1d46   :  { %3872 = vadd.xlane.f32.xlu0 %v3871_v28  ;;  %v4095_v28 = vrot.slane %v4073_v18, %v10102_v29 }
0x1d5c   :  { %9297 = vrot.lane.b32.xlu0 %v9296_v55, %s9734_s9  ;;  %v4206_v55 = vld [vmem:[%s11390_s26] sm:$0xff] }
0x1d5d   :  { %v8938_v30 = vpack.c.bf16 %v4207_v24, %v4206_v55 }
0x1dd3   :  { %v3873_v34 = vpop.xlane.xlu0 %3872 }
0x1dd4   :  { %v3874_v35 = vmul.f32 0.03125, %v3873_v34  ;;  %v4210_v34 = vld [vmem:[%s11390_s26 + $0x20] sm:$0xff] }
0x1dd6   :  { %v3875_v36 = vadd.f32 1e-05, %v3874_v35  ;;  %v4211_v35 = vld [vmem:[%s11390_s26 + $0x28] sm:$0xff] }
0x1dd7   :  { %v9298_v37 = vpop.permute.xlu0 %9297 }
0x1dd8   :  { %9441 = vrsqrt.f32 %v3875_v36  ;;  %v9300_v17 = vunpack.i.h.bf16 %v9298_v37  ;;  %v9299_v22 = vunpack.i.l.bf16 %v9298_v37  ;;  %v8944_v36 = vpack.c.bf16 %v4211_v35, %v4210_v34  ;;  %v4212_v37 = vld [vmem:[%s11390_s26 + $0x30] sm:$0xff] }
0x1dda   :  { %v8923_v38 = vpack.c.bf16 %v9300_v17, %v9299_v22  ;;  %v4213_v17 = vld [vmem:[%s11390_s26 + $0x38] sm:$0xff] }
0x1ddb   :  { %v8947_v22 = vpack.c.bf16 %v4213_v17, %v4212_v37  ;;  %v10767_v37 = vld [vmem:[%s11392_s29 + $0x8] sm:$0xff] }
0x1ddc   :  { %8924 = vmatpush3.bf16.msra.mxu0 %v8923_v38  ;;  %v4214_v38 = vld [vmem:[%s11390_s26 + $0x40] sm:$0xff] }
0x1ddd   :  { %8925 = vmatprep.subr.bf16.mxu0 %v9730_v0 }
0x1de2   :  { %v9442_v41 = vpop.eup %9441 }
0x1de3   :  { %v3877_v44 = vmul.f32 %v9442_v41, %v3869_v26  ;;  %v4216_v41 = vld [vmem:[%s11390_s26 + $0x50] sm:$0xff] }
0x1de5   :  { %v3882_v48 = vmul.f32 %v3881_v40, %v3877_v44  ;;  %v8950_v40 = vpack.c.bf16 %v4215_v39, %v4214_v38  ;;  %v4217_v44 = vld [vmem:[%s11390_s26 + $0x58] sm:$0xff] }
0x1de7   :  { %v3887_v51 = vadd.f32 %v3886_v45, %v3882_v48  ;;  %v8953_v45 = vpack.c.bf16 %v4217_v44, %v4216_v41  ;;  %v8956_v48 = vpack.c.bf16 %v4219_v47, %v4218_v46  ;;  %v10780_v41 = vld [vmem:[%s11392_s29 + $0x18] sm:$0xff]  ;;  %v7542_v46 = vld [vmem:[%s11390_s26 + $0x80] ss:$0 sm:$0xff] }
0x1de8   :  { %v4400_v47 = vld [vmem:[%s11393_s1] sm:$0xff] }
0x1de9   :  { %8324 = vmatmul.mubr.msk.f32.vlgmr.msra.gmra.mrb[38].mxu0 %vm470_vm7, %v3887_v51  ;;  %v4221_v51 = vld [vmem:[%s11390_s26 + $0x78] sm:$0xff] }
0x1dea   :  { %8927 = vmatpush3.bf16.msra.mxu0 %v8926_v49  ;;  %8334 = vmatprep.mubr.msk.f32.mxu0 %vm9731_vm0, %v9732_v1  ;;  %v4220_v49 = vld [vmem:[%s11390_s26 + $0x70] sm:$0xff]  ;;  %s11420_s26 = sld [smem:[#allocation19_spill]] }
0x1deb   :  { %8928 = vmatprep.subr.bf16.mxu0 %v9730_v0  ;;  %v8959_v52 = vpack.c.bf16 %v4221_v51, %v4220_v49 }
0x1dee   :  { %8930 = vmatpush3.bf16.msra.mxu0 %v8929_v54  ;;  %v4299_v54 = vld [vmem:[%s11391_s28 + $0x8] sm:$0xff] }
0x1def   :  { %8931 = vmatprep.subr.bf16.mxu0 %v9730_v0 }
0x1ebc   :  { %v3986_v58 = vpop.f32.mrb[38].mxu0 }
0x1ebd   :  { %v3987_v59 = vadd.f32 %v3986_v58, %v3915_v56  ;;  %v8325_v60 = vpop.f32.mrb[39].mxu0  ;;  %v4300_v56 = vld [vmem:[%s11391_s28 + $0x10] sm:$0xff]  ;;  %v9301_v58 = vpack.i.bf16 %v4299_v54, %v4298_v53 }
0x1ebf   :  { %8335 = vmatmul.mubr.msk.f32.vlgmr.msra.gmra.mrb[40].mxu0 %vm470_vm7, %v3987_v59  ;;  %v4301_v59 = vld [vmem:[%s11391_s28 + $0x18] sm:$0xff] }
0x1ec0   :  { %8345 = vmatprep.mubr.msk.f32.mxu0 %vm9731_vm0, %v9732_v1  ;;  %8933 = vmatpush3.bf16.msra.mxu0 %v8932_v9  ;;  %v9306_v60 = vpack.i.bf16 %v4301_v59, %v4300_v56  ;;  %v4402_v56 = vld [vmem:[%s11393_s1 + $0x10] sm:$0xff] }
0x1ec1   :  { %8934 = vmatprep.subr.bf16.mxu0 %v9730_v0 }
0x1f92   :  { %v4068_v33 = vpop.f32.mrb[40].mxu0 }
0x1f93   :  { %v4069_v61 = vadd.f32 %v7538_v43, %v4068_v33  ;;  %v8336_v57 = vpop.f32.mrb[41].mxu0  ;;  %v7540_v43 = vld [vmem:[%s11389_s24 + $0x20] ss:$0 sm:$0xff] }
0x1f95   :  { %v10714_v62 = vadd.f32 %v4069_v61, %v10682_v12  ;;  %v4100_v12 = vld [vmem:[%s11389_s24 + $0x18] sm:$0xff]  ;;  %s11419_s24 = sld [smem:[#allocation18_spill]] }
0x1f96   :  { %v8935_v13 = vpack.c.bf16 %v4100_v12, %v4099_v10 }
0x1f97   :  { %v4074_v63 = vsel %vm393_vm2, %v10714_v62, 0.0 }
0x1f98   :  { %4075 = vadd.xlane.f32.xlu1 %v4074_v63  ;;  %8936 = vmatpush3.bf16.msra.mxu0 %v8935_v13 }
0x1f99   :  { %8937 = vmatprep.subr.bf16.mxu0 %v9730_v0 }
0x1fa9   :  { %9307 = vrot.lane.b32.xlu1 %v9306_v60, %s9734_s9 }
0x2025   :  { %v4076_v2 = vpop.xlane.xlu1 %4075 }
0x2026   :  { %v4077_v3 = vmul.f32 0.03125, %v4076_v2 }
0x2028   :  { %v4078_v4 = vsub.f32 %v10714_v62, %v4077_v3 }
0x2029   :  { %v9308_v55 = vpop.permute.xlu1 %9307 }
0x202a   :  { %v4079_v42 = vmul.f32 %v4078_v4, %v4078_v4  ;;  %v9310_v24 = vunpack.i.h.bf16 %v9308_v55 }
0x202c   :  { %v4080_v5 = vsel %vm393_vm2, %v4079_v42, 0.0 }
0x202d   :  { %4081 = vadd.xlane.f32.xlu0 %v4080_v5 }
0x2043   :  { %9302 = vrot.lane.b32.xlu0 %v9301_v58, %s9734_s9 }
0x20ba   :  { %v4082_v14 = vpop.xlane.xlu0 %4081 }
0x20bb   :  { %v4083_v15 = vmul.f32 0.03125, %v4082_v14 }
0x20bd   :  { %v4084_v16 = vadd.f32 1e-05, %v4083_v15 }
0x20bf   :  { %9443 = vrsqrt.f32 %v4084_v16 }
0x20c9   :  { %v9444_v26 = vpop.eup %9443 }
0x20ca   :  { %v4086_v25 = vmul.f32 %v9444_v26, %v4078_v4 }
0x20cc   :  { %v4091_v50 = vmul.f32 %v4090_v20, %v4086_v25  ;;  %v9303_v25 = vpop.permute.xlu0 %9302 }
0x20ce   :  { %v4096_v21 = vadd.f32 %v4095_v28, %v4091_v50  ;;  %v9305_v50 = vunpack.i.h.bf16 %v9303_v25 }
0x20d0   :  { %8346 = vmatmul.mubr.msk.f32.vlgmr.msra.gmra.mrb[42].mxu0 %vm470_vm7, %v4096_v21  ;;  %v9304_v21 = vunpack.i.l.bf16 %v9303_v25  ;;  %v4515_v25 = vld [vmem:[%s11394_s2] sm:$0xff] }
0x20d1   :  { %8380 = vmatprep.mubr.msk.f32.mxu0 %vm9731_vm0, %v9732_v1  ;;  %8939 = vmatpush3.bf16.msra.mxu0 %v8938_v30  ;;  %v9309_v30 = vunpack.i.l.bf16 %v9308_v55 }
0x20d2   :  { %8940 = vmatprep.subr.bf16.mxu0 %v9730_v0  ;;  %v8962_v32 = vpack.c.bf16 %v9305_v50, %v9304_v21  ;;  %v4517_v50 = vld [vmem:[%s11394_s2 + $0x10] sm:$0xff]  ;;  %v4518_v21 = vld [vmem:[%s11394_s2 + $0x18] sm:$0xff] }
0x20d3   :  { %v8965_v35 = vpack.c.bf16 %v9310_v24, %v9309_v30  ;;  %v8977_v55 = vpack.c.bf16 %v4518_v21, %v4517_v50 }
0x20d4   :  { %8963 = vmatpush3.bf16.msra.mxu1 %v8962_v32  ;;  %v4491_v32 = vld [vmem:[%s11396_s7] sm:$0x3] }
0x20d5   :  { %8942 = vmatpush3.bf16.msra.mxu0 %v8941_v19  ;;  %8964 = vmatprep.subr.bf16.mxu1 %v9730_v0 }
0x20d6   :  { %8943 = vmatprep.subr.bf16.mxu0 %v9730_v0 }
0x20d8   :  { %8966 = vmatpush3.bf16.msra.mxu1 %v8965_v35 }
0x20d9   :  { %8945 = vmatpush3.bf16.msra.mxu0 %v8944_v36  ;;  %v10764_v36 = vld [vmem:[%s11392_s29] sm:$0xff]  ;;  %8967 = vmatprep.subr.bf16.mxu1 %v9730_v0 }
0x20da   :  { %8946 = vmatprep.subr.bf16.mxu0 %v9730_v0  ;;  %v9004_v38 = vpack.c.bf16 %v10767_v37, %v10764_v36 }
0x20dd   :  { %8948 = vmatpush3.bf16.msra.mxu0 %v8947_v22 }
0x20de   :  { %8949 = vmatprep.subr.bf16.mxu0 %v9730_v0 }
0x20e1   :  { %8951 = vmatpush3.bf16.msra.mxu0 %v8950_v40  ;;  %v10777_v40 = vld [vmem:[%s11392_s29 + $0x10] sm:$0xff] }
0x20e2   :  { %8952 = vmatprep.subr.bf16.mxu0 %v9730_v0  ;;  %v9007_v44 = vpack.c.bf16 %v10780_v41, %v10777_v40 }
0x20e5   :  { %8954 = vmatpush3.bf16.msra.mxu0 %v8953_v45  ;;  %v7543_v45 = vld [vmem:[%s11391_s28 + $0x20] ss:$0 sm:$0xff]  ;;  %s9743_s28 = smov [#allocation11]  }
0x20e6   :  { %8955 = vmatprep.subr.bf16.mxu0 %v9730_v0  ;;  %4324 = vrot.lane.b32.xlu1 %v7543_v45, %s9734_s9 }
0x20e9   :  { %8957 = vmatpush3.bf16.msra.mxu0 %v8956_v48  ;;  %v4401_v48 = vld [vmem:[%s11393_s1 + $0x8] sm:$0xff] }
0x20ea   :  { %8958 = vmatprep.subr.bf16.mxu0 %v9730_v0  ;;  %v8968_v53 = vpack.c.bf16 %v4401_v48, %v4400_v47  ;;  %v4627_v47 = vld [vmem:[%s11397_s4 + $0x18] sm:$0xff] }
0x20ed   :  { %8960 = vmatpush3.bf16.msra.mxu0 %v8959_v52 }
0x20ee   :  { %9003 = vmatprep.subr.bf16.mxu0 %v9730_v0 }
0x2158   :  { %v4325_v59 = vpop.permute.xlu1 %4324 }
0x21a3   :  { %v4175_v33 = vpop.f32.mrb[42].mxu0 }
0x21a4   :  { %v4176_v61 = vadd.f32 %v7540_v43, %v4175_v33  ;;  %v8347_v57 = vpop.f32.mrb[43].mxu0 }
0x21a6   :  { %v4180_v63 = vmul.f32 0.70710677, %v4176_v61  ;;  %v4179_v17 = vmul.f32 0.5, %v4176_v61 }
0x21a8   :  { %v4183_v2 = vand.u32 2147483647, %v4180_v63  ;;  %vm4181_vm12 = vcmp.ge.f32.partialorder %v4180_v63, 0.0  ;;  %v7545_v63 = vld [vmem:[%s11393_s1 + $0x20] ss:$0 sm:$0xff] }
0x21a9   :  { %v4182_v19 = vsel %vm4181_vm12, 1.0, %v9741_v7  ;;  %vm5010_vm12 = vcmask 8192  }
0x21aa   :  { %v4184_v3 = vmul.f32 0.3275911, %v4183_v2  ;;  %v4197_v42 = vsub.f32 0.0, %v4183_v2 }
0x21ac   :  { %v4185_v4 = vadd.f32 1.0, %v4184_v3  ;;  %v4198_v6 = vmul.f32 %v4197_v42, %v4183_v2  ;;  %v7525_v2 = vld [vmem:[%s11382_s15 + $0x80] ss:$0 sm:$0xff]  ;;  %s11411_s15 = sld [smem:[#allocation33_spill]] }
0x21ae   :  { %9445 = vrcp.f32 %v4185_v4  ;;  %v4199_v10 = vmul.f32 1.442695, %v4198_v6 }
0x21b0   :  { %9447 = vpow2.f32 %v4199_v10 }
0x21b8   :  { %v9446_v5 = vpop.eup %9445 }
0x21b9   :  { %v4188_v8 = vmul.f32 1.0614054, %v9446_v5 }
0x21ba   :  { %v9448_v26 = vpop.eup %9447 }
0x21bb   :  { %v4189_v9 = vadd.f32 -1.4531521, %v4188_v8 }
0x21bd   :  { %v4190_v12 = vmul.f32 %v9446_v5, %v4189_v9 }
0x21bf   :  { %v4191_v13 = vadd.f32 1.4214138, %v4190_v12 }
0x21c1   :  { %v4192_v14 = vmul.f32 %v9446_v5, %v4191_v13 }
0x21c3   :  { %v4193_v15 = vadd.f32 -0.28449672, %v4192_v14 }
0x21c5   :  { %v4194_v16 = vmul.f32 %v9446_v5, %v4193_v15 }
0x21c7   :  { %v4195_v18 = vadd.f32 0.2548296, %v4194_v16 }
0x21c9   :  { %v4196_v20 = vmul.f32 %v9446_v5, %v4195_v18  ;;  %v3333_v5 = vadd.f32 %v7525_v2, %v10614_v11  ;;  %v4637_v2 = vld [vmem:[%s11397_s4 + $0x68] sm:$0xff] }
0x21cb   :  { %v4201_v28 = vmul.f32 %v9448_v26, %v4196_v20  ;;  %v3336_v10 = vadd.f32 %v3333_v5, %v10542_v23  ;;  %v4516_v23 = vld [vmem:[%s11394_s2 + $0x8] sm:$0xff] }
0x21cd   :  { %v4202_v31 = vsub.f32 1.0, %v4201_v28  ;;  %v8974_v28 = vpack.c.bf16 %v4516_v23, %v4515_v25 }
0x21cf   :  { %v4203_v34 = vmul.f32 %v4202_v31, %v4182_v19  ;;  %v4508_v19 = vrot.slane %v4491_v32, %v10098_v27 }
0x21d1   :  { %v4204_v22 = vadd.f32 1.0, %v4203_v34 }
0x21d3   :  { %v4205_v39 = vmul.f32 %v4204_v22, %v4179_v17  ;;  %v4513_v17 = vrot.slane %v4491_v32, %v10102_v29 }
0x21d5   :  { %8381 = vmatmul.mubr.f32.vlgmr.msra.gmra.mrb[44].mxu0 %v4205_v39  ;;  %v4624_v39 = vld [vmem:[%s11397_s4] sm:$0xff] }
0x21d6   :  { %9005 = vmatpush3.bf16.msra.mxu0 %v9004_v38  ;;  %8459 = vmatprep.mubr.msk.f32.mxu0 %vm9731_vm0, %v9732_v1 }
0x21d7   :  { %9006 = vmatprep.subr.bf16.mxu0 %v9730_v0 }
0x21da   :  { %9008 = vmatpush3.bf16.msra.mxu0 %v9007_v44  ;;  %v4625_v44 = vld [vmem:[%s11397_s4 + $0x8] sm:$0xff] }
0x21db   :  { %9009 = vmatprep.subr.bf16.mxu0 %v9730_v0  ;;  %v8980_v45 = vpack.c.bf16 %v4625_v44, %v4624_v39  ;;  %v7549_v44 = vld [vmem:[%s11397_s4 + $0x80] ss:$0 sm:$0xff] }
0x22a8   :  { %v4293_v49 = vpop.f32.mrb[44].mxu0 }
0x22a9   :  { %v4294_v51 = vadd.f32 %v7542_v46, %v4293_v49  ;;  %v8382_v52 = vpop.f32.mrb[45].mxu0  ;;  %v4626_v46 = vld [vmem:[%s11397_s4 + $0x10] sm:$0xff]  ;;  %v4628_v49 = vld [vmem:[%s11397_s4 + $0x20] sm:$0xff] }
0x22aa   :  { %v8983_v48 = vpack.c.bf16 %v4627_v47, %v4626_v46 }
0x22ab   :  { %v10791_v54 = vadd.f32 %v4294_v51, %v10714_v62  ;;  %v4403_v62 = vld [vmem:[%s11393_s1 + $0x18] sm:$0xff]  ;;  %v4629_v51 = vld [vmem:[%s11397_s4 + $0x28] sm:$0xff] }
0x22ac   :  { %v8971_v58 = vpack.c.bf16 %v4403_v62, %v4402_v56  ;;  %v8986_v52 = vpack.c.bf16 %v4629_v51, %v4628_v49  ;;  %v4631_v56 = vld [vmem:[%s11397_s4 + $0x38] sm:$0xff]  ;;  %v9311_v51 = vpack.i.bf16 %v10767_v37, %v10764_v36 }
0x22ad   :  { %8392 = vmatmul.mubr.msk.f32.vlgmr.msra.gmra.mrb[30].mxu1 %vm470_vm7, %v10791_v54  ;;  %8460 = vmatmul.mubr.msk.f32.vlgmr.msra.gmra.mrb[46].mxu0 %vm470_vm7, %v10791_v54 }
0x22ae   :  { %8969 = vmatpush3.bf16.msra.mxu1 %v8968_v53  ;;  %8402 = vmatprep.mubr.msk.f32.mxu1 %vm9731_vm0, %v9732_v1  ;;  %v4630_v53 = vld [vmem:[%s11397_s4 + $0x30] sm:$0xff] }
0x22af   :  { %8970 = vmatprep.subr.bf16.mxu1 %v9730_v0  ;;  %8470 = vmatprep.mubr.msk.f32.mxu0 %vm9731_vm0, %v9732_v1  ;;  %v8989_v62 = vpack.c.bf16 %v4631_v56, %v4630_v53  ;;  %v9326_v53 = vpack.i.bf16 %v10780_v41, %v10777_v40 }
0x22b2   :  { %8972 = vmatpush3.bf16.msra.mxu1 %v8971_v58  ;;  %v4632_v58 = vld [vmem:[%s11397_s4 + $0x40] sm:$0xff] }
0x22b3   :  { %8973 = vmatprep.subr.bf16.mxu1 %v9730_v0 }
0x2380   :  { %v4396_v60 = vpop.f32.mrb[30].mxu1  ;;  %v10805_v43 = vpop.f32.mrb[46].mxu0 }
0x2381   :  { %v4397_v33 = vadd.f32 %v4396_v60, %v4325_v59  ;;  %v8393_v61 = vpop.f32.mrb[31].mxu1  ;;  %v8461_v57 = vpop.f32.mrb[47].mxu0  ;;  %v4633_v59 = vld [vmem:[%s11397_s4 + $0x48] sm:$0xff] }
0x2382   :  { %v8992_v60 = vpack.c.bf16 %v4633_v59, %v4632_v58  ;;  %v4635_v61 = vld [vmem:[%s11397_s4 + $0x58] sm:$0xff] }
0x2383   :  { %8403 = vmatmul.mubr.msk.f32.vlgmr.msra.gmra.mrb[32].mxu1 %vm470_vm7, %v4397_v33  ;;  %v4634_v33 = vld [vmem:[%s11397_s4 + $0x50] sm:$0xff] }
0x2384   :  { %8413 = vmatprep.mubr.msk.f32.mxu1 %vm9731_vm0, %v9732_v1  ;;  %8975 = vmatpush3.bf16.msra.mxu1 %v8974_v28  ;;  %v8995_v57 = vpack.c.bf16 %v4635_v61, %v4634_v33 }
0x2385   :  { %8976 = vmatprep.subr.bf16.mxu1 %v9730_v0 }
0x2388   :  { %8978 = vmatpush3.bf16.msra.mxu1 %v8977_v55 }
0x2389   :  { %8979 = vmatprep.subr.bf16.mxu1 %v9730_v0 }
0x2456   :  { %v4478_v3 = vpop.f32.mrb[32].mxu1 }
0x2457   :  { %v4479_v4 = vadd.f32 %v7545_v63, %v4478_v3  ;;  %v8404_v42 = vpop.f32.mrb[33].mxu1  ;;  %v4636_v63 = vld [vmem:[%s11397_s4 + $0x60] sm:$0xff] }
0x2458   :  { %v8998_v3 = vpack.c.bf16 %v4637_v2, %v4636_v63  ;;  %v4639_v42 = vld [vmem:[%s11397_s4 + $0x78] sm:$0xff] }
0x2459   :  { %v4483_v6 = vrot.slane %v4479_v4, 7  ;;  %v4485_v8 = vrot.slane %v4479_v4, 6 }
0x245b   :  { %v4487_v9 = vsel %vm430_vm3, %v4479_v4, %v4483_v6  ;;  %v4638_v4 = vld [vmem:[%s11397_s4 + $0x70] sm:$0xff] }
0x245c   :  { %v4488_v12 = vsel %vm432_vm4, %v4487_v9, %v4483_v6  ;;  %v9001_v5 = vpack.c.bf16 %v4639_v42, %v4638_v4  ;;  %v7547_v6 = vld [vmem:[%s11394_s2 + $0x20] ss:$0 sm:$0xff] }
0x245d   :  { %v4489_v13 = vsel %vm11395_vm5, %v4488_v12, %v4485_v8  ;;  %vm5429_vm5 = vcmask 9217  }
0x245e   :  { %v4490_v14 = vadd.f32 %v4489_v13, %v3336_v10 }
0x2460   :  { %v4492_v15 = vsel %vm437_vm6, %v4490_v14, 0.0 }
0x2461   :  { %4493 = vadd.xlane.f32.xlu1 %v4492_v15 }
0x2472   :  { %9312 = vrot.lane.b32.xlu1 %v9311_v51, %s9733_s5 }
0x24ee   :  { %v4494_v16 = vpop.xlane.xlu1 %4493 }
0x24ef   :  { %v4495_v11 = vmul.f32 0.03125, %v4494_v16 }
0x24f1   :  { %v4496_v18 = vsub.f32 %v4490_v14, %v4495_v11 }
0x24f2   :  { %v9313_v37 = vpop.permute.xlu1 %9312 }
0x24f3   :  { %v4497_v20 = vmul.f32 %v4496_v18, %v4496_v18  ;;  %v9315_v59 = vunpack.i.h.bf16 %v9313_v37 }
0x24f5   :  { %v4498_v26 = vsel %vm437_vm6, %v4497_v20, 0.0 }
0x24f6   :  { %4499 = vadd.xlane.f32.xlu0 %v4498_v26 }
0x2583   :  { %v4500_v24 = vpop.xlane.xlu0 %4499 }
0x2584   :  { %v4501_v30 = vmul.f32 0.03125, %v4500_v24 }
0x2586   :  { %v4502_v31 = vadd.f32 1e-05, %v4501_v30 }
0x2588   :  { %9449 = vrsqrt.f32 %v4502_v31 }
0x2592   :  { %v9450_v34 = vpop.eup %9449 }
0x2593   :  { %v4504_v35 = vmul.f32 %v9450_v34, %v4496_v18 }
0x2595   :  { %v4509_v22 = vmul.f32 %v4508_v19, %v4504_v35 }
0x2597   :  { %v10828_v38 = vadd.f32 %v4513_v17, %v4509_v22 }
0x2599   :  { %8414 = vmatmul.mubr.msk.f32.vlgmr.msra.gmra.mrb[34].mxu1 %vm470_vm7, %v10828_v38 }
0x259a   :  { %8448 = vmatprep.mubr.msk.f32.mxu1 %vm9731_vm0, %v9732_v1  ;;  %8981 = vmatpush3.bf16.msra.mxu1 %v8980_v45 }
0x259b   :  { %8982 = vmatprep.subr.bf16.mxu1 %v9730_v0 }
0x259e   :  { %8984 = vmatpush3.bf16.msra.mxu1 %v8983_v48 }
0x259f   :  { %8985 = vmatprep.subr.bf16.mxu1 %v9730_v0 }
0x25a2   :  { %8987 = vmatpush3.bf16.msra.mxu1 %v8986_v52  ;;  %v10869_v52 = vld [vmem:[%s11392_s29 + $0x20] ss:$0 sm:$0xff]  ;;  %s7403_s29 = sshll.u32 %s9743_s28, 4  ;;  %s7404_s29 = int_to_ptr.vmem [resolvable:$true] %s7403_s29 }
0x25a3   :  { %8988 = vmatprep.subr.bf16.mxu1 %v9730_v0  ;;  %4836 = vrot.lane.b32.xlu1 %v10869_v52, %s9733_s5  ;;  %s9635_s1 = scalar_lea.vmem %s7404_s29, 32  ;;  %p9640_p13 = scmp.lt.s32.totalorder %s7404_s29, %s7404_s29 }
0x25a4   :  { %p9636_p12 = scmp.ne.s32.totalorder %s7404_s29, %s9635_s1  ;;  %p9641_p0 = scmp.lt.s32.totalorder %s9635_s1, %s9635_s1 }
0x25a6   :  { %8990 = vmatpush3.bf16.msra.mxu1 %v8989_v62  ;;  %p9642_p1 = por %p9641_p0, %p9640_p13 }
0x25a7   :  { %8991 = vmatprep.subr.bf16.mxu1 %v9730_v0  ;;  %9322 = vrot.lane.b32.xlu1 %v9311_v51, %s9734_s9 }
0x25a8   :  { %p9643_p2 = pnand %p9642_p1, %p9636_p12 }
0x25aa   :  { %8993 = vmatpush3.bf16.msra.mxu1 %v8992_v60  ;;  %v9314_v60 = vunpack.i.l.bf16 %v9313_v37 }
0x25ab   :  { %8994 = vmatprep.subr.bf16.mxu1 %v9730_v0  ;;  %9327 = vrot.lane.b32.xlu1 %v9326_v53, %s9734_s9 }
0x25ac   :  { %v9010_v33 = vpack.c.bf16 %v9315_v59, %v9314_v60 }
0x25ae   :  { %8996 = vmatpush3.bf16.msra.mxu1 %v8995_v57  ;;  %9011 = vmatpush3.bf16.msra.mxu0 %v9010_v33 }
0x25af   :  { %8997 = vmatprep.subr.bf16.mxu1 %v9730_v0  ;;  %9012 = vmatprep.subr.bf16.mxu0 %v9730_v0 }
0x25b2   :  { %8999 = vmatpush3.bf16.msra.mxu1 %v8998_v3 }
0x25b3   :  { %9000 = vmatprep.subr.bf16.mxu1 %v9730_v0 }
0x25b6   :  { %9002 = vmatpush3.bf16.msra.mxu1 %v9001_v5  ;;  %v4716_v5 = vld [vmem:[%s11398_s10] sm:$0x3] }
0x25b7   :  { %8489 = vmatprep.subr.mxu1 %v9732_v1 }
0x2615   :  { %v4837_v57 = vpop.permute.xlu1 %4836 }
0x2619   :  { %v9323_v42 = vpop.permute.xlu1 %9322 }
0x266c   :  { %v4593_v8 = vpop.f32.mrb[34].mxu1 }
0x266d   :  { %v4594_v9 = vadd.f32 %v7547_v6, %v4593_v8  ;;  %v8415_v10 = vpop.f32.mrb[35].mxu1  ;;  %v4733_v6 = vrot.slane %v4716_v5, %v10098_v27 }
0x266e   :  { %v9324_v10 = vunpack.i.l.bf16 %v9323_v42 }
0x266f   :  { %v4598_v12 = vmul.f32 0.70710677, %v4594_v9  ;;  %v4597_v17 = vmul.f32 0.5, %v4594_v9  ;;  %v9325_v9 = vunpack.i.h.bf16 %v9323_v42 }
0x2671   :  { %v4601_v13 = vand.u32 2147483647, %v4598_v12  ;;  %vm4599_vm8 = vcmp.ge.f32.partialorder %v4598_v12, 0.0 }
0x2672   :  { %v4600_v34 = vsel %vm4599_vm8, 1.0, %v9741_v7 }
0x2673   :  { %v4602_v14 = vmul.f32 0.3275911, %v4601_v13  ;;  %v4615_v16 = vsub.f32 0.0, %v4601_v13 }
0x2675   :  { %v4603_v15 = vadd.f32 1.0, %v4602_v14  ;;  %v4616_v18 = vmul.f32 %v4615_v16, %v4601_v13  ;;  %v9328_v13 = vpop.permute.xlu1 %9327  ;;  %v4738_v14 = vrot.slane %v4716_v5, %v10102_v29  ;;  %v9016_v16 = vpack.c.bf16 %v9325_v9, %v9324_v10 }
0x2677   :  { %9451 = vrcp.f32 %v4603_v15  ;;  %v4617_v25 = vmul.f32 1.442695, %v4616_v18  ;;  %v9329_v18 = vunpack.i.l.bf16 %v9328_v13 }
0x2679   :  { %9453 = vpow2.f32 %v4617_v25 }
0x2681   :  { %v9452_v11 = vpop.eup %9451 }
0x2682   :  { %v4606_v20 = vmul.f32 1.0614054, %v9452_v11 }
0x2683   :  { %v9454_v31 = vpop.eup %9453 }
0x2684   :  { %v4607_v26 = vadd.f32 -1.4531521, %v4606_v20 }
0x2686   :  { %v4608_v23 = vmul.f32 %v9452_v11, %v4607_v26 }
0x2688   :  { %v4609_v28 = vadd.f32 1.4214138, %v4608_v23  ;;  %v4816_v23 = vadd.f32 %v10869_v52, %v10805_v43 }
0x268a   :  { %v4610_v50 = vmul.f32 %v9452_v11, %v4609_v28 }
0x268c   :  { %v4611_v21 = vadd.f32 -0.28449672, %v4610_v50 }
0x268e   :  { %v4612_v55 = vmul.f32 %v9452_v11, %v4611_v21 }
0x2690   :  { %v4613_v24 = vadd.f32 0.2548296, %v4612_v55 }
0x2692   :  { %v4614_v30 = vmul.f32 %v9452_v11, %v4613_v24  ;;  %v9330_v11 = vunpack.i.h.bf16 %v9328_v13 }
0x2694   :  { %v4619_v32 = vmul.f32 %v9454_v31, %v4614_v30  ;;  %v9019_v26 = vpack.c.bf16 %v9330_v11, %v9329_v18 }
0x2696   :  { %v4620_v19 = vsub.f32 1.0, %v4619_v32 }
0x2698   :  { %v4621_v35 = vmul.f32 %v4620_v19, %v4600_v34 }
0x269a   :  { %v4622_v22 = vadd.f32 1.0, %v4621_v35 }
0x269c   :  { %v4623_v39 = vmul.f32 %v4622_v22, %v4597_v17 }
0x269e   :  { %8449 = vmatmul.mubr.f32.vlgmr.msra.gmra.mrb[36].mxu1 %v4623_v39 }
0x269f   :  { %8491 = vmatprep.mubr.msk.f32.mxu1 %vm9731_vm0, %v9732_v1 }
0x2771   :  { %v4711_v45 = vpop.f32.mrb[36].mxu1 }
0x2772   :  { %v4712_v46 = vadd.f32 %v7549_v44, %v4711_v45  ;;  %v8450_v47 = vpop.f32.mrb[37].mxu1 }
0x2774   :  { %v4715_v48 = vadd.f32 %v4712_v46, %v10828_v38 }
0x2776   :  { %v4717_v49 = vsel %vm437_vm6, %v4715_v48, 0.0 }
0x2777   :  { %4718 = vadd.xlane.f32.xlu0 %v4717_v49 }
0x2804   :  { %v4719_v38 = vpop.xlane.xlu0 %4718 }
0x2805   :  { %v4720_v56 = vmul.f32 0.03125, %v4719_v38 }
0x2807   :  { %v4721_v62 = vsub.f32 %v4715_v48, %v4720_v56 }
0x2809   :  { %v4722_v58 = vmul.f32 %v4721_v62, %v4721_v62 }
0x280b   :  { %v4723_v36 = vsel %vm437_vm6, %v4722_v58, 0.0  ;;  %vm4998_vm6 = vcmask 57344  }
0x280c   :  { %4724 = vadd.xlane.f32.xlu0 %v4723_v36 }
0x2822   :  { %9317 = vrot.lane.b32.xlu0 %v9326_v53, %s9733_s5  ;;  %s11400_s5 = sld [smem:[#allocation26_spill]] }
0x2899   :  { %v4725_v40 = vpop.xlane.xlu0 %4724 }
0x289a   :  { %v4726_v41 = vmul.f32 0.03125, %v4725_v40 }
0x289c   :  { %v4727_v61 = vadd.f32 1e-05, %v4726_v41 }
0x289d   :  { %v9318_v63 = vpop.permute.xlu0 %9317 }
0x289e   :  { %9455 = vrsqrt.f32 %v4727_v61  ;;  %v9320_v2 = vunpack.i.h.bf16 %v9318_v63  ;;  %v9319_v3 = vunpack.i.l.bf16 %v9318_v63 }
0x28a0   :  { %v9013_v4 = vpack.c.bf16 %v9320_v2, %v9319_v3 }
0x28a2   :  { %9014 = vmatpush3.bf16.msra.mxu0 %v9013_v4 }
0x28a3   :  { %9015 = vmatprep.subr.bf16.mxu0 %v9730_v0 }
0x28a8   :  { %v9456_v8 = vpop.eup %9455 }
0x28a9   :  { %v4729_v12 = vmul.f32 %v9456_v8, %v4721_v62 }
0x28ab   :  { %v4734_v15 = vmul.f32 %v4733_v6, %v4729_v12 }
0x28ad   :  { %v10884_v20 = vadd.f32 %v4738_v14, %v4734_v15 }
0x28af   :  { %8471 = vmatmul.mubr.msk.f32.vlgmr.msra.gmra.mrb[48].mxu0 %vm470_vm7, %v10884_v20 }
0x28b0   :  { %9017 = vmatpush3.bf16.msra.mxu0 %v9016_v16  ;;  %8481 = vmatprep.mubr.msk.f32.mxu0 %vm9731_vm0, %v9732_v1 }
0x28b1   :  { %9018 = vmatprep.subr.bf16.mxu0 %v9730_v0 }
0x28b4   :  { %9020 = vmatpush3.bf16.msra.mxu0 %v9019_v26 }
0x28b5   :  { %8484 = vmatprep.subr.mxu0 %v9732_v1 }
0x28b7   :  { %8482 = vmatmul.mubr.msk.f32.vlgmr.msra.gmra.mrb[50].mxu0 %vm470_vm7, %v10884_v20 }
0x28b8   :  { %8486 = vmatprep.mubr.msk.f32.mxu0 %vm9731_vm0, %v9732_v1 }
0x2982   :  { %v4908_v25 = vpop.f32.mrb[48].mxu0 }
0x2983   :  { %v4909_v28 = vadd.f32 %v4908_v25, %v4837_v57  ;;  %v8472_v50 = vpop.f32.mrb[49].mxu0 }
0x2985   :  { %v4997_v21 = vmul.f32 %v4909_v28, %v4816_v23  ;;  %v5003_v55 = vrot.slane %v4909_v28, 1  ;;  %v5422_v24 = vrot.slane %v4909_v28, 2 }
0x2987   :  { %v5005_v30 = vmul.f32 %v5003_v55, %v4816_v23  ;;  %v5424_v31 = vmul.f32 %v5422_v24, %v4816_v23  ;;  %5099 = vrot.lane.b32.xlu0 %v4997_v21, %s9735_s13  ;;  %v4999_v34 = vsel %vm4998_vm6, %v4997_v21, 0.0 }
0x2989   :  { %5106 = vrot.lane.b32.xlu1 %v5005_v30, %s9735_s13  ;;  %v5006_v43 = vsel %vm4998_vm6, %v5005_v30, 0.0  ;;  %v5425_v35 = vsel %vm5418_vm9, %v5424_v31, 0.0  ;;  %v5419_v17 = vsel %vm5418_vm9, %v5005_v30, 0.0 }
0x298a   :  { %v10900_v32 = vpop.f32.mrb[50].mxu0 }
0x298b   :  { %v8483_v19 = vpop.f32.mrb[51].mxu0  ;;  %5201 = vrot.lane.b32.xlu0 %v4997_v21, %s9736_s3 }
0x298d   :  { %5207 = vrot.lane.b32.xlu1 %v5005_v30, %s9736_s3 }
0x298f   :  { %5302 = vrot.lane.b32.xlu0 %v4997_v21, %s9737_s14 }
0x2991   :  { %5308 = vrot.lane.b32.xlu1 %v5005_v30, %s9737_s14 }
0x2993   :  { %5522 = vrot.lane.b32.xlu0 %v5424_v31, %s9735_s13 }
0x2995   :  { %5621 = vrot.lane.b32.xlu1 %v5424_v31, %s9736_s3 }
0x2997   :  { %5720 = vrot.lane.b32.xlu0 %v5424_v31, %s9737_s14 }
0x29b6   :  { %5007 = vadd.xlane.f32.xlu0 %v5006_v43 }
0x29b9   :  { %5000 = vadd.xlane.f32.xlu1 %v4999_v34 }
0x29ba   :  { %5426 = vadd.xlane.f32.xlu0 %v5425_v35 }
0x29bd   :  { %5420 = vadd.xlane.f32.xlu1 %v5419_v17 }
0x29f9   :  { %v5100_v22 = vpop.permute.xlu0 %5099 }
0x29fa   :  { %v5102_v39 = vsel %vm4998_vm6, %v5100_v22, 0.0 }
0x29fb   :  { %v5107_v44 = vpop.permute.xlu1 %5106  ;;  %5103 = vadd.xlane.f32.xlu0 %v5102_v39 }
0x29fc   :  { %v5109_v47 = vsel %vm4998_vm6, %v5107_v44, 0.0  ;;  %v5518_v62 = vsel %vm5418_vm9, %v5107_v44, 0.0 }
0x29fd   :  { %v5202_v45 = vpop.permute.xlu0 %5201 }
0x29fe   :  { %v5204_v46 = vsel %vm4998_vm6, %v5202_v45, 0.0 }
0x29ff   :  { %v5208_v48 = vpop.permute.xlu1 %5207  ;;  %5110 = vadd.xlane.f32.xlu0 %v5109_v47  ;;  %5205 = vadd.xlane.f32.xlu1 %v5204_v46 }
0x2a00   :  { %v5210_v53 = vsel %vm4998_vm6, %v5208_v48, 0.0  ;;  %v5618_v37 = vsel %vm5418_vm9, %v5208_v48, 0.0 }
0x2a01   :  { %v5303_v49 = vpop.permute.xlu0 %5302 }
0x2a02   :  { %v5305_v51 = vsel %vm4998_vm6, %v5303_v49, 0.0 }
0x2a03   :  { %v5309_v38 = vpop.permute.xlu1 %5308  ;;  %5211 = vadd.xlane.f32.xlu0 %v5210_v53  ;;  %5306 = vadd.xlane.f32.xlu1 %v5305_v51 }
0x2a04   :  { %v5311_v56 = vsel %vm4998_vm6, %v5309_v38, 0.0  ;;  %v5717_v33 = vsel %vm5418_vm9, %v5309_v38, 0.0 }
0x2a05   :  { %v5523_v58 = vpop.permute.xlu0 %5522 }
0x2a06   :  { %v5525_v36 = vsel %vm5418_vm9, %v5523_v58, 0.0 }
0x2a07   :  { %5312 = vadd.xlane.f32.xlu0 %v5311_v56  ;;  %5519 = vadd.xlane.f32.xlu1 %v5518_v62  ;;  %v5622_v59 = vpop.permute.xlu1 %5621 }
0x2a08   :  { %v5624_v60 = vsel %vm5418_vm9, %v5622_v59, 0.0 }
0x2a09   :  { %v5721_v40 = vpop.permute.xlu0 %5720 }
0x2a0a   :  { %v5723_v41 = vsel %vm5418_vm9, %v5721_v40, 0.0 }
0x2a0b   :  { %5526 = vadd.xlane.f32.xlu0 %v5525_v36  ;;  %5619 = vadd.xlane.f32.xlu1 %v5618_v37 }
0x2a0f   :  { %5625 = vadd.xlane.f32.xlu0 %v5624_v60  ;;  %5718 = vadd.xlane.f32.xlu1 %v5717_v33 }
0x2a13   :  { %5724 = vadd.xlane.f32.xlu0 %v5723_v41 }
0x2a43   :  { %v5008_v61 = vpop.xlane.xlu0 %5007 }
0x2a46   :  { %v5001_v57 = vpop.xlane.xlu1 %5000 }
0x2a47   :  { %v5009_v63 = vsel %vm736_vm10, %v5001_v57, %v5008_v61  ;;  %v5427_v3 = vpop.xlane.xlu0 %5426 }
0x2a48   :  { %v5011_v2 = vsel %vm5010_vm12, %v5009_v63, -inf }
0x2a49   :  { %5012 = vmax.xlane.f32.xlu1 %v5011_v2 }
0x2a4a   :  { %v5421_v4 = vpop.xlane.xlu1 %5420 }
0x2a4b   :  { %v5428_v15 = vsel %vm736_vm10, %v5421_v4, %v5427_v3 }
0x2a4c   :  { %v5430_v26 = vsel %vm5429_vm5, %v5428_v15, -inf }
0x2a88   :  { %v5104_v42 = vpop.xlane.xlu0 %5103 }
0x2a8c   :  { %v5111_v5 = vpop.xlane.xlu0 %5110  ;;  %v5206_v6 = vpop.xlane.xlu1 %5205 }
0x2a8d   :  { %v5112_v8 = vsel %vm736_vm10, %v5104_v42, %v5111_v5 }
0x2a8e   :  { %v5113_v9 = vsel %vm5010_vm12, %v5112_v8, -inf }
0x2a8f   :  { %5114 = vmax.xlane.f32.xlu0 %v5113_v9 }
0x2a90   :  { %v5212_v10 = vpop.xlane.xlu0 %5211  ;;  %v5307_v12 = vpop.xlane.xlu1 %5306 }
0x2a91   :  { %v5213_v13 = vsel %vm736_vm10, %v5206_v6, %v5212_v10 }
0x2a92   :  { %v5214_v14 = vsel %vm5010_vm12, %v5213_v13, -inf }
0x2a93   :  { %5215 = vmax.xlane.f32.xlu1 %v5214_v14 }
0x2a94   :  { %v5313_v16 = vpop.xlane.xlu0 %5312  ;;  %v5520_v18 = vpop.xlane.xlu1 %5519 }
0x2a95   :  { %v5314_v11 = vsel %vm736_vm10, %v5307_v12, %v5313_v16 }
0x2a96   :  { %v5315_v25 = vsel %vm5010_vm12, %v5314_v11, -inf }
0x2a97   :  { %5431 = vmax.xlane.f32.xlu1 %v5430_v26  ;;  %5316 = vmax.xlane.f32.xlu0 %v5315_v25 }
0x2a98   :  { %v5527_v23 = vpop.xlane.xlu0 %5526  ;;  %v5620_v21 = vpop.xlane.xlu1 %5619 }
0x2a99   :  { %v5528_v28 = vsel %vm736_vm10, %v5520_v18, %v5527_v23 }
0x2a9a   :  { %v5529_v50 = vsel %vm5429_vm5, %v5528_v28, -inf }
0x2a9b   :  { %5530 = vmax.xlane.f32.xlu0 %v5529_v50 }
0x2a9c   :  { %v5626_v55 = vpop.xlane.xlu0 %5625  ;;  %v5719_v31 = vpop.xlane.xlu1 %5718 }
0x2a9d   :  { %v5627_v24 = vsel %vm736_vm10, %v5620_v21, %v5626_v55 }
0x2a9e   :  { %v5628_v30 = vsel %vm5429_vm5, %v5627_v24, -inf }
0x2a9f   :  { %5629 = vmax.xlane.f32.xlu1 %v5628_v30 }
0x2aa0   :  { %v5725_v48 = vpop.xlane.xlu0 %5724 }
0x2ab0   :  { %4924 = vrot.lane.b32.xlu1 %v10869_v52, %s9734_s9 }
0x2ad6   :  { %v5013_v19 = vpop.xlane.xlu1 %5012 }
0x2ad7   :  { %v5014_v46 = vsub.f32 %v5009_v63, %v5013_v19 }
0x2ad9   :  { %v5015_v47 = vmul.f32 1.442695, %v5014_v46 }
0x2b1c   :  { %v5115_v56 = vpop.xlane.xlu0 %5114 }
0x2b1d   :  { %v5116_v62 = vsub.f32 %v5112_v8, %v5115_v56 }
0x2b1f   :  { %v5117_v36 = vmul.f32 1.442695, %v5116_v62 }
0x2b20   :  { %v5216_v43 = vpop.xlane.xlu1 %5215 }
0x2b21   :  { %v5217_v37 = vsub.f32 %v5213_v13, %v5216_v43 }
0x2b23   :  { %v5218_v59 = vmul.f32 1.442695, %v5217_v37 }
0x2b24   :  { %v5432_v34 = vpop.xlane.xlu1 %5431  ;;  %v5317_v58 = vpop.xlane.xlu0 %5316 }
0x2b25   :  { %v5433_v35 = vsub.f32 %v5428_v15, %v5432_v34  ;;  %v5318_v60 = vsub.f32 %v5314_v11, %v5317_v58 }
0x2b27   :  { %v5434_v17 = vmul.f32 1.442695, %v5433_v35  ;;  %v5319_v40 = vmul.f32 1.442695, %v5318_v60 }
0x2b28   :  { %v5531_v33 = vpop.xlane.xlu0 %5530 }
0x2b29   :  { %9457 = vpow2.f32 %v5434_v17  ;;  %v5532_v41 = vsub.f32 %v5528_v28, %v5531_v33 }
0x2b2a   :  { %9459 = vpow2.f32 %v5015_v47 }
0x2b2b   :  { %9461 = vpow2.f32 %v5117_v36  ;;  %v5533_v61 = vmul.f32 1.442695, %v5532_v41 }
0x2b2c   :  { %v5630_v22 = vpop.xlane.xlu1 %5629  ;;  %9463 = vpow2.f32 %v5218_v59 }
0x2b2d   :  { %9465 = vpow2.f32 %v5319_v40  ;;  %v5631_v57 = vsub.f32 %v5627_v24, %v5630_v22 }
0x2b2e   :  { %9467 = vpow2.f32 %v5533_v61 }
0x2b2f   :  { %v5632_v2 = vmul.f32 1.442695, %v5631_v57  ;;  %v5835_v57 = vld [vmem:[%s11399_s0] sm:$0xff] }
0x2b30   :  { %v4925_v39 = vpop.permute.xlu1 %4924 }
0x2b31   :  { %v4994_v44 = vadd.f32 %v10900_v32, %v4925_v39  ;;  %v5726_v32 = vsel %vm736_vm10, %v5719_v31, %v5725_v48  ;;  %9469 = vpow2.f32 %v5632_v2  ;;  %vm6188_vm10 = vcmask 523264  }
0x2b32   :  { %v5727_v49 = vsel %vm5429_vm5, %v5726_v32, -inf }
0x2b33   :  { %5124 = vrot.lane.b32.xlu0 %v4994_v44, %s9735_s13  ;;  %8485 = vmatpush3.msk.msra.mxu0 %vm432_vm4, %v4994_v44  ;;  %v10944_v45 = vpop.eup %9457  ;;  %v10954_v38 = vrot.slane %v4994_v44, 2 }
0x2b34   :  { %8494 = vmatprep.subr.mxu0 %v9732_v1  ;;  %v5436_v52 = vsel %vm5429_vm5, %v10944_v45, 0.0  ;;  %v9460_v51 = vpop.eup %9459 }
0x2b35   :  { %5437 = vadd.xlane.f32.xlu1 %v5436_v52  ;;  %v5017_v53 = vsel %vm5010_vm12, %v9460_v51, 0.0  ;;  %v9462_v63 = vpop.eup %9461 }
0x2b36   :  { %v5119_v3 = vsel %vm5010_vm12, %v9462_v63, 0.0  ;;  %v9464_v4 = vpop.eup %9463 }
0x2b37   :  { %v5220_v42 = vsel %vm5010_vm12, %v9464_v4, 0.0  ;;  %v9466_v5 = vpop.eup %9465 }
0x2b38   :  { %v5321_v6 = vsel %vm5010_vm12, %v9466_v5, 0.0  ;;  %v10963_v8 = vpop.eup %9467 }
0x2b39   :  { %v5535_v9 = vsel %vm5429_vm5, %v10963_v8, 0.0 }
0x2b3b   :  { %v10967_v10 = vpop.eup %9469 }
0x2b3c   :  { %v5634_v12 = vsel %vm5429_vm5, %v10967_v10, 0.0 }
0x2b46   :  { %5225 = vrot.lane.b32.xlu1 %v4994_v44, %s9736_s3 }
0x2b52   :  { %5728 = vmax.xlane.f32.xlu0 %v5727_v49 }
0x2b56   :  { %5018 = vadd.xlane.f32.xlu0 %v5017_v53 }
0x2b6c   :  { %5326 = vrot.lane.b32.xlu0 %v4994_v44, %s9737_s14 }
0x2b70   :  { %5542 = vrot.lane.b32.xlu0 %v10954_v38, %s9735_s13  ;;  %s11401_s13 = sld [smem:[#allocation28_spill]] }
0x2b74   :  { %5641 = vrot.lane.b32.xlu0 %v10954_v38, %s9736_s3  ;;  %s11402_s3 = sld [smem:[#allocation27_spill]] }
0x2b93   :  { %5120 = vadd.xlane.f32.xlu0 %v5119_v3 }
0x2b97   :  { %5221 = vadd.xlane.f32.xlu0 %v5220_v42 }
0x2b9b   :  { %5322 = vadd.xlane.f32.xlu0 %v5321_v6 }
0x2b9f   :  { %5536 = vadd.xlane.f32.xlu0 %v5535_v9 }
0x2ba3   :  { %5635 = vadd.xlane.f32.xlu0 %v5634_v12  ;;  %v5837_v12 = vld [vmem:[%s11399_s0 + $0x10] sm:$0xff] }
0x2ba5   :  { %v5125_v13 = vpop.permute.xlu0 %5124 }
0x2ba6   :  { %8490 = vmatpush3.msk.msra.mxu1 %vm432_vm4, %v5125_v13  ;;  %v5838_v13 = vld [vmem:[%s11399_s0 + $0x18] sm:$0xff] }
0x2ba7   :  { %8499 = vmatprep.subr.mxu1 %v9732_v1 }
0x2bc2   :  { %v5438_v18 = vpop.xlane.xlu1 %5437 }
0x2bc6   :  { %v5226_v50 = vpop.permute.xlu1 %5225 }
0x2bdf   :  { %v5729_v14 = vpop.xlane.xlu0 %5728 }
0x2be0   :  { %v5730_v15 = vsub.f32 %v5726_v32, %v5729_v14  ;;  %v9025_v14 = vpack.c.bf16 %v5838_v13, %v5837_v12  ;;  %v6059_v12 = vld [vmem:[%s11402_s3 + $0x40] sm:$0xff]  ;;  %v6060_v13 = vld [vmem:[%s11402_s3 + $0x48] sm:$0xff] }
0x2be2   :  { %v5731_v16 = vmul.f32 1.442695, %v5730_v15 }
0x2be3   :  { %v5019_v11 = vpop.xlane.xlu0 %5018 }
0x2be4   :  { %9471 = vpow2.f32 %v5731_v16 }
0x2be5   :  { %9473 = vrcp.f32 %v5019_v11 }
0x2be7   :  { %v5327_v21 = vpop.permute.xlu0 %5326 }
0x2beb   :  { %v5543_v55 = vpop.permute.xlu0 %5542 }
0x2bee   :  { %v10973_v26 = vpop.eup %9471 }
0x2bef   :  { %v9474_v25 = vpop.eup %9473  ;;  %v5733_v23 = vsel %vm5429_vm5, %v10973_v26, 0.0  ;;  %v5642_v24 = vpop.permute.xlu0 %5641 }
0x2bf0   :  { %v5021_v28 = vmul.f32 %v9474_v25, %v9460_v51  ;;  %5734 = vadd.xlane.f32.xlu0 %v5733_v23 }
0x2bf2   :  { %8487 = vmatmul.mubr.msk.f32.vlgmr.msra.gmra.mrb[52].mxu0 %vm750_vm13, %v5021_v28 }
0x2bf3   :  { %8495 = vmatpush3.msk.msra.mxu0 %vm432_vm4, %v5226_v50  ;;  %8496 = vmatprep.mubr.msk.f32.mxu0 %vm9731_vm0, %v9732_v1 }
0x2bf4   :  { %8504 = vmatprep.subr.mxu0 %v9732_v1 }
0x2c06   :  { %5740 = vrot.lane.b32.xlu0 %v10954_v38, %s9737_s14  ;;  %s11403_s14 = sld [smem:[#allocation49_spill]] }
0x2c20   :  { %v5121_v30 = vpop.xlane.xlu0 %5120 }
0x2c21   :  { %9475 = vrcp.f32 %v5121_v30 }
0x2c22   :  { %9477 = vrcp.f32 %v5438_v18 }
0x2c24   :  { %v5222_v31 = vpop.xlane.xlu0 %5221 }
0x2c25   :  { %9479 = vrcp.f32 %v5222_v31 }
0x2c28   :  { %v5323_v19 = vpop.xlane.xlu0 %5322 }
0x2c29   :  { %9481 = vrcp.f32 %v5323_v19 }
0x2c2b   :  { %v9476_v43 = vpop.eup %9475 }
0x2c2c   :  { %v5123_v34 = vmul.f32 %v9476_v43, %v9462_v63  ;;  %v5537_v35 = vpop.xlane.xlu0 %5536  ;;  %v9478_v17 = vpop.eup %9477  ;;  %v5836_v63 = vld [vmem:[%s11399_s0 + $0x8] sm:$0xff] }
0x2c2d   :  { %9483 = vrcp.f32 %v5537_v35  ;;  %v5440_v39 = vmul.f32 %v9478_v17, %v10944_v45  ;;  %v9022_v2 = vpack.c.bf16 %v5836_v63, %v5835_v57  ;;  %v6052_v57 = vld [vmem:[%s11402_s3 + $0x8] sm:$0xff] }
0x2c2e   :  { %8492 = vmatmul.mubr.msk.f32.vlgmr.msra.gmra.mrb[38].mxu1 %vm750_vm13, %v5123_v34  ;;  %v7570_v34 = vld [vmem:[%s11399_s0 + $0x20] ss:$0 sm:$0xff] }
0x2c2f   :  { %v9480_v22 = vpop.eup %9479  ;;  %8500 = vmatpush3.msk.msra.mxu1 %vm432_vm4, %v5327_v21  ;;  %8501 = vmatprep.mubr.msk.f32.mxu1 %vm9731_vm0, %v9732_v1  ;;  %v5442_v48 = vrot.slane %v5440_v39, 1 }
0x2c30   :  { %v5224_v44 = vmul.f32 %v9480_v22, %v9464_v4  ;;  %v5636_v52 = vpop.xlane.xlu0 %5635  ;;  %8509 = vmatprep.subr.mxu1 %v9732_v1 }
0x2c31   :  { %9485 = vrcp.f32 %v5636_v52 }
0x2c32   :  { %8497 = vmatmul.mubr.msk.f32.vlgmr.msra.gmra.mrb[54].mxu0 %vm750_vm13, %v5224_v44 }
0x2c33   :  { %v9482_v46 = vpop.eup %9481  ;;  %8505 = vmatpush3.msk.msra.mxu0 %vm432_vm4, %v10954_v38  ;;  %8506 = vmatprep.mubr.msk.f32.mxu0 %vm9731_vm0, %v9732_v1 }
0x2c34   :  { %v5325_v47 = vmul.f32 %v9482_v46, %v9466_v5  ;;  %8514 = vmatprep.subr.mxu0 %v9732_v1 }
0x2c36   :  { %8502 = vmatmul.mubr.msk.f32.vlgmr.msra.gmra.mrb[40].mxu1 %vm750_vm13, %v5325_v47  ;;  %8507 = vmatmul.mubr.msk.f32.vlgmr.msra.gmra.mrb[56].mxu0 %vm750_vm13, %v5442_v48 }
0x2c37   :  { %v9484_v45 = vpop.eup %9483  ;;  %8510 = vmatpush3.msk.msra.mxu1 %vm432_vm4, %v5543_v55  ;;  %8515 = vmatpush3.msk.msra.mxu0 %vm432_vm4, %v5642_v24 }
0x2c38   :  { %v5539_v32 = vmul.f32 %v9484_v45, %v10963_v8  ;;  %8511 = vmatprep.mubr.msk.f32.mxu1 %vm9731_vm0, %v9732_v1  ;;  %8516 = vmatprep.mubr.msk.f32.mxu0 %vm9731_vm0, %v9732_v1 }
0x2c39   :  { %8519 = vmatprep.subr.mxu1 %v9732_v1  ;;  %9021 = vmatprep.subr.bf16.mxu0 %v9730_v0 }
0x2c3a   :  { %v5541_v49 = vrot.slane %v5539_v32, 1  ;;  %v5942_v32 = vld [vmem:[%s11400_s5] sm:$0xff] }
0x2c3b   :  { %v9486_v51 = vpop.eup %9485 }
0x2c3c   :  { %v5638_v53 = vmul.f32 %v9486_v51, %v10967_v10  ;;  %8512 = vmatmul.mubr.msk.f32.vlgmr.msra.gmra.mrb[42].mxu1 %vm750_vm13, %v5541_v49  ;;  %v5943_v49 = vld [vmem:[%s11400_s5 + $0x8] sm:$0xff] }
0x2c3d   :  { %8521 = vmatprep.mubr.msk.f32.mxu1 %vm9731_vm0, %v9732_v1  ;;  %v9028_v51 = vpack.c.bf16 %v5943_v49, %v5942_v32 }
0x2c3e   :  { %v5640_v38 = vrot.slane %v5638_v53, 1  ;;  %v5944_v53 = vld [vmem:[%s11400_s5 + $0x10] sm:$0xff] }
0x2c40   :  { %8517 = vmatmul.mubr.msk.f32.vlgmr.msra.gmra.mrb[58].mxu0 %vm750_vm13, %v5640_v38  ;;  %v5945_v38 = vld [vmem:[%s11400_s5 + $0x18] sm:$0xff] }
0x2c41   :  { %8532 = vmatprep.mubr.msk.f32.mxu0 %vm9731_vm0, %v9732_v1  ;;  %9023 = vmatpush3.bf16.msra.mxu0 %v9022_v2  ;;  %v6053_v2 = vld [vmem:[%s11402_s3 + $0x10] sm:$0xff] }
0x2c42   :  { %9024 = vmatprep.subr.bf16.mxu0 %v9730_v0 }
0x2c45   :  { %9026 = vmatpush3.bf16.msra.mxu0 %v9025_v14  ;;  %v9046_v14 = vpack.c.bf16 %v6060_v13, %v6059_v12  ;;  %v6179_v12 = vld [vmem:[%s11403_s14 + $0x20] sm:$0xff]  ;;  %v6180_v13 = vld [vmem:[%s11403_s14 + $0x28] sm:$0xff] }
0x2c46   :  { %9033 = vmatprep.subr.bf16.mxu0 %v9730_v0 }
0x2c7d   :  { %v5735_v56 = vpop.xlane.xlu0 %5734 }
0x2c7e   :  { %9487 = vrcp.f32 %v5735_v56  ;;  %v9031_v56 = vpack.c.bf16 %v5945_v38, %v5944_v53 }
0x2c81   :  { %v5741_v62 = vpop.permute.xlu0 %5740 }
0x2c82   :  { %8520 = vmatpush3.msk.msra.mxu1 %vm432_vm4, %v5741_v62 }
0x2c83   :  { %9027 = vmatprep.subr.bf16.mxu1 %v9730_v0 }
0x2c88   :  { %v9488_v58 = vpop.eup %9487 }
0x2c89   :  { %v5737_v36 = vmul.f32 %v9488_v58, %v10973_v26 }
0x2c8b   :  { %v5739_v37 = vrot.slane %v5737_v36, 1  ;;  %v5918_v36 = vld [vmem:[%s11401_s13] sm:$0x3] }
0x2c8d   :  { %8522 = vmatmul.mubr.msk.f32.vlgmr.msra.gmra.mrb[44].mxu1 %vm750_vm13, %v5739_v37  ;;  %v5935_v37 = vrot.slane %v5918_v36, %v10098_v27 }
0x2c8e   :  { %8543 = vmatprep.mubr.msk.f32.mxu1 %vm9731_vm0, %v9732_v1  ;;  %9029 = vmatpush3.bf16.msra.mxu1 %v9028_v51 }
0x2c8f   :  { %9030 = vmatprep.subr.bf16.mxu1 %v9730_v0 }
0x2c92   :  { %9032 = vmatpush3.bf16.msra.mxu1 %v9031_v56 }
0x2c93   :  { %9057 = vmatprep.subr.bf16.mxu1 %v9730_v0 }
0x2cc5   :  { %v5094_v59 = vpop.f32.mrb[52].mxu0 }
0x2cc6   :  { %v8488_v60 = vpop.f32.mrb[53].mxu0 }
0x2d01   :  { %v5197_v33 = vpop.f32.mrb[38].mxu1 }
0x2d02   :  { %5404 = vrot.lane.b32.xlu0 %v5197_v33, %s9738_s6  ;;  %v8493_v40 = vpop.f32.mrb[39].mxu1  ;;  %v5940_v33 = vrot.slane %v5918_v36, %v10102_v29 }
0x2d05   :  { %v5298_v41 = vpop.f32.mrb[54].mxu0 }
0x2d06   :  { %v8498_v61 = vpop.f32.mrb[55].mxu0 }
0x2d07   :  { %v6051_v61 = vld [vmem:[%s11402_s3] sm:$0xff] }
0x2d08   :  { %v9034_v63 = vpack.c.bf16 %v6052_v57, %v6051_v61 }
0x2d09   :  { %v5399_v3 = vpop.f32.mrb[40].mxu1  ;;  %v5514_v4 = vpop.f32.mrb[56].mxu0 }
0x2d0a   :  { %v8503_v42 = vpop.f32.mrb[41].mxu1  ;;  %v8508_v5 = vpop.f32.mrb[57].mxu0 }
0x2d0b   :  { %v6055_v42 = vld [vmem:[%s11402_s3 + $0x20] sm:$0xff]  ;;  %v6056_v5 = vld [vmem:[%s11402_s3 + $0x28] sm:$0xff] }
0x2d0f   :  { %v5614_v6 = vpop.f32.mrb[42].mxu1 }
0x2d10   :  { %5817 = vrot.lane.b32.xlu0 %v5614_v6, %s9738_s6  ;;  %v8513_v8 = vpop.f32.mrb[43].mxu1  ;;  %v9040_v6 = vpack.c.bf16 %v6056_v5, %v6055_v42  ;;  %v6175_v5 = vld [vmem:[%s11403_s14] sm:$0xff]  ;;  %s11404_s6 = sld [smem:[#allocation29_spill]] }
0x2d11   :  { %v6057_v8 = vld [vmem:[%s11402_s3 + $0x30] sm:$0xff] }
0x2d13   :  { %v5713_v9 = vpop.f32.mrb[58].mxu0 }
0x2d14   :  { %5408 = vrot.lane.b32.xlu0 %v5298_v41, %s9739_s27  ;;  %5821 = vrot.lane.b32.xlu1 %v5713_v9, %s9739_s27  ;;  %v8518_v10 = vpop.f32.mrb[59].mxu0  ;;  %v6058_v9 = vld [vmem:[%s11402_s3 + $0x38] sm:$0xff]  ;;  %s9742_s27 = smov 32  }
0x2d15   :  { %v9043_v10 = vpack.c.bf16 %v6058_v9, %v6057_v8  ;;  %v6177_v8 = vld [vmem:[%s11403_s14 + $0x10] sm:$0xff] }
0x2d60   :  { %v5812_v15 = vpop.f32.mrb[44].mxu1 }
0x2d61   :  { %v8523_v16 = vpop.f32.mrb[45].mxu1  ;;  %5825 = vrot.lane.b32.xlu1 %v5812_v15, %s9740_s11  ;;  %v6061_v15 = vld [vmem:[%s11402_s3 + $0x50] sm:$0xff] }
0x2d62   :  { %v6062_v16 = vld [vmem:[%s11402_s3 + $0x58] sm:$0xff] }
0x2d65   :  { %5412 = vrot.lane.b32.xlu1 %v5399_v3, %s9740_s11  ;;  %v6054_v3 = vld [vmem:[%s11402_s3 + $0x18] sm:$0xff]  ;;  %s11405_s11 = sld [smem:[#allocation50_spill]] }
0x2d74   :  { %v5405_v11 = vpop.permute.xlu0 %5404 }
0x2d75   :  { %v5415_v55 = vsel %vm1144_vm15, %v5094_v59, %v5405_v11  ;;  %v9049_v11 = vpack.c.bf16 %v6062_v16, %v6061_v15  ;;  %v6181_v15 = vld [vmem:[%s11403_s14 + $0x30] sm:$0xff]  ;;  %v6182_v16 = vld [vmem:[%s11403_s14 + $0x38] sm:$0xff] }
0x2d82   :  { %v5818_v18 = vpop.permute.xlu0 %5817 }
0x2d83   :  { %v5828_v25 = vsel %vm1144_vm15, %v5514_v4, %v5818_v18  ;;  %v9037_v4 = vpack.c.bf16 %v6054_v3, %v6053_v2  ;;  %v6063_v18 = vld [vmem:[%s11402_s3 + $0x60] sm:$0xff]  ;;  %vm7264_vm15 = vcmask 123904  }
0x2d86   :  { %v5822_v26 = vpop.permute.xlu1 %5821  ;;  %v5409_v50 = vpop.permute.xlu0 %5408 }
0x2d87   :  { %v5829_v23 = vsel %vm1146_vm14, %v5828_v25, %v5822_v26  ;;  %v5416_v24 = vsel %vm1146_vm14, %v5415_v55, %v5409_v50  ;;  %v6064_v26 = vld [vmem:[%s11402_s3 + $0x68] sm:$0xff] }
0x2d88   :  { %v9052_v25 = vpack.c.bf16 %v6064_v26, %v6063_v18 }
0x2dd3   :  { %v5826_v28 = vpop.permute.xlu1 %5825 }
0x2dd4   :  { %v5830_v21 = vsel %vm1148_vm1, %v5829_v23, %v5826_v28  ;;  %v6065_v23 = vld [vmem:[%s11402_s3 + $0x70] sm:$0xff]  ;;  %v6066_v28 = vld [vmem:[%s11402_s3 + $0x78] sm:$0xff] }
0x2dd5   :  { %v5832_v30 = vrot.slane %v5830_v21, 7  ;;  %v9055_v50 = vpack.c.bf16 %v6066_v28, %v6065_v23  ;;  %v7572_v21 = vld [vmem:[%s11400_s5 + $0x20] ss:$0 sm:$0xff] }
0x2dd6   :  { %v6143_v23 = vld [vmem:[%s11404_s6] sm:$0x3] }
0x2dd7   :  { %v5413_v31 = vpop.permute.xlu1 %5412  ;;  %v6160_v28 = vrot.slane %v6143_v23, %v10098_v27 }
0x2dd8   :  { %v5417_v19 = vsel %vm1148_vm1, %v5416_v24, %v5413_v31 }
0x2dd9   :  { %v5834_v43 = vsel %vm430_vm3, %v5417_v19, %v5832_v30 }
0x2dda   :  { %8533 = vmatmul.mubr.msk.f32.vlgmr.msra.gmra.mrb[60].mxu0 %vm470_vm7, %v5834_v43 }
0x2ddb   :  { %8578 = vmatprep.mubr.msk.f32.mxu0 %vm9731_vm0, %v9732_v1  ;;  %9035 = vmatpush3.bf16.msra.mxu0 %v9034_v63 }
0x2ddc   :  { %9036 = vmatprep.subr.bf16.mxu0 %v9730_v0 }
0x2ddf   :  { %9038 = vmatpush3.bf16.msra.mxu0 %v9037_v4 }
0x2de0   :  { %9039 = vmatprep.subr.bf16.mxu0 %v9730_v0 }
0x2de3   :  { %9041 = vmatpush3.bf16.msra.mxu0 %v9040_v6  ;;  %v6176_v6 = vld [vmem:[%s11403_s14 + $0x8] sm:$0xff] }
0x2de4   :  { %9042 = vmatprep.subr.bf16.mxu0 %v9730_v0  ;;  %v9058_v9 = vpack.c.bf16 %v6176_v6, %v6175_v5 }
0x2de7   :  { %9044 = vmatpush3.bf16.msra.mxu0 %v9043_v10  ;;  %v6178_v10 = vld [vmem:[%s11403_s14 + $0x18] sm:$0xff] }
0x2de8   :  { %9045 = vmatprep.subr.bf16.mxu0 %v9730_v0 }
0x2deb   :  { %9047 = vmatpush3.bf16.msra.mxu0 %v9046_v14  ;;  %v9064_v14 = vpack.c.bf16 %v6180_v13, %v6179_v12 }
0x2dec   :  { %9048 = vmatprep.subr.bf16.mxu0 %v9730_v0 }
0x2def   :  { %9050 = vmatpush3.bf16.msra.mxu0 %v9049_v11  ;;  %v9067_v11 = vpack.c.bf16 %v6182_v16, %v6181_v15 }
0x2df0   :  { %9051 = vmatprep.subr.bf16.mxu0 %v9730_v0 }
0x2df3   :  { %9053 = vmatpush3.bf16.msra.mxu0 %v9052_v25 }
0x2df4   :  { %9054 = vmatprep.subr.bf16.mxu0 %v9730_v0 }
0x2df7   :  { %9056 = vmatpush3.bf16.msra.mxu0 %v9055_v50 }
0x2df8   :  { %9081 = vmatprep.subr.bf16.mxu0 %v9730_v0 }
0x2ead   :  { %v5913_v35 = vpop.f32.mrb[60].mxu0 }
0x2eae   :  { %v5914_v17 = vadd.f32 %v7570_v34, %v5913_v35  ;;  %v8534_v22 = vpop.f32.mrb[61].mxu0 }
0x2eb0   :  { %v5917_v39 = vadd.f32 %v5914_v17, %v10791_v54 }
0x2eb2   :  { %v5919_v44 = vsel %vm393_vm2, %v5917_v39, 0.0 }
0x2eb3   :  { %5920 = vadd.xlane.f32.xlu0 %v5919_v44 }
0x2f40   :  { %v5921_v52 = vpop.xlane.xlu0 %5920 }
0x2f41   :  { %v5922_v46 = vmul.f32 0.03125, %v5921_v52 }
0x2f43   :  { %v5923_v47 = vsub.f32 %v5917_v39, %v5922_v46 }
0x2f45   :  { %v5924_v48 = vmul.f32 %v5923_v47, %v5923_v47 }
0x2f47   :  { %v5925_v45 = vsel %vm393_vm2, %v5924_v48, 0.0 }
0x2f48   :  { %5926 = vadd.xlane.f32.xlu1 %v5925_v45 }
0x2fd5   :  { %v5927_v54 = vpop.xlane.xlu1 %5926 }
0x2fd6   :  { %v5928_v62 = vmul.f32 0.03125, %v5927_v54 }
0x2fd8   :  { %v5929_v58 = vadd.f32 1e-05, %v5928_v62 }
0x2fda   :  { %9489 = vrsqrt.f32 %v5929_v58 }
0x2fe4   :  { %v9490_v59 = vpop.eup %9489 }
0x2fe5   :  { %v5931_v60 = vmul.f32 %v9490_v59, %v5923_v47  ;;  %v7574_v59 = vld [vmem:[%s11402_s3 + $0x80] ss:$0 sm:$0xff] }
0x2fe7   :  { %v5936_v40 = vmul.f32 %v5935_v37, %v5931_v60 }
0x2fe9   :  { %v11055_v41 = vadd.f32 %v5940_v33, %v5936_v40 }
0x2feb   :  { %8544 = vmatmul.mubr.msk.f32.vlgmr.msra.gmra.mrb[46].mxu1 %vm470_vm7, %v11055_v41 }
0x2fec   :  { %8597 = vmatprep.mubr.msk.f32.mxu1 %vm9731_vm0, %v9732_v1  ;;  %9059 = vmatpush3.bf16.msra.mxu1 %v9058_v9 }
0x2fed   :  { %9060 = vmatprep.subr.bf16.mxu1 %v9730_v0 }
0x30be   :  { %v6020_v55 = vpop.f32.mrb[46].mxu1 }
0x30bf   :  { %v6021_v24 = vadd.f32 %v7572_v21, %v6020_v55  ;;  %v8545_v30 = vpop.f32.mrb[47].mxu1  ;;  %v6165_v55 = vrot.slane %v6143_v23, %v10102_v29 }
0x30c1   :  { %v6025_v31 = vmul.f32 0.70710677, %v6021_v24  ;;  %v6024_v58 = vmul.f32 0.5, %v6021_v24 }
0x30c3   :  { %v6028_v19 = vand.u32 2147483647, %v6025_v31  ;;  %vm6026_vm4 = vcmp.ge.f32.partialorder %v6025_v31, 0.0  ;;  %v6167_v31 = vrot.slane %v10884_v20, 1 }
0x30c4   :  { %v6027_v54 = vsel %vm6026_vm4, 1.0, %v9741_v7 }
0x30c5   :  { %v6029_v43 = vmul.f32 0.3275911, %v6028_v19  ;;  %v6042_v35 = vsub.f32 0.0, %v6028_v19 }
0x30c7   :  { %v6030_v34 = vadd.f32 1.0, %v6029_v43  ;;  %v6043_v22 = vmul.f32 %v6042_v35, %v6028_v19  ;;  %v6169_v19 = vsel %vm430_vm3, %v10884_v20, %v6167_v31  ;;  %v7575_v35 = vld [vmem:[%s11403_s14 + $0x40] ss:$0 sm:$0xff]  ;;  %v6340_v31 = vld [vmem:[%s11406_s17 + $0x18] sm:$0xff] }
0x30c9   :  { %9491 = vrcp.f32 %v6030_v34  ;;  %v6044_v52 = vmul.f32 1.442695, %v6043_v22 }
0x30cb   :  { %9493 = vpow2.f32 %v6044_v52 }
0x30d3   :  { %v9492_v17 = vpop.eup %9491 }
0x30d4   :  { %v6033_v39 = vmul.f32 1.0614054, %v9492_v17 }
0x30d5   :  { %v9494_v53 = vpop.eup %9493 }
0x30d6   :  { %v6034_v44 = vadd.f32 -1.4531521, %v6033_v39 }
0x30d8   :  { %v6035_v46 = vmul.f32 %v9492_v17, %v6034_v44 }
0x30da   :  { %v6036_v47 = vadd.f32 1.4214138, %v6035_v46 }
0x30dc   :  { %v6037_v48 = vmul.f32 %v9492_v17, %v6036_v47 }
0x30de   :  { %v6038_v45 = vadd.f32 -0.28449672, %v6037_v48 }
0x30e0   :  { %v6039_v32 = vmul.f32 %v9492_v17, %v6038_v45 }
0x30e2   :  { %v6040_v49 = vadd.f32 0.2548296, %v6039_v32 }
0x30e4   :  { %v6041_v51 = vmul.f32 %v9492_v17, %v6040_v49 }
0x30e6   :  { %v6046_v38 = vmul.f32 %v9494_v53, %v6041_v51  ;;  %v6262_v51 = vld [vmem:[%s11405_s11] sm:$0x3] }
0x30e7   :  { %v6279_v53 = vrot.slane %v6262_v51, %v10098_v27 }
0x30e8   :  { %v6047_v56 = vsub.f32 1.0, %v6046_v38 }
0x30ea   :  { %v6048_v62 = vmul.f32 %v6047_v56, %v6027_v54  ;;  %v6284_v54 = vrot.slane %v6262_v51, %v10102_v29 }
0x30ec   :  { %v6049_v36 = vadd.f32 1.0, %v6048_v62 }
0x30ee   :  { %v6050_v37 = vmul.f32 %v6049_v36, %v6024_v58 }
0x30f0   :  { %8579 = vmatmul.mubr.f32.vlgmr.msra.gmra.mrb[62].mxu0 %v6050_v37 }
0x30f1   :  { %8630 = vmatprep.mubr.msk.f32.mxu0 %vm9731_vm0, %v9732_v1 }
0x31c3   :  { %v6138_v60 = vpop.f32.mrb[62].mxu0 }
0x31c4   :  { %v6139_v33 = vadd.f32 %v7574_v59, %v6138_v60  ;;  %v8580_v40 = vpop.f32.mrb[63].mxu0 }
0x31c6   :  { %v6142_v61 = vadd.f32 %v6139_v33, %v11055_v41  ;;  %v9061_v41 = vpack.c.bf16 %v6178_v10, %v6177_v8 }
0x31c8   :  { %v6144_v57 = vsel %vm393_vm2, %v6142_v61, 0.0  ;;  %9062 = vmatpush3.bf16.msra.mxu1 %v9061_v41 }
0x31c9   :  { %6145 = vadd.xlane.f32.xlu0 %v6144_v57  ;;  %9063 = vmatprep.subr.bf16.mxu1 %v9730_v0 }
0x31cc   :  { %9065 = vmatpush3.bf16.msra.mxu1 %v9064_v14 }
0x31cd   :  { %9066 = vmatprep.subr.bf16.mxu1 %v9730_v0 }
0x31d0   :  { %9068 = vmatpush3.bf16.msra.mxu1 %v9067_v11 }
0x31d1   :  { %9069 = vmatprep.subr.bf16.mxu1 %v9730_v0 }
0x3256   :  { %v6146_v63 = vpop.xlane.xlu0 %6145 }
0x3257   :  { %v6147_v2 = vmul.f32 0.03125, %v6146_v63 }
0x3259   :  { %v6148_v3 = vsub.f32 %v6142_v61, %v6147_v2 }
0x325b   :  { %v6149_v4 = vmul.f32 %v6148_v3, %v6148_v3 }
0x325d   :  { %v6150_v42 = vsel %vm393_vm2, %v6149_v4, 0.0 }
0x325e   :  { %6151 = vadd.xlane.f32.xlu0 %v6150_v42 }
0x32eb   :  { %v6152_v18 = vpop.xlane.xlu0 %6151 }
0x32ec   :  { %v6153_v26 = vmul.f32 0.03125, %v6152_v18 }
0x32ee   :  { %v6154_v25 = vadd.f32 1e-05, %v6153_v26  ;;  %v6337_v26 = vld [vmem:[%s11406_s17] sm:$0xff] }
0x32f0   :  { %9495 = vrsqrt.f32 %v6154_v25  ;;  %v6338_v25 = vld [vmem:[%s11406_s17 + $0x8] sm:$0xff] }
0x32f1   :  { %v9331_v23 = vpack.i.bf16 %v6338_v25, %v6337_v26  ;;  %v6522_v25 = vld [vmem:[%s11410_s12] sm:$0x3] }
0x32fa   :  { %v9496_v50 = vpop.eup %9495 }
0x32fb   :  { %v6156_v21 = vmul.f32 %v9496_v50, %v6148_v3 }
0x32fd   :  { %v6161_v24 = vmul.f32 %v6160_v28, %v6156_v21 }
0x32ff   :  { %v6166_v30 = vadd.f32 %v6165_v55, %v6161_v24 }
0x3301   :  { %6171 = vrot.lane.b32.xlu1 %v6166_v30, %s9742_s27  ;;  %v6339_v30 = vld [vmem:[%s11406_s17 + $0x10] sm:$0xff] }
0x3305   :  { %9332 = vrot.lane.b32.xlu1 %v9331_v23, %s9734_s9  ;;  %v6539_v23 = vrot.slane %v6522_v25, %v10098_v27 }
0x3373   :  { %v6172_v43 = vpop.permute.xlu1 %6171 }
0x3374   :  { %v6174_v34 = vsel %vm470_vm7, %v6169_v19, %v6172_v43  ;;  %v9336_v19 = vpack.i.bf16 %v6340_v31, %v6339_v30  ;;  %v6655_v30 = vld [vmem:[%s11411_s15] sm:$0xff]  ;;  %v6656_v31 = vld [vmem:[%s11411_s15 + $0x8] sm:$0xff] }
0x3375   :  { %8598 = vmatmul.mubr.msk.f32.vlgmr.msra.gmra.mrb[48].mxu1 %vm6188_vm10, %v6174_v34 }
0x3376   :  { %8608 = vmatprep.mubr.msk.f32.mxu1 %vm9731_vm0, %v9732_v1 }
0x3377   :  { %v9333_v43 = vpop.permute.xlu1 %9332 }
0x3378   :  { %v9335_v34 = vunpack.i.h.bf16 %v9333_v43 }
0x3448   :  { %v6258_v17 = vpop.f32.mrb[48].mxu1 }
0x3449   :  { %v6259_v22 = vadd.f32 %v7575_v35, %v6258_v17  ;;  %v8599_v39 = vpop.f32.mrb[49].mxu1  ;;  %v9334_v35 = vunpack.i.l.bf16 %v9333_v43  ;;  %v6657_v43 = vld [vmem:[%s11411_s15 + $0x10] sm:$0xff] }
0x344b   :  { %v6263_v44 = vsel %vm393_vm2, %v6259_v22, 0.0  ;;  %v9070_v17 = vpack.c.bf16 %v9335_v34, %v9334_v35  ;;  %v6658_v34 = vld [vmem:[%s11411_s15 + $0x18] sm:$0xff] }
0x344c   :  { %6264 = vadd.xlane.f32.xlu0 %v6263_v44  ;;  %v9091_v35 = vpack.c.bf16 %v6658_v34, %v6657_v43 }
0x344d   :  { %9071 = vmatpush3.bf16.msra.mxu1 %v9070_v17  ;;  %v6659_v17 = vld [vmem:[%s11411_s15 + $0x20] sm:$0xff] }
0x344e   :  { %9072 = vmatprep.subr.bf16.mxu1 %v9730_v0 }
0x34d9   :  { %v6265_v52 = vpop.xlane.xlu0 %6264 }
0x34da   :  { %v6266_v46 = vmul.f32 0.03125, %v6265_v52 }
0x34dc   :  { %v6267_v47 = vsub.f32 %v6259_v22, %v6266_v46  ;;  %v7577_v22 = vld [vmem:[%s11406_s17 + $0x20] ss:$0 sm:$0xff] }
0x34dd   :  { %6363 = vrot.lane.b32.xlu1 %v7577_v22, %s9734_s9  ;;  %v6660_v22 = vld [vmem:[%s11411_s15 + $0x28] sm:$0xff] }
0x34de   :  { %v6268_v48 = vmul.f32 %v6267_v47, %v6267_v47 }
0x34e0   :  { %v6269_v20 = vsel %vm393_vm2, %v6268_v48, 0.0 }
0x34e1   :  { %6270 = vadd.xlane.f32.xlu0 %v6269_v20 }
0x356e   :  { %v6271_v45 = vpop.xlane.xlu0 %6270 }
0x356f   :  { %v6272_v32 = vmul.f32 0.03125, %v6271_v45  ;;  %v6313_v45 = vld [vmem:[%s11407_s21] sm:$0x3] }
0x3571   :  { %v6273_v49 = vadd.f32 1e-05, %v6272_v32  ;;  %v6330_v32 = vrot.slane %v6313_v45, %v10098_v27 }
0x3573   :  { %9497 = vrsqrt.f32 %v6273_v49 }
0x357d   :  { %v9498_v38 = vpop.eup %9497 }
0x357e   :  { %v6275_v56 = vmul.f32 %v9498_v38, %v6267_v47  ;;  %v6439_v38 = vld [vmem:[%s11408_s25] sm:$0xff] }
0x3580   :  { %v6280_v62 = vmul.f32 %v6279_v53, %v6275_v56  ;;  %v6335_v53 = vrot.slane %v6313_v45, %v10102_v29  ;;  %v6440_v56 = vld [vmem:[%s11408_s25 + $0x8] sm:$0xff]  ;;  %v6665_v45 = vld [vmem:[%s11411_s15 + $0x50] sm:$0xff] }
0x3582   :  { %v6285_v58 = vadd.f32 %v6284_v54, %v6280_v62  ;;  %v9076_v62 = vpack.c.bf16 %v6440_v56, %v6439_v38  ;;  %v6669_v56 = vld [vmem:[%s11411_s15 + $0x70] sm:$0xff] }
0x3584   :  { %v6287_v36 = vmul.f32 0.70710677, %v6285_v58  ;;  %v6286_v15 = vmul.f32 0.5, %v6285_v58 }
0x3586   :  { %v6290_v37 = vand.u32 2147483647, %v6287_v36  ;;  %vm6288_vm3 = vcmp.ge.f32.partialorder %v6287_v36, 0.0  ;;  %v6441_v36 = vld [vmem:[%s11408_s25 + $0x10] sm:$0xff] }
0x3587   :  { %v6289_v13 = vsel %vm6288_vm3, 1.0, %v9741_v7 }
0x3588   :  { %v6291_v59 = vmul.f32 0.3275911, %v6290_v37  ;;  %v6304_v33 = vsub.f32 0.0, %v6290_v37 }
0x358a   :  { %v6292_v60 = vadd.f32 1.0, %v6291_v59  ;;  %v6305_v61 = vmul.f32 %v6304_v33, %v6290_v37  ;;  %v6442_v37 = vld [vmem:[%s11408_s25 + $0x18] sm:$0xff] }
0x358b   :  { %v9079_v59 = vpack.c.bf16 %v6442_v37, %v6441_v36 }
0x358c   :  { %9499 = vrcp.f32 %v6292_v60  ;;  %v6306_v2 = vmul.f32 1.442695, %v6305_v61  ;;  %v6364_v60 = vpop.permute.xlu1 %6363 }
0x358e   :  { %9501 = vpow2.f32 %v6306_v2 }
0x3596   :  { %v9500_v40 = vpop.eup %9499 }
0x3597   :  { %v6295_v57 = vmul.f32 1.0614054, %v9500_v40 }
0x3598   :  { %v9502_v10 = vpop.eup %9501 }
0x3599   :  { %v6296_v63 = vadd.f32 -1.4531521, %v6295_v57  ;;  %v7579_v57 = vld [vmem:[%s11408_s25 + $0x20] ss:$0 sm:$0xff] }
0x359b   :  { %v6297_v3 = vmul.f32 %v9500_v40, %v6296_v63 }
0x359d   :  { %v6298_v4 = vadd.f32 1.4214138, %v6297_v3 }
0x359f   :  { %v6299_v42 = vmul.f32 %v9500_v40, %v6298_v4 }
0x35a1   :  { %v6300_v5 = vadd.f32 -0.28449672, %v6299_v42 }
0x35a3   :  { %v6301_v6 = vmul.f32 %v9500_v40, %v6300_v5 }
0x35a5   :  { %v6302_v8 = vadd.f32 0.2548296, %v6301_v6 }
0x35a7   :  { %v6303_v9 = vmul.f32 %v9500_v40, %v6302_v8 }
0x35a9   :  { %v6308_v41 = vmul.f32 %v9502_v10, %v6303_v9 }
0x35ab   :  { %v6309_v12 = vsub.f32 1.0, %v6308_v41  ;;  %v6546_v41 = vld [vmem:[%s11409_s30] sm:$0xff] }
0x35ad   :  { %v6310_v14 = vmul.f32 %v6309_v12, %v6289_v13  ;;  %v6547_v12 = vld [vmem:[%s11409_s30 + $0x8] sm:$0xff] }
0x35ae   :  { %v9082_v13 = vpack.c.bf16 %v6547_v12, %v6546_v41 }
0x35af   :  { %v6311_v16 = vadd.f32 1.0, %v6310_v14  ;;  %v6548_v14 = vld [vmem:[%s11409_s30 + $0x10] sm:$0xff] }
0x35b0   :  { %9083 = vmatpush3.bf16.msra.mxu0 %v9082_v13 }
0x35b1   :  { %v11121_v11 = vmul.f32 %v6311_v16, %v6286_v15  ;;  %v6549_v15 = vld [vmem:[%s11409_s30 + $0x18] sm:$0xff]  ;;  %9084 = vmatprep.subr.bf16.mxu0 %v9730_v0 }
0x35b2   :  { %v9085_v16 = vpack.c.bf16 %v6549_v15, %v6548_v14 }
0x35b3   :  { %v6314_v18 = vsel %vm393_vm2, %v11121_v11, 0.0 }
0x35b4   :  { %6315 = vadd.xlane.f32.xlu0 %v6314_v18  ;;  %9086 = vmatpush3.bf16.msra.mxu0 %v9085_v16 }
0x35b5   :  { %9111 = vmatprep.subr.bf16.mxu0 %v9730_v0 }
0x3641   :  { %v6316_v28 = vpop.xlane.xlu0 %6315 }
0x3642   :  { %v6317_v50 = vmul.f32 0.03125, %v6316_v28 }
0x3644   :  { %v6318_v21 = vsub.f32 %v11121_v11, %v6317_v50 }
0x3646   :  { %v6319_v55 = vmul.f32 %v6318_v21, %v6318_v21 }
0x3648   :  { %v6320_v24 = vsel %vm393_vm2, %v6319_v55, 0.0 }
0x3649   :  { %6321 = vadd.xlane.f32.xlu0 %v6320_v24 }
0x365f   :  { %9337 = vrot.lane.b32.xlu0 %v9336_v19, %s9734_s9  ;;  %v9088_v19 = vpack.c.bf16 %v6656_v31, %v6655_v30  ;;  %v6773_v31 = vld [vmem:[%s11412_s8 + $0x10] sm:$0xff] }
0x36d6   :  { %v6322_v39 = vpop.xlane.xlu0 %6321 }
0x36d7   :  { %v6323_v44 = vmul.f32 0.03125, %v6322_v39  ;;  %v9094_v39 = vpack.c.bf16 %v6660_v22, %v6659_v17 }
0x36d9   :  { %v6324_v52 = vadd.f32 1e-05, %v6323_v44  ;;  %v6661_v44 = vld [vmem:[%s11411_s15 + $0x30] sm:$0xff] }
0x36da   :  { %v9338_v46 = vpop.permute.xlu0 %9337 }
0x36db   :  { %9503 = vrsqrt.f32 %v6324_v52  ;;  %v9340_v47 = vunpack.i.h.bf16 %v9338_v46  ;;  %v9339_v48 = vunpack.i.l.bf16 %v9338_v46  ;;  %v6662_v52 = vld [vmem:[%s11411_s15 + $0x38] sm:$0xff] }
0x36dc   :  { %v9097_v46 = vpack.c.bf16 %v6662_v52, %v6661_v44  ;;  %v6772_v44 = vld [vmem:[%s11412_s8 + $0x8] sm:$0xff] }
0x36dd   :  { %v9073_v20 = vpack.c.bf16 %v9340_v47, %v9339_v48  ;;  %v6663_v47 = vld [vmem:[%s11411_s15 + $0x40] sm:$0xff]  ;;  %v6664_v48 = vld [vmem:[%s11411_s15 + $0x48] sm:$0xff] }
0x36df   :  { %9074 = vmatpush3.bf16.msra.mxu1 %v9073_v20  ;;  %v9100_v20 = vpack.c.bf16 %v6664_v48, %v6663_v47 }
0x36e0   :  { %9075 = vmatprep.subr.bf16.mxu1 %v9730_v0 }
0x36e5   :  { %v9504_v49 = vpop.eup %9503 }
0x36e6   :  { %v6326_v51 = vmul.f32 %v9504_v49, %v6318_v21  ;;  %v6544_v21 = vrot.slane %v6522_v25, %v10102_v29 }
0x36e8   :  { %v6331_v54 = vmul.f32 %v6330_v32, %v6326_v51  ;;  %v6666_v32 = vld [vmem:[%s11411_s15 + $0x58] sm:$0xff]  ;;  %v6667_v51 = vld [vmem:[%s11411_s15 + $0x60] sm:$0xff] }
0x36e9   :  { %v9103_v49 = vpack.c.bf16 %v6666_v32, %v6665_v45 }
0x36ea   :  { %v6336_v58 = vadd.f32 %v6335_v53, %v6331_v54  ;;  %v6668_v53 = vld [vmem:[%s11411_s15 + $0x68] sm:$0xff]  ;;  %v6670_v54 = vld [vmem:[%s11411_s15 + $0x78] sm:$0xff] }
0x36eb   :  { %v9106_v38 = vpack.c.bf16 %v6668_v53, %v6667_v51 }
0x36ec   :  { %8609 = vmatmul.mubr.msk.f32.vlgmr.msra.gmra.mrb[50].mxu1 %vm470_vm7, %v6336_v58  ;;  %v7581_v58 = vld [vmem:[%s11409_s30 + $0x20] ss:$0 sm:$0xff] }
0x36ed   :  { %9077 = vmatpush3.bf16.msra.mxu1 %v9076_v62  ;;  %8619 = vmatprep.mubr.msk.f32.mxu1 %vm9731_vm0, %v9732_v1  ;;  %v9109_v62 = vpack.c.bf16 %v6670_v54, %v6669_v56 }
0x36ee   :  { %9078 = vmatprep.subr.bf16.mxu1 %v9730_v0 }
0x36f1   :  { %9080 = vmatpush3.bf16.msra.mxu1 %v9079_v59 }
0x36f2   :  { %9087 = vmatprep.subr.bf16.mxu1 %v9730_v0 }
0x37bf   :  { %v6435_v33 = vpop.f32.mrb[50].mxu1 }
0x37c0   :  { %v6436_v40 = vadd.f32 %v6435_v33, %v6364_v60  ;;  %v8610_v61 = vpop.f32.mrb[51].mxu1 }
0x37c2   :  { %8620 = vmatmul.mubr.msk.f32.vlgmr.msra.gmra.mrb[52].mxu1 %vm470_vm7, %v6436_v40 }
0x37c3   :  { %8665 = vmatprep.mubr.msk.f32.mxu1 %vm9731_vm0, %v9732_v1  ;;  %9089 = vmatpush3.bf16.msra.mxu1 %v9088_v19  ;;  %v6774_v19 = vld [vmem:[%s11412_s8 + $0x18] sm:$0xff] }
0x37c4   :  { %9090 = vmatprep.subr.bf16.mxu1 %v9730_v0  ;;  %v9346_v43 = vpack.i.bf16 %v6774_v19, %v6773_v31  ;;  %v6956_v19 = vld [vmem:[%s11416_s20] sm:$0x3] }
0x37c7   :  { %9092 = vmatpush3.bf16.msra.mxu1 %v9091_v35 }
0x37c8   :  { %9093 = vmatprep.subr.bf16.mxu1 %v9730_v0 }
0x37cb   :  { %9095 = vmatpush3.bf16.msra.mxu1 %v9094_v39 }
0x37cc   :  { %9096 = vmatprep.subr.bf16.mxu1 %v9730_v0 }
0x37cf   :  { %9098 = vmatpush3.bf16.msra.mxu1 %v9097_v46  ;;  %v7584_v46 = vld [vmem:[%s11412_s8 + $0x20] ss:$0 sm:$0xff] }
0x37d0   :  { %9099 = vmatprep.subr.bf16.mxu1 %v9730_v0 }
0x37d3   :  { %9101 = vmatpush3.bf16.msra.mxu1 %v9100_v20 }
0x37d4   :  { %9102 = vmatprep.subr.bf16.mxu1 %v9730_v0 }
0x37d7   :  { %9104 = vmatpush3.bf16.msra.mxu1 %v9103_v49 }
0x37d8   :  { %9105 = vmatprep.subr.bf16.mxu1 %v9730_v0 }
0x37db   :  { %9107 = vmatpush3.bf16.msra.mxu1 %v9106_v38 }
0x37dc   :  { %9108 = vmatprep.subr.bf16.mxu1 %v9730_v0 }
0x37df   :  { %9110 = vmatpush3.bf16.msra.mxu1 %v9109_v62  ;;  %v6747_v62 = vld [vmem:[%s11413_s16] sm:$0x3] }
0x37e0   :  { %9153 = vmatprep.subr.bf16.mxu1 %v9730_v0 }
0x3895   :  { %v6517_v63 = vpop.f32.mrb[52].mxu1 }
0x3896   :  { %v6518_v2 = vadd.f32 %v7579_v57, %v6517_v63  ;;  %v8621_v3 = vpop.f32.mrb[53].mxu1 }
0x3898   :  { %v11154_v4 = vadd.f32 %v6518_v2, %v11121_v11 }
0x389a   :  { %v6523_v42 = vsel %vm393_vm2, %v11154_v4, 0.0 }
0x389b   :  { %6524 = vadd.xlane.f32.xlu1 %v6523_v42 }
0x3928   :  { %v6525_v5 = vpop.xlane.xlu1 %6524 }
0x3929   :  { %v6526_v6 = vmul.f32 0.03125, %v6525_v5 }
0x392b   :  { %v6527_v8 = vsub.f32 %v11154_v4, %v6526_v6 }
0x392d   :  { %v6528_v9 = vmul.f32 %v6527_v8, %v6527_v8 }
0x392f   :  { %v6529_v10 = vsel %vm393_vm2, %v6528_v9, 0.0 }
0x3930   :  { %6530 = vadd.xlane.f32.xlu0 %v6529_v10 }
0x3946   :  { %9347 = vrot.lane.b32.xlu0 %v9346_v43, %s9734_s9  ;;  %v6973_v43 = vrot.slane %v6956_v19, %v10098_v27 }
0x39bd   :  { %v6531_v11 = vpop.xlane.xlu0 %6530 }
0x39be   :  { %v6532_v18 = vmul.f32 0.03125, %v6531_v11 }
0x39c0   :  { %v6533_v26 = vadd.f32 1e-05, %v6532_v18 }
0x39c1   :  { %v9348_v20 = vpop.permute.xlu0 %9347 }
0x39c2   :  { %9505 = vrsqrt.f32 %v6533_v26  ;;  %v9350_v49 = vunpack.i.h.bf16 %v9348_v20  ;;  %v9349_v38 = vunpack.i.l.bf16 %v9348_v20  ;;  %v7093_v20 = vld [vmem:[%s11417_s22 + $0x20] sm:$0xff] }
0x39c4   :  { %v9115_v54 = vpack.c.bf16 %v9350_v49, %v9349_v38  ;;  %v7095_v49 = vld [vmem:[%s11417_s22 + $0x30] sm:$0xff]  ;;  %v7097_v38 = vld [vmem:[%s11417_s22 + $0x40] sm:$0xff] }
0x39cc   :  { %v9506_v28 = vpop.eup %9505 }
0x39cd   :  { %v6535_v50 = vmul.f32 %v9506_v28, %v6527_v8  ;;  %v7583_v28 = vld [vmem:[%s11411_s15 + $0x80] ss:$0 sm:$0xff] }
0x39cf   :  { %v6540_v55 = vmul.f32 %v6539_v23, %v6535_v50 }
0x39d1   :  { %v6545_v24 = vadd.f32 %v6544_v21, %v6540_v55 }
0x39d3   :  { %8631 = vmatmul.mubr.msk.f32.vlgmr.msra.gmra.mrb[64].mxu0 %vm470_vm7, %v6545_v24 }
0x39d4   :  { %8676 = vmatprep.mubr.msk.f32.mxu0 %vm9731_vm0, %v9732_v1 }
0x3aa6   :  { %v6624_v36 = vpop.f32.mrb[64].mxu0 }
0x3aa7   :  { %v6625_v37 = vadd.f32 %v7581_v58, %v6624_v36  ;;  %v8632_v59 = vpop.f32.mrb[65].mxu0  ;;  %v6764_v58 = vrot.slane %v6747_v62, %v10098_v27 }
0x3aa8   :  { %v6769_v59 = vrot.slane %v6747_v62, %v10102_v29  ;;  %v7099_v62 = vld [vmem:[%s11417_s22 + $0x50] sm:$0xff] }
0x3aa9   :  { %v6629_v60 = vmul.f32 0.70710677, %v6625_v37  ;;  %v6628_v26 = vmul.f32 0.5, %v6625_v37 }
0x3aab   :  { %v6632_v33 = vand.u32 2147483647, %v6629_v60  ;;  %vm6630_vm13 = vcmp.ge.f32.partialorder %v6629_v60, 0.0  ;;  %v6873_v60 = vld [vmem:[%s11414_s18] sm:$0xff] }
0x3aac   :  { %v6631_v11 = vsel %vm6630_vm13, 1.0, %v9741_v7 }
0x3aad   :  { %v6633_v40 = vmul.f32 0.3275911, %v6632_v33  ;;  %v6646_v57 = vsub.f32 0.0, %v6632_v33 }
0x3aaf   :  { %v6634_v61 = vadd.f32 1.0, %v6633_v40  ;;  %v6647_v2 = vmul.f32 %v6646_v57, %v6632_v33  ;;  %v6874_v33 = vld [vmem:[%s11414_s18 + $0x8] sm:$0xff] }
0x3ab1   :  { %9507 = vrcp.f32 %v6634_v61  ;;  %v6648_v5 = vmul.f32 1.442695, %v6647_v2  ;;  %v9118_v61 = vpack.c.bf16 %v6874_v33, %v6873_v60  ;;  %v6876_v2 = vld [vmem:[%s11414_s18 + $0x18] sm:$0xff]  ;;  %v7103_v33 = vld [vmem:[%s11417_s22 + $0x70] sm:$0xff] }
0x3ab3   :  { %9509 = vpow2.f32 %v6648_v5 }
0x3abb   :  { %v9508_v63 = vpop.eup %9507 }
0x3abc   :  { %v6637_v3 = vmul.f32 1.0614054, %v9508_v63 }
0x3abd   :  { %v9510_v14 = vpop.eup %9509 }
0x3abe   :  { %v6638_v42 = vadd.f32 -1.4531521, %v6637_v3 }
0x3ac0   :  { %v6639_v6 = vmul.f32 %v9508_v63, %v6638_v42 }
0x3ac2   :  { %v6640_v8 = vadd.f32 1.4214138, %v6639_v6 }
0x3ac4   :  { %v6641_v9 = vmul.f32 %v9508_v63, %v6640_v8 }
0x3ac6   :  { %v6642_v10 = vadd.f32 -0.28449672, %v6641_v9  ;;  %v7586_v9 = vld [vmem:[%s11414_s18 + $0x20] ss:$0 sm:$0xff] }
0x3ac8   :  { %v6643_v41 = vmul.f32 %v9508_v63, %v6642_v10 }
0x3aca   :  { %v6644_v12 = vadd.f32 0.2548296, %v6643_v41 }
0x3acc   :  { %v6645_v13 = vmul.f32 %v9508_v63, %v6644_v12  ;;  %v6875_v63 = vld [vmem:[%s11414_s18 + $0x10] sm:$0xff] }
0x3acd   :  { %v9121_v3 = vpack.c.bf16 %v6876_v2, %v6875_v63  ;;  %v7182_v63 = vld [vmem:[%s11418_s23 + $0x8] sm:$0xff] }
0x3ace   :  { %v6650_v15 = vmul.f32 %v9510_v14, %v6645_v13 }
0x3ad0   :  { %v6651_v16 = vsub.f32 1.0, %v6650_v15 }
0x3ad2   :  { %v6652_v18 = vmul.f32 %v6651_v16, %v6631_v11 }
0x3ad4   :  { %v6653_v25 = vadd.f32 1.0, %v6652_v18 }
0x3ad6   :  { %v6654_v23 = vmul.f32 %v6653_v25, %v6628_v26 }
0x3ad8   :  { %8666 = vmatmul.mubr.f32.vlgmr.msra.gmra.mrb[54].mxu1 %v6654_v23 }
0x3ad9   :  { %8744 = vmatprep.mubr.msk.f32.mxu1 %vm9731_vm0, %v9732_v1 }
0x3bab   :  { %v6742_v50 = vpop.f32.mrb[54].mxu1 }
0x3bac   :  { %v6743_v21 = vadd.f32 %v7583_v28, %v6742_v50  ;;  %v8667_v55 = vpop.f32.mrb[55].mxu1 }
0x3bae   :  { %v11202_v24 = vadd.f32 %v6743_v21, %v11154_v4  ;;  %v6771_v4 = vld [vmem:[%s11412_s8] sm:$0xff] }
0x3baf   :  { %v9341_v52 = vpack.i.bf16 %v6772_v44, %v6771_v4  ;;  %v7089_v4 = vld [vmem:[%s11417_s22] sm:$0xff]  ;;  %v7090_v44 = vld [vmem:[%s11417_s22 + $0x8] sm:$0xff] }
0x3bb0   :  { %v6748_v30 = vsel %vm393_vm2, %v11202_v24, 0.0 }
0x3bb1   :  { %6749 = vadd.xlane.f32.xlu1 %v6748_v30 }
0x3c3e   :  { %v6750_v34 = vpop.xlane.xlu1 %6749 }
0x3c3f   :  { %v6751_v35 = vmul.f32 0.03125, %v6750_v34 }
0x3c41   :  { %v6752_v17 = vsub.f32 %v11202_v24, %v6751_v35 }
0x3c43   :  { %v6753_v22 = vmul.f32 %v6752_v17, %v6752_v17 }
0x3c45   :  { %v6754_v39 = vsel %vm393_vm2, %v6753_v22, 0.0 }
0x3c46   :  { %6755 = vadd.xlane.f32.xlu1 %v6754_v39 }
0x3c57   :  { %9342 = vrot.lane.b32.xlu1 %v9341_v52, %s9734_s9  ;;  %v9130_v52 = vpack.c.bf16 %v7090_v44, %v7089_v4  ;;  %v7590_v44 = vld [vmem:[%s11417_s22 + $0x80] ss:$0 sm:$0xff] }
0x3c5b   :  { %6797 = vrot.lane.b32.xlu1 %v7584_v46, %s9734_s9  ;;  %s11415_s9 = sld [smem:[#allocation38_spill]]  ;;  %v7091_v46 = vld [vmem:[%s11417_s22 + $0x10] sm:$0xff] }
0x3c61   :  { %v6980_v25 = vld [vmem:[%s11415_s9] sm:$0xff]  ;;  %v6981_v23 = vld [vmem:[%s11415_s9 + $0x8] sm:$0xff]  ;;  %v6982_v50 = vld [vmem:[%s11415_s9 + $0x10] sm:$0xff] }
0x3c62   :  { %v9124_v28 = vpack.c.bf16 %v6981_v23, %v6980_v25  ;;  %v6983_v21 = vld [vmem:[%s11415_s9 + $0x18] sm:$0xff] }
0x3c63   :  { %v9127_v55 = vpack.c.bf16 %v6983_v21, %v6982_v50 }
0x3cd3   :  { %v6756_v47 = vpop.xlane.xlu1 %6755 }
0x3cd4   :  { %v6757_v48 = vmul.f32 0.03125, %v6756_v47  ;;  %v7092_v47 = vld [vmem:[%s11417_s22 + $0x18] sm:$0xff] }
0x3cd6   :  { %v6758_v45 = vadd.f32 1e-05, %v6757_v48  ;;  %v9133_v48 = vpack.c.bf16 %v7092_v47, %v7091_v46 }
0x3cd7   :  { %v9343_v32 = vpop.permute.xlu1 %9342 }
0x3cd8   :  { %9511 = vrsqrt.f32 %v6758_v45  ;;  %v9345_v51 = vunpack.i.h.bf16 %v9343_v32  ;;  %v9344_v53 = vunpack.i.l.bf16 %v9343_v32  ;;  %v7094_v45 = vld [vmem:[%s11417_s22 + $0x28] sm:$0xff] }
0x3cd9   :  { %v9136_v32 = vpack.c.bf16 %v7094_v45, %v7093_v20  ;;  %v7591_v20 = vld [vmem:[%s11418_s23 + $0x20] ss:$0 sm:$0xff] }
0x3cda   :  { %v9112_v56 = vpack.c.bf16 %v9345_v51, %v9344_v53  ;;  %v7096_v51 = vld [vmem:[%s11417_s22 + $0x38] sm:$0xff] }
0x3cdb   :  { %v6798_v42 = vpop.permute.xlu1 %6797  ;;  %v9139_v53 = vpack.c.bf16 %v7096_v51, %v7095_v49 }
0x3cdc   :  { %9113 = vmatpush3.bf16.msra.mxu0 %v9112_v56  ;;  %v7098_v56 = vld [vmem:[%s11417_s22 + $0x48] sm:$0xff] }
0x3cdd   :  { %9114 = vmatprep.subr.bf16.mxu0 %v9730_v0 }
0x3ce0   :  { %9116 = vmatpush3.bf16.msra.mxu0 %v9115_v54  ;;  %v9142_v54 = vpack.c.bf16 %v7098_v56, %v7097_v38 }
0x3ce1   :  { %9117 = vmatprep.subr.bf16.mxu0 %v9730_v0 }
0x3ce2   :  { %v9512_v36 = vpop.eup %9511 }
0x3ce3   :  { %v6760_v37 = vmul.f32 %v9512_v36, %v6752_v17  ;;  %v6978_v17 = vrot.slane %v6956_v19, %v10102_v29 }
0x3ce5   :  { %v6765_v40 = vmul.f32 %v6764_v58, %v6760_v37  ;;  %v7100_v58 = vld [vmem:[%s11417_s22 + $0x58] sm:$0xff]  ;;  %v7101_v37 = vld [vmem:[%s11417_s22 + $0x60] sm:$0xff] }
0x3ce6   :  { %v9145_v36 = vpack.c.bf16 %v7100_v58, %v7099_v62  ;;  %v7317_v62 = vld [vmem:[%s11419_s24 + $0x8] sm:$0xff] }
0x3ce7   :  { %v6770_v57 = vadd.f32 %v6769_v59, %v6765_v40  ;;  %v7102_v59 = vld [vmem:[%s11417_s22 + $0x68] sm:$0xff]  ;;  %v7104_v40 = vld [vmem:[%s11417_s22 + $0x78] sm:$0xff] }
0x3ce8   :  { %v9148_v60 = vpack.c.bf16 %v7102_v59, %v7101_v37  ;;  %v7263_v59 = vld [vmem:[%s11420_s26] sm:$0x3] }
0x3ce9   :  { %8677 = vmatmul.mubr.msk.f32.vlgmr.msra.gmra.mrb[66].mxu0 %vm470_vm7, %v6770_v57  ;;  %v7181_v57 = vld [vmem:[%s11418_s23] sm:$0xff] }
0x3cea   :  { %9119 = vmatpush3.bf16.msra.mxu0 %v9118_v61  ;;  %8687 = vmatprep.mubr.msk.f32.mxu0 %vm9731_vm0, %v9732_v1  ;;  %v9151_v61 = vpack.c.bf16 %v7104_v40, %v7103_v33  ;;  %v9154_v2 = vpack.c.bf16 %v7182_v63, %v7181_v57  ;;  %v7287_v40 = vrot.slane %v7263_v59, %v10102_v29 }
0x3ceb   :  { %9120 = vmatprep.subr.bf16.mxu0 %v9730_v0 }
0x3cec   :  { %9155 = vmatpush3.bf16.msra.mxu1 %v9154_v2 }
0x3ced   :  { %9156 = vmatprep.subr.bf16.mxu1 %v9730_v0 }
0x3cee   :  { %9122 = vmatpush3.bf16.msra.mxu0 %v9121_v3  ;;  %v7588_v3 = vld [vmem:[%s11415_s9 + $0x20] ss:$0 sm:$0xff] }
0x3cef   :  { %9123 = vmatprep.subr.bf16.mxu0 %v9730_v0 }
0x3dbc   :  { %v6869_v5 = vpop.f32.mrb[66].mxu0 }
0x3dbd   :  { %v6870_v6 = vadd.f32 %v6869_v5, %v6798_v42  ;;  %v8678_v8 = vpop.f32.mrb[67].mxu0 }
0x3dbf   :  { %8688 = vmatmul.mubr.msk.f32.vlgmr.msra.gmra.mrb[68].mxu0 %vm470_vm7, %v6870_v6 }
0x3dc0   :  { %8698 = vmatprep.mubr.msk.f32.mxu0 %vm9731_vm0, %v9732_v1  ;;  %9125 = vmatpush3.bf16.msra.mxu0 %v9124_v28 }
0x3dc1   :  { %9126 = vmatprep.subr.bf16.mxu0 %v9730_v0 }
0x3dc4   :  { %9128 = vmatpush3.bf16.msra.mxu0 %v9127_v55 }
0x3dc5   :  { %9129 = vmatprep.subr.bf16.mxu0 %v9730_v0 }
0x3e92   :  { %v6951_v10 = vpop.f32.mrb[68].mxu0 }
0x3e93   :  { %v6952_v41 = vadd.f32 %v7586_v9, %v6951_v10  ;;  %v8689_v12 = vpop.f32.mrb[69].mxu0 }
0x3e95   :  { %v11235_v13 = vadd.f32 %v6952_v41, %v11202_v24 }
0x3e97   :  { %v6957_v14 = vsel %vm393_vm2, %v11235_v13, 0.0 }
0x3e98   :  { %6958 = vadd.xlane.f32.xlu1 %v6957_v14 }
0x3f25   :  { %v6959_v15 = vpop.xlane.xlu1 %6958 }
0x3f26   :  { %v6960_v16 = vmul.f32 0.03125, %v6959_v15 }
0x3f28   :  { %v6961_v11 = vsub.f32 %v11235_v13, %v6960_v16 }
0x3f2a   :  { %v6962_v18 = vmul.f32 %v6961_v11, %v6961_v11 }
0x3f2c   :  { %v6963_v26 = vsel %vm393_vm2, %v6962_v18, 0.0 }
0x3f2d   :  { %6964 = vadd.xlane.f32.xlu0 %v6963_v26 }
0x3fba   :  { %v6965_v24 = vpop.xlane.xlu0 %6964 }
0x3fbb   :  { %v6966_v30 = vmul.f32 0.03125, %v6965_v24 }
0x3fbd   :  { %v6967_v31 = vadd.f32 1e-05, %v6966_v30 }
0x3fbf   :  { %9513 = vrsqrt.f32 %v6967_v31 }
0x3fc9   :  { %v9514_v34 = vpop.eup %9513 }
0x3fca   :  { %v6969_v35 = vmul.f32 %v9514_v34, %v6961_v11 }
0x3fcc   :  { %v6974_v22 = vmul.f32 %v6973_v43, %v6969_v35 }
0x3fce   :  { %v6979_v39 = vadd.f32 %v6978_v17, %v6974_v22  ;;  %v7183_v22 = vld [vmem:[%s11418_s23 + $0x10] sm:$0xff] }
0x3fd0   :  { %8699 = vmatmul.mubr.msk.f32.vlgmr.msra.gmra.mrb[70].mxu0 %vm470_vm7, %v6979_v39  ;;  %v7184_v39 = vld [vmem:[%s11418_s23 + $0x18] sm:$0xff] }
0x3fd1   :  { %8733 = vmatprep.mubr.msk.f32.mxu0 %vm9731_vm0, %v9732_v1  ;;  %9131 = vmatpush3.bf16.msra.mxu0 %v9130_v52  ;;  %v9157_v4 = vpack.c.bf16 %v7184_v39, %v7183_v22 }
0x3fd2   :  { %9132 = vmatprep.subr.bf16.mxu0 %v9730_v0 }
0x3fd3   :  { %9158 = vmatpush3.bf16.msra.mxu1 %v9157_v4 }
0x3fd4   :  { %9159 = vmatprep.subr.bf16.mxu1 %v9730_v0 }
0x3fd5   :  { %9134 = vmatpush3.bf16.msra.mxu0 %v9133_v48 }
0x3fd6   :  { %9135 = vmatprep.subr.bf16.mxu0 %v9730_v0 }
0x3fd9   :  { %9137 = vmatpush3.bf16.msra.mxu0 %v9136_v32 }
0x3fda   :  { %9138 = vmatprep.subr.bf16.mxu0 %v9730_v0 }
0x3fdd   :  { %9140 = vmatpush3.bf16.msra.mxu0 %v9139_v53 }
0x3fde   :  { %9141 = vmatprep.subr.bf16.mxu0 %v9730_v0 }
0x3fe1   :  { %9143 = vmatpush3.bf16.msra.mxu0 %v9142_v54  ;;  %v7316_v54 = vld [vmem:[%s11419_s24] sm:$0xff] }
0x3fe2   :  { %9144 = vmatprep.subr.bf16.mxu0 %v9730_v0  ;;  %v9160_v58 = vpack.c.bf16 %v7317_v62, %v7316_v54 }
0x3fe5   :  { %9146 = vmatpush3.bf16.msra.mxu0 %v9145_v36 }
0x3fe6   :  { %9147 = vmatprep.subr.bf16.mxu0 %v9730_v0 }
0x3fe9   :  { %9149 = vmatpush3.bf16.msra.mxu0 %v9148_v60  ;;  %v7282_v60 = vrot.slane %v7263_v59, %v10098_v27 }
0x3fea   :  { %9150 = vmatprep.subr.bf16.mxu0 %v9730_v0 }
0x3fed   :  { %9152 = vmatpush3.bf16.msra.mxu0 %v9151_v61 }
0x40a3   :  { %v7058_v42 = vpop.f32.mrb[70].mxu0 }
0x40a4   :  { %v7059_v5 = vadd.f32 %v7588_v3, %v7058_v42  ;;  %v8700_v6 = vpop.f32.mrb[71].mxu0 }
0x40a6   :  { %v7063_v8 = vmul.f32 0.70710677, %v7059_v5  ;;  %v7062_v34 = vmul.f32 0.5, %v7059_v5 }
0x40a8   :  { %v7066_v9 = vand.u32 2147483647, %v7063_v8  ;;  %vm7064_vm2 = vcmp.ge.f32.partialorder %v7063_v8, 0.0 }
0x40a9   :  { %v7065_v19 = vsel %vm7064_vm2, 1.0, %v9741_v7 }
0x40aa   :  { %v7067_v10 = vmul.f32 0.3275911, %v7066_v9  ;;  %v7080_v12 = vsub.f32 0.0, %v7066_v9 }
0x40ac   :  { %v7068_v41 = vadd.f32 1.0, %v7067_v10  ;;  %v7081_v15 = vmul.f32 %v7080_v12, %v7066_v9 }
0x40ae   :  { %9515 = vrcp.f32 %v7068_v41  ;;  %v7082_v18 = vmul.f32 1.442695, %v7081_v15 }
0x40b0   :  { %9517 = vpow2.f32 %v7082_v18 }
0x40b8   :  { %v9516_v14 = vpop.eup %9515 }
0x40b9   :  { %v7071_v16 = vmul.f32 1.0614054, %v9516_v14 }
0x40ba   :  { %v9518_v24 = vpop.eup %9517 }
0x40bb   :  { %v7072_v11 = vadd.f32 -1.4531521, %v7071_v16 }
0x40bd   :  { %v7073_v26 = vmul.f32 %v9516_v14, %v7072_v11 }
0x40bf   :  { %v7074_v25 = vadd.f32 1.4214138, %v7073_v26 }
0x40c1   :  { %v7075_v23 = vmul.f32 %v9516_v14, %v7074_v25 }
0x40c3   :  { %v7076_v28 = vadd.f32 -0.28449672, %v7075_v23 }
0x40c5   :  { %v7077_v50 = vmul.f32 %v9516_v14, %v7076_v28 }
0x40c7   :  { %v7078_v21 = vadd.f32 0.2548296, %v7077_v50 }
0x40c9   :  { %v7079_v55 = vmul.f32 %v9516_v14, %v7078_v21 }
0x40cb   :  { %v7084_v30 = vmul.f32 %v9518_v24, %v7079_v55 }
0x40cd   :  { %v7085_v31 = vsub.f32 1.0, %v7084_v30  ;;  %v7593_v30 = vld [vmem:[%s11419_s24 + $0x10] ss:$0 sm:$0xff] }
0x40cf   :  { %v7086_v43 = vmul.f32 %v7085_v31, %v7065_v19 }
0x40d1   :  { %v7087_v35 = vadd.f32 1.0, %v7086_v43 }
0x40d3   :  { %v7088_v17 = vmul.f32 %v7087_v35, %v7062_v34 }
0x40d5   :  { %8734 = vmatmul.mubr.f32.vlgmr.msra.gmra.mrb[72].mxu0 %v7088_v17 }
0x41a8   :  { %v7176_v52 = vpop.f32.mrb[72].mxu0 }
0x41a9   :  { %v7177_v46 = vadd.f32 %v7590_v44, %v7176_v52  ;;  %v8735_v47 = vpop.f32.mrb[73].mxu0 }
0x41ab   :  { %v7180_v48 = vadd.f32 %v7177_v46, %v11235_v13 }
0x41ad   :  { %8745 = vmatmul.mubr.msk.f32.vlgmr.msra.gmra.mrb[56].mxu1 %vm470_vm7, %v7180_v48 }
0x41ae   :  { %8751 = vmatprep.mubr.msk.f32.mxu1 %vm9731_vm0, %v9732_v1  ;;  %9161 = vmatpush3.bf16.msra.mxu1 %v9160_v58 }
0x4280   :  { %v7259_v45 = vpop.f32.mrb[56].mxu1 }
0x4281   :  { %v7260_v32 = vadd.f32 %v7591_v20, %v7259_v45  ;;  %v8746_v49 = vpop.f32.mrb[57].mxu1 }
0x4283   :  { %v7265_v51 = vsel %vm7264_vm15, %v7260_v32, 0.0 }
0x4284   :  { %7266 = vadd.xlane.f32.xlu0 %v7265_v51 }
0x4311   :  { %v7267_v0 = vpop.xlane.xlu0 %7266 }
0x4312   :  { %v7269_v53 = vmul.f32 0.0625, %v7267_v0 }
0x4314   :  { %v7270_v38 = vsub.f32 %v7260_v32, %v7269_v53 }
0x4316   :  { %v7271_v56 = vmul.f32 %v7270_v38, %v7270_v38 }
0x4318   :  { %v7272_v13 = vsel %vm7264_vm15, %v7271_v56, 0.0 }
0x4319   :  { %7273 = vadd.xlane.f32.xlu1 %v7272_v13 }
0x43a6   :  { %v7274_v36 = vpop.xlane.xlu1 %7273 }
0x43a7   :  { %v7275_v1 = vmul.f32 0.0625, %v7274_v36 }
0x43a9   :  { %v7276_v37 = vadd.f32 1e-05, %v7275_v1 }
0x43ab   :  { %9519 = vrsqrt.f32 %v7276_v37 }
0x43b5   :  { %v9520_v33 = vpop.eup %9519 }
0x43b6   :  { %v7278_v61 = vmul.f32 %v9520_v33, %v7270_v38 }
0x43b8   :  { %v7283_v57 = vmul.f32 %v7282_v60, %v7278_v61 }
0x43ba   :  { %v7288_v63 = vadd.f32 %v7287_v40, %v7283_v57 }
0x43bc   :  { %v7290_v2 = vmul.f32 0.70710677, %v7288_v63  ;;  %v7289_v21 = vmul.f32 0.5, %v7288_v63 }
0x43be   :  { %v7293_v3 = vand.u32 2147483647, %v7290_v2  ;;  %vm7291_vm0 = vcmp.ge.f32.partialorder %v7290_v2, 0.0 }
0x43bf   :  { %v7292_v28 = vsel %vm7291_vm0, 1.0, %v9741_v7 }
0x43c0   :  { %v7294_v42 = vmul.f32 0.3275911, %v7293_v3  ;;  %v7307_v6 = vsub.f32 0.0, %v7293_v3 }
0x43c2   :  { %v7295_v5 = vadd.f32 1.0, %v7294_v42  ;;  %v7308_v9 = vmul.f32 %v7307_v6, %v7293_v3 }
0x43c4   :  { %9521 = vrcp.f32 %v7295_v5  ;;  %v7309_v12 = vmul.f32 1.442695, %v7308_v9 }
0x43c6   :  { %9523 = vpow2.f32 %v7309_v12 }
0x43ce   :  { %v9522_v8 = vpop.eup %9521 }
0x43cf   :  { %v7298_v10 = vmul.f32 1.0614054, %v9522_v8 }
0x43d0   :  { %v9524_v26 = vpop.eup %9523 }
0x43d1   :  { %v7299_v41 = vadd.f32 -1.4531521, %v7298_v10 }
0x43d3   :  { %v7300_v14 = vmul.f32 %v9522_v8, %v7299_v41 }
0x43d5   :  { %v7301_v15 = vadd.f32 1.4214138, %v7300_v14 }
0x43d7   :  { %v7302_v27 = vmul.f32 %v9522_v8, %v7301_v15 }
0x43d9   :  { %v7303_v29 = vadd.f32 -0.28449672, %v7302_v27 }
0x43db   :  { %v7304_v16 = vmul.f32 %v9522_v8, %v7303_v29 }
0x43dd   :  { %v7305_v11 = vadd.f32 0.2548296, %v7304_v16 }
0x43df   :  { %v7306_v18 = vmul.f32 %v9522_v8, %v7305_v11 }
0x43e1   :  { %v7311_v25 = vmul.f32 %v9524_v26, %v7306_v18 }
0x43e3   :  { %v7312_v23 = vsub.f32 1.0, %v7311_v25 }
0x43e5   :  { %v7313_v50 = vmul.f32 %v7312_v23, %v7292_v28 }
0x43e7   :  { %v7314_v55 = vadd.f32 1.0, %v7313_v50 }
0x43e9   :  { %v7315_v24 = vmul.f32 %v7314_v55, %v7289_v21 }
0x43eb   :  { %8752 = vmatmul.mubr.msk.f32.vlgmr.msra.gmra.mrb[58].mxu1 %vm1146_vm14, %v7315_v24 }
0x44be   :  { %v7392_v31 = vpop.f32.mrb[58].mxu1 }
0x44bf   :  { %v7393_v19 = vadd.f32 %v7593_v30, %v7392_v31  ;;  %v8753_v43 = vpop.f32.mrb[59].mxu1 }
0x44c1   :  { %7396 = vst.msk [vmem:[#allocation11] sm:$0x3] %vm738_vm11, %v7393_v19 }
0x44c2   :  { %9646 = shalt.err (!%p9643_p2)
}
0x44c3   :  { %s9647_s2 = scalar_lea.hbm %s10052_s19, 32 }
0x44c4   :  { %p9648_p3 = scmp.ne.s32.totalorder %s10052_s19, %s9647_s2  ;;  %p9651_p4 = scmp.lt.u32.totalorder %s9647_s2, %s10052_s19 }
0x44c6   :  { %p9653_p5 = pnand %p9651_p4, %p9648_p3 }
0x44c8   :  { %9656 = shalt.err (!%p9653_p5)
}
0x44c9   :  { %7406 = dma.vmem_to_hbm [thread:$0]  %s7404_s29, 32, %s10052_s19, [#allocation4]  }
0x44ca   :  { %9663 = dma.done.wait [#allocation4], 32  }
0x44cb   :  { %9664 = vsyncadd [#allocation4], 4294967264 }
0x44cc   :  { %7410 = vsyncpa [#allocation3], 1 }
0x44cd   :  { %7411 = vsyncpa [#allocation6], 1 }
0x44ce   :  { %7412 = vsyncpa [#allocation9], 1 }
0x44cf   :  { %7413 = vsyncpa [#allocation4], 1 }

</bundles_post_ra>
